<compile_context>
chip_gen: v5e
topology: v5e:2x2
jax: 0.10.0
libtpu: 0.0.40
codegen_flags: <defaults>
</compile_context>

<pallas_src>
import functools

import jax
import jax.numpy as jnp
from jax.experimental import pallas as pl
from jax.experimental.pallas import tpu as pltpu


# ---------------------------------------------------------------------------
# helpers
# ---------------------------------------------------------------------------
def _pick_tm(m, align=8, cap=1024):
    """Largest tile <= cap that divides m and is a multiple of `align`."""
    best = None
    t = align
    while t <= min(m, cap):
        if m % t == 0:
            best = t
        t += align
    return best if best is not None else m


# ---------------------------------------------------------------------------
# conv1: im2col + fused matmul/bias/LeakyReLU Pallas kernel
# ---------------------------------------------------------------------------
def _matmul_bias_lrelu_kernel(x_ref, w_ref, b_ref, o_ref, *, slope):
    acc = jnp.dot(x_ref[...], w_ref[...], preferred_element_type=jnp.float32)
    acc = acc + b_ref[...]
    acc = jnp.where(acc >= 0.0, acc, slope * acc)
    o_ref[...] = acc.astype(o_ref.dtype)


def conv1_pallas(x, w1, b1):
    """Conv3d(1, 32, k=5, s=2) + LeakyReLU(0.1) on (B,1,32,32,32).

    Returns the activation as a (B*14*14*14, 32) bf16 matrix, rows ordered
    (b, d, h, w), channels last.
    """
    B = x.shape[0]
    xs = x.reshape(B, 32, 32, 32).astype(jnp.bfloat16)      # C_in == 1
    cols = []
    for dz in range(5):
        for dy in range(5):
            for dx in range(5):
                cols.append(xs[:, dz:dz + 27:2, dy:dy + 27:2, dx:dx + 27:2])
    patches = jnp.stack(cols, axis=-1).reshape(B * 2744, 125)   # (M, 125)
    patches = jnp.pad(patches, ((0, 0), (0, 3)))                # K: 125 -> 128

    M = B * 2744
    tm = _pick_tm(M)                                            # B=2 -> 784, grid 7
    return pl.pallas_call(
        functools.partial(_matmul_bias_lrelu_kernel, slope=0.1),
        out_shape=jax.ShapeDtypeStruct((M, 32), jnp.bfloat16),
        grid=(M // tm,),
        in_specs=[
            pl.BlockSpec((tm, 128), lambda i: (i, 0)),
            pl.BlockSpec((128, 32), lambda i: (0, 0)),
            pl.BlockSpec((1, 32), lambda i: (0, 0)),
        ],
        out_specs=pl.BlockSpec((tm, 32), lambda i: (i, 0)),
        compiler_params=pltpu.CompilerParams(
            dimension_semantics=("parallel",)),
    )(patches, w1, b1)


# ---------------------------------------------------------------------------
# conv2: tap-accumulation kernel over a VMEM-resident activation
# ---------------------------------------------------------------------------
_C2_ROW_W = 16                       # x slots per (d, h) row group (12 padded to 16)
_C2_TAP_OFFS = tuple(dz * 14 * _C2_ROW_W + dy * _C2_ROW_W
                     for dz in range(3) for dy in range(3))   # all multiples of 16
_C2_PAD_ROWS = _C2_TAP_OFFS[-1]      # 480-row halo for the largest tap shift


def _conv2_kernel(x_ref, w_ref, b_ref, o_ref, *, tm, slope):
    base = pl.program_id(0) * tm
    acc = jnp.zeros((tm, 32), jnp.float32)
    for t, off in enumerate(_C2_TAP_OFFS):           # 9 (kd,kh) taps, static offsets
        start = pl.multiple_of(base + off, 8)        # 16-row aligned window
        lhs = x_ref[pl.ds(start, tm), :]             # (tm, 96) from resident VMEM
        acc = acc + jnp.dot(lhs, w_ref[t],
                            preferred_element_type=jnp.float32)
    acc = acc + b_ref[...]
    acc = jnp.where(acc >= 0.0, acc, slope * acc)
    o_ref[...] = acc.astype(o_ref.dtype)


def conv2_pallas(a, w2, b2, B):
    """Conv3d(32, 32, k=3, s=1) + LeakyReLU(0.1).

    `a` is the conv1 activation, shape (B*14*14*14, 32), bf16.
    Returns (B, 12, 12, 12, 32) bf16 (channels last).
    """
    # Unfold only the innermost W axis in JAX (3 taps -> K=96); pad W 12->16 so
    # every (kd,kh) tap shift is a whole multiple of 16 rows (aligned loads).
    a = a.reshape(B, 14, 14, 14, 32)
    a = jnp.concatenate([a[:, :, :, 0:12, :],
                         a[:, :, :, 1:13, :],
                         a[:, :, :, 2:14, :]], axis=-1)        # (B,14,14,12,96)
    a = jnp.pad(a, ((0, 0), (0, 0), (0, 0), (0, 4), (0, 0)))   # W: 12 -> 16
    M = B * 14 * 14 * _C2_ROW_W
    a = a.reshape(M, 96)
    a = jnp.pad(a, ((0, _C2_PAD_ROWS), (0, 0)))                # tap halo rows

    tm = _pick_tm(M, align=16)                                  # B=2 -> 896, grid 7
    rows_in = M + _C2_PAD_ROWS
    out = pl.pallas_call(
        functools.partial(_conv2_kernel, tm=tm, slope=0.1),
        out_shape=jax.ShapeDtypeStruct((M, 32), jnp.bfloat16),
        grid=(M // tm,),
        in_specs=[
            # whole (padded) activation stays resident in VMEM across all steps
            pl.BlockSpec((rows_in, 96), lambda i: (0, 0)),
            pl.BlockSpec((9, 96, 32), lambda i: (0, 0, 0)),
            pl.BlockSpec((1, 32), lambda i: (0, 0)),
        ],
        out_specs=pl.BlockSpec((tm, 32), lambda i: (i, 0)),
        compiler_params=pltpu.CompilerParams(
            dimension_semantics=("parallel",)),
    )(a, w2, b2)
    # Valid output region: d, h in [0,12) and x in [0,12); the rest is garbage
    # rows produced only to keep the tiling rectangular.
    return out.reshape(B, 14, 14, _C2_ROW_W, 32)[:, :12, :12, :12, :]


# ---------------------------------------------------------------------------
# fused FC head: Linear(6912,128) + ReLU + Linear(128, num_classes padded)
# ---------------------------------------------------------------------------
def _fc_fused_kernel(x_ref, w1_ref, b1_ref, w2_ref, b2_ref, o_ref):
    h = jnp.dot(x_ref[...], w1_ref[...], preferred_element_type=jnp.float32)
    h = jnp.maximum(h + b1_ref[...], 0.0)                    # f32 epilogue
    o = jnp.dot(h.astype(w2_ref.dtype), w2_ref[...],
                preferred_element_type=jnp.float32)
    o_ref[...] = o + b2_ref[...]


def fc_pallas(x, fc1_w, fc1_b, fc2_w, fc2_b):
    Bp = x.shape[0]
    return pl.pallas_call(
        _fc_fused_kernel,
        out_shape=jax.ShapeDtypeStruct((Bp, 128), jnp.float32),
    )(x, fc1_w, fc1_b, fc2_w, fc2_b)


# ---------------------------------------------------------------------------
# VoxNet forward
# ---------------------------------------------------------------------------
def voxnet_forward(x, kp, *, num_classes):
    B = x.shape[0]
    h = conv1_pallas(x, kp["c1_w"], kp["c1_b"])              # (B*2744, 32) bf16
    # Dropout(p=0.5): identity at inference.
    h = conv2_pallas(h, kp["c2_w"], kp["c2_b"], B)           # (B,12,12,12,32) bf16
    # MaxPool3d(2,2): plain reshape+max on a ~0.4 MB tensor.
    h = h.reshape(B, 6, 2, 6, 2, 6, 2, 32).max(axis=(2, 4, 6))
    # Dropout(p=0.5): identity at inference.
    h = h.reshape(B, 6912)                                   # (d,h,w,c) flatten order
    Bp = max(8, ((B + 7) // 8) * 8)
    h = jnp.pad(h, ((0, Bp - B), (0, 0)))
    logits = fc_pallas(h, kp["fc1_w"], kp["fc1_b"], kp["fc2_w"], kp["fc2_b"])
    return logits[:B, :num_classes]


# ---------------------------------------------------------------------------
# parameter preparation: PyTorch-convention params -> kernel layouts (once)
# ---------------------------------------------------------------------------
def prepare_params(params):
    f32, bf16 = jnp.float32, jnp.bfloat16
    # conv1: (Cout, Cin=1, 5,5,5) -> (K=125, 32) in (kd,kh,kw) patch order, pad K->128
    c1_w = jnp.pad(params["conv1_w"].reshape(32, 125).T, ((0, 3), (0, 0)))
    c1_b = params["conv1_b"].reshape(1, 32).astype(f32)
    # conv2: (Cout, Cin, kd, kh, kw) -> 9 (kd,kh) taps of (K=kw*Cin=96, Cout=32),
    # columns ordered (kw, Cin) to match the W-unfolded activation.
    c2_w = params["conv2_w"].transpose(2, 3, 4, 1, 0).reshape(9, 96, 32)
    c2_b = params["conv2_b"].reshape(1, 32).astype(f32)
    # fc1 rows are stored in PyTorch's NCDHW flatten order (c,d,h,w); permute
    # once to this kernel's NDHWC flatten order (d,h,w,c).
    fc1_w = params["fc1_w"].reshape(32, 6, 6, 6, 128)
    fc1_w = fc1_w.transpose(1, 2, 3, 0, 4).reshape(6912, 128)
    fc1_b = params["fc1_b"].reshape(1, 128).astype(f32)
    nc = params["fc2_w"].shape[1]
    assert nc <= 128
    fc2_w = jnp.pad(params["fc2_w"], ((0, 0), (0, 128 - nc)))   # lane-dense output
    fc2_b = jnp.pad(params["fc2_b"], (0, 128 - nc)).reshape(1, 128).astype(f32)
    kp = {
        "c1_w": c1_w.astype(bf16), "c1_b": c1_b,
        "c2_w": c2_w.astype(bf16), "c2_b": c2_b,
        "fc1_w": fc1_w.astype(bf16), "fc1_b": fc1_b,
        "fc2_w": fc2_w.astype(bf16), "fc2_b": fc2_b,
    }
    return kp, nc


# ---------------------------------------------------------------------------
# Deterministic parameter init (synthetic, PyTorch-like uniform fan-in)
# ---------------------------------------------------------------------------
def init_params(key, num_classes=4):
    ks = jax.random.split(key, 8)

    def u(k, shape, fan_in):
        bound = 1.0 / jnp.sqrt(jnp.float32(fan_in))
        return jax.random.uniform(k, shape, jnp.float32, -bound, bound)

    return {
        "conv1_w": u(ks[0], (32, 1, 5, 5, 5), 1 * 125),
        "conv1_b": u(ks[1], (32,), 1 * 125),
        "conv2_w": u(ks[2], (32, 32, 3, 3, 3), 32 * 27),
        "conv2_b": u(ks[3], (32,), 32 * 27),
        # stored as (in, out) so forward computes x @ W + b; rows in NCDHW order
        "fc1_w": u(ks[4], (6912, 128), 6912),
        "fc1_b": u(ks[5], (128,), 6912),
        "fc2_w": u(ks[6], (128, num_classes), 128),
        "fc2_b": u(ks[7], (num_classes,), 128),
    }


# ---------------------------------------------------------------------------
# Pure-JAX reference (for correctness check)
# ---------------------------------------------------------------------------
def voxnet_reference(x, params):
    hp = jax.lax.Precision.HIGHEST
    dn = ("NCDHW", "OIDHW", "NCDHW")
    h = jax.lax.conv_general_dilated(
        x, params["conv1_w"], (2, 2, 2), "VALID",
        dimension_numbers=jax.lax.conv_dimension_numbers(
            x.shape, params["conv1_w"].shape, dn),
        precision=hp)
    h = h + params["conv1_b"].reshape(1, -1, 1, 1, 1)
    h = jnp.where(h >= 0.0, h, 0.1 * h)
    h = jax.lax.conv_general_dilated(
        h, params["conv2_w"], (1, 1, 1), "VALID",
        dimension_numbers=jax.lax.conv_dimension_numbers(
            h.shape, params["conv2_w"].shape, dn),
        precision=hp)
    h = h + params["conv2_b"].reshape(1, -1, 1, 1, 1)
    h = jnp.where(h >= 0.0, h, 0.1 * h)
    B, C, D, H, W = h.shape
    h = h.reshape(B, C, D // 2, 2, H // 2, 2, W // 2, 2).max(axis=(3, 5, 7))
    h = h.reshape(B, -1)
    h = jnp.maximum(jnp.dot(h, params["fc1_w"], precision=hp) + params["fc1_b"], 0.0)
    return jnp.dot(h, params["fc2_w"], precision=hp) + params["fc2_b"]


if __name__ == "__main__":
    key = jax.random.PRNGKey(0)
    k_x, k_p = jax.random.split(key)

    B, num_classes = 2, 4
    x = jax.random.normal(k_x, (B, 1, 32, 32, 32), jnp.float32)
    params = init_params(k_p, num_classes=num_classes)
    kparams, nc = prepare_params(params)

    fwd = jax.jit(functools.partial(voxnet_forward, num_classes=nc))
    out = jax.block_until_ready(fwd(x, kparams))
    assert out.shape == (B, num_classes), out.shape

    ref = jax.block_until_ready(voxnet_reference(x, params))
    err = float(jnp.max(jnp.abs(out - ref)))
    scale = float(jnp.max(jnp.abs(ref))) + 1.0
    assert err <= 2e-2 * scale, f"mismatch: max abs err {err}, scale {scale}"

    print("KERNEL_OK")
</pallas_src>

<mosaic_0001>
module attributes {stable_mosaic.version = 11 : i64} {
  func.func @_matmul_bias_lrelu_kernel(%arg0: i32, %arg1: memref<784x128xbf16, #tpu.memory_space<vmem>>, %arg2: memref<128x32xbf16, #tpu.memory_space<vmem>>, %arg3: memref<1x32xf32, #tpu.memory_space<vmem>>, %arg4: memref<784x32xbf16, #tpu.memory_space<vmem>>) attributes {dimension_semantics = [#tpu.dimension_semantics<parallel>], iteration_bounds = array<i64: 7>, scalar_prefetch = 0 : i64, scratch_operands = 0 : i64, tpu.core_type = #tpu.core_type<tc>, window_params = [{transform_indices = @transform_0, window_bounds = array<i64: 784, 128>}, {pipeline_mode = #tpu.pipeline_mode<synchronous>, transform_indices = @transform_1, window_bounds = array<i64: 128, 32>}, {pipeline_mode = #tpu.pipeline_mode<synchronous>, transform_indices = @transform_2, window_bounds = array<i64: 1, 32>}, {transform_indices = @transform_3, window_bounds = array<i64: 784, 32>}]} {
    %c0 = arith.constant 0 : index
    %c0_0 = arith.constant 0 : index
    %0 = vector.load %arg1[%c0, %c0_0] : memref<784x128xbf16, #tpu.memory_space<vmem>>, vector<784x128xbf16>
    %c0_1 = arith.constant 0 : index
    %c0_2 = arith.constant 0 : index
    %1 = vector.load %arg2[%c0_1, %c0_2] : memref<128x32xbf16, #tpu.memory_space<vmem>>, vector<128x32xbf16>
    %cst = arith.constant dense<0.000000e+00> : vector<784x32xf32>
    %2 = tpu.matmul %0, %1, %cst {dimension_numbers = #tpu.dot_dimension_numbers<[1], [0], [0], [1], [0, 0, 1, 1], [], []>} : vector<784x128xbf16>, vector<128x32xbf16>, vector<784x32xf32> -> vector<784x32xf32>
    %c0_3 = arith.constant 0 : index
    %c0_4 = arith.constant 0 : index
    %3 = vector.load %arg3[%c0_3, %c0_4] : memref<1x32xf32, #tpu.memory_space<vmem>>, vector<1x32xf32>
    %4 = vector.broadcast %3 : vector<1x32xf32> to vector<784x32xf32>
    %5 = arith.addf %2, %4 : vector<784x32xf32>
    %cst_5 = arith.constant 0.000000e+00 : f32
    %6 = vector.broadcast %cst_5 : f32 to vector<784x32xf32>
    %7 = arith.cmpf oge, %5, %6 : vector<784x32xf32>
    %cst_6 = arith.constant 1.000000e-01 : f32
    %8 = vector.broadcast %cst_6 : f32 to vector<784x32xf32>
    %9 = arith.mulf %8, %5 : vector<784x32xf32>
    %10 = arith.select %7, %5, %9 : vector<784x32xi1>, vector<784x32xf32>
    %11 = arith.truncf %10 : vector<784x32xf32> to vector<784x32xbf16>
    %c0_7 = arith.constant 0 : index
    %c0_8 = arith.constant 0 : index
    %12 = vector.load %arg4[%c0_7, %c0_8] : memref<784x32xbf16, #tpu.memory_space<vmem>>, vector<784x32xbf16>
    tpu.vector_store %arg4[%c0_7, %c0_8], %11 {strides = array<i32>} : memref<784x32xbf16, #tpu.memory_space<vmem>>, vector<784x32xbf16>,
    return
  }
  func.func @transform_0(%arg0: i32) -> (i32, i32) {
    %c0_i32 = arith.constant 0 : i32
    %c0_i32_0 = arith.constant 0 : i32
    return %arg0, %c0_i32 : i32, i32
  }
  func.func @transform_1(%arg0: i32) -> (i32, i32) {
    %c0_i32 = arith.constant 0 : i32
    %c0_i32_0 = arith.constant 0 : i32
    %c0_i32_1 = arith.constant 0 : i32
    return %c0_i32, %c0_i32_0 : i32, i32
  }
  func.func @transform_2(%arg0: i32) -> (i32, i32) {
    %c0_i32 = arith.constant 0 : i32
    %c0_i32_0 = arith.constant 0 : i32
    %c0_i32_1 = arith.constant 0 : i32
    return %c0_i32, %c0_i32_0 : i32, i32
  }
  func.func @transform_3(%arg0: i32) -> (i32, i32) {
    %c0_i32 = arith.constant 0 : i32
    %c0_i32_0 = arith.constant 0 : i32
    return %arg0, %c0_i32 : i32, i32
  }
}

module attributes {stable_mosaic.version = 11 : i64} {
  func.func @_conv2_kernel(%arg0: i32, %arg1: memref<6752x96xbf16, #tpu.memory_space<vmem>>, %arg2: memref<9x96x32xbf16, #tpu.memory_space<vmem>>, %arg3: memref<1x32xf32, #tpu.memory_space<vmem>>, %arg4: memref<896x32xbf16, #tpu.memory_space<vmem>>) attributes {dimension_semantics = [#tpu.dimension_semantics<parallel>], iteration_bounds = array<i64: 7>, scalar_prefetch = 0 : i64, scratch_operands = 0 : i64, tpu.core_type = #tpu.core_type<tc>, window_params = [{pipeline_mode = #tpu.pipeline_mode<synchronous>, transform_indices = @transform_0, window_bounds = array<i64: 6752, 96>}, {pipeline_mode = #tpu.pipeline_mode<synchronous>, transform_indices = @transform_1, window_bounds = array<i64: 9, 96, 32>}, {pipeline_mode = #tpu.pipeline_mode<synchronous>, transform_indices = @transform_2, window_bounds = array<i64: 1, 32>}, {transform_indices = @transform_3, window_bounds = array<i64: 896, 32>}]} {
    %c896_i32 = arith.constant 896 : i32
    %0 = arith.muli %arg0, %c896_i32 : i32
    %cst = arith.constant 0.000000e+00 : f32
    %1 = vector.broadcast %cst : f32 to vector<896x32xf32>
    %c0_i32 = arith.constant 0 : i32
    %2 = arith.addi %0, %c0_i32 : i32
    %3 = tpu.assume_multiple %2, 8 : i32
    %4 = arith.index_cast %3 : i32 to index
    %c0 = arith.constant 0 : index
    %5 = vector.load %arg1[%4, %c0] : memref<6752x96xbf16, #tpu.memory_space<vmem>>, vector<896x96xbf16>
    %c0_0 = arith.constant 0 : index
    %c0_1 = arith.constant 0 : index
    %c0_2 = arith.constant 0 : index
    %6 = vector.load %arg2[%c0_0, %c0_1, %c0_2] : memref<9x96x32xbf16, #tpu.memory_space<vmem>>, vector<1x96x32xbf16>
    %7 = vector.shape_cast %6 : vector<1x96x32xbf16> to vector<96x32xbf16>
    %cst_3 = arith.constant dense<0.000000e+00> : vector<896x32xf32>
    %8 = tpu.matmul %5, %7, %cst_3 {dimension_numbers = #tpu.dot_dimension_numbers<[1], [0], [0], [1], [0, 0, 1, 1], [], []>} : vector<896x96xbf16>, vector<96x32xbf16>, vector<896x32xf32> -> vector<896x32xf32>
    %9 = arith.addf %1, %8 : vector<896x32xf32>
    %c16_i32 = arith.constant 16 : i32
    %10 = arith.addi %0, %c16_i32 : i32
    %11 = tpu.assume_multiple %10, 8 : i32
    %12 = arith.index_cast %11 : i32 to index
    %c0_4 = arith.constant 0 : index
    %13 = vector.load %arg1[%12, %c0_4] : memref<6752x96xbf16, #tpu.memory_space<vmem>>, vector<896x96xbf16>
    %c1 = arith.constant 1 : index
    %c0_5 = arith.constant 0 : index
    %c0_6 = arith.constant 0 : index
    %14 = vector.load %arg2[%c1, %c0_5, %c0_6] : memref<9x96x32xbf16, #tpu.memory_space<vmem>>, vector<1x96x32xbf16>
    %15 = vector.shape_cast %14 : vector<1x96x32xbf16> to vector<96x32xbf16>
    %cst_7 = arith.constant dense<0.000000e+00> : vector<896x32xf32>
    %16 = tpu.matmul %13, %15, %cst_7 {dimension_numbers = #tpu.dot_dimension_numbers<[1], [0], [0], [1], [0, 0, 1, 1], [], []>} : vector<896x96xbf16>, vector<96x32xbf16>, vector<896x32xf32> -> vector<896x32xf32>
    %17 = arith.addf %9, %16 : vector<896x32xf32>
    %c32_i32 = arith.constant 32 : i32
    %18 = arith.addi %0, %c32_i32 : i32
    %19 = tpu.assume_multiple %18, 8 : i32
    %20 = arith.index_cast %19 : i32 to index
    %c0_8 = arith.constant 0 : index
    %21 = vector.load %arg1[%20, %c0_8] : memref<6752x96xbf16, #tpu.memory_space<vmem>>, vector<896x96xbf16>
    %c2 = arith.constant 2 : index
    %c0_9 = arith.constant 0 : index
    %c0_10 = arith.constant 0 : index
    %22 = vector.load %arg2[%c2, %c0_9, %c0_10] : memref<9x96x32xbf16, #tpu.memory_space<vmem>>, vector<1x96x32xbf16>
    %23 = vector.shape_cast %22 : vector<1x96x32xbf16> to vector<96x32xbf16>
    %cst_11 = arith.constant dense<0.000000e+00> : vector<896x32xf32>
    %24 = tpu.matmul %21, %23, %cst_11 {dimension_numbers = #tpu.dot_dimension_numbers<[1], [0], [0], [1], [0, 0, 1, 1], [], []>} : vector<896x96xbf16>, vector<96x32xbf16>, vector<896x32xf32> -> vector<896x32xf32>
    %25 = arith.addf %17, %24 : vector<896x32xf32>
    %c224_i32 = arith.constant 224 : i32
    %26 = arith.addi %0, %c224_i32 : i32
    %27 = tpu.assume_multiple %26, 8 : i32
    %28 = arith.index_cast %27 : i32 to index
    %c0_12 = arith.constant 0 : index
    %29 = vector.load %arg1[%28, %c0_12] : memref<6752x96xbf16, #tpu.memory_space<vmem>>, vector<896x96xbf16>
    %c3 = arith.constant 3 : index
    %c0_13 = arith.constant 0 : index
    %c0_14 = arith.constant 0 : index
    %30 = vector.load %arg2[%c3, %c0_13, %c0_14] : memref<9x96x32xbf16, #tpu.memory_space<vmem>>, vector<1x96x32xbf16>
    %31 = vector.shape_cast %30 : vector<1x96x32xbf16> to vector<96x32xbf16>
    %cst_15 = arith.constant dense<0.000000e+00> : vector<896x32xf32>
    %32 = tpu.matmul %29, %31, %cst_15 {dimension_numbers = #tpu.dot_dimension_numbers<[1], [0], [0], [1], [0, 0, 1, 1], [], []>} : vector<896x96xbf16>, vector<96x32xbf16>, vector<896x32xf32> -> vector<896x32xf32>
    %33 = arith.addf %25, %32 : vector<896x32xf32>
    %c240_i32 = arith.constant 240 : i32
    %34 = arith.addi %0, %c240_i32 : i32
    %35 = tpu.assume_multiple %34, 8 : i32
    %36 = arith.index_cast %35 : i32 to index
    %c0_16 = arith.constant 0 : index
    %37 = vector.load %arg1[%36, %c0_16] : memref<6752x96xbf16, #tpu.memory_space<vmem>>, vector<896x96xbf16>
    %c4 = arith.constant 4 : index
    %c0_17 = arith.constant 0 : index
    %c0_18 = arith.constant 0 : index
    %38 = vector.load %arg2[%c4, %c0_17, %c0_18] : memref<9x96x32xbf16, #tpu.memory_space<vmem>>, vector<1x96x32xbf16>
    %39 = vector.shape_cast %38 : vector<1x96x32xbf16> to vector<96x32xbf16>
    %cst_19 = arith.constant dense<0.000000e+00> : vector<896x32xf32>
    %40 = tpu.matmul %37, %39, %cst_19 {dimension_numbers = #tpu.dot_dimension_numbers<[1], [0], [0], [1], [0, 0, 1, 1], [], []>} : vector<896x96xbf16>, vector<96x32xbf16>, vector<896x32xf32> -> vector<896x32xf32>
    %41 = arith.addf %33, %40 : vector<896x32xf32>
    %c256_i32 = arith.constant 256 : i32
    %42 = arith.addi %0, %c256_i32 : i32
    %43 = tpu.assume_multiple %42, 8 : i32
    %44 = arith.index_cast %43 : i32 to index
    %c0_20 = arith.constant 0 : index
    %45 = vector.load %arg1[%44, %c0_20] : memref<6752x96xbf16, #tpu.memory_space<vmem>>, vector<896x96xbf16>
    %c5 = arith.constant 5 : index
    %c0_21 = arith.constant 0 : index
    %c0_22 = arith.constant 0 : index
    %46 = vector.load %arg2[%c5, %c0_21, %c0_22] : memref<9x96x32xbf16, #tpu.memory_space<vmem>>, vector<1x96x32xbf16>
    %47 = vector.shape_cast %46 : vector<1x96x32xbf16> to vector<96x32xbf16>
    %cst_23 = arith.constant dense<0.000000e+00> : vector<896x32xf32>
    %48 = tpu.matmul %45, %47, %cst_23 {dimension_numbers = #tpu.dot_dimension_numbers<[1], [0], [0], [1], [0, 0, 1, 1], [], []>} : vector<896x96xbf16>, vector<96x32xbf16>, vector<896x32xf32> -> vector<896x32xf32>
    %49 = arith.addf %41, %48 : vector<896x32xf32>
    %c448_i32 = arith.constant 448 : i32
    %50 = arith.addi %0, %c448_i32 : i32
    %51 = tpu.assume_multiple %50, 8 : i32
    %52 = arith.index_cast %51 : i32 to index
    %c0_24 = arith.constant 0 : index
    %53 = vector.load %arg1[%52, %c0_24] : memref<6752x96xbf16, #tpu.memory_space<vmem>>, vector<896x96xbf16>
    %c6 = arith.constant 6 : index
    %c0_25 = arith.constant 0 : index
    %c0_26 = arith.constant 0 : index
    %54 = vector.load %arg2[%c6, %c0_25, %c0_26] : memref<9x96x32xbf16, #tpu.memory_space<vmem>>, vector<1x96x32xbf16>
    %55 = vector.shape_cast %54 : vector<1x96x32xbf16> to vector<96x32xbf16>
    %cst_27 = arith.constant dense<0.000000e+00> : vector<896x32xf32>
    %56 = tpu.matmul %53, %55, %cst_27 {dimension_numbers = #tpu.dot_dimension_numbers<[1], [0], [0], [1], [0, 0, 1, 1], [], []>} : vector<896x96xbf16>, vector<96x32xbf16>, vector<896x32xf32> -> vector<896x32xf32>
    %57 = arith.addf %49, %56 : vector<896x32xf32>
    %c464_i32 = arith.constant 464 : i32
    %58 = arith.addi %0, %c464_i32 : i32
    %59 = tpu.assume_multiple %58, 8 : i32
    %60 = arith.index_cast %59 : i32 to index
    %c0_28 = arith.constant 0 : index
    %61 = vector.load %arg1[%60, %c0_28] : memref<6752x96xbf16, #tpu.memory_space<vmem>>, vector<896x96xbf16>
    %c7 = arith.constant 7 : index
    %c0_29 = arith.constant 0 : index
    %c0_30 = arith.constant 0 : index
    %62 = vector.load %arg2[%c7, %c0_29, %c0_30] : memref<9x96x32xbf16, #tpu.memory_space<vmem>>, vector<1x96x32xbf16>
    %63 = vector.shape_cast %62 : vector<1x96x32xbf16> to vector<96x32xbf16>
    %cst_31 = arith.constant dense<0.000000e+00> : vector<896x32xf32>
    %64 = tpu.matmul %61, %63, %cst_31 {dimension_numbers = #tpu.dot_dimension_numbers<[1], [0], [0], [1], [0, 0, 1, 1], [], []>} : vector<896x96xbf16>, vector<96x32xbf16>, vector<896x32xf32> -> vector<896x32xf32>
    %65 = arith.addf %57, %64 : vector<896x32xf32>
    %c480_i32 = arith.constant 480 : i32
    %66 = arith.addi %0, %c480_i32 : i32
    %67 = tpu.assume_multiple %66, 8 : i32
    %68 = arith.index_cast %67 : i32 to index
    %c0_32 = arith.constant 0 : index
    %69 = vector.load %arg1[%68, %c0_32] : memref<6752x96xbf16, #tpu.memory_space<vmem>>, vector<896x96xbf16>
    %c8 = arith.constant 8 : index
    %c0_33 = arith.constant 0 : index
    %c0_34 = arith.constant 0 : index
    %70 = vector.load %arg2[%c8, %c0_33, %c0_34] : memref<9x96x32xbf16, #tpu.memory_space<vmem>>, vector<1x96x32xbf16>
    %71 = vector.shape_cast %70 : vector<1x96x32xbf16> to vector<96x32xbf16>
    %cst_35 = arith.constant dense<0.000000e+00> : vector<896x32xf32>
    %72 = tpu.matmul %69, %71, %cst_35 {dimension_numbers = #tpu.dot_dimension_numbers<[1], [0], [0], [1], [0, 0, 1, 1], [], []>} : vector<896x96xbf16>, vector<96x32xbf16>, vector<896x32xf32> -> vector<896x32xf32>
    %73 = arith.addf %65, %72 : vector<896x32xf32>
    %c0_36 = arith.constant 0 : index
    %c0_37 = arith.constant 0 : index
    %74 = vector.load %arg3[%c0_36, %c0_37] : memref<1x32xf32, #tpu.memory_space<vmem>>, vector<1x32xf32>
    %75 = vector.broadcast %74 : vector<1x32xf32> to vector<896x32xf32>
    %76 = arith.addf %73, %75 : vector<896x32xf32>
    %cst_38 = arith.constant 0.000000e+00 : f32
    %77 = vector.broadcast %cst_38 : f32 to vector<896x32xf32>
    %78 = arith.cmpf oge, %76, %77 : vector<896x32xf32>
    %cst_39 = arith.constant 1.000000e-01 : f32
    %79 = vector.broadcast %cst_39 : f32 to vector<896x32xf32>
    %80 = arith.mulf %79, %76 : vector<896x32xf32>
    %81 = arith.select %78, %76, %80 : vector<896x32xi1>, vector<896x32xf32>
    %82 = arith.truncf %81 : vector<896x32xf32> to vector<896x32xbf16>
    %c0_40 = arith.constant 0 : index
    %c0_41 = arith.constant 0 : index
    %83 = vector.load %arg4[%c0_40, %c0_41] : memref<896x32xbf16, #tpu.memory_space<vmem>>, vector<896x32xbf16>
    tpu.vector_store %arg4[%c0_40, %c0_41], %82 {strides = array<i32>} : memref<896x32xbf16, #tpu.memory_space<vmem>>, vector<896x32xbf16>,
    return
  }
  func.func @transform_0(%arg0: i32) -> (i32, i32) {
    %c0_i32 = arith.constant 0 : i32
    %c0_i32_0 = arith.constant 0 : i32
    %c0_i32_1 = arith.constant 0 : i32
    return %c0_i32, %c0_i32_0 : i32, i32
  }
  func.func @transform_1(%arg0: i32) -> (i32, i32, i32) {
    %c0_i32 = arith.constant 0 : i32
    %c0_i32_0 = arith.constant 0 : i32
    %c0_i32_1 = arith.constant 0 : i32
    %c0_i32_2 = arith.constant 0 : i32
    return %c0_i32, %c0_i32_0, %c0_i32_1 : i32, i32, i32
  }
  func.func @transform_2(%arg0: i32) -> (i32, i32) {
    %c0_i32 = arith.constant 0 : i32
    %c0_i32_0 = arith.constant 0 : i32
    %c0_i32_1 = arith.constant 0 : i32
    return %c0_i32, %c0_i32_0 : i32, i32
  }
  func.func @transform_3(%arg0: i32) -> (i32, i32) {
    %c0_i32 = arith.constant 0 : i32
    %c0_i32_0 = arith.constant 0 : i32
    return %arg0, %c0_i32 : i32, i32
  }
}

module attributes {stable_mosaic.version = 11 : i64} {
  func.func @_fc_fused_kernel(%arg0: memref<8x6912xbf16, #tpu.memory_space<vmem>>, %arg1: memref<6912x128xbf16, #tpu.memory_space<vmem>>, %arg2: memref<1x128xf32, #tpu.memory_space<vmem>>, %arg3: memref<128x128xbf16, #tpu.memory_space<vmem>>, %arg4: memref<1x128xf32, #tpu.memory_space<vmem>>, %arg5: memref<8x128xf32, #tpu.memory_space<vmem>>) attributes {dimension_semantics = [], scalar_prefetch = 0 : i64, scratch_operands = 0 : i64, tpu.core_type = #tpu.core_type<tc>} {
    %c0 = arith.constant 0 : index
    %c0_0 = arith.constant 0 : index
    %0 = vector.load %arg0[%c0, %c0_0] : memref<8x6912xbf16, #tpu.memory_space<vmem>>, vector<8x6912xbf16>
    %c0_1 = arith.constant 0 : index
    %c0_2 = arith.constant 0 : index
    %1 = vector.load %arg1[%c0_1, %c0_2] : memref<6912x128xbf16, #tpu.memory_space<vmem>>, vector<6912x128xbf16>
    %cst = arith.constant dense<0.000000e+00> : vector<8x128xf32>
    %2 = tpu.matmul %0, %1, %cst {dimension_numbers = #tpu.dot_dimension_numbers<[1], [0], [0], [1], [0, 0, 1, 1], [], []>} : vector<8x6912xbf16>, vector<6912x128xbf16>, vector<8x128xf32> -> vector<8x128xf32>
    %c0_3 = arith.constant 0 : index
    %c0_4 = arith.constant 0 : index
    %3 = vector.load %arg2[%c0_3, %c0_4] : memref<1x128xf32, #tpu.memory_space<vmem>>, vector<1x128xf32>
    %4 = vector.broadcast %3 : vector<1x128xf32> to vector<8x128xf32>
    %5 = arith.addf %2, %4 : vector<8x128xf32>
    %cst_5 = arith.constant 0.000000e+00 : f32
    %6 = vector.broadcast %cst_5 : f32 to vector<8x128xf32>
    %7 = arith.maximumf %5, %6 : vector<8x128xf32>
    %8 = arith.truncf %7 : vector<8x128xf32> to vector<8x128xbf16>
    %c0_6 = arith.constant 0 : index
    %c0_7 = arith.constant 0 : index
    %9 = vector.load %arg3[%c0_6, %c0_7] : memref<128x128xbf16, #tpu.memory_space<vmem>>, vector<128x128xbf16>
    %cst_8 = arith.constant dense<0.000000e+00> : vector<8x128xf32>
    %10 = tpu.matmul %8, %9, %cst_8 {dimension_numbers = #tpu.dot_dimension_numbers<[1], [0], [0], [1], [0, 0, 1, 1], [], []>} : vector<8x128xbf16>, vector<128x128xbf16>, vector<8x128xf32> -> vector<8x128xf32>
    %c0_9 = arith.constant 0 : index
    %c0_10 = arith.constant 0 : index
    %11 = vector.load %arg4[%c0_9, %c0_10] : memref<1x128xf32, #tpu.memory_space<vmem>>, vector<1x128xf32>
    %12 = vector.broadcast %11 : vector<1x128xf32> to vector<8x128xf32>
    %13 = arith.addf %10, %12 : vector<8x128xf32>
    %c0_11 = arith.constant 0 : index
    %c0_12 = arith.constant 0 : index
    %14 = vector.load %arg5[%c0_11, %c0_12] : memref<8x128xf32, #tpu.memory_space<vmem>>, vector<8x128xf32>
    tpu.vector_store %arg5[%c0_11, %c0_12], %13 {strides = array<i32>} : memref<8x128xf32, #tpu.memory_space<vmem>>, vector<8x128xf32>,
    return
  }
}

</mosaic_0001>

<bundles_post_ra>
// kernel: voxnet_forward.3
= control target key start
LH: loop header
LB: loop body
LE: loop exit
PB: predicated region body
PF: predicated region fallthrough
CT: control target
= control target key end

     0   :  { %s1791_s12 = smov 0   ;;  %s2196_s0 = inlined_call_operand.vmem [shape: bf16[5488,128], index: 0, kind: input, shape index: {}]   ;;  %s2197_s1 = inlined_call_operand.vmem [shape: bf16[128,32], index: 1, kind: input, shape index: {}]   ;;  %s2198_s2 = inlined_call_operand.vmem [shape: f32[1,32], index: 2, kind: input, shape index: {}]   ;;  %s2199_s3 = inlined_call_operand.vmem [shape: bf16[5488,32], index: 3, kind: output, shape index: {}]  }
   0x1 LB: > { %s1435_s13 = sadd.s32 4294967295, %s1769_s12   ;;  %p1439_p0 = scmp.ge.s32.totalorder %s1769_s12, 1  ;;  %s1769_s12 = sphi %s1791_s12, %s13_s12  }
   0x2   : > { %p138_p1 = scmp.lt.s32.totalorder %s1769_s12, 8 }
   0x4   : > { %p139_p2 = pnand %p1439_p0, %p138_p1 }
   0x5   : > { %s162_s22 = smul.u32 (!%p139_p2), 98, %s1435_s13 }
   0x6   : > { %142 = sbr.rel (%p139_p2) target bundleno = 383 (0x17f), region = 32 }
   0x7   : > { %p163_p3 = scmp.lt.s32.totalorder (!%p139_p2), %s162_s22, 685 }
   0xb   : > { %v1728_v0 = vld [vmem:[%s2197_s1 + $0x38] sm:$0xff]  ;;  %v1727_v1 = vld [vmem:[%s2197_s1 + $0x30] sm:$0xff]  ;;  %v1726_v2 = vld [vmem:[%s2197_s1 + $0x28] sm:$0xff]  ;;  %s2201_s22 = smov (!%p163_p3, %s162_s22), 685  ;;  %vm1280_vm2 = vcmask 257024  }
   0xc   : > { %1730 = vmatpush.bf16.msra.mxu2 %v1728_v0  ;;  %1731 = vmatpush.bf16.msra.mxu3 %v1728_v0  ;;  %v1725_v3 = vld [vmem:[%s2197_s1 + $0x20] sm:$0xff]  ;;  %v1724_v4 = vld [vmem:[%s2197_s1 + $0x18] sm:$0xff]  ;;  %v1723_v5 = vld [vmem:[%s2197_s1 + $0x10] sm:$0xff]  ;;  %s1440_s29 = sshll.u32 %s2201_s22, 2 }
   0xd   : > { %634 = vmatpush.bf16.msra.mxu0 %v1728_v0  ;;  %1729 = vmatpush.bf16.msra.mxu1 %v1728_v0  ;;  %v1722_v6 = vld [vmem:[%s2197_s1 + $0x8] sm:$0xff]  ;;  %v1721_v7 = vld [vmem:[%s2197_s1] sm:$0xff]  ;;  %s1831_s7 = scalar_lea.vmem %s2196_s0, %s1440_s29  ;;  %s1883_s13 = scalar_lea.vmem %s2199_s3, %s1440_s29 }
   0xe   : > { %v1696_v8 = vld [vmem:[%s1831_s7 + $0xc0] sm:$0xff]  ;;  %v1709_v9 = vld [vmem:[%s1831_s7 + $0x128] sm:$0xff]  ;;  %v1710_v13 = vld [vmem:[%s1831_s7 + $0x130] sm:$0xff] }
   0xf   : > { %v1672_v10 = vld [vmem:[%s1831_s7] sm:$0xff]  ;;  %v1697_v12 = vld [vmem:[%s1831_s7 + $0xc8] sm:$0xff]  ;;  %v1698_v16 = vld [vmem:[%s1831_s7 + $0xd0] sm:$0xff] }
  0x10   : > { %1733 = vmatpush.bf16.msra.mxu2 %v1727_v1  ;;  %1734 = vmatpush.bf16.msra.mxu3 %v1727_v1  ;;  %v1684_v11 = vld [vmem:[%s1831_s7 + $0x60] sm:$0xff]  ;;  %v1673_v14 = vld [vmem:[%s1831_s7 + $0x8] sm:$0xff]  ;;  %v1711_v17 = vld [vmem:[%s1831_s7 + $0x138] sm:$0xff] }
  0x11   : > { %635 = vmatpush.bf16.msra.mxu0 %v1727_v1  ;;  %1732 = vmatpush.bf16.msra.mxu1 %v1727_v1  ;;  %v1685_v15 = vld [vmem:[%s1831_s7 + $0x68] sm:$0xff]  ;;  %v1674_v18 = vld [vmem:[%s1831_s7 + $0x10] sm:$0xff]  ;;  %v1699_v20 = vld [vmem:[%s1831_s7 + $0xd8] sm:$0xff] }
  0x12   : > { %v1686_v19 = vld [vmem:[%s1831_s7 + $0x70] sm:$0xff]  ;;  %v1712_v21 = vld [vmem:[%s1831_s7 + $0x140] sm:$0xff]  ;;  %v1675_v22 = vld [vmem:[%s1831_s7 + $0x18] sm:$0xff] }
  0x13   : > { %v1687_v23 = vld [vmem:[%s1831_s7 + $0x78] sm:$0xff]  ;;  %v1700_v24 = vld [vmem:[%s1831_s7 + $0xe0] sm:$0xff]  ;;  %v1713_v25 = vld [vmem:[%s1831_s7 + $0x148] sm:$0xff] }
  0x14   : > { %1736 = vmatpush.bf16.msra.mxu2 %v1726_v2  ;;  %1737 = vmatpush.bf16.msra.mxu3 %v1726_v2  ;;  %v1676_v26 = vld [vmem:[%s1831_s7 + $0x20] sm:$0xff]  ;;  %v1701_v28 = vld [vmem:[%s1831_s7 + $0xe8] sm:$0xff]  ;;  %v1714_v29 = vld [vmem:[%s1831_s7 + $0x150] sm:$0xff] }
  0x15   : > { %636 = vmatpush.bf16.msra.mxu0 %v1726_v2  ;;  %1735 = vmatpush.bf16.msra.mxu1 %v1726_v2  ;;  %v1688_v27 = vld [vmem:[%s1831_s7 + $0x80] sm:$0xff]  ;;  %v1677_v30 = vld [vmem:[%s1831_s7 + $0x28] sm:$0xff]  ;;  %v1702_v32 = vld [vmem:[%s1831_s7 + $0xf0] sm:$0xff] }
  0x16   : > { %v1689_v31 = vld [vmem:[%s1831_s7 + $0x88] sm:$0xff]  ;;  %v1715_v33 = vld [vmem:[%s1831_s7 + $0x158] sm:$0xff]  ;;  %v1678_v34 = vld [vmem:[%s1831_s7 + $0x30] sm:$0xff] }
  0x17   : > { %v1690_v35 = vld [vmem:[%s1831_s7 + $0x90] sm:$0xff]  ;;  %v1703_v36 = vld [vmem:[%s1831_s7 + $0xf8] sm:$0xff]  ;;  %v1716_v37 = vld [vmem:[%s1831_s7 + $0x160] sm:$0xff] }
  0x18   : > { %1739 = vmatpush.bf16.msra.mxu2 %v1725_v3  ;;  %1740 = vmatpush.bf16.msra.mxu3 %v1725_v3  ;;  %v1679_v38 = vld [vmem:[%s1831_s7 + $0x38] sm:$0xff]  ;;  %v1704_v40 = vld [vmem:[%s1831_s7 + $0x100] sm:$0xff]  ;;  %v1717_v41 = vld [vmem:[%s1831_s7 + $0x168] sm:$0xff] }
  0x19   : > { %637 = vmatpush.bf16.msra.mxu0 %v1725_v3  ;;  %1738 = vmatpush.bf16.msra.mxu1 %v1725_v3  ;;  %v1691_v39 = vld [vmem:[%s1831_s7 + $0x98] sm:$0xff]  ;;  %v1870_v42 = vld [vmem:[%s2198_s2] ss:$0 sm:$0xff] }
  0x1a   : > { %v1680_v43 = vld [vmem:[%s1831_s7 + $0x40] sm:$0xff] }
  0x1b   : > { %v1692_v44 = vld [vmem:[%s1831_s7 + $0xa0] sm:$0xff] }
  0x1c   : > { %1742 = vmatpush.bf16.msra.mxu2 %v1724_v4  ;;  %1743 = vmatpush.bf16.msra.mxu3 %v1724_v4 }
  0x1d   : > { %638 = vmatpush.bf16.msra.mxu0 %v1724_v4  ;;  %1741 = vmatpush.bf16.msra.mxu1 %v1724_v4 }
  0x20   : > { %1745 = vmatpush.bf16.msra.mxu2 %v1723_v5  ;;  %1746 = vmatpush.bf16.msra.mxu3 %v1723_v5 }
  0x21   : > { %639 = vmatpush.bf16.msra.mxu0 %v1723_v5  ;;  %1744 = vmatpush.bf16.msra.mxu1 %v1723_v5 }
  0x24   : > { %1748 = vmatpush.bf16.msra.mxu2 %v1722_v6  ;;  %1749 = vmatpush.bf16.msra.mxu3 %v1722_v6 }
  0x25   : > { %640 = vmatpush.bf16.msra.mxu0 %v1722_v6  ;;  %1747 = vmatpush.bf16.msra.mxu1 %v1722_v6 }
  0x28   : > { %1751 = vmatpush.bf16.msra.mxu2 %v1721_v7  ;;  %1752 = vmatpush.bf16.msra.mxu3 %v1721_v7 }
  0x29   : > { %641 = vmatpush.bf16.msra.mxu0 %v1721_v7  ;;  %1750 = vmatpush.bf16.msra.mxu1 %v1721_v7 }
  0x2b   : > { %762 = vmatmul.bf16.vlgmr.msra.gmra.mxu2 %v1696_v8  ;;  %827 = vmatmul.bf16.vlgmr.msra.gmra.mxu3 %v1709_v9 }
  0x2c   : > { %642 = vmatmul.bf16.vlgmr.msra.gmra.mxu0 %v1672_v10  ;;  %702 = vmatmul.bf16.vlgmr.msra.gmra.mxu1 %v1684_v11  ;;  %v1705_v11 = vld [vmem:[%s1831_s7 + $0x108] sm:$0xff] }
  0x3b   : > { %767 = vmatmul.bf16.gmra.mxu2 %v1697_v12  ;;  %832 = vmatmul.bf16.gmra.mxu3 %v1710_v13 }
  0x3c   : > { %647 = vmatmul.bf16.gmra.mxu0 %v1673_v14  ;;  %707 = vmatmul.bf16.gmra.mxu1 %v1685_v15  ;;  %v1718_v15 = vld [vmem:[%s1831_s7 + $0x170] sm:$0xff] }
  0x4b   : > { %772 = vmatmul.bf16.gmra.mxu2 %v1698_v16  ;;  %837 = vmatmul.bf16.gmra.mxu3 %v1711_v17  ;;  %v1681_v17 = vld [vmem:[%s1831_s7 + $0x48] sm:$0xff] }
  0x4c   : > { %652 = vmatmul.bf16.gmra.mxu0 %v1674_v18  ;;  %712 = vmatmul.bf16.gmra.mxu1 %v1686_v19  ;;  %v1693_v18 = vld [vmem:[%s1831_s7 + $0xa8] sm:$0xff] }
  0x5b   : > { %777 = vmatmul.bf16.gmra.mxu2 %v1699_v20  ;;  %842 = vmatmul.bf16.gmra.mxu3 %v1712_v21 }
  0x5c   : > { %657 = vmatmul.bf16.gmra.mxu0 %v1675_v22  ;;  %717 = vmatmul.bf16.gmra.mxu1 %v1687_v23 }
  0x6b   : > { %782 = vmatmul.bf16.gmra.mxu2 %v1700_v24  ;;  %847 = vmatmul.bf16.gmra.mxu3 %v1713_v25 }
  0x6c   : > { %662 = vmatmul.bf16.gmra.mxu0 %v1676_v26  ;;  %722 = vmatmul.bf16.gmra.mxu1 %v1688_v27 }
  0x7b   : > { %787 = vmatmul.bf16.gmra.mxu2 %v1701_v28  ;;  %852 = vmatmul.bf16.gmra.mxu3 %v1714_v29 }
  0x7c   : > { %667 = vmatmul.bf16.gmra.mxu0 %v1677_v30  ;;  %727 = vmatmul.bf16.gmra.mxu1 %v1689_v31 }
  0x8b   : > { %792 = vmatmul.bf16.gmra.mxu2 %v1702_v32  ;;  %857 = vmatmul.bf16.gmra.mxu3 %v1715_v33 }
  0x8c   : > { %672 = vmatmul.bf16.gmra.mxu0 %v1678_v34  ;;  %732 = vmatmul.bf16.gmra.mxu1 %v1690_v35 }
  0x9b   : > { %797 = vmatmul.bf16.gmra.mxu2 %v1703_v36  ;;  %862 = vmatmul.bf16.gmra.mxu3 %v1716_v37 }
  0x9c   : > { %677 = vmatmul.bf16.gmra.mxu0 %v1679_v38  ;;  %737 = vmatmul.bf16.gmra.mxu1 %v1691_v39 }
  0xa9   : > { %v643_v45 = vpop.f32.mrf.mxu0  ;;  %v703_v46 = vpop.f32.mrf.mxu1 }
  0xaa   : > { %v644_v47 = vadd.f32 %v1870_v42, %v643_v45  ;;  %v704_v48 = vadd.f32 %v1870_v42, %v703_v46 }
  0xab   : > { %802 = vmatmul.bf16.gmra.mxu2 %v1704_v40  ;;  %867 = vmatmul.bf16.gmra.mxu3 %v1717_v41 }
  0xac   : > { %vm888_vm0 = vcmp.ge.f32.partialorder %v644_v47, 0.0  ;;  %v986_v49 = vmul.f32 0.1, %v644_v47  ;;  %vm912_vm1 = vcmp.ge.f32.partialorder %v704_v48, 0.0  ;;  %v1010_v50 = vmul.f32 0.1, %v704_v48  ;;  %682 = vmatmul.bf16.gmra.mxu0 %v1680_v43  ;;  %742 = vmatmul.bf16.gmra.mxu1 %v1692_v44 }
  0xae   : > { %v763_v51 = vpop.f32.mrf.mxu2  ;;  %v1084_v52 = vsel %vm888_vm0, %v644_v47, %v986_v49  ;;  %v1108_v53 = vsel %vm912_vm1, %v704_v48, %v1010_v50  ;;  %v828_v54 = vpop.f32.mrf.mxu3 }
  0xaf   : > { %v764_v55 = vadd.f32 %v1870_v42, %v763_v51  ;;  %v1182_v56 = vpack.c.bf16 %v1084_v52, %v1084_v52  ;;  %v1206_v57 = vpack.c.bf16 %v1108_v53, %v1108_v53  ;;  %v829_v58 = vadd.f32 %v1870_v42, %v828_v54 }
  0xb1   : > { %vm936_vm3 = vcmp.ge.f32.partialorder %v764_v55, 0.0  ;;  %v1034_v59 = vmul.f32 0.1, %v764_v55  ;;  %1281 = vst.msk [vmem:[%s1883_s13] sm:$0xf] %vm1280_vm2, %v1182_v56  ;;  %vm962_vm4 = vcmp.ge.f32.partialorder %v829_v58, 0.0  ;;  %v645_v60 = vpop.f32.mrf.mxu0  ;;  %v705_v61 = vpop.f32.mrf.mxu1 }
  0xb2   : > { %1305 = vst.msk [vmem:[%s1883_s13 + $0x60] sm:$0xf] %vm1280_vm2, %v1206_v57  ;;  %v1060_v62 = vmul.f32 0.1, %v829_v58  ;;  %v646_v63 = vadd.f32 %v1870_v42, %v645_v60  ;;  %v706_v0 = vadd.f32 %v1870_v42, %v705_v61  ;;  %v1706_v56 = vld [vmem:[%s1831_s7 + $0x110] sm:$0xff]  ;;  %v1719_v60 = vld [vmem:[%s1831_s7 + $0x178] sm:$0xff] }
  0xb3   : > { %v1132_v1 = vsel %vm936_vm3, %v764_v55, %v1034_v59 }
  0xb4   : > { %v1230_v2 = vpack.c.bf16 %v1132_v1, %v1132_v1  ;;  %v1158_v3 = vsel %vm962_vm4, %v829_v58, %v1060_v62  ;;  %vm889_vm5 = vcmp.ge.f32.partialorder %v646_v63, 0.0  ;;  %v987_v4 = vmul.f32 0.1, %v646_v63  ;;  %v1682_v62 = vld [vmem:[%s1831_s7 + $0x50] sm:$0xff] }
  0xb5   : > { %v1256_v5 = vpack.c.bf16 %v1158_v3, %v1158_v3  ;;  %vm913_vm6 = vcmp.ge.f32.partialorder %v706_v0, 0.0  ;;  %v1011_v6 = vmul.f32 0.1, %v706_v0 }
  0xb6   : > { %1329 = vst.msk [vmem:[%s1883_s13 + $0xc0] sm:$0xf] %vm1280_vm2, %v1230_v2  ;;  %v765_v7 = vpop.f32.mrf.mxu2  ;;  %v1085_v8 = vsel %vm889_vm5, %v646_v63, %v987_v4  ;;  %v830_v9 = vpop.f32.mrf.mxu3  ;;  %v1694_v63 = vld [vmem:[%s1831_s7 + $0xb0] sm:$0xff] }
  0xb7   : > { %1355 = vst.msk [vmem:[%s1883_s13 + $0x128] sm:$0xf] %vm1280_vm2, %v1256_v5  ;;  %v766_v10 = vadd.f32 %v1870_v42, %v765_v7  ;;  %v1183_v12 = vpack.c.bf16 %v1085_v8, %v1085_v8  ;;  %v1109_v13 = vsel %vm913_vm6, %v706_v0, %v1011_v6  ;;  %v831_v14 = vadd.f32 %v1870_v42, %v830_v9 }
  0xb8   : > { %v1207_v16 = vpack.c.bf16 %v1109_v13, %v1109_v13 }
  0xb9   : > { %vm937_vm7 = vcmp.ge.f32.partialorder %v766_v10, 0.0  ;;  %v1035_v19 = vmul.f32 0.1, %v766_v10  ;;  %1282 = vst.msk [vmem:[%s1883_s13 + $0x4] sm:$0xf] %vm1280_vm2, %v1183_v12  ;;  %vm963_vm8 = vcmp.ge.f32.partialorder %v831_v14, 0.0  ;;  %v648_v20 = vpop.f32.mrf.mxu0  ;;  %v708_v21 = vpop.f32.mrf.mxu1 }
  0xba   : > { %1306 = vst.msk [vmem:[%s1883_s13 + $0x64] sm:$0xf] %vm1280_vm2, %v1207_v16  ;;  %v1061_v22 = vmul.f32 0.1, %v831_v14  ;;  %v649_v23 = vadd.f32 %v1870_v42, %v648_v20  ;;  %v709_v24 = vadd.f32 %v1870_v42, %v708_v21 }
  0xbb   : > { %v1133_v25 = vsel %vm937_vm7, %v766_v10, %v1035_v19  ;;  %807 = vmatmul.bf16.gmra.mxu2 %v1705_v11  ;;  %872 = vmatmul.bf16.gmra.mxu3 %v1718_v15 }
  0xbc   : > { %v1231_v26 = vpack.c.bf16 %v1133_v25, %v1133_v25  ;;  %v1159_v27 = vsel %vm963_vm8, %v831_v14, %v1061_v22  ;;  %vm890_vm9 = vcmp.ge.f32.partialorder %v649_v23, 0.0  ;;  %v988_v28 = vmul.f32 0.1, %v649_v23  ;;  %687 = vmatmul.bf16.gmra.mxu0 %v1681_v17  ;;  %747 = vmatmul.bf16.gmra.mxu1 %v1693_v18 }
  0xbd   : > { %v1257_v29 = vpack.c.bf16 %v1159_v27, %v1159_v27  ;;  %vm914_vm10 = vcmp.ge.f32.partialorder %v709_v24, 0.0  ;;  %v1012_v30 = vmul.f32 0.1, %v709_v24 }
  0xbe   : > { %1330 = vst.msk [vmem:[%s1883_s13 + $0xc4] sm:$0xf] %vm1280_vm2, %v1231_v26  ;;  %v768_v31 = vpop.f32.mrf.mxu2  ;;  %v1086_v32 = vsel %vm890_vm9, %v649_v23, %v988_v28  ;;  %v833_v33 = vpop.f32.mrf.mxu3 }
  0xbf   : > { %1356 = vst.msk [vmem:[%s1883_s13 + $0x12c] sm:$0xf] %vm1280_vm2, %v1257_v29  ;;  %v769_v34 = vadd.f32 %v1870_v42, %v768_v31  ;;  %v1184_v35 = vpack.c.bf16 %v1086_v32, %v1086_v32  ;;  %v1110_v36 = vsel %vm914_vm10, %v709_v24, %v1012_v30  ;;  %v834_v37 = vadd.f32 %v1870_v42, %v833_v33 }
  0xc0   : > { %v1208_v38 = vpack.c.bf16 %v1110_v36, %v1110_v36  ;;  %v1707_v36 = vld [vmem:[%s1831_s7 + $0x118] sm:$0xff] }
  0xc1   : > { %vm938_vm11 = vcmp.ge.f32.partialorder %v769_v34, 0.0  ;;  %v1036_v39 = vmul.f32 0.1, %v769_v34  ;;  %1283 = vst.msk [vmem:[%s1883_s13 + $0x8] sm:$0xf] %vm1280_vm2, %v1184_v35  ;;  %vm964_vm12 = vcmp.ge.f32.partialorder %v834_v37, 0.0  ;;  %v650_v40 = vpop.f32.mrf.mxu0  ;;  %v710_v41 = vpop.f32.mrf.mxu1 }
  0xc2   : > { %1307 = vst.msk [vmem:[%s1883_s13 + $0x68] sm:$0xf] %vm1280_vm2, %v1208_v38  ;;  %v1062_v43 = vmul.f32 0.1, %v834_v37  ;;  %v651_v44 = vadd.f32 %v1870_v42, %v650_v40  ;;  %v711_v45 = vadd.f32 %v1870_v42, %v710_v41  ;;  %v1720_v40 = vld [vmem:[%s1831_s7 + $0x180] sm:$0xff] }
  0xc3   : > { %v1134_v46 = vsel %vm938_vm11, %v769_v34, %v1036_v39 }
  0xc4   : > { %v1232_v47 = vpack.c.bf16 %v1134_v46, %v1134_v46  ;;  %v1160_v48 = vsel %vm964_vm12, %v834_v37, %v1062_v43  ;;  %vm891_vm13 = vcmp.ge.f32.partialorder %v651_v44, 0.0  ;;  %v989_v49 = vmul.f32 0.1, %v651_v44  ;;  %v1683_v43 = vld [vmem:[%s1831_s7 + $0x58] sm:$0xff] }
  0xc5   : > { %v1258_v50 = vpack.c.bf16 %v1160_v48, %v1160_v48  ;;  %vm915_vm14 = vcmp.ge.f32.partialorder %v711_v45, 0.0  ;;  %v1013_v51 = vmul.f32 0.1, %v711_v45 }
  0xc6   : > { %1331 = vst.msk [vmem:[%s1883_s13 + $0xc8] sm:$0xf] %vm1280_vm2, %v1232_v47  ;;  %v770_v52 = vpop.f32.mrf.mxu2  ;;  %v1087_v53 = vsel %vm891_vm13, %v651_v44, %v989_v49  ;;  %v835_v54 = vpop.f32.mrf.mxu3  ;;  %v1695_v44 = vld [vmem:[%s1831_s7 + $0xb8] sm:$0xff] }
  0xc7   : > { %1357 = vst.msk [vmem:[%s1883_s13 + $0x130] sm:$0xf] %vm1280_vm2, %v1258_v50  ;;  %v771_v55 = vadd.f32 %v1870_v42, %v770_v52  ;;  %v1185_v57 = vpack.c.bf16 %v1087_v53, %v1087_v53  ;;  %v1111_v58 = vsel %vm915_vm14, %v711_v45, %v1013_v51  ;;  %v836_v59 = vadd.f32 %v1870_v42, %v835_v54 }
  0xc8   : > { %v1209_v61 = vpack.c.bf16 %v1111_v58, %v1111_v58 }
  0xc9   : > { %vm939_vm15 = vcmp.ge.f32.partialorder %v771_v55, 0.0  ;;  %v1037_v0 = vmul.f32 0.1, %v771_v55  ;;  %1284 = vst.msk [vmem:[%s1883_s13 + $0xc] sm:$0xf] %vm1280_vm2, %v1185_v57  ;;  %vm965_vm0 = vcmp.ge.f32.partialorder %v836_v59, 0.0  ;;  %v653_v1 = vpop.f32.mrf.mxu0  ;;  %v713_v2 = vpop.f32.mrf.mxu1 }
  0xca   : > { %1308 = vst.msk [vmem:[%s1883_s13 + $0x6c] sm:$0xf] %vm1280_vm2, %v1209_v61  ;;  %v1063_v3 = vmul.f32 0.1, %v836_v59  ;;  %v654_v4 = vadd.f32 %v1870_v42, %v653_v1  ;;  %v714_v5 = vadd.f32 %v1870_v42, %v713_v2 }
  0xcb   : > { %v1135_v6 = vsel %vm939_vm15, %v771_v55, %v1037_v0  ;;  %812 = vmatmul.bf16.gmra.mxu2 %v1706_v56  ;;  %877 = vmatmul.bf16.gmra.mxu3 %v1719_v60 }
  0xcc   : > { %v1233_v7 = vpack.c.bf16 %v1135_v6, %v1135_v6  ;;  %v1161_v8 = vsel %vm965_vm0, %v836_v59, %v1063_v3  ;;  %vm892_vm1 = vcmp.ge.f32.partialorder %v654_v4, 0.0  ;;  %v990_v9 = vmul.f32 0.1, %v654_v4  ;;  %692 = vmatmul.bf16.gmra.mxu0 %v1682_v62  ;;  %752 = vmatmul.bf16.gmra.mxu1 %v1694_v63 }
  0xcd   : > { %v1259_v10 = vpack.c.bf16 %v1161_v8, %v1161_v8  ;;  %vm916_vm3 = vcmp.ge.f32.partialorder %v714_v5, 0.0  ;;  %v1014_v11 = vmul.f32 0.1, %v714_v5 }
  0xce   : > { %1332 = vst.msk [vmem:[%s1883_s13 + $0xcc] sm:$0xf] %vm1280_vm2, %v1233_v7  ;;  %v773_v12 = vpop.f32.mrf.mxu2  ;;  %v1088_v13 = vsel %vm892_vm1, %v654_v4, %v990_v9  ;;  %v838_v14 = vpop.f32.mrf.mxu3 }
  0xcf   : > { %1358 = vst.msk [vmem:[%s1883_s13 + $0x134] sm:$0xf] %vm1280_vm2, %v1259_v10  ;;  %v774_v15 = vadd.f32 %v1870_v42, %v773_v12  ;;  %v1186_v16 = vpack.c.bf16 %v1088_v13, %v1088_v13  ;;  %v1112_v17 = vsel %vm916_vm3, %v714_v5, %v1014_v11  ;;  %v839_v18 = vadd.f32 %v1870_v42, %v838_v14 }
  0xd0   : > { %v1210_v19 = vpack.c.bf16 %v1112_v17, %v1112_v17  ;;  %v1708_v17 = vld [vmem:[%s1831_s7 + $0x120] sm:$0xff] }
  0xd1   : > { %vm940_vm4 = vcmp.ge.f32.partialorder %v774_v15, 0.0  ;;  %v1038_v20 = vmul.f32 0.1, %v774_v15  ;;  %1285 = vst.msk [vmem:[%s1883_s13 + $0x10] sm:$0xf] %vm1280_vm2, %v1186_v16  ;;  %vm966_vm5 = vcmp.ge.f32.partialorder %v839_v18, 0.0  ;;  %v655_v21 = vpop.f32.mrf.mxu0  ;;  %v715_v22 = vpop.f32.mrf.mxu1 }
  0xd2   : > { %1309 = vst.msk [vmem:[%s1883_s13 + $0x70] sm:$0xf] %vm1280_vm2, %v1210_v19  ;;  %v1064_v23 = vmul.f32 0.1, %v839_v18  ;;  %v656_v24 = vadd.f32 %v1870_v42, %v655_v21  ;;  %v716_v25 = vadd.f32 %v1870_v42, %v715_v22 }
  0xd3   : > { %v1136_v26 = vsel %vm940_vm4, %v774_v15, %v1038_v20 }
  0xd4   : > { %v1234_v27 = vpack.c.bf16 %v1136_v26, %v1136_v26  ;;  %v1162_v28 = vsel %vm966_vm5, %v839_v18, %v1064_v23  ;;  %vm893_vm6 = vcmp.ge.f32.partialorder %v656_v24, 0.0  ;;  %v991_v29 = vmul.f32 0.1, %v656_v24 }
  0xd5   : > { %v1260_v30 = vpack.c.bf16 %v1162_v28, %v1162_v28  ;;  %vm917_vm7 = vcmp.ge.f32.partialorder %v716_v25, 0.0  ;;  %v1015_v31 = vmul.f32 0.1, %v716_v25 }
  0xd6   : > { %1333 = vst.msk [vmem:[%s1883_s13 + $0xd0] sm:$0xf] %vm1280_vm2, %v1234_v27  ;;  %v775_v32 = vpop.f32.mrf.mxu2  ;;  %v1089_v33 = vsel %vm893_vm6, %v656_v24, %v991_v29  ;;  %v840_v34 = vpop.f32.mrf.mxu3 }
  0xd7   : > { %1359 = vst.msk [vmem:[%s1883_s13 + $0x138] sm:$0xf] %vm1280_vm2, %v1260_v30  ;;  %v776_v35 = vadd.f32 %v1870_v42, %v775_v32  ;;  %v1187_v37 = vpack.c.bf16 %v1089_v33, %v1089_v33  ;;  %v1113_v38 = vsel %vm917_vm7, %v716_v25, %v1015_v31  ;;  %v841_v39 = vadd.f32 %v1870_v42, %v840_v34 }
  0xd8   : > { %v1211_v41 = vpack.c.bf16 %v1113_v38, %v1113_v38 }
  0xd9   : > { %vm941_vm8 = vcmp.ge.f32.partialorder %v776_v35, 0.0  ;;  %v1039_v45 = vmul.f32 0.1, %v776_v35  ;;  %1286 = vst.msk [vmem:[%s1883_s13 + $0x14] sm:$0xf] %vm1280_vm2, %v1187_v37  ;;  %vm967_vm9 = vcmp.ge.f32.partialorder %v841_v39, 0.0  ;;  %v658_v46 = vpop.f32.mrf.mxu0  ;;  %v718_v47 = vpop.f32.mrf.mxu1 }
  0xda   : > { %1310 = vst.msk [vmem:[%s1883_s13 + $0x74] sm:$0xf] %vm1280_vm2, %v1211_v41  ;;  %v1065_v48 = vmul.f32 0.1, %v841_v39  ;;  %v659_v49 = vadd.f32 %v1870_v42, %v658_v46  ;;  %v719_v50 = vadd.f32 %v1870_v42, %v718_v47 }
  0xdb   : > { %v1137_v51 = vsel %vm941_vm8, %v776_v35, %v1039_v45  ;;  %817 = vmatmul.bf16.gmra.mxu2 %v1707_v36  ;;  %882 = vmatmul.bf16.gmra.mxu3 %v1720_v40 }
  0xdc   : > { %v1235_v52 = vpack.c.bf16 %v1137_v51, %v1137_v51  ;;  %v1163_v53 = vsel %vm967_vm9, %v841_v39, %v1065_v48  ;;  %vm894_vm10 = vcmp.ge.f32.partialorder %v659_v49, 0.0  ;;  %v992_v54 = vmul.f32 0.1, %v659_v49  ;;  %697 = vmatmul.bf16.gmra.mxu0 %v1683_v43  ;;  %757 = vmatmul.bf16.gmra.mxu1 %v1695_v44 }
  0xdd   : > { %v1261_v55 = vpack.c.bf16 %v1163_v53, %v1163_v53  ;;  %vm918_vm11 = vcmp.ge.f32.partialorder %v719_v50, 0.0  ;;  %v1016_v56 = vmul.f32 0.1, %v719_v50 }
  0xde   : > { %1334 = vst.msk [vmem:[%s1883_s13 + $0xd4] sm:$0xf] %vm1280_vm2, %v1235_v52  ;;  %v778_v57 = vpop.f32.mrf.mxu2  ;;  %v1090_v58 = vsel %vm894_vm10, %v659_v49, %v992_v54  ;;  %v843_v59 = vpop.f32.mrf.mxu3 }
  0xdf   : > { %1360 = vst.msk [vmem:[%s1883_s13 + $0x13c] sm:$0xf] %vm1280_vm2, %v1261_v55  ;;  %v779_v60 = vadd.f32 %v1870_v42, %v778_v57  ;;  %v1188_v61 = vpack.c.bf16 %v1090_v58, %v1090_v58  ;;  %v1114_v62 = vsel %vm918_vm11, %v719_v50, %v1016_v56  ;;  %v844_v63 = vadd.f32 %v1870_v42, %v843_v59 }
  0xe0   : > { %v1212_v0 = vpack.c.bf16 %v1114_v62, %v1114_v62 }
  0xe1   : > { %vm942_vm12 = vcmp.ge.f32.partialorder %v779_v60, 0.0  ;;  %v1040_v1 = vmul.f32 0.1, %v779_v60  ;;  %1287 = vst.msk [vmem:[%s1883_s13 + $0x18] sm:$0xf] %vm1280_vm2, %v1188_v61  ;;  %vm968_vm13 = vcmp.ge.f32.partialorder %v844_v63, 0.0  ;;  %v660_v2 = vpop.f32.mrf.mxu0  ;;  %v720_v3 = vpop.f32.mrf.mxu1 }
  0xe2   : > { %1311 = vst.msk [vmem:[%s1883_s13 + $0x78] sm:$0xf] %vm1280_vm2, %v1212_v0  ;;  %v1066_v4 = vmul.f32 0.1, %v844_v63  ;;  %v661_v5 = vadd.f32 %v1870_v42, %v660_v2  ;;  %v721_v6 = vadd.f32 %v1870_v42, %v720_v3 }
  0xe3   : > { %v1138_v7 = vsel %vm942_vm12, %v779_v60, %v1040_v1 }
  0xe4   : > { %v1236_v8 = vpack.c.bf16 %v1138_v7, %v1138_v7  ;;  %v1164_v9 = vsel %vm968_vm13, %v844_v63, %v1066_v4  ;;  %vm895_vm14 = vcmp.ge.f32.partialorder %v661_v5, 0.0  ;;  %v993_v10 = vmul.f32 0.1, %v661_v5 }
  0xe5   : > { %v1262_v11 = vpack.c.bf16 %v1164_v9, %v1164_v9  ;;  %vm919_vm15 = vcmp.ge.f32.partialorder %v721_v6, 0.0  ;;  %v1017_v12 = vmul.f32 0.1, %v721_v6 }
  0xe6   : > { %1335 = vst.msk [vmem:[%s1883_s13 + $0xd8] sm:$0xf] %vm1280_vm2, %v1236_v8  ;;  %v780_v13 = vpop.f32.mrf.mxu2  ;;  %v1091_v14 = vsel %vm895_vm14, %v661_v5, %v993_v10  ;;  %v845_v15 = vpop.f32.mrf.mxu3 }
  0xe7   : > { %1361 = vst.msk [vmem:[%s1883_s13 + $0x140] sm:$0xf] %vm1280_vm2, %v1262_v11  ;;  %v781_v16 = vadd.f32 %v1870_v42, %v780_v13  ;;  %v1189_v18 = vpack.c.bf16 %v1091_v14, %v1091_v14  ;;  %v1115_v19 = vsel %vm919_vm15, %v721_v6, %v1017_v12  ;;  %v846_v20 = vadd.f32 %v1870_v42, %v845_v15 }
  0xe8   : > { %v1213_v21 = vpack.c.bf16 %v1115_v19, %v1115_v19 }
  0xe9   : > { %vm943_vm0 = vcmp.ge.f32.partialorder %v781_v16, 0.0  ;;  %v1041_v22 = vmul.f32 0.1, %v781_v16  ;;  %1288 = vst.msk [vmem:[%s1883_s13 + $0x1c] sm:$0xf] %vm1280_vm2, %v1189_v18  ;;  %vm969_vm1 = vcmp.ge.f32.partialorder %v846_v20, 0.0  ;;  %v663_v23 = vpop.f32.mrf.mxu0  ;;  %v723_v24 = vpop.f32.mrf.mxu1 }
  0xea   : > { %1312 = vst.msk [vmem:[%s1883_s13 + $0x7c] sm:$0xf] %vm1280_vm2, %v1213_v21  ;;  %v1067_v25 = vmul.f32 0.1, %v846_v20  ;;  %v664_v26 = vadd.f32 %v1870_v42, %v663_v23  ;;  %v724_v27 = vadd.f32 %v1870_v42, %v723_v24 }
  0xeb   : > { %v1139_v28 = vsel %vm943_vm0, %v781_v16, %v1041_v22  ;;  %822 = vmatmul.bf16.gmra.mxu2 %v1708_v17 }
  0xec   : > { %v1237_v29 = vpack.c.bf16 %v1139_v28, %v1139_v28  ;;  %v1165_v30 = vsel %vm969_vm1, %v846_v20, %v1067_v25  ;;  %vm896_vm3 = vcmp.ge.f32.partialorder %v664_v26, 0.0  ;;  %v994_v31 = vmul.f32 0.1, %v664_v26 }
  0xed   : > { %v1263_v32 = vpack.c.bf16 %v1165_v30, %v1165_v30  ;;  %vm920_vm4 = vcmp.ge.f32.partialorder %v724_v27, 0.0  ;;  %v1018_v33 = vmul.f32 0.1, %v724_v27 }
  0xee   : > { %1336 = vst.msk [vmem:[%s1883_s13 + $0xdc] sm:$0xf] %vm1280_vm2, %v1237_v29  ;;  %v783_v34 = vpop.f32.mrf.mxu2  ;;  %v1092_v35 = vsel %vm896_vm3, %v664_v26, %v994_v31  ;;  %v848_v36 = vpop.f32.mrf.mxu3 }
  0xef   : > { %1362 = vst.msk [vmem:[%s1883_s13 + $0x144] sm:$0xf] %vm1280_vm2, %v1263_v32  ;;  %v784_v37 = vadd.f32 %v1870_v42, %v783_v34  ;;  %v1190_v38 = vpack.c.bf16 %v1092_v35, %v1092_v35  ;;  %v1116_v39 = vsel %vm920_vm4, %v724_v27, %v1018_v33  ;;  %v849_v40 = vadd.f32 %v1870_v42, %v848_v36 }
  0xf0   : > { %v1214_v41 = vpack.c.bf16 %v1116_v39, %v1116_v39 }
  0xf1   : > { %vm944_vm5 = vcmp.ge.f32.partialorder %v784_v37, 0.0  ;;  %v1042_v43 = vmul.f32 0.1, %v784_v37  ;;  %1289 = vst.msk [vmem:[%s1883_s13 + $0x20] sm:$0xf] %vm1280_vm2, %v1190_v38  ;;  %vm970_vm6 = vcmp.ge.f32.partialorder %v849_v40, 0.0  ;;  %v665_v44 = vpop.f32.mrf.mxu0  ;;  %v725_v45 = vpop.f32.mrf.mxu1 }
  0xf2   : > { %1313 = vst.msk [vmem:[%s1883_s13 + $0x80] sm:$0xf] %vm1280_vm2, %v1214_v41  ;;  %v1068_v46 = vmul.f32 0.1, %v849_v40  ;;  %v666_v47 = vadd.f32 %v1870_v42, %v665_v44  ;;  %v726_v48 = vadd.f32 %v1870_v42, %v725_v45 }
  0xf3   : > { %v1140_v49 = vsel %vm944_vm5, %v784_v37, %v1042_v43 }
  0xf4   : > { %v1238_v50 = vpack.c.bf16 %v1140_v49, %v1140_v49  ;;  %v1166_v51 = vsel %vm970_vm6, %v849_v40, %v1068_v46  ;;  %vm897_vm7 = vcmp.ge.f32.partialorder %v666_v47, 0.0  ;;  %v995_v52 = vmul.f32 0.1, %v666_v47 }
  0xf5   : > { %v1264_v53 = vpack.c.bf16 %v1166_v51, %v1166_v51  ;;  %vm921_vm8 = vcmp.ge.f32.partialorder %v726_v48, 0.0  ;;  %v1019_v54 = vmul.f32 0.1, %v726_v48 }
  0xf6   : > { %1337 = vst.msk [vmem:[%s1883_s13 + $0xe0] sm:$0xf] %vm1280_vm2, %v1238_v50  ;;  %v785_v55 = vpop.f32.mrf.mxu2  ;;  %v1093_v56 = vsel %vm897_vm7, %v666_v47, %v995_v52  ;;  %v850_v57 = vpop.f32.mrf.mxu3 }
  0xf7   : > { %1363 = vst.msk [vmem:[%s1883_s13 + $0x148] sm:$0xf] %vm1280_vm2, %v1264_v53  ;;  %v786_v58 = vadd.f32 %v1870_v42, %v785_v55  ;;  %v1191_v59 = vpack.c.bf16 %v1093_v56, %v1093_v56  ;;  %v1117_v60 = vsel %vm921_vm8, %v726_v48, %v1019_v54  ;;  %v851_v61 = vadd.f32 %v1870_v42, %v850_v57 }
  0xf8   : > { %v1215_v62 = vpack.c.bf16 %v1117_v60, %v1117_v60 }
  0xf9   : > { %vm945_vm9 = vcmp.ge.f32.partialorder %v786_v58, 0.0  ;;  %v1043_v63 = vmul.f32 0.1, %v786_v58  ;;  %1290 = vst.msk [vmem:[%s1883_s13 + $0x24] sm:$0xf] %vm1280_vm2, %v1191_v59  ;;  %vm971_vm10 = vcmp.ge.f32.partialorder %v851_v61, 0.0  ;;  %v668_v0 = vpop.f32.mrf.mxu0  ;;  %v728_v1 = vpop.f32.mrf.mxu1 }
  0xfa   : > { %1314 = vst.msk [vmem:[%s1883_s13 + $0x84] sm:$0xf] %vm1280_vm2, %v1215_v62  ;;  %v1069_v2 = vmul.f32 0.1, %v851_v61  ;;  %v669_v3 = vadd.f32 %v1870_v42, %v668_v0  ;;  %v729_v4 = vadd.f32 %v1870_v42, %v728_v1 }
  0xfb   : > { %v1141_v5 = vsel %vm945_vm9, %v786_v58, %v1043_v63 }
  0xfc   : > { %v1239_v6 = vpack.c.bf16 %v1141_v5, %v1141_v5  ;;  %v1167_v7 = vsel %vm971_vm10, %v851_v61, %v1069_v2  ;;  %vm898_vm11 = vcmp.ge.f32.partialorder %v669_v3, 0.0  ;;  %v996_v8 = vmul.f32 0.1, %v669_v3 }
  0xfd   : > { %v1265_v9 = vpack.c.bf16 %v1167_v7, %v1167_v7  ;;  %vm922_vm12 = vcmp.ge.f32.partialorder %v729_v4, 0.0  ;;  %v1020_v10 = vmul.f32 0.1, %v729_v4 }
  0xfe   : > { %1338 = vst.msk [vmem:[%s1883_s13 + $0xe4] sm:$0xf] %vm1280_vm2, %v1239_v6  ;;  %v788_v11 = vpop.f32.mrf.mxu2  ;;  %v1094_v12 = vsel %vm898_vm11, %v669_v3, %v996_v8  ;;  %v853_v13 = vpop.f32.mrf.mxu3 }
  0xff   : > { %1364 = vst.msk [vmem:[%s1883_s13 + $0x14c] sm:$0xf] %vm1280_vm2, %v1265_v9  ;;  %v789_v14 = vadd.f32 %v1870_v42, %v788_v11  ;;  %v1192_v15 = vpack.c.bf16 %v1094_v12, %v1094_v12  ;;  %v1118_v16 = vsel %vm922_vm12, %v729_v4, %v1020_v10  ;;  %v854_v17 = vadd.f32 %v1870_v42, %v853_v13 }
 0x100   : > { %v1216_v18 = vpack.c.bf16 %v1118_v16, %v1118_v16 }
 0x101   : > { %vm946_vm13 = vcmp.ge.f32.partialorder %v789_v14, 0.0  ;;  %v1044_v19 = vmul.f32 0.1, %v789_v14  ;;  %1291 = vst.msk [vmem:[%s1883_s13 + $0x28] sm:$0xf] %vm1280_vm2, %v1192_v15  ;;  %vm972_vm14 = vcmp.ge.f32.partialorder %v854_v17, 0.0  ;;  %v670_v20 = vpop.f32.mrf.mxu0  ;;  %v730_v21 = vpop.f32.mrf.mxu1 }
 0x102   : > { %1315 = vst.msk [vmem:[%s1883_s13 + $0x88] sm:$0xf] %vm1280_vm2, %v1216_v18  ;;  %v1070_v22 = vmul.f32 0.1, %v854_v17  ;;  %v671_v23 = vadd.f32 %v1870_v42, %v670_v20  ;;  %v731_v24 = vadd.f32 %v1870_v42, %v730_v21 }
 0x103   : > { %v1142_v25 = vsel %vm946_vm13, %v789_v14, %v1044_v19 }
 0x104   : > { %v1240_v26 = vpack.c.bf16 %v1142_v25, %v1142_v25  ;;  %v1168_v27 = vsel %vm972_vm14, %v854_v17, %v1070_v22  ;;  %vm899_vm15 = vcmp.ge.f32.partialorder %v671_v23, 0.0  ;;  %v997_v28 = vmul.f32 0.1, %v671_v23 }
 0x105   : > { %v1266_v29 = vpack.c.bf16 %v1168_v27, %v1168_v27  ;;  %vm923_vm0 = vcmp.ge.f32.partialorder %v731_v24, 0.0  ;;  %v1021_v30 = vmul.f32 0.1, %v731_v24 }
 0x106   : > { %1339 = vst.msk [vmem:[%s1883_s13 + $0xe8] sm:$0xf] %vm1280_vm2, %v1240_v26  ;;  %v790_v31 = vpop.f32.mrf.mxu2  ;;  %v1095_v32 = vsel %vm899_vm15, %v671_v23, %v997_v28  ;;  %v855_v33 = vpop.f32.mrf.mxu3 }
 0x107   : > { %1365 = vst.msk [vmem:[%s1883_s13 + $0x150] sm:$0xf] %vm1280_vm2, %v1266_v29  ;;  %v791_v34 = vadd.f32 %v1870_v42, %v790_v31  ;;  %v1193_v35 = vpack.c.bf16 %v1095_v32, %v1095_v32  ;;  %v1119_v36 = vsel %vm923_vm0, %v731_v24, %v1021_v30  ;;  %v856_v37 = vadd.f32 %v1870_v42, %v855_v33 }
 0x108   : > { %v1217_v38 = vpack.c.bf16 %v1119_v36, %v1119_v36 }
 0x109   : > { %vm947_vm1 = vcmp.ge.f32.partialorder %v791_v34, 0.0  ;;  %v1045_v39 = vmul.f32 0.1, %v791_v34  ;;  %1292 = vst.msk [vmem:[%s1883_s13 + $0x2c] sm:$0xf] %vm1280_vm2, %v1193_v35  ;;  %vm973_vm3 = vcmp.ge.f32.partialorder %v856_v37, 0.0  ;;  %v673_v40 = vpop.f32.mrf.mxu0  ;;  %v733_v41 = vpop.f32.mrf.mxu1 }
 0x10a   : > { %1316 = vst.msk [vmem:[%s1883_s13 + $0x8c] sm:$0xf] %vm1280_vm2, %v1217_v38  ;;  %v1071_v43 = vmul.f32 0.1, %v856_v37  ;;  %v674_v44 = vadd.f32 %v1870_v42, %v673_v40  ;;  %v734_v45 = vadd.f32 %v1870_v42, %v733_v41 }
 0x10b   : > { %v1143_v46 = vsel %vm947_vm1, %v791_v34, %v1045_v39 }
 0x10c   : > { %v1241_v47 = vpack.c.bf16 %v1143_v46, %v1143_v46  ;;  %v1169_v48 = vsel %vm973_vm3, %v856_v37, %v1071_v43  ;;  %vm900_vm4 = vcmp.ge.f32.partialorder %v674_v44, 0.0  ;;  %v998_v49 = vmul.f32 0.1, %v674_v44 }
 0x10d   : > { %v1267_v50 = vpack.c.bf16 %v1169_v48, %v1169_v48  ;;  %vm924_vm5 = vcmp.ge.f32.partialorder %v734_v45, 0.0  ;;  %v1022_v51 = vmul.f32 0.1, %v734_v45 }
 0x10e   : > { %1340 = vst.msk [vmem:[%s1883_s13 + $0xec] sm:$0xf] %vm1280_vm2, %v1241_v47  ;;  %v793_v52 = vpop.f32.mrf.mxu2  ;;  %v1096_v53 = vsel %vm900_vm4, %v674_v44, %v998_v49  ;;  %v858_v54 = vpop.f32.mrf.mxu3 }
 0x10f   : > { %1366 = vst.msk [vmem:[%s1883_s13 + $0x154] sm:$0xf] %vm1280_vm2, %v1267_v50  ;;  %v794_v55 = vadd.f32 %v1870_v42, %v793_v52  ;;  %v1194_v56 = vpack.c.bf16 %v1096_v53, %v1096_v53  ;;  %v1120_v57 = vsel %vm924_vm5, %v734_v45, %v1022_v51  ;;  %v859_v58 = vadd.f32 %v1870_v42, %v858_v54 }
 0x110   : > { %v1218_v59 = vpack.c.bf16 %v1120_v57, %v1120_v57 }
 0x111   : > { %vm948_vm6 = vcmp.ge.f32.partialorder %v794_v55, 0.0  ;;  %v1046_v60 = vmul.f32 0.1, %v794_v55  ;;  %1293 = vst.msk [vmem:[%s1883_s13 + $0x30] sm:$0xf] %vm1280_vm2, %v1194_v56  ;;  %vm974_vm7 = vcmp.ge.f32.partialorder %v859_v58, 0.0  ;;  %v675_v61 = vpop.f32.mrf.mxu0  ;;  %v735_v62 = vpop.f32.mrf.mxu1 }
 0x112   : > { %1317 = vst.msk [vmem:[%s1883_s13 + $0x90] sm:$0xf] %vm1280_vm2, %v1218_v59  ;;  %v1072_v63 = vmul.f32 0.1, %v859_v58  ;;  %v676_v0 = vadd.f32 %v1870_v42, %v675_v61  ;;  %v736_v1 = vadd.f32 %v1870_v42, %v735_v62 }
 0x113   : > { %v1144_v2 = vsel %vm948_vm6, %v794_v55, %v1046_v60 }
 0x114   : > { %v1242_v3 = vpack.c.bf16 %v1144_v2, %v1144_v2  ;;  %v1170_v4 = vsel %vm974_vm7, %v859_v58, %v1072_v63  ;;  %vm901_vm8 = vcmp.ge.f32.partialorder %v676_v0, 0.0  ;;  %v999_v5 = vmul.f32 0.1, %v676_v0 }
 0x115   : > { %v1268_v6 = vpack.c.bf16 %v1170_v4, %v1170_v4  ;;  %vm925_vm9 = vcmp.ge.f32.partialorder %v736_v1, 0.0  ;;  %v1023_v7 = vmul.f32 0.1, %v736_v1 }
 0x116   : > { %1341 = vst.msk [vmem:[%s1883_s13 + $0xf0] sm:$0xf] %vm1280_vm2, %v1242_v3  ;;  %v795_v8 = vpop.f32.mrf.mxu2  ;;  %v1097_v9 = vsel %vm901_vm8, %v676_v0, %v999_v5  ;;  %v860_v10 = vpop.f32.mrf.mxu3 }
 0x117   : > { %1367 = vst.msk [vmem:[%s1883_s13 + $0x158] sm:$0xf] %vm1280_vm2, %v1268_v6  ;;  %v796_v11 = vadd.f32 %v1870_v42, %v795_v8  ;;  %v1195_v12 = vpack.c.bf16 %v1097_v9, %v1097_v9  ;;  %v1121_v13 = vsel %vm925_vm9, %v736_v1, %v1023_v7  ;;  %v861_v14 = vadd.f32 %v1870_v42, %v860_v10 }
 0x118   : > { %v1219_v15 = vpack.c.bf16 %v1121_v13, %v1121_v13 }
 0x119   : > { %vm949_vm10 = vcmp.ge.f32.partialorder %v796_v11, 0.0  ;;  %v1047_v16 = vmul.f32 0.1, %v796_v11  ;;  %1294 = vst.msk [vmem:[%s1883_s13 + $0x34] sm:$0xf] %vm1280_vm2, %v1195_v12  ;;  %vm975_vm11 = vcmp.ge.f32.partialorder %v861_v14, 0.0  ;;  %v678_v17 = vpop.f32.mrf.mxu0  ;;  %v738_v18 = vpop.f32.mrf.mxu1 }
 0x11a   : > { %1318 = vst.msk [vmem:[%s1883_s13 + $0x94] sm:$0xf] %vm1280_vm2, %v1219_v15  ;;  %v1073_v19 = vmul.f32 0.1, %v861_v14  ;;  %v679_v20 = vadd.f32 %v1870_v42, %v678_v17  ;;  %v739_v21 = vadd.f32 %v1870_v42, %v738_v18 }
 0x11b   : > { %v1145_v22 = vsel %vm949_vm10, %v796_v11, %v1047_v16 }
 0x11c   : > { %v1243_v23 = vpack.c.bf16 %v1145_v22, %v1145_v22  ;;  %v1171_v24 = vsel %vm975_vm11, %v861_v14, %v1073_v19  ;;  %vm902_vm12 = vcmp.ge.f32.partialorder %v679_v20, 0.0  ;;  %v1000_v25 = vmul.f32 0.1, %v679_v20 }
 0x11d   : > { %v1269_v26 = vpack.c.bf16 %v1171_v24, %v1171_v24  ;;  %vm926_vm13 = vcmp.ge.f32.partialorder %v739_v21, 0.0  ;;  %v1024_v27 = vmul.f32 0.1, %v739_v21 }
 0x11e   : > { %1342 = vst.msk [vmem:[%s1883_s13 + $0xf4] sm:$0xf] %vm1280_vm2, %v1243_v23  ;;  %v798_v28 = vpop.f32.mrf.mxu2  ;;  %v1098_v29 = vsel %vm902_vm12, %v679_v20, %v1000_v25  ;;  %v863_v30 = vpop.f32.mrf.mxu3 }
 0x11f   : > { %1368 = vst.msk [vmem:[%s1883_s13 + $0x15c] sm:$0xf] %vm1280_vm2, %v1269_v26  ;;  %v799_v31 = vadd.f32 %v1870_v42, %v798_v28  ;;  %v1196_v32 = vpack.c.bf16 %v1098_v29, %v1098_v29  ;;  %v1122_v33 = vsel %vm926_vm13, %v739_v21, %v1024_v27  ;;  %v864_v34 = vadd.f32 %v1870_v42, %v863_v30 }
 0x120   : > { %v1220_v35 = vpack.c.bf16 %v1122_v33, %v1122_v33 }
 0x121   : > { %vm950_vm14 = vcmp.ge.f32.partialorder %v799_v31, 0.0  ;;  %v1048_v36 = vmul.f32 0.1, %v799_v31  ;;  %1295 = vst.msk [vmem:[%s1883_s13 + $0x38] sm:$0xf] %vm1280_vm2, %v1196_v32  ;;  %vm976_vm15 = vcmp.ge.f32.partialorder %v864_v34, 0.0  ;;  %v680_v37 = vpop.f32.mrf.mxu0  ;;  %v740_v38 = vpop.f32.mrf.mxu1 }
 0x122   : > { %1319 = vst.msk [vmem:[%s1883_s13 + $0x98] sm:$0xf] %vm1280_vm2, %v1220_v35  ;;  %v1074_v39 = vmul.f32 0.1, %v864_v34  ;;  %v681_v40 = vadd.f32 %v1870_v42, %v680_v37  ;;  %v741_v41 = vadd.f32 %v1870_v42, %v740_v38 }
 0x123   : > { %v1146_v43 = vsel %vm950_vm14, %v799_v31, %v1048_v36 }
 0x124   : > { %v1244_v44 = vpack.c.bf16 %v1146_v43, %v1146_v43  ;;  %v1172_v45 = vsel %vm976_vm15, %v864_v34, %v1074_v39  ;;  %vm903_vm0 = vcmp.ge.f32.partialorder %v681_v40, 0.0  ;;  %v1001_v46 = vmul.f32 0.1, %v681_v40 }
 0x125   : > { %v1270_v47 = vpack.c.bf16 %v1172_v45, %v1172_v45  ;;  %vm927_vm1 = vcmp.ge.f32.partialorder %v741_v41, 0.0  ;;  %v1025_v48 = vmul.f32 0.1, %v741_v41 }
 0x126   : > { %1343 = vst.msk [vmem:[%s1883_s13 + $0xf8] sm:$0xf] %vm1280_vm2, %v1244_v44  ;;  %v800_v49 = vpop.f32.mrf.mxu2  ;;  %v1099_v50 = vsel %vm903_vm0, %v681_v40, %v1001_v46  ;;  %v865_v51 = vpop.f32.mrf.mxu3 }
 0x127   : > { %1369 = vst.msk [vmem:[%s1883_s13 + $0x160] sm:$0xf] %vm1280_vm2, %v1270_v47  ;;  %v801_v52 = vadd.f32 %v1870_v42, %v800_v49  ;;  %v1197_v53 = vpack.c.bf16 %v1099_v50, %v1099_v50  ;;  %v1123_v54 = vsel %vm927_vm1, %v741_v41, %v1025_v48  ;;  %v866_v55 = vadd.f32 %v1870_v42, %v865_v51 }
 0x128   : > { %v1221_v56 = vpack.c.bf16 %v1123_v54, %v1123_v54 }
 0x129   : > { %vm951_vm3 = vcmp.ge.f32.partialorder %v801_v52, 0.0  ;;  %v1049_v57 = vmul.f32 0.1, %v801_v52  ;;  %1296 = vst.msk [vmem:[%s1883_s13 + $0x3c] sm:$0xf] %vm1280_vm2, %v1197_v53  ;;  %vm977_vm4 = vcmp.ge.f32.partialorder %v866_v55, 0.0  ;;  %v683_v58 = vpop.f32.mrf.mxu0  ;;  %v743_v59 = vpop.f32.mrf.mxu1 }
 0x12a   : > { %1320 = vst.msk [vmem:[%s1883_s13 + $0x9c] sm:$0xf] %vm1280_vm2, %v1221_v56  ;;  %v1075_v60 = vmul.f32 0.1, %v866_v55  ;;  %v684_v61 = vadd.f32 %v1870_v42, %v683_v58  ;;  %v744_v62 = vadd.f32 %v1870_v42, %v743_v59 }
 0x12b   : > { %v1147_v63 = vsel %vm951_vm3, %v801_v52, %v1049_v57 }
 0x12c   : > { %v1245_v0 = vpack.c.bf16 %v1147_v63, %v1147_v63  ;;  %v1173_v1 = vsel %vm977_vm4, %v866_v55, %v1075_v60  ;;  %vm904_vm5 = vcmp.ge.f32.partialorder %v684_v61, 0.0  ;;  %v1002_v2 = vmul.f32 0.1, %v684_v61 }
 0x12d   : > { %v1271_v3 = vpack.c.bf16 %v1173_v1, %v1173_v1  ;;  %vm928_vm6 = vcmp.ge.f32.partialorder %v744_v62, 0.0  ;;  %v1026_v4 = vmul.f32 0.1, %v744_v62 }
 0x12e   : > { %1344 = vst.msk [vmem:[%s1883_s13 + $0xfc] sm:$0xf] %vm1280_vm2, %v1245_v0  ;;  %v803_v5 = vpop.f32.mrf.mxu2  ;;  %v1100_v6 = vsel %vm904_vm5, %v684_v61, %v1002_v2  ;;  %v868_v7 = vpop.f32.mrf.mxu3 }
 0x12f   : > { %1370 = vst.msk [vmem:[%s1883_s13 + $0x164] sm:$0xf] %vm1280_vm2, %v1271_v3  ;;  %v804_v8 = vadd.f32 %v1870_v42, %v803_v5  ;;  %v1198_v9 = vpack.c.bf16 %v1100_v6, %v1100_v6  ;;  %v1124_v10 = vsel %vm928_vm6, %v744_v62, %v1026_v4  ;;  %v869_v11 = vadd.f32 %v1870_v42, %v868_v7 }
 0x130   : > { %v1222_v12 = vpack.c.bf16 %v1124_v10, %v1124_v10 }
 0x131   : > { %vm952_vm7 = vcmp.ge.f32.partialorder %v804_v8, 0.0  ;;  %v1050_v13 = vmul.f32 0.1, %v804_v8  ;;  %1297 = vst.msk [vmem:[%s1883_s13 + $0x40] sm:$0xf] %vm1280_vm2, %v1198_v9  ;;  %vm978_vm8 = vcmp.ge.f32.partialorder %v869_v11, 0.0  ;;  %v685_v14 = vpop.f32.mrf.mxu0  ;;  %v745_v15 = vpop.f32.mrf.mxu1 }
 0x132   : > { %1321 = vst.msk [vmem:[%s1883_s13 + $0xa0] sm:$0xf] %vm1280_vm2, %v1222_v12  ;;  %v1076_v16 = vmul.f32 0.1, %v869_v11  ;;  %v686_v17 = vadd.f32 %v1870_v42, %v685_v14  ;;  %v746_v18 = vadd.f32 %v1870_v42, %v745_v15  ;;  %v2103_v42 = vld [vmem:[%s2198_s2] ss:$0 sm:$0xff] }
 0x133   : > { %v1148_v19 = vsel %vm952_vm7, %v804_v8, %v1050_v13 }
 0x134   : > { %v1246_v20 = vpack.c.bf16 %v1148_v19, %v1148_v19  ;;  %v1174_v21 = vsel %vm978_vm8, %v869_v11, %v1076_v16  ;;  %vm905_vm9 = vcmp.ge.f32.partialorder %v686_v17, 0.0  ;;  %v1003_v22 = vmul.f32 0.1, %v686_v17 }
 0x135   : > { %v1272_v23 = vpack.c.bf16 %v1174_v21, %v1174_v21  ;;  %vm929_vm10 = vcmp.ge.f32.partialorder %v746_v18, 0.0  ;;  %v1027_v24 = vmul.f32 0.1, %v746_v18 }
 0x136   : > { %1345 = vst.msk [vmem:[%s1883_s13 + $0x100] sm:$0xf] %vm1280_vm2, %v1246_v20  ;;  %v805_v25 = vpop.f32.mrf.mxu2  ;;  %v1101_v26 = vsel %vm905_vm9, %v686_v17, %v1003_v22  ;;  %v870_v27 = vpop.f32.mrf.mxu3 }
 0x137   : > { %1371 = vst.msk [vmem:[%s1883_s13 + $0x168] sm:$0xf] %vm1280_vm2, %v1272_v23  ;;  %v806_v28 = vadd.f32 %v2103_v42, %v805_v25  ;;  %v1199_v29 = vpack.c.bf16 %v1101_v26, %v1101_v26  ;;  %v1125_v30 = vsel %vm929_vm10, %v746_v18, %v1027_v24  ;;  %v871_v31 = vadd.f32 %v2103_v42, %v870_v27 }
 0x138   : > { %v1223_v32 = vpack.c.bf16 %v1125_v30, %v1125_v30 }
 0x139   : > { %vm953_vm11 = vcmp.ge.f32.partialorder %v806_v28, 0.0  ;;  %v1051_v33 = vmul.f32 0.1, %v806_v28  ;;  %1298 = vst.msk [vmem:[%s1883_s13 + $0x44] sm:$0xf] %vm1280_vm2, %v1199_v29  ;;  %vm979_vm12 = vcmp.ge.f32.partialorder %v871_v31, 0.0  ;;  %v688_v34 = vpop.f32.mrf.mxu0  ;;  %v748_v35 = vpop.f32.mrf.mxu1 }
 0x13a   : > { %1322 = vst.msk [vmem:[%s1883_s13 + $0xa4] sm:$0xf] %vm1280_vm2, %v1223_v32  ;;  %v1077_v36 = vmul.f32 0.1, %v871_v31  ;;  %v689_v37 = vadd.f32 %v2103_v42, %v688_v34  ;;  %v749_v38 = vadd.f32 %v2103_v42, %v748_v35 }
 0x13b   : > { %v1149_v39 = vsel %vm953_vm11, %v806_v28, %v1051_v33 }
 0x13c   : > { %v1247_v40 = vpack.c.bf16 %v1149_v39, %v1149_v39  ;;  %v1175_v41 = vsel %vm979_vm12, %v871_v31, %v1077_v36  ;;  %vm906_vm13 = vcmp.ge.f32.partialorder %v689_v37, 0.0  ;;  %v1004_v43 = vmul.f32 0.1, %v689_v37 }
 0x13d   : > { %v1273_v44 = vpack.c.bf16 %v1175_v41, %v1175_v41  ;;  %vm930_vm14 = vcmp.ge.f32.partialorder %v749_v38, 0.0  ;;  %v1028_v45 = vmul.f32 0.1, %v749_v38 }
 0x13e   : > { %1346 = vst.msk [vmem:[%s1883_s13 + $0x104] sm:$0xf] %vm1280_vm2, %v1247_v40  ;;  %v808_v46 = vpop.f32.mrf.mxu2  ;;  %v1102_v47 = vsel %vm906_vm13, %v689_v37, %v1004_v43  ;;  %v873_v48 = vpop.f32.mrf.mxu3 }
 0x13f   : > { %1372 = vst.msk [vmem:[%s1883_s13 + $0x16c] sm:$0xf] %vm1280_vm2, %v1273_v44  ;;  %v809_v49 = vadd.f32 %v2103_v42, %v808_v46  ;;  %v1200_v50 = vpack.c.bf16 %v1102_v47, %v1102_v47  ;;  %v1126_v51 = vsel %vm930_vm14, %v749_v38, %v1028_v45  ;;  %v874_v52 = vadd.f32 %v2103_v42, %v873_v48 }
 0x140   : > { %v1224_v53 = vpack.c.bf16 %v1126_v51, %v1126_v51 }
 0x141   : > { %vm954_vm15 = vcmp.ge.f32.partialorder %v809_v49, 0.0  ;;  %v1052_v54 = vmul.f32 0.1, %v809_v49  ;;  %1299 = vst.msk [vmem:[%s1883_s13 + $0x48] sm:$0xf] %vm1280_vm2, %v1200_v50  ;;  %vm980_vm0 = vcmp.ge.f32.partialorder %v874_v52, 0.0  ;;  %v690_v55 = vpop.f32.mrf.mxu0  ;;  %v750_v56 = vpop.f32.mrf.mxu1 }
 0x142   : > { %1323 = vst.msk [vmem:[%s1883_s13 + $0xa8] sm:$0xf] %vm1280_vm2, %v1224_v53  ;;  %v1078_v57 = vmul.f32 0.1, %v874_v52  ;;  %v691_v58 = vadd.f32 %v2103_v42, %v690_v55  ;;  %v751_v59 = vadd.f32 %v2103_v42, %v750_v56 }
 0x143   : > { %v1150_v60 = vsel %vm954_vm15, %v809_v49, %v1052_v54 }
 0x144   : > { %v1248_v61 = vpack.c.bf16 %v1150_v60, %v1150_v60  ;;  %v1176_v62 = vsel %vm980_vm0, %v874_v52, %v1078_v57  ;;  %vm907_vm1 = vcmp.ge.f32.partialorder %v691_v58, 0.0  ;;  %v1005_v63 = vmul.f32 0.1, %v691_v58 }
 0x145   : > { %v1274_v0 = vpack.c.bf16 %v1176_v62, %v1176_v62  ;;  %vm931_vm3 = vcmp.ge.f32.partialorder %v751_v59, 0.0  ;;  %v1029_v1 = vmul.f32 0.1, %v751_v59 }
 0x146   : > { %1347 = vst.msk [vmem:[%s1883_s13 + $0x108] sm:$0xf] %vm1280_vm2, %v1248_v61  ;;  %v810_v2 = vpop.f32.mrf.mxu2  ;;  %v1103_v3 = vsel %vm907_vm1, %v691_v58, %v1005_v63  ;;  %v875_v4 = vpop.f32.mrf.mxu3 }
 0x147   : > { %1373 = vst.msk [vmem:[%s1883_s13 + $0x170] sm:$0xf] %vm1280_vm2, %v1274_v0  ;;  %v811_v5 = vadd.f32 %v2103_v42, %v810_v2  ;;  %v1201_v6 = vpack.c.bf16 %v1103_v3, %v1103_v3  ;;  %v1127_v7 = vsel %vm931_vm3, %v751_v59, %v1029_v1  ;;  %v876_v8 = vadd.f32 %v2103_v42, %v875_v4 }
 0x148   : > { %v1225_v9 = vpack.c.bf16 %v1127_v7, %v1127_v7 }
 0x149   : > { %vm955_vm4 = vcmp.ge.f32.partialorder %v811_v5, 0.0  ;;  %v1053_v10 = vmul.f32 0.1, %v811_v5  ;;  %1300 = vst.msk [vmem:[%s1883_s13 + $0x4c] sm:$0xf] %vm1280_vm2, %v1201_v6  ;;  %vm981_vm5 = vcmp.ge.f32.partialorder %v876_v8, 0.0  ;;  %v693_v11 = vpop.f32.mrf.mxu0  ;;  %v753_v12 = vpop.f32.mrf.mxu1 }
 0x14a   : > { %1324 = vst.msk [vmem:[%s1883_s13 + $0xac] sm:$0xf] %vm1280_vm2, %v1225_v9  ;;  %v1079_v13 = vmul.f32 0.1, %v876_v8  ;;  %v694_v14 = vadd.f32 %v2103_v42, %v693_v11  ;;  %v754_v15 = vadd.f32 %v2103_v42, %v753_v12 }
 0x14b   : > { %v1151_v16 = vsel %vm955_vm4, %v811_v5, %v1053_v10 }
 0x14c   : > { %v1249_v17 = vpack.c.bf16 %v1151_v16, %v1151_v16  ;;  %v1177_v18 = vsel %vm981_vm5, %v876_v8, %v1079_v13  ;;  %vm908_vm6 = vcmp.ge.f32.partialorder %v694_v14, 0.0  ;;  %v1006_v19 = vmul.f32 0.1, %v694_v14 }
 0x14d   : > { %v1275_v20 = vpack.c.bf16 %v1177_v18, %v1177_v18  ;;  %vm932_vm7 = vcmp.ge.f32.partialorder %v754_v15, 0.0  ;;  %v1030_v21 = vmul.f32 0.1, %v754_v15 }
 0x14e   : > { %1348 = vst.msk [vmem:[%s1883_s13 + $0x10c] sm:$0xf] %vm1280_vm2, %v1249_v17  ;;  %v813_v22 = vpop.f32.mrf.mxu2  ;;  %v1104_v23 = vsel %vm908_vm6, %v694_v14, %v1006_v19  ;;  %v878_v24 = vpop.f32.mrf.mxu3 }
 0x14f   : > { %1374 = vst.msk [vmem:[%s1883_s13 + $0x174] sm:$0xf] %vm1280_vm2, %v1275_v20  ;;  %v814_v25 = vadd.f32 %v2103_v42, %v813_v22  ;;  %v1202_v26 = vpack.c.bf16 %v1104_v23, %v1104_v23  ;;  %v1128_v27 = vsel %vm932_vm7, %v754_v15, %v1030_v21  ;;  %v879_v28 = vadd.f32 %v2103_v42, %v878_v24 }
 0x150   : > { %v1226_v29 = vpack.c.bf16 %v1128_v27, %v1128_v27 }
 0x151   : > { %vm956_vm8 = vcmp.ge.f32.partialorder %v814_v25, 0.0  ;;  %v1054_v30 = vmul.f32 0.1, %v814_v25  ;;  %1301 = vst.msk [vmem:[%s1883_s13 + $0x50] sm:$0xf] %vm1280_vm2, %v1202_v26  ;;  %vm982_vm9 = vcmp.ge.f32.partialorder %v879_v28, 0.0  ;;  %v695_v31 = vpop.f32.mrf.mxu0  ;;  %v755_v32 = vpop.f32.mrf.mxu1 }
 0x152   : > { %1325 = vst.msk [vmem:[%s1883_s13 + $0xb0] sm:$0xf] %vm1280_vm2, %v1226_v29  ;;  %v1080_v33 = vmul.f32 0.1, %v879_v28  ;;  %v696_v34 = vadd.f32 %v2103_v42, %v695_v31  ;;  %v756_v35 = vadd.f32 %v2103_v42, %v755_v32 }
 0x153   : > { %v1152_v36 = vsel %vm956_vm8, %v814_v25, %v1054_v30 }
 0x154   : > { %v1250_v37 = vpack.c.bf16 %v1152_v36, %v1152_v36  ;;  %v1178_v38 = vsel %vm982_vm9, %v879_v28, %v1080_v33  ;;  %vm909_vm10 = vcmp.ge.f32.partialorder %v696_v34, 0.0  ;;  %v1007_v39 = vmul.f32 0.1, %v696_v34 }
 0x155   : > { %v1276_v40 = vpack.c.bf16 %v1178_v38, %v1178_v38  ;;  %vm933_vm11 = vcmp.ge.f32.partialorder %v756_v35, 0.0  ;;  %v1031_v41 = vmul.f32 0.1, %v756_v35 }
 0x156   : > { %1349 = vst.msk [vmem:[%s1883_s13 + $0x110] sm:$0xf] %vm1280_vm2, %v1250_v37  ;;  %v815_v43 = vpop.f32.mrf.mxu2  ;;  %v1105_v44 = vsel %vm909_vm10, %v696_v34, %v1007_v39  ;;  %v880_v45 = vpop.f32.mrf.mxu3 }
 0x157   : > { %1375 = vst.msk [vmem:[%s1883_s13 + $0x178] sm:$0xf] %vm1280_vm2, %v1276_v40  ;;  %v816_v46 = vadd.f32 %v2103_v42, %v815_v43  ;;  %v1203_v47 = vpack.c.bf16 %v1105_v44, %v1105_v44  ;;  %v1129_v48 = vsel %vm933_vm11, %v756_v35, %v1031_v41  ;;  %v881_v49 = vadd.f32 %v2103_v42, %v880_v45 }
 0x158   : > { %v1227_v50 = vpack.c.bf16 %v1129_v48, %v1129_v48 }
 0x159   : > { %vm957_vm12 = vcmp.ge.f32.partialorder %v816_v46, 0.0  ;;  %v1055_v51 = vmul.f32 0.1, %v816_v46  ;;  %1302 = vst.msk [vmem:[%s1883_s13 + $0x54] sm:$0xf] %vm1280_vm2, %v1203_v47  ;;  %vm983_vm13 = vcmp.ge.f32.partialorder %v881_v49, 0.0  ;;  %v698_v52 = vpop.f32.mrf.mxu0  ;;  %v758_v53 = vpop.f32.mrf.mxu1 }
 0x15a   : > { %1326 = vst.msk [vmem:[%s1883_s13 + $0xb4] sm:$0xf] %vm1280_vm2, %v1227_v50  ;;  %v1081_v54 = vmul.f32 0.1, %v881_v49  ;;  %v699_v55 = vadd.f32 %v2103_v42, %v698_v52  ;;  %v759_v56 = vadd.f32 %v2103_v42, %v758_v53 }
 0x15b   : > { %v1153_v57 = vsel %vm957_vm12, %v816_v46, %v1055_v51 }
 0x15c   : > { %v1251_v58 = vpack.c.bf16 %v1153_v57, %v1153_v57  ;;  %v1179_v59 = vsel %vm983_vm13, %v881_v49, %v1081_v54  ;;  %vm910_vm14 = vcmp.ge.f32.partialorder %v699_v55, 0.0  ;;  %v1008_v60 = vmul.f32 0.1, %v699_v55 }
 0x15d   : > { %v1277_v61 = vpack.c.bf16 %v1179_v59, %v1179_v59  ;;  %vm934_vm15 = vcmp.ge.f32.partialorder %v759_v56, 0.0  ;;  %v1032_v62 = vmul.f32 0.1, %v759_v56 }
 0x15e   : > { %1350 = vst.msk [vmem:[%s1883_s13 + $0x114] sm:$0xf] %vm1280_vm2, %v1251_v58  ;;  %v818_v63 = vpop.f32.mrf.mxu2  ;;  %v1106_v0 = vsel %vm910_vm14, %v699_v55, %v1008_v60  ;;  %v883_v1 = vpop.f32.mrf.mxu3 }
 0x15f   : > { %1376 = vst.msk [vmem:[%s1883_s13 + $0x17c] sm:$0xf] %vm1280_vm2, %v1277_v61  ;;  %v819_v2 = vadd.f32 %v2103_v42, %v818_v63  ;;  %v1204_v3 = vpack.c.bf16 %v1106_v0, %v1106_v0  ;;  %v1130_v4 = vsel %vm934_vm15, %v759_v56, %v1032_v62  ;;  %v884_v5 = vadd.f32 %v2103_v42, %v883_v1 }
 0x160   : > { %v1228_v6 = vpack.c.bf16 %v1130_v4, %v1130_v4 }
 0x161   : > { %vm958_vm0 = vcmp.ge.f32.partialorder %v819_v2, 0.0  ;;  %v1056_v7 = vmul.f32 0.1, %v819_v2  ;;  %1303 = vst.msk [vmem:[%s1883_s13 + $0x58] sm:$0xf] %vm1280_vm2, %v1204_v3  ;;  %vm984_vm1 = vcmp.ge.f32.partialorder %v884_v5, 0.0  ;;  %v700_v8 = vpop.f32.mrf.mxu0  ;;  %v760_v9 = vpop.f32.mrf.mxu1 }
 0x162   : > { %1327 = vst.msk [vmem:[%s1883_s13 + $0xb8] sm:$0xf] %vm1280_vm2, %v1228_v6  ;;  %v1082_v10 = vmul.f32 0.1, %v884_v5  ;;  %v701_v11 = vadd.f32 %v2103_v42, %v700_v8  ;;  %v761_v12 = vadd.f32 %v2103_v42, %v760_v9 }
 0x163   : > { %v1154_v13 = vsel %vm958_vm0, %v819_v2, %v1056_v7 }
 0x164   : > { %v1252_v14 = vpack.c.bf16 %v1154_v13, %v1154_v13  ;;  %v1180_v15 = vsel %vm984_vm1, %v884_v5, %v1082_v10  ;;  %vm911_vm3 = vcmp.ge.f32.partialorder %v701_v11, 0.0  ;;  %v1009_v16 = vmul.f32 0.1, %v701_v11 }
 0x165   : > { %v1278_v17 = vpack.c.bf16 %v1180_v15, %v1180_v15  ;;  %vm935_vm4 = vcmp.ge.f32.partialorder %v761_v12, 0.0  ;;  %v1033_v18 = vmul.f32 0.1, %v761_v12 }
 0x166   : > { %1351 = vst.msk [vmem:[%s1883_s13 + $0x118] sm:$0xf] %vm1280_vm2, %v1252_v14  ;;  %v820_v19 = vpop.f32.mrf.mxu2  ;;  %v1107_v20 = vsel %vm911_vm3, %v701_v11, %v1009_v16  ;;  %v885_v21 = vpop.f32.mrf.mxu3 }
 0x167   : > { %1377 = vst.msk [vmem:[%s1883_s13 + $0x180] sm:$0xf] %vm1280_vm2, %v1278_v17  ;;  %v821_v22 = vadd.f32 %v2103_v42, %v820_v19  ;;  %v1205_v23 = vpack.c.bf16 %v1107_v20, %v1107_v20  ;;  %v1131_v24 = vsel %vm935_vm4, %v761_v12, %v1033_v18  ;;  %v886_v25 = vadd.f32 %v2103_v42, %v885_v21 }
 0x168   : > { %v1229_v26 = vpack.c.bf16 %v1131_v24, %v1131_v24 }
 0x169   : > { %vm959_vm5 = vcmp.ge.f32.partialorder %v821_v22, 0.0  ;;  %v1057_v27 = vmul.f32 0.1, %v821_v22  ;;  %1304 = vst.msk [vmem:[%s1883_s13 + $0x5c] sm:$0xf] %vm1280_vm2, %v1205_v23  ;;  %vm985_vm6 = vcmp.ge.f32.partialorder %v886_v25, 0.0 }
 0x16a   : > { %1328 = vst.msk [vmem:[%s1883_s13 + $0xbc] sm:$0xf] %vm1280_vm2, %v1229_v26  ;;  %v1083_v28 = vmul.f32 0.1, %v886_v25 }
 0x16b   : > { %v1155_v29 = vsel %vm959_vm5, %v821_v22, %v1057_v27 }
 0x16c   : > { %v1253_v30 = vpack.c.bf16 %v1155_v29, %v1155_v29  ;;  %v1181_v31 = vsel %vm985_vm6, %v886_v25, %v1083_v28 }
 0x16d   : > { %v1279_v32 = vpack.c.bf16 %v1181_v31, %v1181_v31 }
 0x16e   : > { %1352 = vst.msk [vmem:[%s1883_s13 + $0x11c] sm:$0xf] %vm1280_vm2, %v1253_v30  ;;  %v823_v33 = vpop.f32.mrf.mxu2 }
 0x16f   : > { %1378 = vst.msk [vmem:[%s1883_s13 + $0x184] sm:$0xf] %vm1280_vm2, %v1279_v32  ;;  %v824_v34 = vadd.f32 %v2103_v42, %v823_v33 }
 0x171   : > { %vm960_vm7 = vcmp.ge.f32.partialorder %v824_v34, 0.0  ;;  %v1058_v35 = vmul.f32 0.1, %v824_v34 }
 0x173   : > { %v1156_v36 = vsel %vm960_vm7, %v824_v34, %v1058_v35 }
 0x174   : > { %v1254_v37 = vpack.c.bf16 %v1156_v36, %v1156_v36 }
 0x176   : > { %1353 = vst.msk [vmem:[%s1883_s13 + $0x120] sm:$0xf] %vm1280_vm2, %v1254_v37  ;;  %v825_v38 = vpop.f32.mrf.mxu2 }
 0x177   : > { %v826_v39 = vadd.f32 %v2103_v42, %v825_v38 }
 0x179   : > { %vm961_vm8 = vcmp.ge.f32.partialorder %v826_v39, 0.0  ;;  %v1059_v40 = vmul.f32 0.1, %v826_v39 }
 0x17b   : > { %v1157_v41 = vsel %vm961_vm8, %v826_v39, %v1059_v40 }
 0x17c   : > { %v1255_v43 = vpack.c.bf16 %v1157_v41, %v1157_v41 }
 0x17e   : > { %1354 = vst.msk [vmem:[%s1883_s13 + $0x124] sm:$0xf] %vm1280_vm2, %v1255_v43 }
 0x17f PF: > { %s13_s12 = sadd.s32 1, %s1769_s12  }
 0x180   : > { %p10_p4 = scmp.ge.s32.totalorder %s13_s12, 9  }
 0x182   :  { %12 = sbr.rel (!%p10_p4) target bundleno = 1 (0x1), region = 62 }

// kernel: voxnet_forward.4
= control target key start
LH: loop header
LB: loop body
LE: loop exit
PB: predicated region body
PF: predicated region fallthrough
CT: control target
= control target key end

     0   :  { %s13267_s12 = smov 0   ;;  %s15541_s0 = inlined_call_operand.vmem [shape: bf16[6752,96], index: 0, kind: input, shape index: {}]   ;;  %s15542_s1 = inlined_call_operand.vmem [shape: bf16[9,96,32], index: 1, kind: input, shape index: {}]   ;;  %s15543_s2 = inlined_call_operand.vmem [shape: f32[1,32], index: 2, kind: input, shape index: {}]   ;;  %s15544_s3 = inlined_call_operand.vmem [shape: bf16[6272,32], index: 3, kind: output, shape index: {}]  }
   0x1 LB: > { %s9803_s13 = sadd.s32 4294967295, %s13245_s12   ;;  %p9806_p0 = scmp.ge.s32.totalorder %s13245_s12, 1  ;;  %s13245_s12 = sphi %s13267_s12, %s13_s12  }
   0x2   : > { %p127_p1 = scmp.lt.s32.totalorder %s13245_s12, 8 }
   0x4   : > { %p128_p2 = pnand %p9806_p0, %p127_p1 }
   0x6   : > { %131 = sbr.rel (%p128_p2) target bundleno = 2189 (0x88d), region = 32 }
   0xb   : > { %v12774_v0 = vld [vmem:[%s15542_s1 + $0x58] sm:$0xff]  ;;  %v12773_v1 = vld [vmem:[%s15542_s1 + $0x50] sm:$0xff]  ;;  %s13283_s18 = smul.u32 896, %s9803_s13  ;;  %v12772_v2 = vld [vmem:[%s15542_s1 + $0x48] sm:$0xff]  ;;  %vm728_vm0 = vcmask 785408   ;;  %vm9628_vm2 = vcmask 257024  }
   0xc   : > { %13209 = vmatpush.bf16.msra.mxu1 %v12774_v0  ;;  %13210 = vmatpush.bf16.msra.mxu2 %v12774_v0  ;;  %v12771_v3 = vld [vmem:[%s15542_s1 + $0x40] sm:$0xff]  ;;  %v12770_v4 = vld [vmem:[%s15542_s1 + $0x38] sm:$0xff]  ;;  %v12769_v5 = vld [vmem:[%s15542_s1 + $0x30] sm:$0xff]  ;;  %s146_s15 = smul.u32 112, %s9803_s13 }
   0xd   : > { %13211 = vmatpush.bf16.msra.mxu3 %v12774_v0  ;;  %899 = vmatpush.bf16.msra.mxu0 %v12774_v0  ;;  %s282_s21 = sadd.s32 16, %s13283_s18  ;;  %v12836_v6 = vld [vmem:[%s15542_s1 + $0x88] sm:$0xff]  ;;  %v12898_v7 = vld [vmem:[%s15542_s1 + $0xb8] sm:$0xff]  ;;  %v12835_v14 = vld [vmem:[%s15542_s1 + $0x80] sm:$0xff]  ;;  %s1959_s19 = sadd.s32 32, %s13283_s18 }
   0xe   : > { %s283_s24 = sshra.s32 %s282_s21, 3  ;;  %v12712_v12 = vld [vmem:[%s15542_s1 + $0x28] sm:$0xff]  ;;  %v12897_v15 = vld [vmem:[%s15542_s1 + $0xb0] sm:$0xff]  ;;  %v12711_v16 = vld [vmem:[%s15542_s1 + $0x20] sm:$0xff]  ;;  %s2974_s20 = sadd.s32 224, %s13283_s18 }
   0xf   : > { %s9809_s27 = sshll.u32 %s283_s24, 2  ;;  %v12960_v13 = vld [vmem:[%s15542_s1 + $0xe8] sm:$0xff]  ;;  %v12959_v21 = vld [vmem:[%s15542_s1 + $0xe0] sm:$0xff]  ;;  %v12834_v26 = vld [vmem:[%s15542_s1 + $0x78] sm:$0xff]  ;;  %s3989_s21 = sadd.s32 240, %s13283_s18 }
  0x10   : > { %13212 = vmatpush.bf16.msra.mxu1 %v12773_v1  ;;  %13213 = vmatpush.bf16.msra.mxu2 %v12773_v1  ;;  %s13301_s5 = scalar_lea.vmem %s15541_s0, %s9809_s27  ;;  %v12896_v27 = vld [vmem:[%s15542_s1 + $0xa8] sm:$0xff]  ;;  %v12710_v28 = vld [vmem:[%s15542_s1 + $0x18] sm:$0xff]  ;;  %v12833_v42 = vld [vmem:[%s15542_s1 + $0x70] sm:$0xff]  ;;  %s154_s22 = sshra.s32 %s13283_s18, 3 }
  0x11   : > { %13214 = vmatpush.bf16.msra.mxu3 %v12773_v1  ;;  %900 = vmatpush.bf16.msra.mxu0 %v12773_v1  ;;  %v12727_v8 = vld [vmem:[%s13301_s5 + $0x70] sm:$0xff]  ;;  %v12741_v9 = vld [vmem:[%s13301_s5 + $0xe0] sm:$0xff]  ;;  %v12728_v17 = vld [vmem:[%s13301_s5 + $0x78] sm:$0xff]  ;;  %s1960_s23 = sshra.s32 %s1959_s19, 3  ;;  %s3990_s24 = sshra.s32 %s3989_s21, 3 }
  0x12   : > { %v12755_v10 = vld [vmem:[%s13301_s5 + $0x150] sm:$0xff]  ;;  %v12713_v11 = vld [vmem:[%s13301_s5] sm:$0xff]  ;;  %v12742_v18 = vld [vmem:[%s13301_s5 + $0xe8] sm:$0xff]  ;;  %s9808_s25 = sshll.u32 %s154_s22, 2  ;;  %s10430_s26 = sshll.u32 %s1960_s23, 2 }
  0x13   : > { %v12756_v19 = vld [vmem:[%s13301_s5 + $0x158] sm:$0xff]  ;;  %v12714_v20 = vld [vmem:[%s13301_s5 + $0x8] sm:$0xff]  ;;  %v12729_v22 = vld [vmem:[%s13301_s5 + $0x80] sm:$0xff]  ;;  %s11064_s28 = sshll.u32 %s3990_s24, 2  ;;  %s13598_s4 = scalar_lea.vmem %s15541_s0, %s9808_s25 }
  0x14   : > { %13215 = vmatpush.bf16.msra.mxu1 %v12772_v2  ;;  %13216 = vmatpush.bf16.msra.mxu2 %v12772_v2  ;;  %v12743_v23 = vld [vmem:[%s13301_s5 + $0xf0] sm:$0xff]  ;;  %v12757_v24 = vld [vmem:[%s13301_s5 + $0x160] sm:$0xff]  ;;  %v12730_v29 = vld [vmem:[%s13301_s5 + $0x88] sm:$0xff]  ;;  %s13603_s8 = scalar_lea.vmem %s15541_s0, %s10430_s26  ;;  %s13613_s16 = scalar_lea.vmem %s15541_s0, %s11064_s28 }
  0x15   : > { %13217 = vmatpush.bf16.msra.mxu3 %v12772_v2  ;;  %901 = vmatpush.bf16.msra.mxu0 %v12772_v2  ;;  %v12715_v25 = vld [vmem:[%s13301_s5 + $0x10] sm:$0xff]  ;;  %v12744_v30 = vld [vmem:[%s13301_s5 + $0xf8] sm:$0xff]  ;;  %v12758_v31 = vld [vmem:[%s13301_s5 + $0x168] sm:$0xff]  ;;  %s5004_s17 = sadd.s32 256, %s13283_s18  ;;  %s6019_s19 = sadd.s32 448, %s13283_s18 }
  0x16   : > { %v12716_v32 = vld [vmem:[%s13301_s5 + $0x18] sm:$0xff]  ;;  %v12731_v34 = vld [vmem:[%s13301_s5 + $0x90] sm:$0xff]  ;;  %v12745_v35 = vld [vmem:[%s13301_s5 + $0x100] sm:$0xff]  ;;  %p147_p3 = scmp.lt.s32.totalorder %s146_s15, 783 }
  0x17   : > { %v12958_v33 = vld [vmem:[%s15542_s1 + $0xd8] sm:$0xff]  ;;  %v12759_v36 = vld [vmem:[%s13301_s5 + $0x170] sm:$0xff]  ;;  %v12717_v37 = vld [vmem:[%s13301_s5 + $0x20] sm:$0xff] }
  0x18   : > { %13218 = vmatpush.bf16.msra.mxu1 %v12771_v3  ;;  %13219 = vmatpush.bf16.msra.mxu2 %v12771_v3  ;;  %v12732_v38 = vld [vmem:[%s13301_s5 + $0x98] sm:$0xff]  ;;  %v12746_v39 = vld [vmem:[%s13301_s5 + $0x108] sm:$0xff]  ;;  %v12895_v43 = vld [vmem:[%s15542_s1 + $0xa0] sm:$0xff]  ;;  %s15816_s15 = smov (!%p147_p3, %s146_s15), 783 }
  0x19   : > { %13220 = vmatpush.bf16.msra.mxu3 %v12771_v3  ;;  %902 = vmatpush.bf16.msra.mxu0 %v12771_v3  ;;  %v12760_v40 = vld [vmem:[%s13301_s5 + $0x178] sm:$0xff]  ;;  %v12718_v41 = vld [vmem:[%s13301_s5 + $0x28] sm:$0xff]  ;;  %v12709_v44 = vld [vmem:[%s15542_s1 + $0x10] sm:$0xff] }
  0x1a   : > { %v12957_v45 = vld [vmem:[%s15542_s1 + $0xd0] sm:$0xff]  ;;  %v12733_v46 = vld [vmem:[%s13301_s5 + $0xa0] sm:$0xff]  ;;  %v12734_v50 = vld [vmem:[%s13301_s5 + $0xa8] sm:$0xff] }
  0x1b   : > { %v12747_v47 = vld [vmem:[%s13301_s5 + $0x110] sm:$0xff]  ;;  %v12761_v48 = vld [vmem:[%s13301_s5 + $0x180] sm:$0xff]  ;;  %v12748_v51 = vld [vmem:[%s13301_s5 + $0x118] sm:$0xff] }
  0x1c   : > { %13221 = vmatpush.bf16.msra.mxu1 %v12770_v4  ;;  %13222 = vmatpush.bf16.msra.mxu2 %v12770_v4  ;;  %v12719_v49 = vld [vmem:[%s13301_s5 + $0x30] sm:$0xff]  ;;  %v12762_v52 = vld [vmem:[%s13301_s5 + $0x188] sm:$0xff]  ;;  %v12720_v53 = vld [vmem:[%s13301_s5 + $0x38] sm:$0xff] }
  0x1d   : > { %13223 = vmatpush.bf16.msra.mxu3 %v12770_v4  ;;  %903 = vmatpush.bf16.msra.mxu0 %v12770_v4  ;;  %v12832_v54 = vld [vmem:[%s15542_s1 + $0x68] sm:$0xff]  ;;  %v12894_v55 = vld [vmem:[%s15542_s1 + $0x98] sm:$0xff]  ;;  %v12735_v57 = vld [vmem:[%s13301_s5 + $0xb0] sm:$0xff] }
  0x1e   : > { %v12708_v56 = vld [vmem:[%s15542_s1 + $0x8] sm:$0xff]  ;;  %v12749_v58 = vld [vmem:[%s13301_s5 + $0x120] sm:$0xff]  ;;  %v12763_v60 = vld [vmem:[%s13301_s5 + $0x190] sm:$0xff] }
  0x1f   : > { %v12721_v61 = vld [vmem:[%s13301_s5 + $0x40] sm:$0xff]  ;;  %v12956_v63 = vld [vmem:[%s15542_s1 + $0xc8] sm:$0xff] }
  0x20   : > { %13224 = vmatpush.bf16.msra.mxu1 %v12769_v5  ;;  %13225 = vmatpush.bf16.msra.mxu2 %v12769_v5 }
  0x21   : > { %13226 = vmatpush.bf16.msra.mxu3 %v12769_v5  ;;  %904 = vmatpush.bf16.msra.mxu0 %v12769_v5 }
  0x23   : > { %10084 = vmatmul.msk.bf16.vlgmr.msra.gmra.mxu1 %vm728_vm0, %v12727_v8  ;;  %10098 = vmatmul.msk.bf16.vlgmr.msra.gmra.mxu2 %vm728_vm0, %v12741_v9  ;;  %v12764_v9 = vld [vmem:[%s13301_s5 + $0x198] sm:$0xff] }
  0x24   : > { %2575 = vmatpush.bf16.msrb.mxu2 %v12836_v6  ;;  %10112 = vmatmul.msk.bf16.vlgmr.msra.gmra.mxu3 %vm728_vm0, %v12755_v10  ;;  %v12736_v6 = vld [vmem:[%s13301_s5 + $0xb8] sm:$0xff]  ;;  %v12722_v10 = vld [vmem:[%s13301_s5 + $0x48] sm:$0xff] }
  0x25   : > { %3590 = vmatpush.bf16.msrb.mxu3 %v12898_v7  ;;  %10070 = vmatmul.msk.bf16.vlgmr.msra.gmra.mxu0 %vm728_vm0, %v12713_v11  ;;  %v12750_v7 = vld [vmem:[%s13301_s5 + $0x128] sm:$0xff] }
  0x26   : > { %1672 = vmatpush.bf16.msrb.mxu1 %v12712_v12  ;;  %4605 = vmatpush.bf16.msrb.mxu0 %v12960_v13 }
  0x28   : > { %2576 = vmatpush.bf16.msrb.mxu2 %v12835_v14 }
  0x29   : > { %3591 = vmatpush.bf16.msrb.mxu3 %v12897_v15 }
  0x2a   : > { %1673 = vmatpush.bf16.msrb.mxu1 %v12711_v16  ;;  %4606 = vmatpush.bf16.msrb.mxu0 %v12959_v21 }
  0x2c   : > { %2577 = vmatpush.bf16.msrb.mxu2 %v12834_v26  ;;  %v12707_v26 = vld [vmem:[%s15542_s1] sm:$0xff] }
  0x2d   : > { %3592 = vmatpush.bf16.msrb.mxu3 %v12896_v27 }
  0x2e   : > { %1674 = vmatpush.bf16.msrb.mxu1 %v12710_v28  ;;  %4607 = vmatpush.bf16.msrb.mxu0 %v12958_v33 }
  0x30   : > { %2578 = vmatpush.bf16.msrb.mxu2 %v12833_v42 }
  0x31   : > { %3593 = vmatpush.bf16.msrb.mxu3 %v12895_v43 }
  0x32   : > { %1675 = vmatpush.bf16.msrb.mxu1 %v12709_v44  ;;  %4608 = vmatpush.bf16.msrb.mxu0 %v12957_v45 }
  0x33   : > { %10085 = vmatmul.msk.bf16.gmra.mxu1 %vm728_vm0, %v12728_v17  ;;  %10099 = vmatmul.msk.bf16.gmra.mxu2 %vm728_vm0, %v12742_v18  ;;  %v12737_v18 = vld [vmem:[%s13301_s5 + $0xc0] sm:$0xff] }
  0x34   : > { %10113 = vmatmul.msk.bf16.gmra.mxu3 %vm728_vm0, %v12756_v19  ;;  %2579 = vmatpush.bf16.msrb.mxu2 %v12832_v54  ;;  %v12751_v19 = vld [vmem:[%s13301_s5 + $0x130] sm:$0xff] }
  0x35   : > { %10071 = vmatmul.msk.bf16.gmra.mxu0 %vm728_vm0, %v12714_v20  ;;  %3594 = vmatpush.bf16.msrb.mxu3 %v12894_v55  ;;  %v12831_v20 = vld [vmem:[%s15542_s1 + $0x60] sm:$0xff] }
  0x36   : > { %1676 = vmatpush.bf16.msrb.mxu1 %v12708_v56  ;;  %4609 = vmatpush.bf16.msrb.mxu0 %v12956_v63  ;;  %v13022_v56 = vld [vmem:[%s15542_s1 + $0x118] sm:$0xff] }
  0x38   : > { %2580 = vmatpush.bf16.msrb.mxu2 %v12831_v20 }
  0x3a   : > { %1677 = vmatpush.bf16.msrb.mxu1 %v12707_v26 }
  0x3e   : > { %5620 = vmatpush.bf16.msra.mxu1 %v13022_v56 }
  0x43   : > { %10086 = vmatmul.msk.bf16.gmra.mxu1 %vm728_vm0, %v12729_v22  ;;  %10100 = vmatmul.msk.bf16.gmra.mxu2 %vm728_vm0, %v12743_v23  ;;  %v12765_v22 = vld [vmem:[%s13301_s5 + $0x1a0] sm:$0xff]  ;;  %v12723_v23 = vld [vmem:[%s13301_s5 + $0x50] sm:$0xff] }
  0x44   : > { %10114 = vmatmul.msk.bf16.gmra.mxu3 %vm728_vm0, %v12757_v24  ;;  %v12893_v24 = vld [vmem:[%s15542_s1 + $0x90] sm:$0xff] }
  0x45   : > { %10072 = vmatmul.msk.bf16.gmra.mxu0 %vm728_vm0, %v12715_v25  ;;  %3595 = vmatpush.bf16.msrb.mxu3 %v12893_v24 }
  0x53   : > { %10087 = vmatmul.msk.bf16.gmra.mxu1 %vm728_vm0, %v12730_v29  ;;  %10101 = vmatmul.msk.bf16.gmra.mxu2 %vm728_vm0, %v12744_v30  ;;  %v12955_v30 = vld [vmem:[%s15542_s1 + $0xc0] sm:$0xff] }
  0x54   : > { %10115 = vmatmul.msk.bf16.gmra.mxu3 %vm728_vm0, %v12758_v31  ;;  %4610 = vmatpush.bf16.msrb.mxu0 %v12955_v30 }
  0x55   : > { %10073 = vmatmul.msk.bf16.gmra.mxu0 %vm728_vm0, %v12716_v32 }
  0x63   : > { %10088 = vmatmul.msk.bf16.gmra.mxu1 %vm728_vm0, %v12731_v34  ;;  %10102 = vmatmul.msk.bf16.gmra.mxu2 %vm728_vm0, %v12745_v35  ;;  %v12738_v34 = vld [vmem:[%s13301_s5 + $0xc8] sm:$0xff]  ;;  %v12752_v35 = vld [vmem:[%s13301_s5 + $0x138] sm:$0xff] }
  0x64   : > { %10116 = vmatmul.msk.bf16.gmra.mxu3 %vm728_vm0, %v12759_v36 }
  0x65   : > { %10074 = vmatmul.msk.bf16.gmra.mxu0 %vm728_vm0, %v12717_v37  ;;  %v12766_v37 = vld [vmem:[%s13301_s5 + $0x1a8] sm:$0xff] }
  0x73   : > { %10089 = vmatmul.msk.bf16.gmra.mxu1 %vm728_vm0, %v12732_v38  ;;  %10103 = vmatmul.msk.bf16.gmra.mxu2 %vm728_vm0, %v12746_v39  ;;  %v12724_v38 = vld [vmem:[%s13301_s5 + $0x58] sm:$0xff] }
  0x74   : > { %10117 = vmatmul.msk.bf16.gmra.mxu3 %vm728_vm0, %v12760_v40 }
  0x75   : > { %10075 = vmatmul.msk.bf16.gmra.mxu0 %vm728_vm0, %v12718_v41 }
  0x83   : > { %10090 = vmatmul.msk.bf16.gmra.mxu1 %vm728_vm0, %v12733_v46  ;;  %10104 = vmatmul.msk.bf16.gmra.mxu2 %vm728_vm0, %v12747_v47  ;;  %v12739_v46 = vld [vmem:[%s13301_s5 + $0xd0] sm:$0xff]  ;;  %v12753_v47 = vld [vmem:[%s13301_s5 + $0x140] sm:$0xff] }
  0x84   : > { %10118 = vmatmul.msk.bf16.gmra.mxu3 %vm728_vm0, %v12761_v48 }
  0x85   : > { %10076 = vmatmul.msk.bf16.gmra.mxu0 %vm728_vm0, %v12719_v49  ;;  %v12767_v49 = vld [vmem:[%s13301_s5 + $0x1b0] sm:$0xff] }
  0x93   : > { %10091 = vmatmul.msk.bf16.gmra.mxu1 %vm728_vm0, %v12734_v50  ;;  %10105 = vmatmul.msk.bf16.gmra.mxu2 %vm728_vm0, %v12748_v51  ;;  %v12725_v50 = vld [vmem:[%s13301_s5 + $0x60] sm:$0xff] }
  0x94   : > { %10119 = vmatmul.msk.bf16.gmra.mxu3 %vm728_vm0, %v12762_v52  ;;  %v13084_v52 = vld [vmem:[%s15542_s1 + $0x148] sm:$0xff] }
  0x95   : > { %10077 = vmatmul.msk.bf16.gmra.mxu0 %vm728_vm0, %v12720_v53  ;;  %v13146_v53 = vld [vmem:[%s15542_s1 + $0x178] sm:$0xff]  ;;  %6635 = vmatpush.bf16.msra.mxu2 %v13084_v52 }
  0x96   : > { %7650 = vmatpush.bf16.msra.mxu3 %v13146_v53 }
  0xa0   : > { %v13426_v59 = vpop.f32.mrf.mxu1 }
  0xa2   : > { %v13430_v62 = vpop.f32.mrf.mxu0 }
  0xa3   : > { %10092 = vmatmul.msk.bf16.gmra.mxu1 %vm728_vm0, %v12735_v57  ;;  %10106 = vmatmul.msk.bf16.gmra.mxu2 %vm728_vm0, %v12749_v58 }
  0xa4   : > { %10120 = vmatmul.msk.bf16.gmra.mxu3 %vm728_vm0, %v12763_v60  ;;  %v13208_v60 = vld [vmem:[%s15542_s1 + $0x1a8] sm:$0xff] }
  0xa5   : > { %10078 = vmatmul.msk.bf16.gmra.mxu0 %vm728_vm0, %v12721_v61 }
  0xa6   : > { %v13439_v0 = vpop.f32.mrf.mxu2  ;;  %8665 = vmatpush.bf16.msra.mxu0 %v13208_v60 }
  0xa7   : > { %15545 = vst [vmem:[#allocation2_spill] sm:$0xff] %v13439_v0  ;;  %v13441_v1 = vpop.f32.mrf.mxu3 }
  0xa8   : > { %15546 = vst [vmem:[#allocation3_spill] sm:$0xff] %v13441_v1  ;;  %v13443_v2 = vpop.f32.mrf.mxu1 }
  0xaa   : > { %v13445_v3 = vpop.f32.mrf.mxu0 }
  0xae   : > { %v13447_v4 = vpop.f32.mrf.mxu2 }
  0xaf   : > { %15547 = vst [vmem:[#allocation4_spill] sm:$0xff] %v13447_v4  ;;  %v13449_v5 = vpop.f32.mrf.mxu3 }
  0xb0   : > { %15548 = vst [vmem:[#allocation5_spill] sm:$0xff] %v13449_v5  ;;  %v13453_v8 = vpop.f32.mrf.mxu1 }
  0xb2   : > { %v13457_v11 = vpop.f32.mrf.mxu0 }
  0xb3   : > { %10093 = vmatmul.msk.bf16.gmra.mxu1 %vm728_vm0, %v12736_v6  ;;  %10107 = vmatmul.msk.bf16.gmra.mxu2 %vm728_vm0, %v12750_v7  ;;  %v12740_v6 = vld [vmem:[%s13301_s5 + $0xd8] sm:$0xff]  ;;  %v12754_v7 = vld [vmem:[%s13301_s5 + $0x148] sm:$0xff] }
  0xb4   : > { %10121 = vmatmul.msk.bf16.gmra.mxu3 %vm728_vm0, %v12764_v9 }
  0xb5   : > { %10079 = vmatmul.msk.bf16.gmra.mxu0 %vm728_vm0, %v12722_v10  ;;  %v12768_v10 = vld [vmem:[%s13301_s5 + $0x1b8] sm:$0xff] }
  0xb6   : > { %v13463_v12 = vpop.f32.mrf.mxu2 }
  0xb7   : > { %15549 = vst [vmem:[#allocation6_spill] sm:$0xff] %v13463_v12  ;;  %v13465_v13 = vpop.f32.mrf.mxu3 }
  0xb8   : > { %15550 = vst [vmem:[#allocation7_spill] sm:$0xff] %v13465_v13  ;;  %v13467_v14 = vpop.f32.mrf.mxu1 }
  0xba   : > { %v13469_v15 = vpop.f32.mrf.mxu0 }
  0xbe   : > { %v13471_v16 = vpop.f32.mrf.mxu2 }
  0xbf   : > { %15551 = vst [vmem:[#allocation8_spill] sm:$0xff] %v13471_v16  ;;  %v13473_v17 = vpop.f32.mrf.mxu3  ;;  %v12658_v16 = vld [vmem:[%s13598_s4 + $0x38] sm:$0xff] }
  0xc0   : > { %15552 = vst [vmem:[#allocation9_spill] sm:$0xff] %v13473_v17  ;;  %v13480_v21 = vpop.f32.mrf.mxu1  ;;  %v12654_v17 = vld [vmem:[%s13598_s4 + $0x18] sm:$0xff] }
  0xc2   : > { %v13487_v25 = vpop.f32.mrf.mxu0 }
  0xc3   : > { %10094 = vmatmul.msk.bf16.gmra.mxu1 %vm728_vm0, %v12737_v18  ;;  %10108 = vmatmul.msk.bf16.gmra.mxu2 %vm728_vm0, %v12751_v19  ;;  %v12726_v18 = vld [vmem:[%s13301_s5 + $0x68] sm:$0xff]  ;;  %s2975_s5 = sshra.s32 %s2974_s20, 3  ;;  %s7034_s20 = sadd.s32 464, %s13283_s18 }
  0xc4   : > { %10122 = vmatmul.msk.bf16.gmra.mxu3 %vm728_vm0, %v12765_v22  ;;  %s10747_s27 = sshll.u32 %s2975_s5, 2 }
  0xc5   : > { %10080 = vmatmul.msk.bf16.gmra.mxu0 %vm728_vm0, %v12723_v23  ;;  %s13608_s11 = scalar_lea.vmem %s15541_s0, %s10747_s27 }
  0xc6   : > { %v13496_v27 = vpop.f32.mrf.mxu2 }
  0xc7   : > { %15553 = vst [vmem:[#allocation10_spill] sm:$0xff] %v13496_v27  ;;  %v13498_v28 = vpop.f32.mrf.mxu3 }
  0xc8   : > { %15554 = vst [vmem:[#allocation11_spill] sm:$0xff] %v13498_v28  ;;  %v13500_v29 = vpop.f32.mrf.mxu1 }
  0xca   : > { %v13505_v31 = vpop.f32.mrf.mxu0 }
  0xce   : > { %v13507_v32 = vpop.f32.mrf.mxu2 }
  0xcf   : > { %15555 = vst [vmem:[#allocation12_spill] sm:$0xff] %v13507_v32  ;;  %v13509_v33 = vpop.f32.mrf.mxu3 }
  0xd0   : > { %15556 = vst [vmem:[#allocation13_spill] sm:$0xff] %v13509_v33  ;;  %v13513_v36 = vpop.f32.mrf.mxu1 }
  0xd2   : > { %v13517_v39 = vpop.f32.mrf.mxu0 }
  0xd3   : > { %10095 = vmatmul.msk.bf16.gmra.mxu1 %vm728_vm0, %v12738_v34  ;;  %10109 = vmatmul.msk.bf16.gmra.mxu2 %vm728_vm0, %v12752_v35  ;;  %v12651_v34 = vld [vmem:[%s13598_s4] sm:$0xff] }
  0xd4   : > { %10123 = vmatmul.msk.bf16.gmra.mxu3 %vm728_vm0, %v12766_v37  ;;  %v12775_v35 = vld [vmem:[%s13603_s8] sm:$0xff] }
  0xd5   : > { %10081 = vmatmul.msk.bf16.gmra.mxu0 %vm728_vm0, %v12724_v38  ;;  %v12837_v38 = vld [vmem:[%s13608_s11] sm:$0xff] }
  0xd6   : > { %v13523_v40 = vpop.f32.mrf.mxu2 }
  0xd7   : > { %15557 = vst [vmem:[#allocation14_spill] sm:$0xff] %v13523_v40  ;;  %v13525_v41 = vpop.f32.mrf.mxu3 }
  0xd8   : > { %15558 = vst [vmem:[#allocation15_spill] sm:$0xff] %v13525_v41  ;;  %v13527_v42 = vpop.f32.mrf.mxu1 }
  0xda   : > { %v13529_v43 = vpop.f32.mrf.mxu0 }
  0xde   : > { %v13531_v44 = vpop.f32.mrf.mxu2 }
  0xdf   : > { %15559 = vst [vmem:[#allocation16_spill] sm:$0xff] %v13531_v44  ;;  %v13533_v45 = vpop.f32.mrf.mxu3  ;;  %v12657_v44 = vld [vmem:[%s13598_s4 + $0x30] sm:$0xff] }
  0xe0   : > { %15560 = vst [vmem:[#allocation17_spill] sm:$0xff] %v13533_v45  ;;  %v13537_v48 = vpop.f32.mrf.mxu1 }
  0xe2   : > { %v13541_v51 = vpop.f32.mrf.mxu0 }
  0xe3   : > { %10096 = vmatmul.msk.bf16.gmra.mxu1 %vm728_vm0, %v12739_v46  ;;  %10110 = vmatmul.msk.bf16.gmra.mxu2 %vm728_vm0, %v12753_v47  ;;  %v12899_v46 = vld [vmem:[%s13613_s16] sm:$0xff] }
  0xe4   : > { %10124 = vmatmul.msk.bf16.gmra.mxu3 %vm728_vm0, %v12767_v49 }
  0xe5   : > { %10082 = vmatmul.msk.bf16.gmra.mxu0 %vm728_vm0, %v12725_v50 }
  0xe6   : > { %v13553_v54 = vpop.f32.mrf.mxu2 }
  0xe7   : > { %15561 = vst [vmem:[#allocation18_spill] sm:$0xff] %v13553_v54  ;;  %v13555_v55 = vpop.f32.mrf.mxu3 }
  0xe8   : > { %15562 = vst [vmem:[#allocation19_spill] sm:$0xff] %v13555_v55  ;;  %v13560_v57 = vpop.f32.mrf.mxu1 }
  0xea   : > { %v13562_v58 = vpop.f32.mrf.mxu0 }
  0xee   : > { %v13567_v61 = vpop.f32.mrf.mxu2 }
  0xef   : > { %15563 = vst [vmem:[#allocation20_spill] sm:$0xff] %v13567_v61  ;;  %v13569_v63 = vpop.f32.mrf.mxu3 }
  0xf0   : > { %15564 = vst [vmem:[#allocation21_spill] sm:$0xff] %v13569_v63  ;;  %v13573_v9 = vpop.f32.mrf.mxu1  ;;  %v12653_v63 = vld [vmem:[%s13598_s4 + $0x10] sm:$0xff] }
  0xf2   : > { %v13577_v19 = vpop.f32.mrf.mxu0 }
  0xf3   : > { %10097 = vmatmul.msk.bf16.gmra.mxu1 %vm728_vm0, %v12740_v6  ;;  %10111 = vmatmul.msk.bf16.gmra.mxu2 %vm728_vm0, %v12754_v7  ;;  %v12652_v6 = vld [vmem:[%s13598_s4 + $0x8] sm:$0xff] }
  0xf4   : > { %10125 = vmatmul.msk.bf16.gmra.mxu3 %vm728_vm0, %v12768_v10  ;;  %v12776_v7 = vld [vmem:[%s13603_s8 + $0x8] sm:$0xff] }
  0xf5   : > { %10083 = vmatmul.msk.bf16.gmra.mxu0 %vm728_vm0, %v12726_v18  ;;  %v12838_v18 = vld [vmem:[%s13608_s11 + $0x8] sm:$0xff] }
  0xf6   : > { %v13586_v20 = vpop.f32.mrf.mxu2 }
  0xf7   : > { %15565 = vst [vmem:[#allocation22_spill] sm:$0xff] %v13586_v20  ;;  %v13589_v22 = vpop.f32.mrf.mxu3 }
  0xf8   : > { %15566 = vst [vmem:[#allocation23_spill] sm:$0xff] %v13589_v22  ;;  %v13591_v23 = vpop.f32.mrf.mxu1 }
  0xfa   : > { %v13593_v24 = vpop.f32.mrf.mxu0 }
  0xfe   : > { %v13615_v26 = vpop.f32.mrf.mxu2 }
  0xff   : > { %15567 = vst [vmem:[#allocation24_spill] sm:$0xff] %v13615_v26  ;;  %v13617_v30 = vpop.f32.mrf.mxu3  ;;  %v12656_v26 = vld [vmem:[%s13598_s4 + $0x28] sm:$0xff] }
 0x100   : > { %15568 = vst [vmem:[#allocation25_spill] sm:$0xff] %v13617_v30  ;;  %v13621_v37 = vpop.f32.mrf.mxu1 }
 0x102   : > { %v13625_v47 = vpop.f32.mrf.mxu0 }
 0x103   : > { %10374 = vmatmul.msk.bf16.vlgmr.msrb.gmra.mxu1 %vm728_vm0, %v12651_v34  ;;  %10691 = vmatmul.msk.bf16.vlgmr.msrb.gmra.mxu2 %vm728_vm0, %v12775_v35  ;;  %v12900_v34 = vld [vmem:[%s13613_s16 + $0x8] sm:$0xff] }
 0x104   : > { %11008 = vmatmul.msk.bf16.vlgmr.msrb.gmra.mxu3 %vm728_vm0, %v12837_v38 }
 0x105   : > { %11325 = vmatmul.msk.bf16.vlgmr.msrb.gmra.mxu0 %vm728_vm0, %v12899_v46 }
 0x106   : > { %v13631_v49 = vpop.f32.mrf.mxu2 }
 0x107   : > { %15569 = vst [vmem:[#allocation26_spill] sm:$0xff] %v13631_v49  ;;  %v13633_v50 = vpop.f32.mrf.mxu3 }
 0x108   : > { %15570 = vst [vmem:[#allocation27_spill] sm:$0xff] %v13633_v50  ;;  %v13635_v52 = vpop.f32.mrf.mxu1 }
 0x10a   : > { %v13637_v53 = vpop.f32.mrf.mxu0 }
 0x10e   : > { %v13639_v56 = vpop.f32.mrf.mxu2 }
 0x10f   : > { %15571 = vst [vmem:[#allocation28_spill] sm:$0xff] %v13639_v56  ;;  %v13641_v60 = vpop.f32.mrf.mxu3 }
 0x110   : > { %15572 = vst [vmem:[#allocation29_spill] sm:$0xff] %v13641_v60  ;;  %v13645_v10 = vpop.f32.mrf.mxu1 }
 0x112   : > { %v13649_v35 = vpop.f32.mrf.mxu0 }
 0x113   : > { %10375 = vmatmul.msk.bf16.gmra.mxu1 %vm728_vm0, %v12652_v6  ;;  %10692 = vmatmul.msk.bf16.gmra.mxu2 %vm728_vm0, %v12776_v7  ;;  %v12777_v6 = vld [vmem:[%s13603_s8 + $0x10] sm:$0xff] }
 0x114   : > { %11009 = vmatmul.msk.bf16.gmra.mxu3 %vm728_vm0, %v12838_v18  ;;  %v12839_v18 = vld [vmem:[%s13608_s11 + $0x10] sm:$0xff] }
 0x115   : > { %11326 = vmatmul.msk.bf16.gmra.mxu0 %vm728_vm0, %v12900_v34  ;;  %v12901_v34 = vld [vmem:[%s13613_s16 + $0x10] sm:$0xff] }
 0x116   : > { %v13655_v38 = vpop.f32.mrf.mxu2 }
 0x117   : > { %15573 = vst [vmem:[#allocation30_spill] sm:$0xff] %v13655_v38  ;;  %v13657_v46 = vpop.f32.mrf.mxu3 }
 0x118   : > { %15574 = vst [vmem:[#allocation31_spill] sm:$0xff] %v13657_v46  ;;  %v13659_v60 = vpop.f32.mrf.mxu1 }
 0x11a   : > { %v13661_v50 = vpop.f32.mrf.mxu0 }
 0x11e   : > { %v13663_v30 = vpop.f32.mrf.mxu2 }
 0x11f   : > { %15575 = vst [vmem:[#allocation32_spill] sm:$0xff] %v13663_v30  ;;  %v13665_v22 = vpop.f32.mrf.mxu3  ;;  %v12655_v30 = vld [vmem:[%s13598_s4 + $0x20] sm:$0xff] }
 0x120   : > { %15576 = vst [vmem:[#allocation33_spill] sm:$0xff] %v13665_v22  ;;  %v13669_v7 = vpop.f32.mrf.mxu1 }
 0x121   : > { %15577 = vst [vmem:[#allocation34_spill] sm:$0xff] %v13669_v7 }
 0x122   : > { %v13673_v55 = vpop.f32.mrf.mxu0 }
 0x123   : > { %10376 = vmatmul.msk.bf16.gmra.mxu1 %vm728_vm0, %v12653_v63  ;;  %10693 = vmatmul.msk.bf16.gmra.mxu2 %vm728_vm0, %v12777_v6  ;;  %v12778_v63 = vld [vmem:[%s13603_s8 + $0x18] sm:$0xff] }
 0x124   : > { %11010 = vmatmul.msk.bf16.gmra.mxu3 %vm728_vm0, %v12839_v18  ;;  %v12840_v18 = vld [vmem:[%s13608_s11 + $0x18] sm:$0xff] }
 0x125   : > { %11327 = vmatmul.msk.bf16.gmra.mxu0 %vm728_vm0, %v12901_v34  ;;  %v12902_v34 = vld [vmem:[%s13613_s16 + $0x18] sm:$0xff] }
 0x126   : > { %v13679_v22 = vpop.f32.mrf.mxu2 }
 0x127   : > { %15578 = vst [vmem:[#allocation35_spill] sm:$0xff] %v13679_v22  ;;  %v13681_v46 = vpop.f32.mrf.mxu3 }
 0x128   : > { %15579 = vst [vmem:[#allocation36_spill] sm:$0xff] %v13681_v46  ;;  %v13683_v45 = vpop.f32.mrf.mxu1 }
 0x129   : > { %15580 = vst [vmem:[#allocation37_spill] sm:$0xff] %v13683_v45 }
 0x12a   : > { %v13685_v41 = vpop.f32.mrf.mxu0 }
 0x12e   : > { %v13687_v33 = vpop.f32.mrf.mxu2 }
 0x12f   : > { %15581 = vst [vmem:[#allocation38_spill] sm:$0xff] %v13687_v33  ;;  %v13689_v28 = vpop.f32.mrf.mxu3 }
 0x130   : > { %15582 = vst [vmem:[#allocation39_spill] sm:$0xff] %v13689_v28  ;;  %v13693_v6 = vpop.f32.mrf.mxu1 }
 0x131   : > { %15583 = vst [vmem:[#allocation40_spill] sm:$0xff] %v13693_v6 }
 0x132   : > { %v13697_v13 = vpop.f32.mrf.mxu0 }
 0x133   : > { %10377 = vmatmul.msk.bf16.gmra.mxu1 %vm728_vm0, %v12654_v17  ;;  %10694 = vmatmul.msk.bf16.gmra.mxu2 %vm728_vm0, %v12778_v63  ;;  %v12779_v17 = vld [vmem:[%s13603_s8 + $0x20] sm:$0xff] }
 0x134   : > { %11011 = vmatmul.msk.bf16.gmra.mxu3 %vm728_vm0, %v12840_v18  ;;  %v12841_v18 = vld [vmem:[%s13608_s11 + $0x20] sm:$0xff] }
 0x135   : > { %11328 = vmatmul.msk.bf16.gmra.mxu0 %vm728_vm0, %v12902_v34  ;;  %v12903_v34 = vld [vmem:[%s13613_s16 + $0x20] sm:$0xff] }
 0x136   : > { %v13703_v28 = vpop.f32.mrf.mxu2 }
 0x137   : > { %15584 = vst [vmem:[#allocation41_spill] sm:$0xff] %v13703_v28  ;;  %v13705_v46 = vpop.f32.mrf.mxu3 }
 0x138   : > { %15585 = vst [vmem:[#allocation42_spill] sm:$0xff] %v13705_v46  ;;  %v13707_v5 = vpop.f32.mrf.mxu1 }
 0x139   : > { %15586 = vst [vmem:[#allocation43_spill] sm:$0xff] %v13707_v5  ;;  %v12784_v5 = vld [vmem:[%s13603_s8 + $0x48] sm:$0xff] }
 0x13a   : > { %v13709_v1 = vpop.f32.mrf.mxu0 }
 0x13e   : > { %v13711_v33 = vpop.f32.mrf.mxu2 }
 0x13f   : > { %15587 = vst [vmem:[#allocation44_spill] sm:$0xff] %v13711_v33  ;;  %v13713_v22 = vpop.f32.mrf.mxu3 }
 0x140   : > { %15588 = vst [vmem:[#allocation45_spill] sm:$0xff] %v13713_v22  ;;  %v13717_v63 = vpop.f32.mrf.mxu1 }
 0x141   : > { %15589 = vst [vmem:[#allocation46_spill] sm:$0xff] %v13717_v63  ;;  %v12660_v63 = vld [vmem:[%s13598_s4 + $0x48] sm:$0xff] }
 0x142   : > { %v13721_v28 = vpop.f32.mrf.mxu0 }
 0x143   : > { %10378 = vmatmul.msk.bf16.gmra.mxu1 %vm728_vm0, %v12655_v30  ;;  %10695 = vmatmul.msk.bf16.gmra.mxu2 %vm728_vm0, %v12779_v17  ;;  %v12780_v30 = vld [vmem:[%s13603_s8 + $0x28] sm:$0xff] }
 0x144   : > { %11012 = vmatmul.msk.bf16.gmra.mxu3 %vm728_vm0, %v12841_v18  ;;  %v12842_v18 = vld [vmem:[%s13608_s11 + $0x28] sm:$0xff] }
 0x145   : > { %11329 = vmatmul.msk.bf16.gmra.mxu0 %vm728_vm0, %v12903_v34  ;;  %v12904_v34 = vld [vmem:[%s13613_s16 + $0x28] sm:$0xff] }
 0x146   : > { %v13727_v22 = vpop.f32.mrf.mxu2 }
 0x147   : > { %15590 = vst [vmem:[#allocation47_spill] sm:$0xff] %v13727_v22  ;;  %v13729_v46 = vpop.f32.mrf.mxu3 }
 0x148   : > { %15591 = vst [vmem:[#allocation48_spill] sm:$0xff] %v13729_v46  ;;  %v13731_v33 = vpop.f32.mrf.mxu1 }
 0x149   : > { %15592 = vst [vmem:[#allocation49_spill] sm:$0xff] %v13731_v33 }
 0x14a   : > { %v13733_v38 = vpop.f32.mrf.mxu0 }
 0x14e   : > { %v13735_v56 = vpop.f32.mrf.mxu2 }
 0x14f   : > { %15593 = vst [vmem:[#allocation50_spill] sm:$0xff] %v13735_v56  ;;  %v13737_v49 = vpop.f32.mrf.mxu3 }
 0x150   : > { %15594 = vst [vmem:[#allocation51_spill] sm:$0xff] %v13737_v49  ;;  %v13741_v17 = vpop.f32.mrf.mxu1 }
 0x151   : > { %15595 = vst [vmem:[#allocation52_spill] sm:$0xff] %v13741_v17 }
 0x152   : > { %v13745_v22 = vpop.f32.mrf.mxu0 }
 0x153   : > { %10379 = vmatmul.msk.bf16.gmra.mxu1 %vm728_vm0, %v12656_v26  ;;  %10696 = vmatmul.msk.bf16.gmra.mxu2 %vm728_vm0, %v12780_v30  ;;  %v12781_v26 = vld [vmem:[%s13603_s8 + $0x30] sm:$0xff] }
 0x154   : > { %11013 = vmatmul.msk.bf16.gmra.mxu3 %vm728_vm0, %v12842_v18  ;;  %v12843_v18 = vld [vmem:[%s13608_s11 + $0x30] sm:$0xff] }
 0x155   : > { %11330 = vmatmul.msk.bf16.gmra.mxu0 %vm728_vm0, %v12904_v34  ;;  %v12905_v34 = vld [vmem:[%s13613_s16 + $0x30] sm:$0xff] }
 0x156   : > { %v13751_v49 = vpop.f32.mrf.mxu2 }
 0x157   : > { %15596 = vst [vmem:[#allocation53_spill] sm:$0xff] %v13751_v49  ;;  %v13753_v46 = vpop.f32.mrf.mxu3 }
 0x158   : > { %15597 = vst [vmem:[#allocation54_spill] sm:$0xff] %v13753_v46  ;;  %v13755_v56 = vpop.f32.mrf.mxu1 }
 0x159   : > { %15598 = vst [vmem:[#allocation55_spill] sm:$0xff] %v13755_v56 }
 0x15a   : > { %v13757_v20 = vpop.f32.mrf.mxu0 }
 0x15e   : > { %v13759_v61 = vpop.f32.mrf.mxu2 }
 0x15f   : > { %15599 = vst [vmem:[#allocation56_spill] sm:$0xff] %v13759_v61  ;;  %v13761_v54 = vpop.f32.mrf.mxu3 }
 0x160   : > { %15600 = vst [vmem:[#allocation57_spill] sm:$0xff] %v13761_v54  ;;  %v13765_v30 = vpop.f32.mrf.mxu1 }
 0x161   : > { %15601 = vst [vmem:[#allocation58_spill] sm:$0xff] %v13765_v30 }
 0x162   : > { %v13769_v49 = vpop.f32.mrf.mxu0 }
 0x163   : > { %10380 = vmatmul.msk.bf16.gmra.mxu1 %vm728_vm0, %v12657_v44  ;;  %10697 = vmatmul.msk.bf16.gmra.mxu2 %vm728_vm0, %v12781_v26  ;;  %v12782_v44 = vld [vmem:[%s13603_s8 + $0x38] sm:$0xff] }
 0x164   : > { %11014 = vmatmul.msk.bf16.gmra.mxu3 %vm728_vm0, %v12843_v18  ;;  %v12844_v26 = vld [vmem:[%s13608_s11 + $0x38] sm:$0xff] }
 0x165   : > { %11331 = vmatmul.msk.bf16.gmra.mxu0 %vm728_vm0, %v12905_v34  ;;  %v12906_v18 = vld [vmem:[%s13613_s16 + $0x38] sm:$0xff] }
 0x166   : > { %v13775_v54 = vpop.f32.mrf.mxu2 }
 0x167   : > { %15602 = vst [vmem:[#allocation59_spill] sm:$0xff] %v13775_v54  ;;  %v13777_v46 = vpop.f32.mrf.mxu3  ;;  %v12783_v54 = vld [vmem:[%s13603_s8 + $0x40] sm:$0xff] }
 0x168   : > { %15603 = vst [vmem:[#allocation60_spill] sm:$0xff] %v13777_v46  ;;  %v13779_v61 = vpop.f32.mrf.mxu1 }
 0x169   : > { %15604 = vst [vmem:[#allocation61_spill] sm:$0xff] %v13779_v61 }
 0x16a   : > { %v13781_v40 = vpop.f32.mrf.mxu0 }
 0x16e   : > { %v13783_v32 = vpop.f32.mrf.mxu2 }
 0x16f   : > { %15605 = vst [vmem:[#allocation62_spill] sm:$0xff] %v13783_v32  ;;  %v13785_v27 = vpop.f32.mrf.mxu3 }
 0x170   : > { %15606 = vst [vmem:[#allocation63_spill] sm:$0xff] %v13785_v27  ;;  %v13789_v12 = vpop.f32.mrf.mxu1 }
 0x171   : > { %15607 = vst [vmem:[#allocation64_spill] sm:$0xff] %v13789_v12  ;;  %v12907_v12 = vld [vmem:[%s13613_s16 + $0x40] sm:$0xff] }
 0x172   : > { %v13793_v4 = vpop.f32.mrf.mxu0 }
 0x173   : > { %10381 = vmatmul.msk.bf16.gmra.mxu1 %vm728_vm0, %v12658_v16  ;;  %10698 = vmatmul.msk.bf16.gmra.mxu2 %vm728_vm0, %v12782_v44  ;;  %v13083_v16 = vld [vmem:[%s15542_s1 + $0x140] sm:$0xff]  ;;  %v13145_v44 = vld [vmem:[%s15542_s1 + $0x170] sm:$0xff] }
 0x174   : > { %11015 = vmatmul.msk.bf16.gmra.mxu3 %vm728_vm0, %v12844_v26  ;;  %v13021_v26 = vld [vmem:[%s15542_s1 + $0x110] sm:$0xff]  ;;  %6636 = vmatpush.bf16.msra.mxu2 %v13083_v16  ;;  %v13207_v16 = vld [vmem:[%s15542_s1 + $0x1a0] sm:$0xff] }
 0x175   : > { %11332 = vmatmul.msk.bf16.gmra.mxu0 %vm728_vm0, %v12906_v18  ;;  %7651 = vmatpush.bf16.msra.mxu3 %v13145_v44 }
 0x176   : > { %v13799_v34 = vpop.f32.mrf.mxu2  ;;  %5621 = vmatpush.bf16.msra.mxu1 %v13021_v26  ;;  %8666 = vmatpush.bf16.msra.mxu0 %v13207_v16 }
 0x177   : > { %15608 = vst [vmem:[#allocation65_spill] sm:$0xff] %v13799_v34  ;;  %v13801_v27 = vpop.f32.mrf.mxu3  ;;  %v12659_v34 = vld [vmem:[%s13598_s4 + $0x40] sm:$0xff] }
 0x178   : > { %15609 = vst [vmem:[#allocation66_spill] sm:$0xff] %v13801_v27  ;;  %v13803_v46 = vpop.f32.mrf.mxu1 }
 0x179   : > { %15610 = vst [vmem:[#allocation67_spill] sm:$0xff] %v13803_v46  ;;  %v12845_v46 = vld [vmem:[%s13608_s11 + $0x40] sm:$0xff] }
 0x17a   : > { %v13805_v32 = vpop.f32.mrf.mxu0 }
 0x17e   : > { %v13816_v18 = vpop.f32.mrf.mxu2 }
 0x17f   : > { %15611 = vst [vmem:[#allocation68_spill] sm:$0xff] %v13816_v18  ;;  %v13818_v27 = vpop.f32.mrf.mxu3 }
 0x180   : > { %15612 = vst [vmem:[#allocation69_spill] sm:$0xff] %v13818_v27  ;;  %v1679_v0 = vpop.f32.mrf.mxu1 }
 0x181   : > { %v1680_v44 = vadd.f32 %v1679_v0, %v13430_v62  ;;  %v12846_v62 = vld [vmem:[%s13608_s11 + $0x48] sm:$0xff] }
 0x182   : > { %v4612_v61 = vpop.f32.mrf.mxu0  ;;  %v12908_v0 = vld [vmem:[%s13613_s16 + $0x48] sm:$0xff] }
 0x183   : > { %10382 = vmatmul.msk.bf16.gmra.mxu1 %vm728_vm0, %v12659_v34  ;;  %10699 = vmatmul.msk.bf16.gmra.mxu2 %vm728_vm0, %v12783_v54 }
 0x184   : > { %11016 = vmatmul.msk.bf16.gmra.mxu3 %vm728_vm0, %v12845_v46 }
 0x185   : > { %11333 = vmatmul.msk.bf16.gmra.mxu0 %vm728_vm0, %v12907_v12 }
 0x186   : > { %v2582_v26 = vpop.f32.mrf.mxu2 }
 0x187   : > { %v2862_v27 = vadd.f32 %v2582_v26, %v1680_v44  ;;  %v3597_v34 = vpop.f32.mrf.mxu3  ;;  %v12661_v26 = vld [vmem:[%s13598_s4 + $0x50] sm:$0xff] }
 0x188   : > { %v1681_v18 = vpop.f32.mrf.mxu1 }
 0x189   : > { %v3877_v54 = vadd.f32 %v3597_v34, %v2862_v27  ;;  %v1682_v12 = vadd.f32 %v1681_v18, %v13445_v3  ;;  %v12785_v34 = vld [vmem:[%s13603_s8 + $0x50] sm:$0xff] }
 0x18a   : > { %v4614_v30 = vpop.f32.mrf.mxu0 }
 0x18b   : > { %v13832_v46 = vadd.f32 %v4612_v61, %v3877_v54 }
 0x18e   : > { %v2584_v56 = vpop.f32.mrf.mxu2 }
 0x18f   : > { %v2863_v17 = vadd.f32 %v2584_v56, %v1682_v12  ;;  %v3599_v33 = vpop.f32.mrf.mxu3  ;;  %v12847_v12 = vld [vmem:[%s13608_s11 + $0x50] sm:$0xff] }
 0x190   : > { %v1684_v6 = vpop.f32.mrf.mxu1 }
 0x191   : > { %v3878_v45 = vadd.f32 %v3599_v33, %v2863_v17  ;;  %v1685_v3 = vadd.f32 %v1684_v6, %v13457_v11 }
 0x192   : > { %v4617_v7 = vpop.f32.mrf.mxu0 }
 0x193   : > { %10383 = vmatmul.msk.bf16.gmra.mxu1 %vm728_vm0, %v12660_v63  ;;  %10700 = vmatmul.msk.bf16.gmra.mxu2 %vm728_vm0, %v12784_v5  ;;  %v13841_v27 = vadd.f32 %v4614_v30, %v3878_v45 }
 0x194   : > { %11017 = vmatmul.msk.bf16.gmra.mxu3 %vm728_vm0, %v12846_v62  ;;  %v12909_v62 = vld [vmem:[%s13613_s16 + $0x50] sm:$0xff] }
 0x195   : > { %11334 = vmatmul.msk.bf16.gmra.mxu0 %vm728_vm0, %v12908_v0 }
 0x196   : > { %v2587_v61 = vpop.f32.mrf.mxu2 }
 0x197   : > { %v2864_v56 = vadd.f32 %v2587_v61, %v1685_v3  ;;  %v3602_v33 = vpop.f32.mrf.mxu3 }
 0x198   : > { %v1686_v17 = vpop.f32.mrf.mxu1 }
 0x199   : > { %v3879_v18 = vadd.f32 %v3602_v33, %v2864_v56  ;;  %v1687_v5 = vadd.f32 %v1686_v17, %v13469_v15 }
 0x19a   : > { %v4619_v63 = vpop.f32.mrf.mxu0 }
 0x19b   : > { %v13846_v16 = vadd.f32 %v4617_v7, %v3879_v18 }
 0x19e   : > { %v2589_v45 = vpop.f32.mrf.mxu2 }
 0x19f   : > { %v2865_v30 = vadd.f32 %v2589_v45, %v1687_v5  ;;  %v3604_v44 = vpop.f32.mrf.mxu3 }
 0x1a0   : > { %v1689_v54 = vpop.f32.mrf.mxu1 }
 0x1a1   : > { %v3880_v11 = vadd.f32 %v3604_v44, %v2865_v30  ;;  %v1690_v15 = vadd.f32 %v1689_v54, %v13487_v25  ;;  %v12662_v44 = vld [vmem:[%s13598_s4 + $0x58] sm:$0xff] }
 0x1a2   : > { %v4622_v6 = vpop.f32.mrf.mxu0 }
 0x1a3   : > { %10384 = vmatmul.msk.bf16.gmra.mxu1 %vm728_vm0, %v12661_v26  ;;  %10701 = vmatmul.msk.bf16.gmra.mxu2 %vm728_vm0, %v12785_v34  ;;  %v13855_v0 = vadd.f32 %v4619_v63, %v3880_v11  ;;  %v12786_v26 = vld [vmem:[%s13603_s8 + $0x58] sm:$0xff] }
 0x1a4   : > { %11018 = vmatmul.msk.bf16.gmra.mxu3 %vm728_vm0, %v12847_v12  ;;  %v12848_v12 = vld [vmem:[%s13608_s11 + $0x58] sm:$0xff] }
 0x1a5   : > { %11335 = vmatmul.msk.bf16.gmra.mxu0 %vm728_vm0, %v12909_v62  ;;  %v12910_v62 = vld [vmem:[%s13613_s16 + $0x58] sm:$0xff] }
 0x1a6   : > { %v2592_v7 = vpop.f32.mrf.mxu2 }
 0x1a7   : > { %v2866_v3 = vadd.f32 %v2592_v7, %v1690_v15  ;;  %v3607_v61 = vpop.f32.mrf.mxu3 }
 0x1a8   : > { %v1691_v56 = vpop.f32.mrf.mxu1 }
 0x1a9   : > { %v3881_v33 = vadd.f32 %v3607_v61, %v2866_v3  ;;  %v1692_v63 = vadd.f32 %v1691_v56, %v13505_v31 }
 0x1aa   : > { %v4624_v17 = vpop.f32.mrf.mxu0 }
 0x1ab   : > { %v13860_v18 = vadd.f32 %v4622_v6, %v3881_v33 }
 0x1ae   : > { %v2594_v5 = vpop.f32.mrf.mxu2 }
 0x1af   : > { %v2867_v45 = vadd.f32 %v2594_v5, %v1692_v63  ;;  %v3609_v30 = vpop.f32.mrf.mxu3 }
 0x1b0   : > { %v1694_v34 = vpop.f32.mrf.mxu1 }
 0x1b1   : > { %v3882_v25 = vadd.f32 %v3609_v30, %v2867_v45  ;;  %v1695_v31 = vadd.f32 %v1694_v34, %v13517_v39  ;;  %v12663_v30 = vld [vmem:[%s13598_s4 + $0x60] sm:$0xff] }
 0x1b2   : > { %v4627_v54 = vpop.f32.mrf.mxu0 }
 0x1b3   : > { %10385 = vmatmul.msk.bf16.gmra.mxu1 %vm728_vm0, %v12662_v44  ;;  %10702 = vmatmul.msk.bf16.gmra.mxu2 %vm728_vm0, %v12786_v26  ;;  %v13869_v11 = vadd.f32 %v4624_v17, %v3882_v25  ;;  %v12787_v44 = vld [vmem:[%s13603_s8 + $0x60] sm:$0xff] }
 0x1b4   : > { %11019 = vmatmul.msk.bf16.gmra.mxu3 %vm728_vm0, %v12848_v12  ;;  %v12849_v12 = vld [vmem:[%s13608_s11 + $0x60] sm:$0xff] }
 0x1b5   : > { %11336 = vmatmul.msk.bf16.gmra.mxu0 %vm728_vm0, %v12910_v62  ;;  %v12911_v62 = vld [vmem:[%s13613_s16 + $0x60] sm:$0xff] }
 0x1b6   : > { %v2597_v6 = vpop.f32.mrf.mxu2 }
 0x1b7   : > { %v2868_v15 = vadd.f32 %v2597_v6, %v1695_v31  ;;  %v3612_v7 = vpop.f32.mrf.mxu3 }
 0x1b8   : > { %v1696_v3 = vpop.f32.mrf.mxu1 }
 0x1b9   : > { %v3883_v61 = vadd.f32 %v3612_v7, %v2868_v15  ;;  %v1697_v17 = vadd.f32 %v1696_v3, %v13529_v43 }
 0x1ba   : > { %v4629_v56 = vpop.f32.mrf.mxu0 }
 0x1bb   : > { %v13874_v33 = vadd.f32 %v4627_v54, %v3883_v61 }
 0x1be   : > { %v2599_v63 = vpop.f32.mrf.mxu2 }
 0x1bf   : > { %v2869_v5 = vadd.f32 %v2599_v63, %v1697_v17  ;;  %v3614_v45 = vpop.f32.mrf.mxu3 }
 0x1c0   : > { %v1699_v26 = vpop.f32.mrf.mxu1 }
 0x1c1   : > { %v3884_v39 = vadd.f32 %v3614_v45, %v2869_v5  ;;  %v1700_v43 = vadd.f32 %v1699_v26, %v13541_v51  ;;  %v12664_v45 = vld [vmem:[%s13598_s4 + $0x68] sm:$0xff] }
 0x1c2   : > { %v4632_v34 = vpop.f32.mrf.mxu0 }
 0x1c3   : > { %10386 = vmatmul.msk.bf16.gmra.mxu1 %vm728_vm0, %v12663_v30  ;;  %10703 = vmatmul.msk.bf16.gmra.mxu2 %vm728_vm0, %v12787_v44  ;;  %v13883_v25 = vadd.f32 %v4629_v56, %v3884_v39  ;;  %v12788_v30 = vld [vmem:[%s13603_s8 + $0x68] sm:$0xff] }
 0x1c4   : > { %11020 = vmatmul.msk.bf16.gmra.mxu3 %vm728_vm0, %v12849_v12  ;;  %v12850_v12 = vld [vmem:[%s13608_s11 + $0x68] sm:$0xff] }
 0x1c5   : > { %11337 = vmatmul.msk.bf16.gmra.mxu0 %vm728_vm0, %v12911_v62  ;;  %v12912_v62 = vld [vmem:[%s13613_s16 + $0x68] sm:$0xff] }
 0x1c6   : > { %v2602_v54 = vpop.f32.mrf.mxu2 }
 0x1c7   : > { %v2870_v31 = vadd.f32 %v2602_v54, %v1700_v43  ;;  %v3617_v6 = vpop.f32.mrf.mxu3 }
 0x1c8   : > { %v1701_v15 = vpop.f32.mrf.mxu1 }
 0x1c9   : > { %v3885_v7 = vadd.f32 %v3617_v6, %v2870_v31  ;;  %v1702_v56 = vadd.f32 %v1701_v15, %v13562_v58 }
 0x1ca   : > { %v4634_v3 = vpop.f32.mrf.mxu0 }
 0x1cb   : > { %v13888_v61 = vadd.f32 %v4632_v34, %v3885_v7 }
 0x1ce   : > { %v2604_v17 = vpop.f32.mrf.mxu2 }
 0x1cf   : > { %v2871_v63 = vadd.f32 %v2604_v17, %v1702_v56  ;;  %v3619_v5 = vpop.f32.mrf.mxu3 }
 0x1d0   : > { %v1704_v44 = vpop.f32.mrf.mxu1 }
 0x1d1   : > { %v3886_v51 = vadd.f32 %v3619_v5, %v2871_v63  ;;  %v1705_v58 = vadd.f32 %v1704_v44, %v13577_v19  ;;  %v12665_v5 = vld [vmem:[%s13598_s4 + $0x70] sm:$0xff] }
 0x1d2   : > { %v4637_v26 = vpop.f32.mrf.mxu0 }
 0x1d3   : > { %10387 = vmatmul.msk.bf16.gmra.mxu1 %vm728_vm0, %v12664_v45  ;;  %10704 = vmatmul.msk.bf16.gmra.mxu2 %vm728_vm0, %v12788_v30  ;;  %v13897_v39 = vadd.f32 %v4634_v3, %v3886_v51  ;;  %v12789_v45 = vld [vmem:[%s13603_s8 + $0x70] sm:$0xff] }
 0x1d4   : > { %11021 = vmatmul.msk.bf16.gmra.mxu3 %vm728_vm0, %v12850_v12  ;;  %v12851_v12 = vld [vmem:[%s13608_s11 + $0x70] sm:$0xff] }
 0x1d5   : > { %11338 = vmatmul.msk.bf16.gmra.mxu0 %vm728_vm0, %v12912_v62  ;;  %v12913_v62 = vld [vmem:[%s13613_s16 + $0x70] sm:$0xff] }
 0x1d6   : > { %v2607_v34 = vpop.f32.mrf.mxu2 }
 0x1d7   : > { %v2872_v43 = vadd.f32 %v2607_v34, %v1705_v58  ;;  %v3622_v54 = vpop.f32.mrf.mxu3 }
 0x1d8   : > { %v1706_v31 = vpop.f32.mrf.mxu1 }
 0x1d9   : > { %v3887_v6 = vadd.f32 %v3622_v54, %v2872_v43  ;;  %v1707_v3 = vadd.f32 %v1706_v31, %v13593_v24 }
 0x1da   : > { %v4639_v15 = vpop.f32.mrf.mxu0 }
 0x1db   : > { %v13902_v7 = vadd.f32 %v4637_v26, %v3887_v6 }
 0x1de   : > { %v2609_v56 = vpop.f32.mrf.mxu2 }
 0x1df   : > { %v2873_v17 = vadd.f32 %v2609_v56, %v1707_v3  ;;  %v3624_v63 = vpop.f32.mrf.mxu3 }
 0x1e0   : > { %v1709_v30 = vpop.f32.mrf.mxu1 }
 0x1e1   : > { %v3888_v19 = vadd.f32 %v3624_v63, %v2873_v17  ;;  %v1710_v24 = vadd.f32 %v1709_v30, %v13625_v47  ;;  %v12666_v63 = vld [vmem:[%s13598_s4 + $0x78] sm:$0xff] }
 0x1e2   : > { %v4642_v44 = vpop.f32.mrf.mxu0 }
 0x1e3   : > { %10388 = vmatmul.msk.bf16.gmra.mxu1 %vm728_vm0, %v12665_v5  ;;  %10705 = vmatmul.msk.bf16.gmra.mxu2 %vm728_vm0, %v12789_v45  ;;  %v13911_v51 = vadd.f32 %v4639_v15, %v3888_v19  ;;  %v12790_v5 = vld [vmem:[%s13603_s8 + $0x78] sm:$0xff] }
 0x1e4   : > { %11022 = vmatmul.msk.bf16.gmra.mxu3 %vm728_vm0, %v12851_v12  ;;  %v12852_v12 = vld [vmem:[%s13608_s11 + $0x78] sm:$0xff] }
 0x1e5   : > { %11339 = vmatmul.msk.bf16.gmra.mxu0 %vm728_vm0, %v12913_v62  ;;  %v12914_v62 = vld [vmem:[%s13613_s16 + $0x78] sm:$0xff] }
 0x1e6   : > { %v2612_v26 = vpop.f32.mrf.mxu2 }
 0x1e7   : > { %v2874_v58 = vadd.f32 %v2612_v26, %v1710_v24  ;;  %v3627_v34 = vpop.f32.mrf.mxu3 }
 0x1e8   : > { %v1711_v43 = vpop.f32.mrf.mxu1 }
 0x1e9   : > { %v3889_v54 = vadd.f32 %v3627_v34, %v2874_v58  ;;  %v1712_v15 = vadd.f32 %v1711_v43, %v13637_v53 }
 0x1ea   : > { %v4644_v31 = vpop.f32.mrf.mxu0 }
 0x1eb   : > { %v13916_v6 = vadd.f32 %v4642_v44, %v3889_v54 }
 0x1ee   : > { %v2614_v3 = vpop.f32.mrf.mxu2 }
 0x1ef   : > { %v2875_v56 = vadd.f32 %v2614_v3, %v1712_v15  ;;  %v3629_v17 = vpop.f32.mrf.mxu3 }
 0x1f0   : > { %v1714_v45 = vpop.f32.mrf.mxu1 }
 0x1f1   : > { %v3890_v47 = vadd.f32 %v3629_v17, %v2875_v56  ;;  %v1715_v53 = vadd.f32 %v1714_v45, %v13649_v35  ;;  %v12667_v17 = vld [vmem:[%s13598_s4 + $0x80] sm:$0xff] }
 0x1f2   : > { %v4647_v30 = vpop.f32.mrf.mxu0 }
 0x1f3   : > { %10389 = vmatmul.msk.bf16.gmra.mxu1 %vm728_vm0, %v12666_v63  ;;  %10706 = vmatmul.msk.bf16.gmra.mxu2 %vm728_vm0, %v12790_v5  ;;  %v13925_v19 = vadd.f32 %v4644_v31, %v3890_v47  ;;  %v12791_v63 = vld [vmem:[%s13603_s8 + $0x80] sm:$0xff] }
 0x1f4   : > { %11023 = vmatmul.msk.bf16.gmra.mxu3 %vm728_vm0, %v12852_v12  ;;  %v12853_v12 = vld [vmem:[%s13608_s11 + $0x80] sm:$0xff] }
 0x1f5   : > { %11340 = vmatmul.msk.bf16.gmra.mxu0 %vm728_vm0, %v12914_v62  ;;  %v12915_v62 = vld [vmem:[%s13613_s16 + $0x80] sm:$0xff] }
 0x1f6   : > { %v2617_v44 = vpop.f32.mrf.mxu2 }
 0x1f7   : > { %v2876_v24 = vadd.f32 %v2617_v44, %v1715_v53  ;;  %v3632_v26 = vpop.f32.mrf.mxu3 }
 0x1f8   : > { %v1716_v58 = vpop.f32.mrf.mxu1 }
 0x1f9   : > { %v3891_v34 = vadd.f32 %v3632_v26, %v2876_v24  ;;  %v1717_v31 = vadd.f32 %v1716_v58, %v13661_v50 }
 0x1fa   : > { %v4649_v43 = vpop.f32.mrf.mxu0 }
 0x1fb   : > { %v13930_v54 = vadd.f32 %v4647_v30, %v3891_v34 }
 0x1fe   : > { %v2619_v15 = vpop.f32.mrf.mxu2 }
 0x1ff   : > { %v2877_v3 = vadd.f32 %v2619_v15, %v1717_v31  ;;  %v3634_v56 = vpop.f32.mrf.mxu3 }
 0x200   : > { %v1719_v5 = vpop.f32.mrf.mxu1 }
 0x201   : > { %v3892_v35 = vadd.f32 %v3634_v56, %v2877_v3  ;;  %v1720_v50 = vadd.f32 %v1719_v5, %v13673_v55  ;;  %v12668_v56 = vld [vmem:[%s13598_s4 + $0x88] sm:$0xff] }
 0x202   : > { %v4652_v45 = vpop.f32.mrf.mxu0 }
 0x203   : > { %10390 = vmatmul.msk.bf16.gmra.mxu1 %vm728_vm0, %v12667_v17  ;;  %10707 = vmatmul.msk.bf16.gmra.mxu2 %vm728_vm0, %v12791_v63  ;;  %v13939_v47 = vadd.f32 %v4649_v43, %v3892_v35  ;;  %v12792_v17 = vld [vmem:[%s13603_s8 + $0x88] sm:$0xff]  ;;  %v13082_v35 = vld [vmem:[%s15542_s1 + $0x138] sm:$0xff] }
 0x204   : > { %11024 = vmatmul.msk.bf16.gmra.mxu3 %vm728_vm0, %v12853_v12  ;;  %v12854_v12 = vld [vmem:[%s13608_s11 + $0x88] sm:$0xff]  ;;  %6637 = vmatpush.bf16.msra.mxu2 %v13082_v35  ;;  %v12917_v35 = vld [vmem:[%s13613_s16 + $0x90] sm:$0xff] }
 0x205   : > { %11341 = vmatmul.msk.bf16.gmra.mxu0 %vm728_vm0, %v12915_v62  ;;  %v12916_v62 = vld [vmem:[%s13613_s16 + $0x88] sm:$0xff] }
 0x206   : > { %v2622_v30 = vpop.f32.mrf.mxu2 }
 0x207   : > { %v2878_v53 = vadd.f32 %v2622_v30, %v1720_v50  ;;  %v3637_v44 = vpop.f32.mrf.mxu3 }
 0x208   : > { %v1721_v24 = vpop.f32.mrf.mxu1 }
 0x209   : > { %v3893_v26 = vadd.f32 %v3637_v44, %v2878_v53  ;;  %v1722_v43 = vadd.f32 %v1721_v24, %v13685_v41  ;;  %v13020_v41 = vld [vmem:[%s15542_s1 + $0x108] sm:$0xff] }
 0x20a   : > { %v4654_v58 = vpop.f32.mrf.mxu0  ;;  %5622 = vmatpush.bf16.msra.mxu1 %v13020_v41 }
 0x20b   : > { %v13944_v34 = vadd.f32 %v4652_v45, %v3893_v26  ;;  %v13144_v45 = vld [vmem:[%s15542_s1 + $0x168] sm:$0xff] }
 0x20c   : > { %7652 = vmatpush.bf16.msra.mxu3 %v13144_v45 }
 0x20e   : > { %v2624_v31 = vpop.f32.mrf.mxu2 }
 0x20f   : > { %v2879_v15 = vadd.f32 %v2624_v31, %v1722_v43  ;;  %v3639_v3 = vpop.f32.mrf.mxu3  ;;  %v13206_v31 = vld [vmem:[%s15542_s1 + $0x198] sm:$0xff] }
 0x210   : > { %v1724_v63 = vpop.f32.mrf.mxu1  ;;  %8667 = vmatpush.bf16.msra.mxu0 %v13206_v31 }
 0x211   : > { %v3894_v55 = vadd.f32 %v3639_v3, %v2879_v15  ;;  %v1725_v30 = vadd.f32 %v1724_v63, %v13697_v13  ;;  %v12669_v63 = vld [vmem:[%s13598_s4 + $0x90] sm:$0xff] }
 0x212   : > { %v4657_v5 = vpop.f32.mrf.mxu0 }
 0x213   : > { %10391 = vmatmul.msk.bf16.gmra.mxu1 %vm728_vm0, %v12668_v56  ;;  %10708 = vmatmul.msk.bf16.gmra.mxu2 %vm728_vm0, %v12792_v17  ;;  %v13962_v50 = vadd.f32 %v4654_v58, %v3894_v55  ;;  %v12855_v55 = vld [vmem:[%s13608_s11 + $0x90] sm:$0xff] }
 0x214   : > { %11025 = vmatmul.msk.bf16.gmra.mxu3 %vm728_vm0, %v12854_v12  ;;  %v12793_v12 = vld [vmem:[%s13603_s8 + $0x90] sm:$0xff] }
 0x215   : > { %11342 = vmatmul.msk.bf16.gmra.mxu0 %vm728_vm0, %v12916_v62 }
 0x216   : > { %v2627_v53 = vpop.f32.mrf.mxu2 }
 0x217   : > { %v2880_v44 = vadd.f32 %v2627_v53, %v1725_v30  ;;  %v3642_v24 = vpop.f32.mrf.mxu3 }
 0x218   : > { %v1726_v26 = vpop.f32.mrf.mxu1 }
 0x219   : > { %v3895_v43 = vadd.f32 %v3642_v24, %v2880_v44  ;;  %v1727_v13 = vadd.f32 %v1726_v26, %v13709_v1 }
 0x21a   : > { %v4659_v58 = vpop.f32.mrf.mxu0 }
 0x21b   : > { %v13970_v15 = vadd.f32 %v4657_v5, %v3895_v43 }
 0x21e   : > { %v2629_v3 = vpop.f32.mrf.mxu2 }
 0x21f   : > { %v2881_v56 = vadd.f32 %v2629_v3, %v1727_v13  ;;  %v3644_v17 = vpop.f32.mrf.mxu3 }
 0x220   : > { %v1729_v62 = vpop.f32.mrf.mxu1 }
 0x221   : > { %v3896_v45 = vadd.f32 %v3644_v17, %v2881_v56  ;;  %v1730_v1 = vadd.f32 %v1729_v62, %v13721_v28  ;;  %v12670_v17 = vld [vmem:[%s13598_s4 + $0x98] sm:$0xff] }
 0x222   : > { %v4662_v41 = vpop.f32.mrf.mxu0 }
 0x223   : > { %10392 = vmatmul.msk.bf16.gmra.mxu1 %vm728_vm0, %v12669_v63  ;;  %10709 = vmatmul.msk.bf16.gmra.mxu2 %vm728_vm0, %v12793_v12  ;;  %v13979_v30 = vadd.f32 %v4659_v58, %v3896_v45  ;;  %v12794_v63 = vld [vmem:[%s13603_s8 + $0x98] sm:$0xff] }
 0x224   : > { %11026 = vmatmul.msk.bf16.gmra.mxu3 %vm728_vm0, %v12855_v55  ;;  %v12856_v55 = vld [vmem:[%s13608_s11 + $0x98] sm:$0xff] }
 0x225   : > { %11343 = vmatmul.msk.bf16.gmra.mxu0 %vm728_vm0, %v12917_v35  ;;  %v12918_v35 = vld [vmem:[%s13613_s16 + $0x98] sm:$0xff] }
 0x226   : > { %v2632_v5 = vpop.f32.mrf.mxu2 }
 0x227   : > { %v2882_v53 = vadd.f32 %v2632_v5, %v1730_v1  ;;  %v3647_v44 = vpop.f32.mrf.mxu3 }
 0x228   : > { %v1731_v24 = vpop.f32.mrf.mxu1 }
 0x229   : > { %v3897_v26 = vadd.f32 %v3647_v44, %v2882_v53  ;;  %v1732_v58 = vadd.f32 %v1731_v24, %v13733_v38 }
 0x22a   : > { %v4664_v43 = vpop.f32.mrf.mxu0 }
 0x22b   : > { %v13984_v31 = vadd.f32 %v4662_v41, %v3897_v26 }
 0x22e   : > { %v2634_v13 = vpop.f32.mrf.mxu2 }
 0x22f   : > { %v2883_v3 = vadd.f32 %v2634_v13, %v1732_v58  ;;  %v3649_v56 = vpop.f32.mrf.mxu3 }
 0x230   : > { %v1734_v12 = vpop.f32.mrf.mxu1 }
 0x231   : > { %v3898_v28 = vadd.f32 %v3649_v56, %v2883_v3  ;;  %v1735_v38 = vadd.f32 %v1734_v12, %v13745_v22  ;;  %v12671_v56 = vld [vmem:[%s13598_s4 + $0xa0] sm:$0xff] }
 0x232   : > { %v4667_v62 = vpop.f32.mrf.mxu0 }
 0x233   : > { %10393 = vmatmul.msk.bf16.gmra.mxu1 %vm728_vm0, %v12670_v17  ;;  %10710 = vmatmul.msk.bf16.gmra.mxu2 %vm728_vm0, %v12794_v63  ;;  %v13993_v45 = vadd.f32 %v4664_v43, %v3898_v28  ;;  %v12795_v17 = vld [vmem:[%s13603_s8 + $0xa0] sm:$0xff] }
 0x234   : > { %11027 = vmatmul.msk.bf16.gmra.mxu3 %vm728_vm0, %v12856_v55  ;;  %v12857_v55 = vld [vmem:[%s13608_s11 + $0xa0] sm:$0xff] }
 0x235   : > { %11344 = vmatmul.msk.bf16.gmra.mxu0 %vm728_vm0, %v12918_v35  ;;  %v12919_v35 = vld [vmem:[%s13613_s16 + $0xa0] sm:$0xff] }
 0x236   : > { %v2637_v41 = vpop.f32.mrf.mxu2 }
 0x237   : > { %v2884_v1 = vadd.f32 %v2637_v41, %v1735_v38  ;;  %v3652_v5 = vpop.f32.mrf.mxu3 }
 0x238   : > { %v1736_v53 = vpop.f32.mrf.mxu1 }
 0x239   : > { %v3899_v44 = vadd.f32 %v3652_v5, %v2884_v1  ;;  %v1737_v43 = vadd.f32 %v1736_v53, %v13757_v20 }
 0x23a   : > { %v4669_v24 = vpop.f32.mrf.mxu0 }
 0x23b   : > { %v13998_v26 = vadd.f32 %v4667_v62, %v3899_v44 }
 0x23e   : > { %v2639_v58 = vpop.f32.mrf.mxu2 }
 0x23f   : > { %v2885_v13 = vadd.f32 %v2639_v58, %v1737_v43  ;;  %v3654_v3 = vpop.f32.mrf.mxu3 }
 0x240   : > { %v1739_v63 = vpop.f32.mrf.mxu1 }
 0x241   : > { %v3900_v22 = vadd.f32 %v3654_v3, %v2885_v13  ;;  %v1740_v20 = vadd.f32 %v1739_v63, %v13769_v49  ;;  %v12672_v3 = vld [vmem:[%s13598_s4 + $0xa8] sm:$0xff] }
 0x242   : > { %v4672_v12 = vpop.f32.mrf.mxu0 }
 0x243   : > { %10394 = vmatmul.msk.bf16.gmra.mxu1 %vm728_vm0, %v12671_v56  ;;  %10711 = vmatmul.msk.bf16.gmra.mxu2 %vm728_vm0, %v12795_v17  ;;  %v14007_v28 = vadd.f32 %v4669_v24, %v3900_v22  ;;  %v12796_v56 = vld [vmem:[%s13603_s8 + $0xa8] sm:$0xff] }
 0x244   : > { %11028 = vmatmul.msk.bf16.gmra.mxu3 %vm728_vm0, %v12857_v55  ;;  %v12858_v55 = vld [vmem:[%s13608_s11 + $0xa8] sm:$0xff] }
 0x245   : > { %11345 = vmatmul.msk.bf16.gmra.mxu0 %vm728_vm0, %v12919_v35  ;;  %v12920_v35 = vld [vmem:[%s13613_s16 + $0xa8] sm:$0xff] }
 0x246   : > { %v2642_v62 = vpop.f32.mrf.mxu2 }
 0x247   : > { %v2886_v38 = vadd.f32 %v2642_v62, %v1740_v20  ;;  %v3657_v41 = vpop.f32.mrf.mxu3 }
 0x248   : > { %v1741_v1 = vpop.f32.mrf.mxu1 }
 0x249   : > { %v3901_v5 = vadd.f32 %v3657_v41, %v2886_v38  ;;  %v1742_v24 = vadd.f32 %v1741_v1, %v13781_v40 }
 0x24a   : > { %v4674_v53 = vpop.f32.mrf.mxu0 }
 0x24b   : > { %v14012_v44 = vadd.f32 %v4672_v12, %v3901_v5 }
 0x24e   : > { %v2644_v43 = vpop.f32.mrf.mxu2 }
 0x24f   : > { %v2887_v58 = vadd.f32 %v2644_v43, %v1742_v24  ;;  %v3659_v13 = vpop.f32.mrf.mxu3 }
 0x250   : > { %v1744_v17 = vpop.f32.mrf.mxu1 }
 0x251   : > { %v3902_v49 = vadd.f32 %v3659_v13, %v2887_v58  ;;  %v1745_v40 = vadd.f32 %v1744_v17, %v13793_v4  ;;  %v12673_v13 = vld [vmem:[%s13598_s4 + $0xb0] sm:$0xff] }
 0x252   : > { %v4677_v63 = vpop.f32.mrf.mxu0 }
 0x253   : > { %10395 = vmatmul.msk.bf16.gmra.mxu1 %vm728_vm0, %v12672_v3  ;;  %10712 = vmatmul.msk.bf16.gmra.mxu2 %vm728_vm0, %v12796_v56  ;;  %v14021_v22 = vadd.f32 %v4674_v53, %v3902_v49  ;;  %v12797_v3 = vld [vmem:[%s13603_s8 + $0xb0] sm:$0xff] }
 0x254   : > { %11029 = vmatmul.msk.bf16.gmra.mxu3 %vm728_vm0, %v12858_v55  ;;  %v12859_v55 = vld [vmem:[%s13608_s11 + $0xb0] sm:$0xff] }
 0x255   : > { %11346 = vmatmul.msk.bf16.gmra.mxu0 %vm728_vm0, %v12920_v35  ;;  %v12921_v35 = vld [vmem:[%s13613_s16 + $0xb0] sm:$0xff] }
 0x256   : > { %v2647_v12 = vpop.f32.mrf.mxu2 }
 0x257   : > { %v2888_v20 = vadd.f32 %v2647_v12, %v1745_v40  ;;  %v3662_v62 = vpop.f32.mrf.mxu3 }
 0x258   : > { %v1746_v38 = vpop.f32.mrf.mxu1 }
 0x259   : > { %v3903_v41 = vadd.f32 %v3662_v62, %v2888_v20  ;;  %v1747_v53 = vadd.f32 %v1746_v38, %v13805_v32 }
 0x25a   : > { %v4679_v1 = vpop.f32.mrf.mxu0 }
 0x25b   : > { %v14026_v5 = vadd.f32 %v4677_v63, %v3903_v41 }
 0x25e   : > { %v2649_v24 = vpop.f32.mrf.mxu2 }
 0x25f   : > { %v2889_v43 = vadd.f32 %v2649_v24, %v1747_v53  ;;  %v3664_v58 = vpop.f32.mrf.mxu3 }
 0x260   : > { %v1749_v56 = vpop.f32.mrf.mxu1 }
 0x261   : > { %v3904_v4 = vadd.f32 %v3664_v58, %v2889_v43  ;;  %v1750_v32 = vadd.f32 %v1749_v56, %v13426_v59  ;;  %v12674_v58 = vld [vmem:[%s13598_s4 + $0xb8] sm:$0xff] }
 0x262   : > { %v4682_v17 = vpop.f32.mrf.mxu0 }
 0x263   : > { %10396 = vmatmul.msk.bf16.gmra.mxu1 %vm728_vm0, %v12673_v13  ;;  %10713 = vmatmul.msk.bf16.gmra.mxu2 %vm728_vm0, %v12797_v3  ;;  %v14035_v49 = vadd.f32 %v4679_v1, %v3904_v4  ;;  %v12798_v13 = vld [vmem:[%s13603_s8 + $0xb8] sm:$0xff] }
 0x264   : > { %11030 = vmatmul.msk.bf16.gmra.mxu3 %vm728_vm0, %v12859_v55  ;;  %v12860_v55 = vld [vmem:[%s13608_s11 + $0xb8] sm:$0xff] }
 0x265   : > { %11347 = vmatmul.msk.bf16.gmra.mxu0 %vm728_vm0, %v12921_v35  ;;  %v12922_v35 = vld [vmem:[%s13613_s16 + $0xb8] sm:$0xff] }
 0x266   : > { %v2652_v63 = vpop.f32.mrf.mxu2 }
 0x267   : > { %v2890_v40 = vadd.f32 %v2652_v63, %v1750_v32  ;;  %v3667_v12 = vpop.f32.mrf.mxu3 }
 0x268   : > { %v1751_v20 = vpop.f32.mrf.mxu1 }
 0x269   : > { %v3905_v62 = vadd.f32 %v3667_v12, %v2890_v40  ;;  %v1752_v1 = vadd.f32 %v1751_v20, %v13443_v2 }
 0x26a   : > { %v4684_v38 = vpop.f32.mrf.mxu0 }
 0x26b   : > { %v14040_v41 = vadd.f32 %v4682_v17, %v3905_v62 }
 0x26e   : > { %v2654_v53 = vpop.f32.mrf.mxu2 }
 0x26f   : > { %v2891_v24 = vadd.f32 %v2654_v53, %v1752_v1  ;;  %v3669_v43 = vpop.f32.mrf.mxu3 }
 0x270   : > { %v1754_v3 = vpop.f32.mrf.mxu1 }
 0x271   : > { %v3906_v59 = vadd.f32 %v3669_v43, %v2891_v24  ;;  %v1755_v2 = vadd.f32 %v1754_v3, %v13453_v8  ;;  %v12675_v43 = vld [vmem:[%s13598_s4 + $0xc0] sm:$0xff] }
 0x272   : > { %v4687_v56 = vpop.f32.mrf.mxu0 }
 0x273   : > { %10397 = vmatmul.msk.bf16.gmra.mxu1 %vm728_vm0, %v12674_v58  ;;  %10714 = vmatmul.msk.bf16.gmra.mxu2 %vm728_vm0, %v12798_v13  ;;  %v14049_v4 = vadd.f32 %v4684_v38, %v3906_v59  ;;  %v12799_v58 = vld [vmem:[%s13603_s8 + $0xc0] sm:$0xff] }
 0x274   : > { %11031 = vmatmul.msk.bf16.gmra.mxu3 %vm728_vm0, %v12860_v55  ;;  %v12861_v55 = vld [vmem:[%s13608_s11 + $0xc0] sm:$0xff] }
 0x275   : > { %11348 = vmatmul.msk.bf16.gmra.mxu0 %vm728_vm0, %v12922_v35  ;;  %v12923_v35 = vld [vmem:[%s13613_s16 + $0xc0] sm:$0xff] }
 0x276   : > { %v2657_v17 = vpop.f32.mrf.mxu2 }
 0x277   : > { %v2892_v32 = vadd.f32 %v2657_v17, %v1755_v2  ;;  %v3672_v63 = vpop.f32.mrf.mxu3 }
 0x278   : > { %v1756_v40 = vpop.f32.mrf.mxu1 }
 0x279   : > { %v3907_v12 = vadd.f32 %v3672_v63, %v2892_v32  ;;  %v1757_v38 = vadd.f32 %v1756_v40, %v13467_v14 }
 0x27a   : > { %v4689_v20 = vpop.f32.mrf.mxu0 }
 0x27b   : > { %v14054_v62 = vadd.f32 %v4687_v56, %v3907_v12 }
 0x27e   : > { %v2659_v1 = vpop.f32.mrf.mxu2 }
 0x27f   : > { %v2893_v53 = vadd.f32 %v2659_v1, %v1757_v38  ;;  %v3674_v24 = vpop.f32.mrf.mxu3 }
 0x280   : > { %v1759_v13 = vpop.f32.mrf.mxu1 }
 0x281   : > { %v3908_v8 = vadd.f32 %v3674_v24, %v2893_v53  ;;  %v1760_v14 = vadd.f32 %v1759_v13, %v13480_v21  ;;  %v12676_v24 = vld [vmem:[%s13598_s4 + $0xc8] sm:$0xff] }
 0x282   : > { %v4692_v3 = vpop.f32.mrf.mxu0 }
 0x283   : > { %10398 = vmatmul.msk.bf16.gmra.mxu1 %vm728_vm0, %v12675_v43  ;;  %10715 = vmatmul.msk.bf16.gmra.mxu2 %vm728_vm0, %v12799_v58  ;;  %v14063_v59 = vadd.f32 %v4689_v20, %v3908_v8  ;;  %v12800_v43 = vld [vmem:[%s13603_s8 + $0xc8] sm:$0xff] }
 0x284   : > { %11032 = vmatmul.msk.bf16.gmra.mxu3 %vm728_vm0, %v12861_v55  ;;  %v12862_v55 = vld [vmem:[%s13608_s11 + $0xc8] sm:$0xff] }
 0x285   : > { %11349 = vmatmul.msk.bf16.gmra.mxu0 %vm728_vm0, %v12923_v35  ;;  %v12924_v35 = vld [vmem:[%s13613_s16 + $0xc8] sm:$0xff] }
 0x286   : > { %v2662_v56 = vpop.f32.mrf.mxu2 }
 0x287   : > { %v2894_v2 = vadd.f32 %v2662_v56, %v1760_v14  ;;  %v3677_v17 = vpop.f32.mrf.mxu3 }
 0x288   : > { %v1761_v32 = vpop.f32.mrf.mxu1 }
 0x289   : > { %v3909_v63 = vadd.f32 %v3677_v17, %v2894_v2  ;;  %v1762_v20 = vadd.f32 %v1761_v32, %v13500_v29 }
 0x28a   : > { %v4694_v40 = vpop.f32.mrf.mxu0 }
 0x28b   : > { %v14068_v12 = vadd.f32 %v4692_v3, %v3909_v63 }
 0x28e   : > { %v2664_v38 = vpop.f32.mrf.mxu2 }
 0x28f   : > { %v2895_v1 = vadd.f32 %v2664_v38, %v1762_v20  ;;  %v3679_v53 = vpop.f32.mrf.mxu3 }
 0x290   : > { %v1764_v58 = vpop.f32.mrf.mxu1 }
 0x291   : > { %v3910_v21 = vadd.f32 %v3679_v53, %v2895_v1  ;;  %v1765_v29 = vadd.f32 %v1764_v58, %v13513_v36  ;;  %v12677_v53 = vld [vmem:[%s13598_s4 + $0xd0] sm:$0xff] }
 0x292   : > { %v4697_v13 = vpop.f32.mrf.mxu0 }
 0x293   : > { %10399 = vmatmul.msk.bf16.gmra.mxu1 %vm728_vm0, %v12676_v24  ;;  %10716 = vmatmul.msk.bf16.gmra.mxu2 %vm728_vm0, %v12800_v43  ;;  %v14077_v8 = vadd.f32 %v4694_v40, %v3910_v21  ;;  %v12801_v24 = vld [vmem:[%s13603_s8 + $0xd0] sm:$0xff] }
 0x294   : > { %11033 = vmatmul.msk.bf16.gmra.mxu3 %vm728_vm0, %v12862_v55  ;;  %v12863_v55 = vld [vmem:[%s13608_s11 + $0xd0] sm:$0xff] }
 0x295   : > { %11350 = vmatmul.msk.bf16.gmra.mxu0 %vm728_vm0, %v12924_v35  ;;  %v12925_v35 = vld [vmem:[%s13613_s16 + $0xd0] sm:$0xff] }
 0x296   : > { %v2667_v3 = vpop.f32.mrf.mxu2 }
 0x297   : > { %v2896_v14 = vadd.f32 %v2667_v3, %v1765_v29  ;;  %v3682_v56 = vpop.f32.mrf.mxu3 }
 0x298   : > { %v1766_v2 = vpop.f32.mrf.mxu1 }
 0x299   : > { %v3911_v17 = vadd.f32 %v3682_v56, %v2896_v14  ;;  %v1767_v40 = vadd.f32 %v1766_v2, %v13527_v42  ;;  %v13081_v42 = vld [vmem:[%s15542_s1 + $0x130] sm:$0xff] }
 0x29a   : > { %v4699_v32 = vpop.f32.mrf.mxu0  ;;  %6638 = vmatpush.bf16.msra.mxu2 %v13081_v42  ;;  %v12926_v42 = vld [vmem:[%s13613_s16 + $0xd8] sm:$0xff] }
 0x29b   : > { %v14082_v63 = vadd.f32 %v4697_v13, %v3911_v17  ;;  %v13143_v13 = vld [vmem:[%s15542_s1 + $0x160] sm:$0xff] }
 0x29c   : > { %7653 = vmatpush.bf16.msra.mxu3 %v13143_v13 }
 0x29e   : > { %v2669_v20 = vpop.f32.mrf.mxu2 }
 0x29f   : > { %v2897_v38 = vadd.f32 %v2669_v20, %v1767_v40  ;;  %v3684_v1 = vpop.f32.mrf.mxu3  ;;  %v13019_v40 = vld [vmem:[%s15542_s1 + $0x100] sm:$0xff] }
 0x2a0   : > { %v1769_v43 = vpop.f32.mrf.mxu1  ;;  %5623 = vmatpush.bf16.msra.mxu1 %v13019_v40 }
 0x2a1   : > { %v3912_v36 = vadd.f32 %v3684_v1, %v2897_v38  ;;  %v1770_v29 = vadd.f32 %v1769_v43, %v13537_v48  ;;  %v13205_v48 = vld [vmem:[%s15542_s1 + $0x190] sm:$0xff]  ;;  %v12678_v43 = vld [vmem:[%s13598_s4 + $0xd8] sm:$0xff] }
 0x2a2   : > { %v4702_v58 = vpop.f32.mrf.mxu0  ;;  %8668 = vmatpush.bf16.msra.mxu0 %v13205_v48 }
 0x2a3   : > { %10400 = vmatmul.msk.bf16.gmra.mxu1 %vm728_vm0, %v12677_v53  ;;  %10717 = vmatmul.msk.bf16.gmra.mxu2 %vm728_vm0, %v12801_v24  ;;  %v14091_v21 = vadd.f32 %v4699_v32, %v3912_v36  ;;  %v12864_v36 = vld [vmem:[%s13608_s11 + $0xd8] sm:$0xff] }
 0x2a4   : > { %11034 = vmatmul.msk.bf16.gmra.mxu3 %vm728_vm0, %v12863_v55  ;;  %v12802_v55 = vld [vmem:[%s13603_s8 + $0xd8] sm:$0xff] }
 0x2a5   : > { %11351 = vmatmul.msk.bf16.gmra.mxu0 %vm728_vm0, %v12925_v35 }
 0x2a6   : > { %v2672_v3 = vpop.f32.mrf.mxu2 }
 0x2a7   : > { %v2898_v14 = vadd.f32 %v2672_v3, %v1770_v29  ;;  %v3687_v56 = vpop.f32.mrf.mxu3 }
 0x2a8   : > { %v1771_v2 = vpop.f32.mrf.mxu1 }
 0x2a9   : > { %v3913_v17 = vadd.f32 %v3687_v56, %v2898_v14  ;;  %v1772_v38 = vadd.f32 %v1771_v2, %v13560_v57 }
 0x2aa   : > { %v4704_v32 = vpop.f32.mrf.mxu0 }
 0x2ab   : > { %v14108_v20 = vadd.f32 %v4702_v58, %v3913_v17 }
 0x2ae   : > { %v2674_v1 = vpop.f32.mrf.mxu2 }
 0x2af   : > { %v2899_v53 = vadd.f32 %v2674_v1, %v1772_v38  ;;  %v3689_v24 = vpop.f32.mrf.mxu3 }
 0x2b0   : > { %v1774_v35 = vpop.f32.mrf.mxu1 }
 0x2b1   : > { %v3914_v13 = vadd.f32 %v3689_v24, %v2899_v53  ;;  %v1775_v57 = vadd.f32 %v1774_v35, %v13573_v9  ;;  %v12679_v24 = vld [vmem:[%s13598_s4 + $0xe0] sm:$0xff] }
 0x2b2   : > { %v4707_v29 = vpop.f32.mrf.mxu0 }
 0x2b3   : > { %10401 = vmatmul.msk.bf16.gmra.mxu1 %vm728_vm0, %v12678_v43  ;;  %10718 = vmatmul.msk.bf16.gmra.mxu2 %vm728_vm0, %v12802_v55  ;;  %v14117_v3 = vadd.f32 %v4704_v32, %v3914_v13  ;;  %v12803_v43 = vld [vmem:[%s13603_s8 + $0xe0] sm:$0xff] }
 0x2b4   : > { %11035 = vmatmul.msk.bf16.gmra.mxu3 %vm728_vm0, %v12864_v36  ;;  %v12865_v36 = vld [vmem:[%s13608_s11 + $0xe0] sm:$0xff] }
 0x2b5   : > { %11352 = vmatmul.msk.bf16.gmra.mxu0 %vm728_vm0, %v12926_v42  ;;  %v12927_v42 = vld [vmem:[%s13613_s16 + $0xe0] sm:$0xff] }
 0x2b6   : > { %v2677_v58 = vpop.f32.mrf.mxu2 }
 0x2b7   : > { %v2900_v14 = vadd.f32 %v2677_v58, %v1775_v57  ;;  %v3692_v56 = vpop.f32.mrf.mxu3 }
 0x2b8   : > { %v1776_v2 = vpop.f32.mrf.mxu1 }
 0x2b9   : > { %v3915_v17 = vadd.f32 %v3692_v56, %v2900_v14  ;;  %v1777_v32 = vadd.f32 %v1776_v2, %v13591_v23 }
 0x2ba   : > { %v4709_v40 = vpop.f32.mrf.mxu0 }
 0x2bb   : > { %v14122_v48 = vadd.f32 %v4707_v29, %v3915_v17 }
 0x2be   : > { %v2679_v38 = vpop.f32.mrf.mxu2 }
 0x2bf   : > { %v2901_v1 = vadd.f32 %v2679_v38, %v1777_v32  ;;  %v3694_v53 = vpop.f32.mrf.mxu3 }
 0x2c0   : > { %v1779_v55 = vpop.f32.mrf.mxu1 }
 0x2c1   : > { %v3916_v9 = vadd.f32 %v3694_v53, %v2901_v1  ;;  %v1780_v23 = vadd.f32 %v1779_v55, %v13621_v37  ;;  %v12680_v53 = vld [vmem:[%s13598_s4 + $0xe8] sm:$0xff] }
 0x2c2   : > { %v4712_v35 = vpop.f32.mrf.mxu0 }
 0x2c3   : > { %10402 = vmatmul.msk.bf16.gmra.mxu1 %vm728_vm0, %v12679_v24  ;;  %10719 = vmatmul.msk.bf16.gmra.mxu2 %vm728_vm0, %v12803_v43  ;;  %v14131_v13 = vadd.f32 %v4709_v40, %v3916_v9  ;;  %v12804_v24 = vld [vmem:[%s13603_s8 + $0xe8] sm:$0xff] }
 0x2c4   : > { %11036 = vmatmul.msk.bf16.gmra.mxu3 %vm728_vm0, %v12865_v36  ;;  %v12866_v36 = vld [vmem:[%s13608_s11 + $0xe8] sm:$0xff] }
 0x2c5   : > { %11353 = vmatmul.msk.bf16.gmra.mxu0 %vm728_vm0, %v12927_v42  ;;  %v12928_v42 = vld [vmem:[%s13613_s16 + $0xe8] sm:$0xff] }
 0x2c6   : > { %v2682_v29 = vpop.f32.mrf.mxu2 }
 0x2c7   : > { %v2902_v57 = vadd.f32 %v2682_v29, %v1780_v23  ;;  %v3697_v58 = vpop.f32.mrf.mxu3 }
 0x2c8   : > { %v1781_v14 = vpop.f32.mrf.mxu1 }
 0x2c9   : > { %v3917_v56 = vadd.f32 %v3697_v58, %v2902_v57  ;;  %v1782_v40 = vadd.f32 %v1781_v14, %v13635_v52 }
 0x2ca   : > { %v4714_v2 = vpop.f32.mrf.mxu0 }
 0x2cb   : > { %v14136_v17 = vadd.f32 %v4712_v35, %v3917_v56 }
 0x2ce   : > { %v2684_v32 = vpop.f32.mrf.mxu2 }
 0x2cf   : > { %v2903_v38 = vadd.f32 %v2684_v32, %v1782_v40  ;;  %v3699_v1 = vpop.f32.mrf.mxu3 }
 0x2d0   : > { %v1784_v43 = vpop.f32.mrf.mxu1 }
 0x2d1   : > { %v3918_v37 = vadd.f32 %v3699_v1, %v2903_v38  ;;  %v1785_v52 = vadd.f32 %v1784_v43, %v13645_v10  ;;  %v12681_v1 = vld [vmem:[%s13598_s4 + $0xf0] sm:$0xff] }
 0x2d2   : > { %v4717_v55 = vpop.f32.mrf.mxu0 }
 0x2d3   : > { %10403 = vmatmul.msk.bf16.gmra.mxu1 %vm728_vm0, %v12680_v53  ;;  %10720 = vmatmul.msk.bf16.gmra.mxu2 %vm728_vm0, %v12804_v24  ;;  %v14145_v9 = vadd.f32 %v4714_v2, %v3918_v37  ;;  %v12805_v53 = vld [vmem:[%s13603_s8 + $0xf0] sm:$0xff] }
 0x2d4   : > { %11037 = vmatmul.msk.bf16.gmra.mxu3 %vm728_vm0, %v12866_v36  ;;  %v12867_v36 = vld [vmem:[%s13608_s11 + $0xf0] sm:$0xff] }
 0x2d5   : > { %11354 = vmatmul.msk.bf16.gmra.mxu0 %vm728_vm0, %v12928_v42  ;;  %v12929_v42 = vld [vmem:[%s13613_s16 + $0xf0] sm:$0xff] }
 0x2d6   : > { %v2687_v35 = vpop.f32.mrf.mxu2 }
 0x2d7   : > { %v2904_v23 = vadd.f32 %v2687_v35, %v1785_v52  ;;  %v3702_v29 = vpop.f32.mrf.mxu3 }
 0x2d8   : > { %v1786_v57 = vpop.f32.mrf.mxu1 }
 0x2d9   : > { %v3919_v58 = vadd.f32 %v3702_v29, %v2904_v23  ;;  %v1787_v2 = vadd.f32 %v1786_v57, %v13659_v60  ;;  %v15615_v60 = vld [vmem:[#allocation34_spill] sm:$0xff] }
 0x2da   : > { %v4719_v14 = vpop.f32.mrf.mxu0 }
 0x2db   : > { %v14150_v56 = vadd.f32 %v4717_v55, %v3919_v58 }
 0x2dd   : > { %15613 = vst [vmem:[#allocation70_spill] sm:$0xff] %v14150_v56 }
 0x2de   : > { %v2689_v40 = vpop.f32.mrf.mxu2 }
 0x2df   : > { %v2905_v32 = vadd.f32 %v2689_v40, %v1787_v2  ;;  %v3704_v38 = vpop.f32.mrf.mxu3  ;;  %v15617_v40 = vld [vmem:[#allocation37_spill] sm:$0xff] }
 0x2e0   : > { %v1789_v24 = vpop.f32.mrf.mxu1 }
 0x2e1   : > { %v3920_v10 = vadd.f32 %v3704_v38, %v2905_v32  ;;  %v1790_v55 = vadd.f32 %v1789_v24, %v15615_v60 }
 0x2e2   : > { %v4722_v43 = vpop.f32.mrf.mxu0 }
 0x2e3   : > { %10404 = vmatmul.msk.bf16.gmra.mxu1 %vm728_vm0, %v12681_v1  ;;  %10721 = vmatmul.msk.bf16.gmra.mxu2 %vm728_vm0, %v12805_v53  ;;  %v14159_v37 = vadd.f32 %v4719_v14, %v3920_v10  ;;  %v12682_v53 = vld [vmem:[%s13598_s4 + $0xf8] sm:$0xff] }
 0x2e4   : > { %11038 = vmatmul.msk.bf16.gmra.mxu3 %vm728_vm0, %v12867_v36  ;;  %v12806_v36 = vld [vmem:[%s13603_s8 + $0xf8] sm:$0xff] }
 0x2e5   : > { %15614 = vst [vmem:[#allocation71_spill] sm:$0xff] %v14159_v37  ;;  %11355 = vmatmul.msk.bf16.gmra.mxu0 %vm728_vm0, %v12929_v42  ;;  %v12868_v10 = vld [vmem:[%s13608_s11 + $0xf8] sm:$0xff] }
 0x2e6   : > { %v2692_v52 = vpop.f32.mrf.mxu2  ;;  %v12930_v37 = vld [vmem:[%s13613_s16 + $0xf8] sm:$0xff] }
 0x2e7   : > { %v2906_v35 = vadd.f32 %v2692_v52, %v1790_v55  ;;  %v3707_v23 = vpop.f32.mrf.mxu3 }
 0x2e8   : > { %v1791_v29 = vpop.f32.mrf.mxu1 }
 0x2e9   : > { %v3921_v57 = vadd.f32 %v3707_v23, %v2906_v35  ;;  %v1792_v14 = vadd.f32 %v1791_v29, %v15617_v40 }
 0x2ea   : > { %v4724_v58 = vpop.f32.mrf.mxu0 }
 0x2eb   : > { %v14164_v2 = vadd.f32 %v4722_v43, %v3921_v57  ;;  %v15619_v43 = vld [vmem:[#allocation40_spill] sm:$0xff] }
 0x2ed   : > { %15616 = vst [vmem:[#allocation34_spill] sm:$0xff] %v14164_v2  ;;  %v12931_v2 = vld [vmem:[%s13613_s16 + $0x100] sm:$0xff] }
 0x2ee   : > { %v2694_v32 = vpop.f32.mrf.mxu2 }
 0x2ef   : > { %v2907_v38 = vadd.f32 %v2694_v32, %v1792_v14  ;;  %v3709_v1 = vpop.f32.mrf.mxu3 }
 0x2f0   : > { %v1794_v42 = vpop.f32.mrf.mxu1 }
 0x2f1   : > { %v3922_v24 = vadd.f32 %v3709_v1, %v2907_v38  ;;  %v1795_v52 = vadd.f32 %v1794_v42, %v15619_v43  ;;  %v15621_v38 = vld [vmem:[#allocation43_spill] sm:$0xff] }
 0x2f2   : > { %v4727_v60 = vpop.f32.mrf.mxu0 }
 0x2f3   : > { %10405 = vmatmul.msk.bf16.gmra.mxu1 %vm728_vm0, %v12682_v53  ;;  %10722 = vmatmul.msk.bf16.gmra.mxu2 %vm728_vm0, %v12806_v36  ;;  %v14173_v55 = vadd.f32 %v4724_v58, %v3922_v24  ;;  %v12807_v24 = vld [vmem:[%s13603_s8 + $0x100] sm:$0xff] }
 0x2f4   : > { %11039 = vmatmul.msk.bf16.gmra.mxu3 %vm728_vm0, %v12868_v10  ;;  %v12683_v10 = vld [vmem:[%s13598_s4 + $0x100] sm:$0xff] }
 0x2f5   : > { %15618 = vst [vmem:[#allocation37_spill] sm:$0xff] %v14173_v55  ;;  %11356 = vmatmul.msk.bf16.gmra.mxu0 %vm728_vm0, %v12930_v37  ;;  %v12869_v55 = vld [vmem:[%s13608_s11 + $0x100] sm:$0xff] }
 0x2f6   : > { %v2697_v35 = vpop.f32.mrf.mxu2 }
 0x2f7   : > { %v2908_v23 = vadd.f32 %v2697_v35, %v1795_v52  ;;  %v3712_v29 = vpop.f32.mrf.mxu3 }
 0x2f8   : > { %v1796_v57 = vpop.f32.mrf.mxu1 }
 0x2f9   : > { %v3923_v40 = vadd.f32 %v3712_v29, %v2908_v23  ;;  %v1797_v58 = vadd.f32 %v1796_v57, %v15621_v38 }
 0x2fa   : > { %v4729_v14 = vpop.f32.mrf.mxu0 }
 0x2fb   : > { %v14178_v32 = vadd.f32 %v4727_v60, %v3923_v40  ;;  %v15623_v60 = vld [vmem:[#allocation46_spill] sm:$0xff] }
 0x2fd   : > { %15620 = vst [vmem:[#allocation40_spill] sm:$0xff] %v14178_v32  ;;  %v12932_v32 = vld [vmem:[%s13613_s16 + $0x108] sm:$0xff] }
 0x2fe   : > { %v2699_v1 = vpop.f32.mrf.mxu2 }
 0x2ff   : > { %v2909_v53 = vadd.f32 %v2699_v1, %v1797_v58  ;;  %v3714_v36 = vpop.f32.mrf.mxu3 }
 0x300   : > { %v1799_v37 = vpop.f32.mrf.mxu1 }
 0x301   : > { %v3924_v42 = vadd.f32 %v3714_v36, %v2909_v53  ;;  %v1800_v35 = vadd.f32 %v1799_v37, %v15623_v60  ;;  %v15625_v53 = vld [vmem:[#allocation49_spill] sm:$0xff] }
 0x302   : > { %v4732_v43 = vpop.f32.mrf.mxu0 }
 0x303   : > { %10406 = vmatmul.msk.bf16.gmra.mxu1 %vm728_vm0, %v12683_v10  ;;  %10723 = vmatmul.msk.bf16.gmra.mxu2 %vm728_vm0, %v12807_v24  ;;  %v14187_v52 = vadd.f32 %v4729_v14, %v3924_v42  ;;  %v12808_v42 = vld [vmem:[%s13603_s8 + $0x108] sm:$0xff] }
 0x304   : > { %11040 = vmatmul.msk.bf16.gmra.mxu3 %vm728_vm0, %v12869_v55  ;;  %v12684_v55 = vld [vmem:[%s13598_s4 + $0x108] sm:$0xff] }
 0x305   : > { %15622 = vst [vmem:[#allocation43_spill] sm:$0xff] %v14187_v52  ;;  %11357 = vmatmul.msk.bf16.gmra.mxu0 %vm728_vm0, %v12931_v2  ;;  %v12870_v52 = vld [vmem:[%s13608_s11 + $0x108] sm:$0xff] }
 0x306   : > { %v2702_v23 = vpop.f32.mrf.mxu2 }
 0x307   : > { %v2910_v29 = vadd.f32 %v2702_v23, %v1800_v35  ;;  %v3717_v57 = vpop.f32.mrf.mxu3 }
 0x308   : > { %v1801_v40 = vpop.f32.mrf.mxu1 }
 0x309   : > { %v3925_v38 = vadd.f32 %v3717_v57, %v2910_v29  ;;  %v1802_v14 = vadd.f32 %v1801_v40, %v15625_v53 }
 0x30a   : > { %v4734_v58 = vpop.f32.mrf.mxu0 }
 0x30b   : > { %v14192_v1 = vadd.f32 %v4732_v43, %v3925_v38  ;;  %v15627_v43 = vld [vmem:[#allocation52_spill] sm:$0xff] }
 0x30d   : > { %15624 = vst [vmem:[#allocation46_spill] sm:$0xff] %v14192_v1  ;;  %v12933_v1 = vld [vmem:[%s13613_s16 + $0x110] sm:$0xff] }
 0x30e   : > { %v2704_v36 = vpop.f32.mrf.mxu2 }
 0x30f   : > { %v2911_v10 = vadd.f32 %v2704_v36, %v1802_v14  ;;  %v3719_v24 = vpop.f32.mrf.mxu3 }
 0x310   : > { %v1804_v2 = vpop.f32.mrf.mxu1 }
 0x311   : > { %v3926_v37 = vadd.f32 %v3719_v24, %v2911_v10  ;;  %v1805_v23 = vadd.f32 %v1804_v2, %v15627_v43  ;;  %v15629_v10 = vld [vmem:[#allocation55_spill] sm:$0xff] }
 0x312   : > { %v4737_v60 = vpop.f32.mrf.mxu0 }
 0x313   : > { %10407 = vmatmul.msk.bf16.gmra.mxu1 %vm728_vm0, %v12684_v55  ;;  %10724 = vmatmul.msk.bf16.gmra.mxu2 %vm728_vm0, %v12808_v42  ;;  %v14201_v35 = vadd.f32 %v4734_v58, %v3926_v37  ;;  %v12809_v37 = vld [vmem:[%s13603_s8 + $0x110] sm:$0xff] }
 0x314   : > { %11041 = vmatmul.msk.bf16.gmra.mxu3 %vm728_vm0, %v12870_v52  ;;  %v12685_v52 = vld [vmem:[%s13598_s4 + $0x110] sm:$0xff] }
 0x315   : > { %15626 = vst [vmem:[#allocation49_spill] sm:$0xff] %v14201_v35  ;;  %11358 = vmatmul.msk.bf16.gmra.mxu0 %vm728_vm0, %v12932_v32  ;;  %v12871_v35 = vld [vmem:[%s13608_s11 + $0x110] sm:$0xff] }
 0x316   : > { %v2707_v29 = vpop.f32.mrf.mxu2 }
 0x317   : > { %v2912_v57 = vadd.f32 %v2707_v29, %v1805_v23  ;;  %v3722_v40 = vpop.f32.mrf.mxu3 }
 0x318   : > { %v1806_v38 = vpop.f32.mrf.mxu1 }
 0x319   : > { %v3927_v53 = vadd.f32 %v3722_v40, %v2912_v57  ;;  %v1807_v58 = vadd.f32 %v1806_v38, %v15629_v10 }
 0x31a   : > { %v4739_v14 = vpop.f32.mrf.mxu0 }
 0x31b   : > { %v14206_v36 = vadd.f32 %v4737_v60, %v3927_v53  ;;  %v15631_v60 = vld [vmem:[#allocation58_spill] sm:$0xff] }
 0x31d   : > { %15628 = vst [vmem:[#allocation52_spill] sm:$0xff] %v14206_v36  ;;  %v12934_v36 = vld [vmem:[%s13613_s16 + $0x118] sm:$0xff] }
 0x31e   : > { %v2709_v24 = vpop.f32.mrf.mxu2 }
 0x31f   : > { %v2913_v55 = vadd.f32 %v2709_v24, %v1807_v58  ;;  %v3724_v42 = vpop.f32.mrf.mxu3 }
 0x320   : > { %v1809_v32 = vpop.f32.mrf.mxu1 }
 0x321   : > { %v3928_v2 = vadd.f32 %v3724_v42, %v2913_v55  ;;  %v1810_v29 = vadd.f32 %v1809_v32, %v15631_v60  ;;  %v15633_v55 = vld [vmem:[#allocation61_spill] sm:$0xff] }
 0x322   : > { %v4742_v43 = vpop.f32.mrf.mxu0 }
 0x323   : > { %10408 = vmatmul.msk.bf16.gmra.mxu1 %vm728_vm0, %v12685_v52  ;;  %10725 = vmatmul.msk.bf16.gmra.mxu2 %vm728_vm0, %v12809_v37  ;;  %v14215_v23 = vadd.f32 %v4739_v14, %v3928_v2  ;;  %v12810_v2 = vld [vmem:[%s13603_s8 + $0x118] sm:$0xff] }
 0x324   : > { %11042 = vmatmul.msk.bf16.gmra.mxu3 %vm728_vm0, %v12871_v35  ;;  %v12686_v35 = vld [vmem:[%s13598_s4 + $0x118] sm:$0xff] }
 0x325   : > { %15630 = vst [vmem:[#allocation55_spill] sm:$0xff] %v14215_v23  ;;  %11359 = vmatmul.msk.bf16.gmra.mxu0 %vm728_vm0, %v12933_v1  ;;  %v12872_v23 = vld [vmem:[%s13608_s11 + $0x118] sm:$0xff] }
 0x326   : > { %v2712_v57 = vpop.f32.mrf.mxu2 }
 0x327   : > { %v2914_v40 = vadd.f32 %v2712_v57, %v1810_v29  ;;  %v3727_v38 = vpop.f32.mrf.mxu3 }
 0x328   : > { %v1811_v53 = vpop.f32.mrf.mxu1 }
 0x329   : > { %v3929_v10 = vadd.f32 %v3727_v38, %v2914_v40  ;;  %v1812_v14 = vadd.f32 %v1811_v53, %v15633_v55 }
 0x32a   : > { %v4744_v58 = vpop.f32.mrf.mxu0 }
 0x32b   : > { %v14220_v24 = vadd.f32 %v4742_v43, %v3929_v10  ;;  %v15635_v43 = vld [vmem:[#allocation64_spill] sm:$0xff] }
 0x32d   : > { %15632 = vst [vmem:[#allocation58_spill] sm:$0xff] %v14220_v24 }
 0x32e   : > { %v2714_v42 = vpop.f32.mrf.mxu2 }
 0x32f   : > { %v2915_v52 = vadd.f32 %v2714_v42, %v1812_v14  ;;  %v3729_v37 = vpop.f32.mrf.mxu3 }
 0x330   : > { %v1814_v1 = vpop.f32.mrf.mxu1 }
 0x331   : > { %v3930_v32 = vadd.f32 %v3729_v37, %v2915_v52  ;;  %v1815_v57 = vadd.f32 %v1814_v1, %v15635_v43  ;;  %v15637_v52 = vld [vmem:[#allocation67_spill] sm:$0xff]  ;;  %v12811_v43 = vld [vmem:[%s13603_s8 + $0x120] sm:$0xff] }
 0x332   : > { %v4747_v60 = vpop.f32.mrf.mxu0 }
 0x333   : > { %10409 = vmatmul.msk.bf16.gmra.mxu1 %vm728_vm0, %v12686_v35  ;;  %10726 = vmatmul.msk.bf16.gmra.mxu2 %vm728_vm0, %v12810_v2  ;;  %v14229_v29 = vadd.f32 %v4744_v58, %v3930_v32  ;;  %v13080_v58 = vld [vmem:[%s15542_s1 + $0x128] sm:$0xff]  ;;  %v12687_v32 = vld [vmem:[%s13598_s4 + $0x120] sm:$0xff] }
 0x334   : > { %11043 = vmatmul.msk.bf16.gmra.mxu3 %vm728_vm0, %v12872_v23  ;;  %v13018_v23 = vld [vmem:[%s15542_s1 + $0xf8] sm:$0xff]  ;;  %6639 = vmatpush.bf16.msra.mxu2 %v13080_v58 }
 0x335   : > { %15634 = vst [vmem:[#allocation61_spill] sm:$0xff] %v14229_v29  ;;  %11360 = vmatmul.msk.bf16.gmra.mxu0 %vm728_vm0, %v12934_v36  ;;  %v13142_v36 = vld [vmem:[%s15542_s1 + $0x158] sm:$0xff]  ;;  %5624 = vmatpush.bf16.msra.mxu1 %v13018_v23 }
 0x336   : > { %v2717_v40 = vpop.f32.mrf.mxu2  ;;  %7654 = vmatpush.bf16.msra.mxu3 %v13142_v36 }
 0x337   : > { %v2916_v38 = vadd.f32 %v2717_v40, %v1815_v57  ;;  %v3732_v53 = vpop.f32.mrf.mxu3  ;;  %v12873_v40 = vld [vmem:[%s13608_s11 + $0x120] sm:$0xff] }
 0x338   : > { %v1816_v10 = vpop.f32.mrf.mxu1 }
 0x339   : > { %v3931_v55 = vadd.f32 %v3732_v53, %v2916_v38  ;;  %v1817_v37 = vadd.f32 %v1816_v10, %v15637_v52  ;;  %v12935_v38 = vld [vmem:[%s13613_s16 + $0x120] sm:$0xff] }
 0x33a   : > { %v4749_v14 = vpop.f32.mrf.mxu0  ;;  %v15639_v10 = vld [vmem:[#allocation2_spill] sm:$0xff] }
 0x33b   : > { %v14243_v42 = vadd.f32 %v4747_v60, %v3931_v55  ;;  %v13204_v60 = vld [vmem:[%s15542_s1 + $0x188] sm:$0xff] }
 0x33c   : > { %8669 = vmatpush.bf16.msra.mxu0 %v13204_v60 }
 0x33d   : > { %15636 = vst [vmem:[#allocation64_spill] sm:$0xff] %v14243_v42 }
 0x33e   : > { %v2719_v35 = vpop.f32.mrf.mxu2 }
 0x33f   : > { %v2917_v2 = vadd.f32 %v2719_v35, %v1817_v37  ;;  %v3734_v1 = vpop.f32.mrf.mxu3 }
 0x340   : > { %v1819_v57 = vpop.f32.mrf.mxu1 }
 0x341   : > { %v3932_v53 = vadd.f32 %v3734_v1, %v2917_v2  ;;  %v1820_v55 = vadd.f32 %v1819_v57, %v15639_v10  ;;  %v15640_v1 = vld [vmem:[#allocation4_spill] sm:$0xff]  ;;  %v12874_v57 = vld [vmem:[%s13608_s11 + $0x128] sm:$0xff] }
 0x342   : > { %v4752_v29 = vpop.f32.mrf.mxu0  ;;  %v12936_v10 = vld [vmem:[%s13613_s16 + $0x128] sm:$0xff] }
 0x343   : > { %10410 = vmatmul.msk.bf16.gmra.mxu1 %vm728_vm0, %v12687_v32  ;;  %10727 = vmatmul.msk.bf16.gmra.mxu2 %vm728_vm0, %v12811_v43  ;;  %v14252_v58 = vadd.f32 %v4749_v14, %v3932_v53  ;;  %v12688_v53 = vld [vmem:[%s13598_s4 + $0x128] sm:$0xff] }
 0x344   : > { %11044 = vmatmul.msk.bf16.gmra.mxu3 %vm728_vm0, %v12873_v40 }
 0x345   : > { %15638 = vst [vmem:[#allocation67_spill] sm:$0xff] %v14252_v58  ;;  %11361 = vmatmul.msk.bf16.gmra.mxu0 %vm728_vm0, %v12935_v38  ;;  %v12812_v58 = vld [vmem:[%s13603_s8 + $0x128] sm:$0xff] }
 0x346   : > { %v2722_v36 = vpop.f32.mrf.mxu2 }
 0x347   : > { %v2918_v23 = vadd.f32 %v2722_v36, %v1820_v55  ;;  %v3737_v52 = vpop.f32.mrf.mxu3 }
 0x348   : > { %v1821_v14 = vpop.f32.mrf.mxu1 }
 0x349   : > { %v3933_v37 = vadd.f32 %v3737_v52, %v2918_v23  ;;  %v1822_v32 = vadd.f32 %v1821_v14, %v15640_v1 }
 0x34a   : > { %v4754_v35 = vpop.f32.mrf.mxu0 }
 0x34b   : > { %v14260_v2 = vadd.f32 %v4752_v29, %v3933_v37  ;;  %v15642_v29 = vld [vmem:[#allocation6_spill] sm:$0xff] }
 0x34e   : > { %v2724_v43 = vpop.f32.mrf.mxu2 }
 0x34f   : > { %v2919_v40 = vadd.f32 %v2724_v43, %v1822_v32  ;;  %v3739_v38 = vpop.f32.mrf.mxu3 }
 0x350   : > { %v1824_v42 = vpop.f32.mrf.mxu1 }
 0x351   : > { %v3934_v24 = vadd.f32 %v3739_v38, %v2919_v40  ;;  %v1825_v55 = vadd.f32 %v1824_v42, %v15642_v29  ;;  %v12689_v38 = vld [vmem:[%s13598_s4 + $0x130] sm:$0xff] }
 0x352   : > { %v4757_v56 = vpop.f32.mrf.mxu0 }
 0x353   : > { %10411 = vmatmul.msk.bf16.gmra.mxu1 %vm728_vm0, %v12688_v53  ;;  %10728 = vmatmul.msk.bf16.gmra.mxu2 %vm728_vm0, %v12812_v58  ;;  %v14269_v60 = vadd.f32 %v4754_v35, %v3934_v24  ;;  %v15644_v58 = vld [vmem:[#allocation8_spill] sm:$0xff] }
 0x354   : > { %11045 = vmatmul.msk.bf16.gmra.mxu3 %vm728_vm0, %v12874_v57  ;;  %v12813_v53 = vld [vmem:[%s13603_s8 + $0x130] sm:$0xff] }
 0x355   : > { %15641 = vst [vmem:[#allocation2_spill] sm:$0xff] %v14269_v60  ;;  %11362 = vmatmul.msk.bf16.gmra.mxu0 %vm728_vm0, %v12936_v10  ;;  %v12875_v10 = vld [vmem:[%s13608_s11 + $0x130] sm:$0xff] }
 0x356   : > { %v2727_v36 = vpop.f32.mrf.mxu2  ;;  %v12937_v60 = vld [vmem:[%s13613_s16 + $0x130] sm:$0xff] }
 0x357   : > { %v2920_v23 = vadd.f32 %v2727_v36, %v1825_v55  ;;  %v3742_v52 = vpop.f32.mrf.mxu3 }
 0x358   : > { %v1826_v14 = vpop.f32.mrf.mxu1 }
 0x359   : > { %v3935_v37 = vadd.f32 %v3742_v52, %v2920_v23  ;;  %v1827_v24 = vadd.f32 %v1826_v14, %v15644_v58 }
 0x35a   : > { %v4759_v1 = vpop.f32.mrf.mxu0 }
 0x35b   : > { %v14274_v32 = vadd.f32 %v4757_v56, %v3935_v37  ;;  %v15646_v56 = vld [vmem:[#allocation10_spill] sm:$0xff] }
 0x35d   : > { %15643 = vst [vmem:[#allocation4_spill] sm:$0xff] %v14274_v32  ;;  %v12938_v32 = vld [vmem:[%s13613_s16 + $0x138] sm:$0xff] }
 0x35e   : > { %v2729_v35 = vpop.f32.mrf.mxu2 }
 0x35f   : > { %v2921_v43 = vadd.f32 %v2729_v35, %v1827_v24  ;;  %v3744_v40 = vpop.f32.mrf.mxu3 }
 0x360   : > { %v1829_v57 = vpop.f32.mrf.mxu1 }
 0x361   : > { %v3936_v42 = vadd.f32 %v3744_v40, %v2921_v43  ;;  %v1830_v36 = vadd.f32 %v1829_v57, %v15646_v56  ;;  %v15648_v43 = vld [vmem:[#allocation12_spill] sm:$0xff] }
 0x362   : > { %v4762_v29 = vpop.f32.mrf.mxu0 }
 0x363   : > { %10412 = vmatmul.msk.bf16.gmra.mxu1 %vm728_vm0, %v12689_v38  ;;  %10729 = vmatmul.msk.bf16.gmra.mxu2 %vm728_vm0, %v12813_v53  ;;  %v14283_v55 = vadd.f32 %v4759_v1, %v3936_v42  ;;  %v12814_v42 = vld [vmem:[%s13603_s8 + $0x138] sm:$0xff] }
 0x364   : > { %11046 = vmatmul.msk.bf16.gmra.mxu3 %vm728_vm0, %v12875_v10  ;;  %v12690_v10 = vld [vmem:[%s13598_s4 + $0x138] sm:$0xff] }
 0x365   : > { %15645 = vst [vmem:[#allocation6_spill] sm:$0xff] %v14283_v55  ;;  %11363 = vmatmul.msk.bf16.gmra.mxu0 %vm728_vm0, %v12937_v60  ;;  %v12876_v55 = vld [vmem:[%s13608_s11 + $0x138] sm:$0xff] }
 0x366   : > { %v2732_v23 = vpop.f32.mrf.mxu2 }
 0x367   : > { %v2922_v52 = vadd.f32 %v2732_v23, %v1830_v36  ;;  %v3747_v14 = vpop.f32.mrf.mxu3 }
 0x368   : > { %v1831_v37 = vpop.f32.mrf.mxu1 }
 0x369   : > { %v3937_v58 = vadd.f32 %v3747_v14, %v2922_v52  ;;  %v1832_v1 = vadd.f32 %v1831_v37, %v15648_v43 }
 0x36a   : > { %v4764_v24 = vpop.f32.mrf.mxu0 }
 0x36b   : > { %v14288_v35 = vadd.f32 %v4762_v29, %v3937_v58  ;;  %v15650_v29 = vld [vmem:[#allocation14_spill] sm:$0xff] }
 0x36d   : > { %15647 = vst [vmem:[#allocation8_spill] sm:$0xff] %v14288_v35  ;;  %v12939_v35 = vld [vmem:[%s13613_s16 + $0x140] sm:$0xff] }
 0x36e   : > { %v2734_v40 = vpop.f32.mrf.mxu2 }
 0x36f   : > { %v2923_v38 = vadd.f32 %v2734_v40, %v1832_v1  ;;  %v3749_v53 = vpop.f32.mrf.mxu3 }
 0x370   : > { %v1834_v60 = vpop.f32.mrf.mxu1 }
 0x371   : > { %v3938_v57 = vadd.f32 %v3749_v53, %v2923_v38  ;;  %v1835_v23 = vadd.f32 %v1834_v60, %v15650_v29  ;;  %v15652_v38 = vld [vmem:[#allocation16_spill] sm:$0xff] }
 0x372   : > { %v4767_v56 = vpop.f32.mrf.mxu0 }
 0x373   : > { %10413 = vmatmul.msk.bf16.gmra.mxu1 %vm728_vm0, %v12690_v10  ;;  %10730 = vmatmul.msk.bf16.gmra.mxu2 %vm728_vm0, %v12814_v42  ;;  %v14297_v36 = vadd.f32 %v4764_v24, %v3938_v57  ;;  %v12815_v57 = vld [vmem:[%s13603_s8 + $0x140] sm:$0xff] }
 0x374   : > { %11047 = vmatmul.msk.bf16.gmra.mxu3 %vm728_vm0, %v12876_v55  ;;  %v12691_v55 = vld [vmem:[%s13598_s4 + $0x140] sm:$0xff] }
 0x375   : > { %15649 = vst [vmem:[#allocation10_spill] sm:$0xff] %v14297_v36  ;;  %11364 = vmatmul.msk.bf16.gmra.mxu0 %vm728_vm0, %v12938_v32  ;;  %v12877_v36 = vld [vmem:[%s13608_s11 + $0x140] sm:$0xff] }
 0x376   : > { %v2737_v52 = vpop.f32.mrf.mxu2 }
 0x377   : > { %v2924_v14 = vadd.f32 %v2737_v52, %v1835_v23  ;;  %v3752_v37 = vpop.f32.mrf.mxu3 }
 0x378   : > { %v1836_v58 = vpop.f32.mrf.mxu1 }
 0x379   : > { %v3939_v43 = vadd.f32 %v3752_v37, %v2924_v14  ;;  %v1837_v24 = vadd.f32 %v1836_v58, %v15652_v38 }
 0x37a   : > { %v4769_v1 = vpop.f32.mrf.mxu0 }
 0x37b   : > { %v14302_v40 = vadd.f32 %v4767_v56, %v3939_v43  ;;  %v15654_v56 = vld [vmem:[#allocation18_spill] sm:$0xff] }
 0x37d   : > { %15651 = vst [vmem:[#allocation12_spill] sm:$0xff] %v14302_v40  ;;  %v12940_v40 = vld [vmem:[%s13613_s16 + $0x148] sm:$0xff] }
 0x37e   : > { %v2739_v53 = vpop.f32.mrf.mxu2 }
 0x37f   : > { %v2925_v10 = vadd.f32 %v2739_v53, %v1837_v24  ;;  %v3754_v42 = vpop.f32.mrf.mxu3 }
 0x380   : > { %v1839_v32 = vpop.f32.mrf.mxu1 }
 0x381   : > { %v3940_v60 = vadd.f32 %v3754_v42, %v2925_v10  ;;  %v1840_v52 = vadd.f32 %v1839_v32, %v15654_v56  ;;  %v15656_v10 = vld [vmem:[#allocation20_spill] sm:$0xff] }
 0x382   : > { %v4772_v29 = vpop.f32.mrf.mxu0 }
 0x383   : > { %10414 = vmatmul.msk.bf16.gmra.mxu1 %vm728_vm0, %v12691_v55  ;;  %10731 = vmatmul.msk.bf16.gmra.mxu2 %vm728_vm0, %v12815_v57  ;;  %v14311_v23 = vadd.f32 %v4769_v1, %v3940_v60  ;;  %v12816_v60 = vld [vmem:[%s13603_s8 + $0x148] sm:$0xff] }
 0x384   : > { %11048 = vmatmul.msk.bf16.gmra.mxu3 %vm728_vm0, %v12877_v36  ;;  %v12692_v36 = vld [vmem:[%s13598_s4 + $0x148] sm:$0xff] }
 0x385   : > { %15653 = vst [vmem:[#allocation14_spill] sm:$0xff] %v14311_v23  ;;  %11365 = vmatmul.msk.bf16.gmra.mxu0 %vm728_vm0, %v12939_v35  ;;  %v12878_v23 = vld [vmem:[%s13608_s11 + $0x148] sm:$0xff] }
 0x386   : > { %v2742_v14 = vpop.f32.mrf.mxu2 }
 0x387   : > { %v2926_v37 = vadd.f32 %v2742_v14, %v1840_v52  ;;  %v3757_v58 = vpop.f32.mrf.mxu3 }
 0x388   : > { %v1841_v43 = vpop.f32.mrf.mxu1 }
 0x389   : > { %v3941_v38 = vadd.f32 %v3757_v58, %v2926_v37  ;;  %v1842_v1 = vadd.f32 %v1841_v43, %v15656_v10 }
 0x38a   : > { %v4774_v24 = vpop.f32.mrf.mxu0 }
 0x38b   : > { %v14316_v53 = vadd.f32 %v4772_v29, %v3941_v38  ;;  %v15658_v29 = vld [vmem:[#allocation22_spill] sm:$0xff] }
 0x38d   : > { %15655 = vst [vmem:[#allocation16_spill] sm:$0xff] %v14316_v53  ;;  %v12941_v53 = vld [vmem:[%s13613_s16 + $0x150] sm:$0xff] }
 0x38e   : > { %v2744_v42 = vpop.f32.mrf.mxu2 }
 0x38f   : > { %v2927_v55 = vadd.f32 %v2744_v42, %v1842_v1  ;;  %v3759_v57 = vpop.f32.mrf.mxu3 }
 0x390   : > { %v1844_v35 = vpop.f32.mrf.mxu1 }
 0x391   : > { %v3942_v32 = vadd.f32 %v3759_v57, %v2927_v55  ;;  %v1845_v14 = vadd.f32 %v1844_v35, %v15658_v29  ;;  %v15660_v55 = vld [vmem:[#allocation24_spill] sm:$0xff] }
 0x392   : > { %v4777_v56 = vpop.f32.mrf.mxu0 }
 0x393   : > { %10415 = vmatmul.msk.bf16.gmra.mxu1 %vm728_vm0, %v12692_v36  ;;  %10732 = vmatmul.msk.bf16.gmra.mxu2 %vm728_vm0, %v12816_v60  ;;  %v14325_v52 = vadd.f32 %v4774_v24, %v3942_v32  ;;  %v12817_v32 = vld [vmem:[%s13603_s8 + $0x150] sm:$0xff] }
 0x394   : > { %11049 = vmatmul.msk.bf16.gmra.mxu3 %vm728_vm0, %v12878_v23  ;;  %v12693_v23 = vld [vmem:[%s13598_s4 + $0x150] sm:$0xff] }
 0x395   : > { %15657 = vst [vmem:[#allocation18_spill] sm:$0xff] %v14325_v52  ;;  %11366 = vmatmul.msk.bf16.gmra.mxu0 %vm728_vm0, %v12940_v40  ;;  %v12879_v52 = vld [vmem:[%s13608_s11 + $0x150] sm:$0xff] }
 0x396   : > { %v2747_v37 = vpop.f32.mrf.mxu2 }
 0x397   : > { %v2928_v58 = vadd.f32 %v2747_v37, %v1845_v14  ;;  %v3762_v43 = vpop.f32.mrf.mxu3 }
 0x398   : > { %v1846_v38 = vpop.f32.mrf.mxu1 }
 0x399   : > { %v3943_v10 = vadd.f32 %v3762_v43, %v2928_v58  ;;  %v1847_v24 = vadd.f32 %v1846_v38, %v15660_v55 }
 0x39a   : > { %v4779_v1 = vpop.f32.mrf.mxu0 }
 0x39b   : > { %v14330_v42 = vadd.f32 %v4777_v56, %v3943_v10  ;;  %v15662_v56 = vld [vmem:[#allocation26_spill] sm:$0xff] }
 0x39d   : > { %15659 = vst [vmem:[#allocation20_spill] sm:$0xff] %v14330_v42  ;;  %v12942_v42 = vld [vmem:[%s13613_s16 + $0x158] sm:$0xff] }
 0x39e   : > { %v2749_v57 = vpop.f32.mrf.mxu2 }
 0x39f   : > { %v2929_v36 = vadd.f32 %v2749_v57, %v1847_v24  ;;  %v3764_v60 = vpop.f32.mrf.mxu3 }
 0x3a0   : > { %v1849_v40 = vpop.f32.mrf.mxu1 }
 0x3a1   : > { %v3944_v35 = vadd.f32 %v3764_v60, %v2929_v36  ;;  %v1850_v37 = vadd.f32 %v1849_v40, %v15662_v56  ;;  %v15664_v36 = vld [vmem:[#allocation28_spill] sm:$0xff] }
 0x3a2   : > { %v4782_v29 = vpop.f32.mrf.mxu0 }
 0x3a3   : > { %10416 = vmatmul.msk.bf16.gmra.mxu1 %vm728_vm0, %v12693_v23  ;;  %10733 = vmatmul.msk.bf16.gmra.mxu2 %vm728_vm0, %v12817_v32  ;;  %v14339_v14 = vadd.f32 %v4779_v1, %v3944_v35  ;;  %v12818_v35 = vld [vmem:[%s13603_s8 + $0x158] sm:$0xff] }
 0x3a4   : > { %11050 = vmatmul.msk.bf16.gmra.mxu3 %vm728_vm0, %v12879_v52  ;;  %v12694_v52 = vld [vmem:[%s13598_s4 + $0x158] sm:$0xff] }
 0x3a5   : > { %15661 = vst [vmem:[#allocation22_spill] sm:$0xff] %v14339_v14  ;;  %11367 = vmatmul.msk.bf16.gmra.mxu0 %vm728_vm0, %v12941_v53  ;;  %v12880_v14 = vld [vmem:[%s13608_s11 + $0x158] sm:$0xff] }
 0x3a6   : > { %v2752_v58 = vpop.f32.mrf.mxu2 }
 0x3a7   : > { %v2930_v43 = vadd.f32 %v2752_v58, %v1850_v37  ;;  %v3767_v38 = vpop.f32.mrf.mxu3 }
 0x3a8   : > { %v1851_v10 = vpop.f32.mrf.mxu1 }
 0x3a9   : > { %v3945_v55 = vadd.f32 %v3767_v38, %v2930_v43  ;;  %v1852_v1 = vadd.f32 %v1851_v10, %v15664_v36 }
 0x3aa   : > { %v4784_v24 = vpop.f32.mrf.mxu0 }
 0x3ab   : > { %v14344_v57 = vadd.f32 %v4782_v29, %v3945_v55  ;;  %v15666_v29 = vld [vmem:[#allocation30_spill] sm:$0xff] }
 0x3ad   : > { %15663 = vst [vmem:[#allocation24_spill] sm:$0xff] %v14344_v57  ;;  %v12943_v57 = vld [vmem:[%s13613_s16 + $0x160] sm:$0xff] }
 0x3ae   : > { %v2754_v60 = vpop.f32.mrf.mxu2 }
 0x3af   : > { %v2931_v23 = vadd.f32 %v2754_v60, %v1852_v1  ;;  %v3769_v32 = vpop.f32.mrf.mxu3 }
 0x3b0   : > { %v1854_v53 = vpop.f32.mrf.mxu1 }
 0x3b1   : > { %v3946_v40 = vadd.f32 %v3769_v32, %v2931_v23  ;;  %v1855_v58 = vadd.f32 %v1854_v53, %v15666_v29  ;;  %v15668_v23 = vld [vmem:[#allocation32_spill] sm:$0xff] }
 0x3b2   : > { %v4787_v56 = vpop.f32.mrf.mxu0 }
 0x3b3   : > { %10417 = vmatmul.msk.bf16.gmra.mxu1 %vm728_vm0, %v12694_v52  ;;  %10734 = vmatmul.msk.bf16.gmra.mxu2 %vm728_vm0, %v12818_v35  ;;  %v14353_v37 = vadd.f32 %v4784_v24, %v3946_v40  ;;  %v12819_v40 = vld [vmem:[%s13603_s8 + $0x160] sm:$0xff] }
 0x3b4   : > { %11051 = vmatmul.msk.bf16.gmra.mxu3 %vm728_vm0, %v12880_v14  ;;  %v12695_v14 = vld [vmem:[%s13598_s4 + $0x160] sm:$0xff] }
 0x3b5   : > { %15665 = vst [vmem:[#allocation26_spill] sm:$0xff] %v14353_v37  ;;  %11368 = vmatmul.msk.bf16.gmra.mxu0 %vm728_vm0, %v12942_v42  ;;  %v12881_v37 = vld [vmem:[%s13608_s11 + $0x160] sm:$0xff] }
 0x3b6   : > { %v2757_v43 = vpop.f32.mrf.mxu2 }
 0x3b7   : > { %v2932_v38 = vadd.f32 %v2757_v43, %v1855_v58  ;;  %v3772_v10 = vpop.f32.mrf.mxu3 }
 0x3b8   : > { %v1856_v55 = vpop.f32.mrf.mxu1 }
 0x3b9   : > { %v3947_v36 = vadd.f32 %v3772_v10, %v2932_v38  ;;  %v1857_v24 = vadd.f32 %v1856_v55, %v15668_v23 }
 0x3ba   : > { %v4789_v1 = vpop.f32.mrf.mxu0 }
 0x3bb   : > { %v14358_v60 = vadd.f32 %v4787_v56, %v3947_v36  ;;  %v15670_v56 = vld [vmem:[#allocation35_spill] sm:$0xff] }
 0x3bd   : > { %15667 = vst [vmem:[#allocation28_spill] sm:$0xff] %v14358_v60  ;;  %v12944_v60 = vld [vmem:[%s13613_s16 + $0x168] sm:$0xff] }
 0x3be   : > { %v2759_v32 = vpop.f32.mrf.mxu2 }
 0x3bf   : > { %v2933_v52 = vadd.f32 %v2759_v32, %v1857_v24  ;;  %v3774_v35 = vpop.f32.mrf.mxu3 }
 0x3c0   : > { %v1859_v42 = vpop.f32.mrf.mxu1 }
 0x3c1   : > { %v3948_v53 = vadd.f32 %v3774_v35, %v2933_v52  ;;  %v1860_v43 = vadd.f32 %v1859_v42, %v15670_v56  ;;  %v15672_v52 = vld [vmem:[#allocation38_spill] sm:$0xff] }
 0x3c2   : > { %v4792_v29 = vpop.f32.mrf.mxu0 }
 0x3c3   : > { %10418 = vmatmul.msk.bf16.gmra.mxu1 %vm728_vm0, %v12695_v14  ;;  %10735 = vmatmul.msk.bf16.gmra.mxu2 %vm728_vm0, %v12819_v40  ;;  %v14367_v58 = vadd.f32 %v4789_v1, %v3948_v53  ;;  %v12820_v53 = vld [vmem:[%s13603_s8 + $0x168] sm:$0xff] }
 0x3c4   : > { %11052 = vmatmul.msk.bf16.gmra.mxu3 %vm728_vm0, %v12881_v37  ;;  %v12696_v37 = vld [vmem:[%s13598_s4 + $0x168] sm:$0xff] }
 0x3c5   : > { %15669 = vst [vmem:[#allocation30_spill] sm:$0xff] %v14367_v58  ;;  %11369 = vmatmul.msk.bf16.gmra.mxu0 %vm728_vm0, %v12943_v57  ;;  %v12882_v58 = vld [vmem:[%s13608_s11 + $0x168] sm:$0xff] }
 0x3c6   : > { %v2762_v38 = vpop.f32.mrf.mxu2 }
 0x3c7   : > { %v2934_v10 = vadd.f32 %v2762_v38, %v1860_v43  ;;  %v3777_v55 = vpop.f32.mrf.mxu3  ;;  %v13079_v43 = vld [vmem:[%s15542_s1 + $0x120] sm:$0xff]  ;;  %v13017_v38 = vld [vmem:[%s15542_s1 + $0xf0] sm:$0xff] }
 0x3c8   : > { %v1861_v36 = vpop.f32.mrf.mxu1  ;;  %6640 = vmatpush.bf16.msra.mxu2 %v13079_v43  ;;  %5625 = vmatpush.bf16.msra.mxu1 %v13017_v38  ;;  %v12697_v43 = vld [vmem:[%s13598_s4 + $0x170] sm:$0xff] }
 0x3c9   : > { %v3949_v23 = vadd.f32 %v3777_v55, %v2934_v10  ;;  %v1862_v1 = vadd.f32 %v1861_v36, %v15672_v52  ;;  %v15674_v55 = vld [vmem:[#allocation41_spill] sm:$0xff] }
 0x3ca   : > { %v4794_v24 = vpop.f32.mrf.mxu0 }
 0x3cb   : > { %v14372_v32 = vadd.f32 %v4792_v29, %v3949_v23  ;;  %v13141_v29 = vld [vmem:[%s15542_s1 + $0x150] sm:$0xff] }
 0x3cc   : > { %7655 = vmatpush.bf16.msra.mxu3 %v13141_v29  ;;  %v12821_v29 = vld [vmem:[%s13603_s8 + $0x170] sm:$0xff] }
 0x3cd   : > { %15671 = vst [vmem:[#allocation32_spill] sm:$0xff] %v14372_v32  ;;  %v12946_v32 = vld [vmem:[%s13613_s16 + $0x178] sm:$0xff] }
 0x3ce   : > { %v2764_v35 = vpop.f32.mrf.mxu2 }
 0x3cf   : > { %v2935_v14 = vadd.f32 %v2764_v35, %v1862_v1  ;;  %v3779_v40 = vpop.f32.mrf.mxu3 }
 0x3d0   : > { %v1864_v57 = vpop.f32.mrf.mxu1 }
 0x3d1   : > { %v3950_v42 = vadd.f32 %v3779_v40, %v2935_v14  ;;  %v1865_v36 = vadd.f32 %v1864_v57, %v15674_v55  ;;  %v15676_v40 = vld [vmem:[#allocation44_spill] sm:$0xff] }
 0x3d2   : > { %v4797_v56 = vpop.f32.mrf.mxu0  ;;  %v12883_v55 = vld [vmem:[%s13608_s11 + $0x170] sm:$0xff] }
 0x3d3   : > { %10419 = vmatmul.msk.bf16.gmra.mxu1 %vm728_vm0, %v12696_v37  ;;  %10736 = vmatmul.msk.bf16.gmra.mxu2 %vm728_vm0, %v12820_v53  ;;  %v14390_v10 = vadd.f32 %v4794_v24, %v3950_v42 }
 0x3d4   : > { %11053 = vmatmul.msk.bf16.gmra.mxu3 %vm728_vm0, %v12882_v58  ;;  %v13203_v58 = vld [vmem:[%s15542_s1 + $0x180] sm:$0xff] }
 0x3d5   : > { %15673 = vst [vmem:[#allocation35_spill] sm:$0xff] %v14390_v10  ;;  %11370 = vmatmul.msk.bf16.gmra.mxu0 %vm728_vm0, %v12944_v60  ;;  %v12884_v10 = vld [vmem:[%s13608_s11 + $0x178] sm:$0xff] }
 0x3d6   : > { %v2767_v23 = vpop.f32.mrf.mxu2  ;;  %8670 = vmatpush.bf16.msra.mxu0 %v13203_v58 }
 0x3d7   : > { %v2936_v52 = vadd.f32 %v2767_v23, %v1865_v36  ;;  %v3782_v1 = vpop.f32.mrf.mxu3  ;;  %v12945_v36 = vld [vmem:[%s13613_s16 + $0x170] sm:$0xff] }
 0x3d8   : > { %v1866_v35 = vpop.f32.mrf.mxu1 }
 0x3d9   : > { %v3951_v14 = vadd.f32 %v3782_v1, %v2936_v52  ;;  %v1867_v37 = vadd.f32 %v1866_v35, %v15676_v40 }
 0x3da   : > { %v4799_v24 = vpop.f32.mrf.mxu0 }
 0x3db   : > { %v14398_v60 = vadd.f32 %v4797_v56, %v3951_v14  ;;  %v15678_v56 = vld [vmem:[#allocation47_spill] sm:$0xff] }
 0x3dd   : > { %15675 = vst [vmem:[#allocation38_spill] sm:$0xff] %v14398_v60  ;;  %v12822_v60 = vld [vmem:[%s13603_s8 + $0x178] sm:$0xff] }
 0x3de   : > { %v2769_v53 = vpop.f32.mrf.mxu2 }
 0x3df   : > { %v2937_v57 = vadd.f32 %v2769_v53, %v1867_v37  ;;  %v3784_v42 = vpop.f32.mrf.mxu3 }
 0x3e0   : > { %v1869_v38 = vpop.f32.mrf.mxu1 }
 0x3e1   : > { %v3952_v23 = vadd.f32 %v3784_v42, %v2937_v57  ;;  %v1870_v35 = vadd.f32 %v1869_v38, %v15678_v56 }
 0x3e2   : > { %v4802_v52 = vpop.f32.mrf.mxu0 }
 0x3e3   : > { %10420 = vmatmul.msk.bf16.gmra.mxu1 %vm728_vm0, %v12697_v43  ;;  %10737 = vmatmul.msk.bf16.gmra.mxu2 %vm728_vm0, %v12821_v29  ;;  %v14407_v1 = vadd.f32 %v4799_v24, %v3952_v23  ;;  %v15680_v43 = vld [vmem:[#allocation50_spill] sm:$0xff] }
 0x3e4   : > { %11054 = vmatmul.msk.bf16.gmra.mxu3 %vm728_vm0, %v12883_v55  ;;  %v12698_v55 = vld [vmem:[%s13598_s4 + $0x178] sm:$0xff] }
 0x3e5   : > { %15677 = vst [vmem:[#allocation41_spill] sm:$0xff] %v14407_v1  ;;  %11371 = vmatmul.msk.bf16.gmra.mxu0 %vm728_vm0, %v12945_v36 }
 0x3e6   : > { %v2772_v14 = vpop.f32.mrf.mxu2 }
 0x3e7   : > { %v2938_v58 = vadd.f32 %v2772_v14, %v1870_v35  ;;  %v3787_v40 = vpop.f32.mrf.mxu3 }
 0x3e8   : > { %v1871_v37 = vpop.f32.mrf.mxu1 }
 0x3e9   : > { %v3953_v53 = vadd.f32 %v3787_v40, %v2938_v58  ;;  %v1872_v24 = vadd.f32 %v1871_v37, %v15680_v43 }
 0x3ea   : > { %v4804_v57 = vpop.f32.mrf.mxu0 }
 0x3eb   : > { %v14412_v42 = vadd.f32 %v4802_v52, %v3953_v53  ;;  %v15682_v52 = vld [vmem:[#allocation53_spill] sm:$0xff] }
 0x3ed   : > { %15679 = vst [vmem:[#allocation44_spill] sm:$0xff] %v14412_v42  ;;  %v12947_v42 = vld [vmem:[%s13613_s16 + $0x180] sm:$0xff] }
 0x3ee   : > { %v2774_v29 = vpop.f32.mrf.mxu2 }
 0x3ef   : > { %v2939_v23 = vadd.f32 %v2774_v29, %v1872_v24  ;;  %v3789_v1 = vpop.f32.mrf.mxu3 }
 0x3f0   : > { %v1874_v36 = vpop.f32.mrf.mxu1 }
 0x3f1   : > { %v3954_v38 = vadd.f32 %v3789_v1, %v2939_v23  ;;  %v1875_v14 = vadd.f32 %v1874_v36, %v15682_v52 }
 0x3f2   : > { %v4807_v56 = vpop.f32.mrf.mxu0 }
 0x3f3   : > { %10421 = vmatmul.msk.bf16.gmra.mxu1 %vm728_vm0, %v12698_v55  ;;  %10738 = vmatmul.msk.bf16.gmra.mxu2 %vm728_vm0, %v12822_v60  ;;  %v14421_v35 = vadd.f32 %v4804_v57, %v3954_v38  ;;  %v15684_v60 = vld [vmem:[#allocation56_spill] sm:$0xff]  ;;  %v12823_v38 = vld [vmem:[%s13603_s8 + $0x180] sm:$0xff] }
 0x3f4   : > { %11055 = vmatmul.msk.bf16.gmra.mxu3 %vm728_vm0, %v12884_v10  ;;  %v12699_v10 = vld [vmem:[%s13598_s4 + $0x180] sm:$0xff] }
 0x3f5   : > { %15681 = vst [vmem:[#allocation47_spill] sm:$0xff] %v14421_v35  ;;  %11372 = vmatmul.msk.bf16.gmra.mxu0 %vm728_vm0, %v12946_v32  ;;  %v12885_v35 = vld [vmem:[%s13608_s11 + $0x180] sm:$0xff] }
 0x3f6   : > { %v2777_v58 = vpop.f32.mrf.mxu2 }
 0x3f7   : > { %v2940_v40 = vadd.f32 %v2777_v58, %v1875_v14  ;;  %v3792_v1 = vpop.f32.mrf.mxu3 }
 0x3f8   : > { %v1876_v37 = vpop.f32.mrf.mxu1 }
 0x3f9   : > { %v3955_v53 = vadd.f32 %v3792_v1, %v2940_v40  ;;  %v1877_v57 = vadd.f32 %v1876_v37, %v15684_v60 }
 0x3fa   : > { %v4809_v43 = vpop.f32.mrf.mxu0 }
 0x3fb   : > { %v14426_v24 = vadd.f32 %v4807_v56, %v3955_v53  ;;  %v15686_v56 = vld [vmem:[#allocation59_spill] sm:$0xff] }
 0x3fd   : > { %15683 = vst [vmem:[#allocation50_spill] sm:$0xff] %v14426_v24  ;;  %v12948_v24 = vld [vmem:[%s13613_s16 + $0x188] sm:$0xff] }
 0x3fe   : > { %v2779_v29 = vpop.f32.mrf.mxu2 }
 0x3ff   : > { %v2941_v23 = vadd.f32 %v2779_v29, %v1877_v57  ;;  %v3794_v55 = vpop.f32.mrf.mxu3 }
 0x400   : > { %v1879_v32 = vpop.f32.mrf.mxu1 }
 0x401   : > { %v3956_v36 = vadd.f32 %v3794_v55, %v2941_v23  ;;  %v1880_v58 = vadd.f32 %v1879_v32, %v15686_v56  ;;  %v15688_v23 = vld [vmem:[#allocation62_spill] sm:$0xff] }
 0x402   : > { %v4812_v52 = vpop.f32.mrf.mxu0 }
 0x403   : > { %10422 = vmatmul.msk.bf16.gmra.mxu1 %vm728_vm0, %v12699_v10  ;;  %10739 = vmatmul.msk.bf16.gmra.mxu2 %vm728_vm0, %v12823_v38  ;;  %v14435_v14 = vadd.f32 %v4809_v43, %v3956_v36  ;;  %v12824_v36 = vld [vmem:[%s13603_s8 + $0x188] sm:$0xff] }
 0x404   : > { %11056 = vmatmul.msk.bf16.gmra.mxu3 %vm728_vm0, %v12885_v35  ;;  %v12700_v35 = vld [vmem:[%s13598_s4 + $0x188] sm:$0xff] }
 0x405   : > { %15685 = vst [vmem:[#allocation53_spill] sm:$0xff] %v14435_v14  ;;  %11373 = vmatmul.msk.bf16.gmra.mxu0 %vm728_vm0, %v12947_v42  ;;  %v12886_v14 = vld [vmem:[%s13608_s11 + $0x188] sm:$0xff] }
 0x406   : > { %v2782_v40 = vpop.f32.mrf.mxu2 }
 0x407   : > { %v2942_v1 = vadd.f32 %v2782_v40, %v1880_v58  ;;  %v3797_v37 = vpop.f32.mrf.mxu3 }
 0x408   : > { %v1881_v53 = vpop.f32.mrf.mxu1 }
 0x409   : > { %v3957_v60 = vadd.f32 %v3797_v37, %v2942_v1  ;;  %v1882_v43 = vadd.f32 %v1881_v53, %v15688_v23 }
 0x40a   : > { %v4814_v57 = vpop.f32.mrf.mxu0 }
 0x40b   : > { %v14440_v29 = vadd.f32 %v4812_v52, %v3957_v60  ;;  %v15690_v52 = vld [vmem:[#allocation65_spill] sm:$0xff] }
 0x40d   : > { %15687 = vst [vmem:[#allocation56_spill] sm:$0xff] %v14440_v29  ;;  %v12949_v29 = vld [vmem:[%s13613_s16 + $0x190] sm:$0xff] }
 0x40e   : > { %v2784_v55 = vpop.f32.mrf.mxu2 }
 0x40f   : > { %v2943_v10 = vadd.f32 %v2784_v55, %v1882_v43  ;;  %v3799_v38 = vpop.f32.mrf.mxu3 }
 0x410   : > { %v1884_v42 = vpop.f32.mrf.mxu1 }
 0x411   : > { %v3958_v32 = vadd.f32 %v3799_v38, %v2943_v10  ;;  %v1885_v40 = vadd.f32 %v1884_v42, %v15690_v52  ;;  %v15692_v10 = vld [vmem:[#allocation68_spill] sm:$0xff] }
 0x412   : > { %v4817_v56 = vpop.f32.mrf.mxu0 }
 0x413   : > { %10423 = vmatmul.msk.bf16.gmra.mxu1 %vm728_vm0, %v12700_v35  ;;  %10740 = vmatmul.msk.bf16.gmra.mxu2 %vm728_vm0, %v12824_v36  ;;  %v14449_v58 = vadd.f32 %v4814_v57, %v3958_v32  ;;  %v12825_v32 = vld [vmem:[%s13603_s8 + $0x190] sm:$0xff] }
 0x414   : > { %11057 = vmatmul.msk.bf16.gmra.mxu3 %vm728_vm0, %v12886_v14  ;;  %v12701_v14 = vld [vmem:[%s13598_s4 + $0x190] sm:$0xff] }
 0x415   : > { %15689 = vst [vmem:[#allocation59_spill] sm:$0xff] %v14449_v58  ;;  %11374 = vmatmul.msk.bf16.gmra.mxu0 %vm728_vm0, %v12948_v24  ;;  %v12887_v58 = vld [vmem:[%s13608_s11 + $0x190] sm:$0xff] }
 0x416   : > { %v2787_v1 = vpop.f32.mrf.mxu2 }
 0x417   : > { %v2944_v37 = vadd.f32 %v2787_v1, %v1885_v40  ;;  %v3802_v53 = vpop.f32.mrf.mxu3 }
 0x418   : > { %v1886_v60 = vpop.f32.mrf.mxu1 }
 0x419   : > { %v3959_v23 = vadd.f32 %v3802_v53, %v2944_v37  ;;  %v1887_v57 = vadd.f32 %v1886_v60, %v15692_v10 }
 0x41a   : > { %v4819_v43 = vpop.f32.mrf.mxu0 }
 0x41b   : > { %v14454_v55 = vadd.f32 %v4817_v56, %v3959_v23  ;;  %v15694_v56 = vld [vmem:[#allocation3_spill] sm:$0xff] }
 0x41d   : > { %15691 = vst [vmem:[#allocation62_spill] sm:$0xff] %v14454_v55  ;;  %v12950_v55 = vld [vmem:[%s13613_s16 + $0x198] sm:$0xff] }
 0x41e   : > { %v2789_v38 = vpop.f32.mrf.mxu2 }
 0x41f   : > { %v2945_v35 = vadd.f32 %v2789_v38, %v1887_v57  ;;  %v3804_v36 = vpop.f32.mrf.mxu3 }
 0x420   : > { %v1889_v24 = vpop.f32.mrf.mxu1 }
 0x421   : > { %v3960_v42 = vadd.f32 %v3804_v36, %v2945_v35  ;;  %v1890_v1 = vadd.f32 %v1889_v24, %v15694_v56  ;;  %v15696_v35 = vld [vmem:[#allocation5_spill] sm:$0xff] }
 0x422   : > { %v4822_v52 = vpop.f32.mrf.mxu0 }
 0x423   : > { %10424 = vmatmul.msk.bf16.gmra.mxu1 %vm728_vm0, %v12701_v14  ;;  %10741 = vmatmul.msk.bf16.gmra.mxu2 %vm728_vm0, %v12825_v32  ;;  %v14463_v40 = vadd.f32 %v4819_v43, %v3960_v42  ;;  %v12826_v42 = vld [vmem:[%s13603_s8 + $0x198] sm:$0xff] }
 0x424   : > { %11058 = vmatmul.msk.bf16.gmra.mxu3 %vm728_vm0, %v12887_v58  ;;  %v12702_v58 = vld [vmem:[%s13598_s4 + $0x198] sm:$0xff] }
 0x425   : > { %15693 = vst [vmem:[#allocation65_spill] sm:$0xff] %v14463_v40  ;;  %11375 = vmatmul.msk.bf16.gmra.mxu0 %vm728_vm0, %v12949_v29  ;;  %v12888_v40 = vld [vmem:[%s13608_s11 + $0x198] sm:$0xff] }
 0x426   : > { %v2792_v37 = vpop.f32.mrf.mxu2 }
 0x427   : > { %v2946_v53 = vadd.f32 %v2792_v37, %v1890_v1  ;;  %v3807_v60 = vpop.f32.mrf.mxu3 }
 0x428   : > { %v1891_v23 = vpop.f32.mrf.mxu1 }
 0x429   : > { %v3961_v10 = vadd.f32 %v3807_v60, %v2946_v53  ;;  %v1892_v43 = vadd.f32 %v1891_v23, %v15696_v35 }
 0x42a   : > { %v4824_v57 = vpop.f32.mrf.mxu0 }
 0x42b   : > { %v14468_v38 = vadd.f32 %v4822_v52, %v3961_v10  ;;  %v15698_v52 = vld [vmem:[#allocation7_spill] sm:$0xff] }
 0x42d   : > { %15695 = vst [vmem:[#allocation68_spill] sm:$0xff] %v14468_v38  ;;  %v12951_v38 = vld [vmem:[%s13613_s16 + $0x1a0] sm:$0xff] }
 0x42e   : > { %v2794_v36 = vpop.f32.mrf.mxu2 }
 0x42f   : > { %v2947_v14 = vadd.f32 %v2794_v36, %v1892_v43  ;;  %v3809_v32 = vpop.f32.mrf.mxu3 }
 0x430   : > { %v1894_v29 = vpop.f32.mrf.mxu1 }
 0x431   : > { %v3962_v24 = vadd.f32 %v3809_v32, %v2947_v14  ;;  %v1895_v37 = vadd.f32 %v1894_v29, %v15698_v52  ;;  %v15700_v14 = vld [vmem:[#allocation9_spill] sm:$0xff] }
 0x432   : > { %v4827_v56 = vpop.f32.mrf.mxu0 }
 0x433   : > { %10425 = vmatmul.msk.bf16.gmra.mxu1 %vm728_vm0, %v12702_v58  ;;  %10742 = vmatmul.msk.bf16.gmra.mxu2 %vm728_vm0, %v12826_v42  ;;  %v14477_v1 = vadd.f32 %v4824_v57, %v3962_v24  ;;  %v12827_v24 = vld [vmem:[%s13603_s8 + $0x1a0] sm:$0xff] }
 0x434   : > { %11059 = vmatmul.msk.bf16.gmra.mxu3 %vm728_vm0, %v12888_v40  ;;  %v12703_v40 = vld [vmem:[%s13598_s4 + $0x1a0] sm:$0xff] }
 0x435   : > { %15697 = vst [vmem:[#allocation3_spill] sm:$0xff] %v14477_v1  ;;  %11376 = vmatmul.msk.bf16.gmra.mxu0 %vm728_vm0, %v12950_v55  ;;  %v12889_v1 = vld [vmem:[%s13608_s11 + $0x1a0] sm:$0xff] }
 0x436   : > { %v2797_v53 = vpop.f32.mrf.mxu2 }
 0x437   : > { %v2948_v60 = vadd.f32 %v2797_v53, %v1895_v37  ;;  %v3812_v23 = vpop.f32.mrf.mxu3 }
 0x438   : > { %v1896_v10 = vpop.f32.mrf.mxu1 }
 0x439   : > { %v3963_v35 = vadd.f32 %v3812_v23, %v2948_v60  ;;  %v1897_v57 = vadd.f32 %v1896_v10, %v15700_v14 }
 0x43a   : > { %v4829_v43 = vpop.f32.mrf.mxu0 }
 0x43b   : > { %v14482_v36 = vadd.f32 %v4827_v56, %v3963_v35  ;;  %v15702_v56 = vld [vmem:[#allocation11_spill] sm:$0xff] }
 0x43d   : > { %15699 = vst [vmem:[#allocation5_spill] sm:$0xff] %v14482_v36  ;;  %v12952_v36 = vld [vmem:[%s13613_s16 + $0x1a8] sm:$0xff] }
 0x43e   : > { %v2799_v32 = vpop.f32.mrf.mxu2 }
 0x43f   : > { %v2949_v58 = vadd.f32 %v2799_v32, %v1897_v57  ;;  %v3814_v42 = vpop.f32.mrf.mxu3 }
 0x440   : > { %v1899_v55 = vpop.f32.mrf.mxu1 }
 0x441   : > { %v3964_v29 = vadd.f32 %v3814_v42, %v2949_v58  ;;  %v1900_v53 = vadd.f32 %v1899_v55, %v15702_v56  ;;  %v15704_v58 = vld [vmem:[#allocation13_spill] sm:$0xff] }
 0x442   : > { %v4832_v52 = vpop.f32.mrf.mxu0 }
 0x443   : > { %10426 = vmatmul.msk.bf16.gmra.mxu1 %vm728_vm0, %v12703_v40  ;;  %10743 = vmatmul.msk.bf16.gmra.mxu2 %vm728_vm0, %v12827_v24  ;;  %v14491_v37 = vadd.f32 %v4829_v43, %v3964_v29  ;;  %v12828_v29 = vld [vmem:[%s13603_s8 + $0x1a8] sm:$0xff] }
 0x444   : > { %11060 = vmatmul.msk.bf16.gmra.mxu3 %vm728_vm0, %v12889_v1  ;;  %v12704_v1 = vld [vmem:[%s13598_s4 + $0x1a8] sm:$0xff] }
 0x445   : > { %15701 = vst [vmem:[#allocation7_spill] sm:$0xff] %v14491_v37  ;;  %11377 = vmatmul.msk.bf16.gmra.mxu0 %vm728_vm0, %v12951_v38  ;;  %v12890_v37 = vld [vmem:[%s13608_s11 + $0x1a8] sm:$0xff] }
 0x446   : > { %v2802_v60 = vpop.f32.mrf.mxu2 }
 0x447   : > { %v2950_v23 = vadd.f32 %v2802_v60, %v1900_v53  ;;  %v3817_v10 = vpop.f32.mrf.mxu3 }
 0x448   : > { %v1901_v35 = vpop.f32.mrf.mxu1 }
 0x449   : > { %v3965_v14 = vadd.f32 %v3817_v10, %v2950_v23  ;;  %v1902_v43 = vadd.f32 %v1901_v35, %v15704_v58 }
 0x44a   : > { %v4834_v57 = vpop.f32.mrf.mxu0 }
 0x44b   : > { %v14496_v32 = vadd.f32 %v4832_v52, %v3965_v14  ;;  %v15706_v52 = vld [vmem:[#allocation15_spill] sm:$0xff] }
 0x44d   : > { %15703 = vst [vmem:[#allocation9_spill] sm:$0xff] %v14496_v32  ;;  %v12953_v32 = vld [vmem:[%s13613_s16 + $0x1b0] sm:$0xff] }
 0x44e   : > { %v2804_v42 = vpop.f32.mrf.mxu2 }
 0x44f   : > { %v2951_v40 = vadd.f32 %v2804_v42, %v1902_v43  ;;  %v3819_v24 = vpop.f32.mrf.mxu3 }
 0x450   : > { %v1904_v38 = vpop.f32.mrf.mxu1 }
 0x451   : > { %v3966_v55 = vadd.f32 %v3819_v24, %v2951_v40  ;;  %v1905_v60 = vadd.f32 %v1904_v38, %v15706_v52  ;;  %v15708_v40 = vld [vmem:[#allocation17_spill] sm:$0xff] }
 0x452   : > { %v4837_v56 = vpop.f32.mrf.mxu0 }
 0x453   : > { %10427 = vmatmul.msk.bf16.gmra.mxu1 %vm728_vm0, %v12704_v1  ;;  %10744 = vmatmul.msk.bf16.gmra.mxu2 %vm728_vm0, %v12828_v29  ;;  %v14505_v53 = vadd.f32 %v4834_v57, %v3966_v55  ;;  %v12829_v55 = vld [vmem:[%s13603_s8 + $0x1b0] sm:$0xff] }
 0x454   : > { %11061 = vmatmul.msk.bf16.gmra.mxu3 %vm728_vm0, %v12890_v37  ;;  %v12705_v37 = vld [vmem:[%s13598_s4 + $0x1b0] sm:$0xff] }
 0x455   : > { %15705 = vst [vmem:[#allocation11_spill] sm:$0xff] %v14505_v53  ;;  %11378 = vmatmul.msk.bf16.gmra.mxu0 %vm728_vm0, %v12952_v36  ;;  %v12891_v53 = vld [vmem:[%s13608_s11 + $0x1b0] sm:$0xff] }
 0x456   : > { %v2807_v23 = vpop.f32.mrf.mxu2 }
 0x457   : > { %v2952_v10 = vadd.f32 %v2807_v23, %v1905_v60  ;;  %v3822_v35 = vpop.f32.mrf.mxu3 }
 0x458   : > { %v1906_v14 = vpop.f32.mrf.mxu1 }
 0x459   : > { %v3967_v58 = vadd.f32 %v3822_v35, %v2952_v10  ;;  %v1907_v57 = vadd.f32 %v1906_v14, %v15708_v40 }
 0x45a   : > { %v4839_v43 = vpop.f32.mrf.mxu0 }
 0x45b   : > { %v14510_v42 = vadd.f32 %v4837_v56, %v3967_v58  ;;  %v15710_v56 = vld [vmem:[#allocation19_spill] sm:$0xff] }
 0x45d   : > { %15707 = vst [vmem:[#allocation13_spill] sm:$0xff] %v14510_v42 }
 0x45e   : > { %v2809_v24 = vpop.f32.mrf.mxu2 }
 0x45f   : > { %v2953_v1 = vadd.f32 %v2809_v24, %v1907_v57  ;;  %v3824_v29 = vpop.f32.mrf.mxu3 }
 0x460   : > { %v1909_v36 = vpop.f32.mrf.mxu1 }
 0x461   : > { %v3968_v38 = vadd.f32 %v3824_v29, %v2953_v1  ;;  %v1910_v23 = vadd.f32 %v1909_v36, %v15710_v56  ;;  %v12954_v56 = vld [vmem:[%s13613_s16 + $0x1b8] sm:$0xff]  ;;  %s7035_s16 = sshra.s32 %s7034_s20, 3 }
 0x462   : > { %v4842_v52 = vpop.f32.mrf.mxu0  ;;  %s12015_s5 = sshll.u32 %s7035_s16, 2 }
 0x463   : > { %10428 = vmatmul.msk.bf16.gmra.mxu1 %vm728_vm0, %v12705_v37  ;;  %10745 = vmatmul.msk.bf16.gmra.mxu2 %vm728_vm0, %v12829_v55  ;;  %v14519_v60 = vadd.f32 %v4839_v43, %v3968_v38  ;;  %v15712_v43 = vld [vmem:[#allocation21_spill] sm:$0xff]  ;;  %s14558_s7 = scalar_lea.vmem %s15541_s0, %s12015_s5 }
 0x464   : > { %11062 = vmatmul.msk.bf16.gmra.mxu3 %vm728_vm0, %v12891_v53  ;;  %v12706_v37 = vld [vmem:[%s13598_s4 + $0x1b8] sm:$0xff]  ;;  %s8049_s4 = sadd.s32 480, %s13283_s18 }
 0x465   : > { %15709 = vst [vmem:[#allocation15_spill] sm:$0xff] %v14519_v60  ;;  %11379 = vmatmul.msk.bf16.gmra.mxu0 %vm728_vm0, %v12953_v32  ;;  %v12830_v55 = vld [vmem:[%s13603_s8 + $0x1b8] sm:$0xff]  ;;  %s5005_s8 = sshra.s32 %s5004_s17, 3  ;;  %s8050_s21 = sshra.s32 %s8049_s4, 3  ;;  %v13086_v60 = vld [vmem:[%s14558_s7 + $0x8] sm:$0xff] }
 0x466   : > { %v2812_v10 = vpop.f32.mrf.mxu2  ;;  %v12892_v38 = vld [vmem:[%s13608_s11 + $0x1b8] sm:$0xff]  ;;  %s6020_s11 = sshra.s32 %s6019_s19, 3  ;;  %s11381_s22 = sshll.u32 %s5005_s8, 2 }
 0x467   : > { %v2954_v35 = vadd.f32 %v2812_v10, %v1910_v23  ;;  %v3827_v14 = vpop.f32.mrf.mxu3  ;;  %s11698_s23 = sshll.u32 %s6020_s11, 2  ;;  %s12332_s24 = sshll.u32 %s8050_s21, 2 }
 0x468   : > { %v1911_v58 = vpop.f32.mrf.mxu1  ;;  %s14547_s26 = scalar_lea.vmem %s15541_s0, %s11381_s22  ;;  %s14552_s29 = scalar_lea.vmem %s15541_s0, %s11698_s23 }
 0x469   : > { %v3969_v40 = vadd.f32 %v3827_v14, %v2954_v35  ;;  %v1912_v1 = vadd.f32 %v1911_v58, %v15712_v43  ;;  %v15714_v35 = vld [vmem:[#allocation23_spill] sm:$0xff]  ;;  %s14563_s14 = scalar_lea.vmem %s15541_s0, %s12332_s24  ;;  %s9807_s19 = sshll.u32 %s15816_s15, 2 }
 0x46a   : > { %v4844_v57 = vpop.f32.mrf.mxu0  ;;  %v13148_v42 = vld [vmem:[%s14563_s14 + $0x8] sm:$0xff]  ;;  %s14704_s8 = scalar_lea.vmem %s15544_s3, %s9807_s19 }
 0x46b   : > { %v14524_v24 = vadd.f32 %v4842_v52, %v3969_v40 }
 0x46d   : > { %15711 = vst [vmem:[#allocation17_spill] sm:$0xff] %v14524_v24  ;;  %v13024_v24 = vld [vmem:[%s14552_s29 + $0x8] sm:$0xff] }
 0x46e   : > { %v2814_v29 = vpop.f32.mrf.mxu2 }
 0x46f   : > { %v2955_v53 = vadd.f32 %v2814_v29, %v1912_v1  ;;  %v3829_v32 = vpop.f32.mrf.mxu3 }
 0x470   : > { %v1914_v36 = vpop.f32.mrf.mxu1 }
 0x471   : > { %v3970_v23 = vadd.f32 %v3829_v32, %v2955_v53  ;;  %v1915_v14 = vadd.f32 %v1914_v36, %v15714_v35  ;;  %v15716_v32 = vld [vmem:[#allocation25_spill] sm:$0xff]  ;;  %v13085_v35 = vld [vmem:[%s14558_s7] sm:$0xff] }
 0x472   : > { %v4847_v10 = vpop.f32.mrf.mxu0 }
 0x473   : > { %10429 = vmatmul.msk.bf16.gmra.mxu1 %vm728_vm0, %v12706_v37  ;;  %10746 = vmatmul.msk.bf16.gmra.mxu2 %vm728_vm0, %v12830_v55  ;;  %v14535_v52 = vadd.f32 %v4844_v57, %v3970_v23  ;;  %v13023_v23 = vld [vmem:[%s14552_s29] sm:$0xff] }
 0x474   : > { %11063 = vmatmul.msk.bf16.gmra.mxu3 %vm728_vm0, %v12892_v38 }
 0x475   : > { %15713 = vst [vmem:[#allocation19_spill] sm:$0xff] %v14535_v52  ;;  %11380 = vmatmul.msk.bf16.gmra.mxu0 %vm728_vm0, %v12954_v56  ;;  %v12961_v56 = vld [vmem:[%s14547_s26] sm:$0xff] }
 0x476   : > { %v2817_v58 = vpop.f32.mrf.mxu2 }
 0x477   : > { %v2956_v40 = vadd.f32 %v2817_v58, %v1915_v14  ;;  %v3832_v43 = vpop.f32.mrf.mxu3  ;;  %v13147_v14 = vld [vmem:[%s14563_s14] sm:$0xff] }
 0x478   : > { %v1916_v1 = vpop.f32.mrf.mxu1 }
 0x479   : > { %v3971_v29 = vadd.f32 %v3832_v43, %v2956_v40  ;;  %v1917_v37 = vadd.f32 %v1916_v1, %v15716_v32  ;;  %v15718_v1 = vld [vmem:[#allocation27_spill] sm:$0xff] }
 0x47a   : > { %v4849_v53 = vpop.f32.mrf.mxu0 }
 0x47b   : > { %v14542_v57 = vadd.f32 %v4847_v10, %v3971_v29 }
 0x47d   : > { %15715 = vst [vmem:[#allocation21_spill] sm:$0xff] %v14542_v57 }
 0x47e   : > { %v2819_v55 = vpop.f32.mrf.mxu2 }
 0x47f   : > { %v2957_v36 = vadd.f32 %v2819_v55, %v1917_v37  ;;  %v3834_v38 = vpop.f32.mrf.mxu3 }
 0x480   : > { %v1919_v10 = vpop.f32.mrf.mxu1 }
 0x481   : > { %v3972_v58 = vadd.f32 %v3834_v38, %v2957_v36  ;;  %v1920_v29 = vadd.f32 %v1919_v10, %v15718_v1 }
 0x482   : > { %v4852_v40 = vpop.f32.mrf.mxu0 }
 0x483   : > { %11642 = vmatmul.msk.bf16.vlgmr.msra.gmra.mxu1 %vm728_vm0, %v12961_v56  ;;  %11959 = vmatmul.msk.bf16.vlgmr.msra.gmra.mxu2 %vm728_vm0, %v13023_v23  ;;  %v14571_v43 = vadd.f32 %v4849_v53, %v3972_v58  ;;  %v15720_v23 = vld [vmem:[#allocation29_spill] sm:$0xff] }
 0x484   : > { %12276 = vmatmul.msk.bf16.vlgmr.msra.gmra.mxu3 %vm728_vm0, %v13085_v35  ;;  %v12962_v35 = vld [vmem:[%s14547_s26 + $0x8] sm:$0xff] }
 0x485   : > { %15717 = vst [vmem:[#allocation23_spill] sm:$0xff] %v14571_v43  ;;  %12593 = vmatmul.msk.bf16.vlgmr.msra.gmra.mxu0 %vm728_vm0, %v13147_v14 }
 0x486   : > { %v2822_v32 = vpop.f32.mrf.mxu2 }
 0x487   : > { %v2958_v37 = vadd.f32 %v2822_v32, %v1920_v29  ;;  %v3837_v55 = vpop.f32.mrf.mxu3 }
 0x488   : > { %v1921_v36 = vpop.f32.mrf.mxu1 }
 0x489   : > { %v3973_v38 = vadd.f32 %v3837_v55, %v2958_v37  ;;  %v1922_v53 = vadd.f32 %v1921_v36, %v15720_v23 }
 0x48a   : > { %v4854_v56 = vpop.f32.mrf.mxu0 }
 0x48b   : > { %v14576_v57 = vadd.f32 %v4852_v40, %v3973_v38  ;;  %v15722_v40 = vld [vmem:[#allocation31_spill] sm:$0xff] }
 0x48d   : > { %15719 = vst [vmem:[#allocation25_spill] sm:$0xff] %v14576_v57  ;;  %v13149_v57 = vld [vmem:[%s14563_s14 + $0x10] sm:$0xff] }
 0x48e   : > { %v2824_v58 = vpop.f32.mrf.mxu2 }
 0x48f   : > { %v2959_v43 = vadd.f32 %v2824_v58, %v1922_v53  ;;  %v3839_v52 = vpop.f32.mrf.mxu3 }
 0x490   : > { %v1924_v14 = vpop.f32.mrf.mxu1 }
 0x491   : > { %v3974_v10 = vadd.f32 %v3839_v52, %v2959_v43  ;;  %v1925_v32 = vadd.f32 %v1924_v14, %v15722_v40 }
 0x492   : > { %v4857_v1 = vpop.f32.mrf.mxu0 }
 0x493   : > { %11643 = vmatmul.msk.bf16.gmra.mxu1 %vm728_vm0, %v12962_v35  ;;  %11960 = vmatmul.msk.bf16.gmra.mxu2 %vm728_vm0, %v13024_v24  ;;  %v14585_v29 = vadd.f32 %v4854_v56, %v3974_v10  ;;  %v15724_v24 = vld [vmem:[#allocation33_spill] sm:$0xff]  ;;  %v13025_v10 = vld [vmem:[%s14552_s29 + $0x10] sm:$0xff] }
 0x494   : > { %12277 = vmatmul.msk.bf16.gmra.mxu3 %vm728_vm0, %v13086_v60  ;;  %v12963_v60 = vld [vmem:[%s14547_s26 + $0x10] sm:$0xff] }
 0x495   : > { %15721 = vst [vmem:[#allocation27_spill] sm:$0xff] %v14585_v29  ;;  %12594 = vmatmul.msk.bf16.gmra.mxu0 %vm728_vm0, %v13148_v42  ;;  %v13087_v29 = vld [vmem:[%s14558_s7 + $0x10] sm:$0xff] }
 0x496   : > { %v2827_v37 = vpop.f32.mrf.mxu2 }
 0x497   : > { %v2960_v55 = vadd.f32 %v2827_v37, %v1925_v32  ;;  %v3842_v52 = vpop.f32.mrf.mxu3 }
 0x498   : > { %v1926_v43 = vpop.f32.mrf.mxu1 }
 0x499   : > { %v3975_v36 = vadd.f32 %v3842_v52, %v2960_v55  ;;  %v1927_v56 = vadd.f32 %v1926_v43, %v15724_v24 }
 0x49a   : > { %v4859_v38 = vpop.f32.mrf.mxu0 }
 0x49b   : > { %v14590_v23 = vadd.f32 %v4857_v1, %v3975_v36  ;;  %v15726_v1 = vld [vmem:[#allocation36_spill] sm:$0xff] }
 0x49d   : > { %15723 = vst [vmem:[#allocation29_spill] sm:$0xff] %v14590_v23  ;;  %v13150_v23 = vld [vmem:[%s14563_s14 + $0x18] sm:$0xff] }
 0x49e   : > { %v2829_v53 = vpop.f32.mrf.mxu2 }
 0x49f   : > { %v2961_v58 = vadd.f32 %v2829_v53, %v1927_v56  ;;  %v3844_v35 = vpop.f32.mrf.mxu3 }
 0x4a0   : > { %v1929_v42 = vpop.f32.mrf.mxu1 }
 0x4a1   : > { %v3976_v14 = vadd.f32 %v3844_v35, %v2961_v58  ;;  %v1930_v37 = vadd.f32 %v1929_v42, %v15726_v1  ;;  %v15728_v58 = vld [vmem:[#allocation39_spill] sm:$0xff] }
 0x4a2   : > { %v4862_v40 = vpop.f32.mrf.mxu0 }
 0x4a3   : > { %11644 = vmatmul.msk.bf16.gmra.mxu1 %vm728_vm0, %v12963_v60  ;;  %11961 = vmatmul.msk.bf16.gmra.mxu2 %vm728_vm0, %v13025_v10  ;;  %v14599_v32 = vadd.f32 %v4859_v38, %v3976_v14  ;;  %v13026_v14 = vld [vmem:[%s14552_s29 + $0x18] sm:$0xff] }
 0x4a4   : > { %12278 = vmatmul.msk.bf16.gmra.mxu3 %vm728_vm0, %v13087_v29  ;;  %v12964_v29 = vld [vmem:[%s14547_s26 + $0x18] sm:$0xff] }
 0x4a5   : > { %15725 = vst [vmem:[#allocation31_spill] sm:$0xff] %v14599_v32  ;;  %12595 = vmatmul.msk.bf16.gmra.mxu0 %vm728_vm0, %v13149_v57  ;;  %v13088_v32 = vld [vmem:[%s14558_s7 + $0x18] sm:$0xff] }
 0x4a6   : > { %v2832_v55 = vpop.f32.mrf.mxu2 }
 0x4a7   : > { %v2962_v52 = vadd.f32 %v2832_v55, %v1930_v37  ;;  %v3847_v43 = vpop.f32.mrf.mxu3 }
 0x4a8   : > { %v1931_v36 = vpop.f32.mrf.mxu1 }
 0x4a9   : > { %v3977_v24 = vadd.f32 %v3847_v43, %v2962_v52  ;;  %v1932_v38 = vadd.f32 %v1931_v36, %v15728_v58 }
 0x4aa   : > { %v4864_v56 = vpop.f32.mrf.mxu0 }
 0x4ab   : > { %v14604_v53 = vadd.f32 %v4862_v40, %v3977_v24  ;;  %v15730_v40 = vld [vmem:[#allocation42_spill] sm:$0xff] }
 0x4ad   : > { %15727 = vst [vmem:[#allocation33_spill] sm:$0xff] %v14604_v53  ;;  %v13151_v53 = vld [vmem:[%s14563_s14 + $0x20] sm:$0xff] }
 0x4ae   : > { %v2834_v35 = vpop.f32.mrf.mxu2 }
 0x4af   : > { %v2963_v60 = vadd.f32 %v2834_v35, %v1932_v38  ;;  %v3849_v10 = vpop.f32.mrf.mxu3 }
 0x4b0   : > { %v1934_v57 = vpop.f32.mrf.mxu1 }
 0x4b1   : > { %v3978_v42 = vadd.f32 %v3849_v10, %v2963_v60  ;;  %v1935_v55 = vadd.f32 %v1934_v57, %v15730_v40  ;;  %v15732_v60 = vld [vmem:[#allocation45_spill] sm:$0xff] }
 0x4b2   : > { %v4867_v1 = vpop.f32.mrf.mxu0 }
 0x4b3   : > { %11645 = vmatmul.msk.bf16.gmra.mxu1 %vm728_vm0, %v12964_v29  ;;  %11962 = vmatmul.msk.bf16.gmra.mxu2 %vm728_vm0, %v13026_v14  ;;  %v14613_v37 = vadd.f32 %v4864_v56, %v3978_v42  ;;  %v13027_v42 = vld [vmem:[%s14552_s29 + $0x20] sm:$0xff] }
 0x4b4   : > { %12279 = vmatmul.msk.bf16.gmra.mxu3 %vm728_vm0, %v13088_v32  ;;  %v12965_v32 = vld [vmem:[%s14547_s26 + $0x20] sm:$0xff] }
 0x4b5   : > { %15729 = vst [vmem:[#allocation36_spill] sm:$0xff] %v14613_v37  ;;  %12596 = vmatmul.msk.bf16.gmra.mxu0 %vm728_vm0, %v13150_v23  ;;  %v13089_v37 = vld [vmem:[%s14558_s7 + $0x20] sm:$0xff] }
 0x4b6   : > { %v2837_v52 = vpop.f32.mrf.mxu2 }
 0x4b7   : > { %v2964_v43 = vadd.f32 %v2837_v52, %v1935_v55  ;;  %v3852_v36 = vpop.f32.mrf.mxu3 }
 0x4b8   : > { %v1936_v24 = vpop.f32.mrf.mxu1 }
 0x4b9   : > { %v3979_v58 = vadd.f32 %v3852_v36, %v2964_v43  ;;  %v1937_v56 = vadd.f32 %v1936_v24, %v15732_v60 }
 0x4ba   : > { %v4869_v38 = vpop.f32.mrf.mxu0 }
 0x4bb   : > { %v14618_v35 = vadd.f32 %v4867_v1, %v3979_v58  ;;  %v15734_v1 = vld [vmem:[#allocation48_spill] sm:$0xff] }
 0x4bd   : > { %15731 = vst [vmem:[#allocation39_spill] sm:$0xff] %v14618_v35  ;;  %v13152_v35 = vld [vmem:[%s14563_s14 + $0x28] sm:$0xff] }
 0x4be   : > { %v2839_v10 = vpop.f32.mrf.mxu2 }
 0x4bf   : > { %v2965_v29 = vadd.f32 %v2839_v10, %v1937_v56  ;;  %v3854_v14 = vpop.f32.mrf.mxu3 }
 0x4c0   : > { %v1939_v23 = vpop.f32.mrf.mxu1 }
 0x4c1   : > { %v3980_v57 = vadd.f32 %v3854_v14, %v2965_v29  ;;  %v1940_v52 = vadd.f32 %v1939_v23, %v15734_v1  ;;  %v15736_v29 = vld [vmem:[#allocation51_spill] sm:$0xff] }
 0x4c2   : > { %v4872_v40 = vpop.f32.mrf.mxu0 }
 0x4c3   : > { %11646 = vmatmul.msk.bf16.gmra.mxu1 %vm728_vm0, %v12965_v32  ;;  %11963 = vmatmul.msk.bf16.gmra.mxu2 %vm728_vm0, %v13027_v42  ;;  %v14627_v55 = vadd.f32 %v4869_v38, %v3980_v57  ;;  %v13028_v57 = vld [vmem:[%s14552_s29 + $0x28] sm:$0xff] }
 0x4c4   : > { %12280 = vmatmul.msk.bf16.gmra.mxu3 %vm728_vm0, %v13089_v37  ;;  %v12966_v37 = vld [vmem:[%s14547_s26 + $0x28] sm:$0xff] }
 0x4c5   : > { %15733 = vst [vmem:[#allocation42_spill] sm:$0xff] %v14627_v55  ;;  %12597 = vmatmul.msk.bf16.gmra.mxu0 %vm728_vm0, %v13151_v53  ;;  %v13090_v55 = vld [vmem:[%s14558_s7 + $0x28] sm:$0xff] }
 0x4c6   : > { %v2842_v43 = vpop.f32.mrf.mxu2 }
 0x4c7   : > { %v2966_v36 = vadd.f32 %v2842_v43, %v1940_v52  ;;  %v3857_v24 = vpop.f32.mrf.mxu3 }
 0x4c8   : > { %v1941_v58 = vpop.f32.mrf.mxu1 }
 0x4c9   : > { %v3981_v60 = vadd.f32 %v3857_v24, %v2966_v36  ;;  %v1942_v38 = vadd.f32 %v1941_v58, %v15736_v29 }
 0x4ca   : > { %v4874_v56 = vpop.f32.mrf.mxu0 }
 0x4cb   : > { %v14632_v10 = vadd.f32 %v4872_v40, %v3981_v60  ;;  %v15738_v40 = vld [vmem:[#allocation54_spill] sm:$0xff] }
 0x4cd   : > { %15735 = vst [vmem:[#allocation45_spill] sm:$0xff] %v14632_v10  ;;  %v13153_v10 = vld [vmem:[%s14563_s14 + $0x30] sm:$0xff] }
 0x4ce   : > { %v2844_v14 = vpop.f32.mrf.mxu2 }
 0x4cf   : > { %v2967_v32 = vadd.f32 %v2844_v14, %v1942_v38  ;;  %v3859_v42 = vpop.f32.mrf.mxu3 }
 0x4d0   : > { %v1944_v53 = vpop.f32.mrf.mxu1 }
 0x4d1   : > { %v3982_v23 = vadd.f32 %v3859_v42, %v2967_v32  ;;  %v1945_v43 = vadd.f32 %v1944_v53, %v15738_v40  ;;  %v15740_v32 = vld [vmem:[#allocation57_spill] sm:$0xff] }
 0x4d2   : > { %v4877_v1 = vpop.f32.mrf.mxu0 }
 0x4d3   : > { %11647 = vmatmul.msk.bf16.gmra.mxu1 %vm728_vm0, %v12966_v37  ;;  %11964 = vmatmul.msk.bf16.gmra.mxu2 %vm728_vm0, %v13028_v57  ;;  %v14641_v52 = vadd.f32 %v4874_v56, %v3982_v23  ;;  %v13029_v23 = vld [vmem:[%s14552_s29 + $0x30] sm:$0xff] }
 0x4d4   : > { %12281 = vmatmul.msk.bf16.gmra.mxu3 %vm728_vm0, %v13090_v55  ;;  %v12967_v55 = vld [vmem:[%s14547_s26 + $0x30] sm:$0xff] }
 0x4d5   : > { %15737 = vst [vmem:[#allocation48_spill] sm:$0xff] %v14641_v52  ;;  %12598 = vmatmul.msk.bf16.gmra.mxu0 %vm728_vm0, %v13152_v35  ;;  %v13091_v52 = vld [vmem:[%s14558_s7 + $0x30] sm:$0xff] }
 0x4d6   : > { %v2847_v36 = vpop.f32.mrf.mxu2 }
 0x4d7   : > { %v2968_v24 = vadd.f32 %v2847_v36, %v1945_v43  ;;  %v3862_v58 = vpop.f32.mrf.mxu3 }
 0x4d8   : > { %v1946_v60 = vpop.f32.mrf.mxu1 }
 0x4d9   : > { %v3983_v29 = vadd.f32 %v3862_v58, %v2968_v24  ;;  %v1947_v56 = vadd.f32 %v1946_v60, %v15740_v32 }
 0x4da   : > { %v4879_v38 = vpop.f32.mrf.mxu0 }
 0x4db   : > { %v14646_v14 = vadd.f32 %v4877_v1, %v3983_v29  ;;  %v15742_v1 = vld [vmem:[#allocation60_spill] sm:$0xff] }
 0x4dd   : > { %15739 = vst [vmem:[#allocation51_spill] sm:$0xff] %v14646_v14  ;;  %v13154_v14 = vld [vmem:[%s14563_s14 + $0x38] sm:$0xff] }
 0x4de   : > { %v2849_v42 = vpop.f32.mrf.mxu2 }
 0x4df   : > { %v2969_v37 = vadd.f32 %v2849_v42, %v1947_v56  ;;  %v3864_v57 = vpop.f32.mrf.mxu3 }
 0x4e0   : > { %v1949_v35 = vpop.f32.mrf.mxu1 }
 0x4e1   : > { %v3984_v53 = vadd.f32 %v3864_v57, %v2969_v37  ;;  %v1950_v36 = vadd.f32 %v1949_v35, %v15742_v1  ;;  %v15744_v37 = vld [vmem:[#allocation63_spill] sm:$0xff] }
 0x4e2   : > { %v4882_v40 = vpop.f32.mrf.mxu0 }
 0x4e3   : > { %11648 = vmatmul.msk.bf16.gmra.mxu1 %vm728_vm0, %v12967_v55  ;;  %11965 = vmatmul.msk.bf16.gmra.mxu2 %vm728_vm0, %v13029_v23  ;;  %v14655_v43 = vadd.f32 %v4879_v38, %v3984_v53  ;;  %v13030_v53 = vld [vmem:[%s14552_s29 + $0x38] sm:$0xff] }
 0x4e4   : > { %12282 = vmatmul.msk.bf16.gmra.mxu3 %vm728_vm0, %v13091_v52  ;;  %v12968_v52 = vld [vmem:[%s14547_s26 + $0x38] sm:$0xff] }
 0x4e5   : > { %15741 = vst [vmem:[#allocation54_spill] sm:$0xff] %v14655_v43  ;;  %12599 = vmatmul.msk.bf16.gmra.mxu0 %vm728_vm0, %v13153_v10  ;;  %v13092_v43 = vld [vmem:[%s14558_s7 + $0x38] sm:$0xff] }
 0x4e6   : > { %v2852_v24 = vpop.f32.mrf.mxu2 }
 0x4e7   : > { %v2970_v58 = vadd.f32 %v2852_v24, %v1950_v36  ;;  %v3867_v60 = vpop.f32.mrf.mxu3 }
 0x4e8   : > { %v1951_v29 = vpop.f32.mrf.mxu1 }
 0x4e9   : > { %v3985_v32 = vadd.f32 %v3867_v60, %v2970_v58  ;;  %v1952_v38 = vadd.f32 %v1951_v29, %v15744_v37 }
 0x4ea   : > { %v4884_v56 = vpop.f32.mrf.mxu0 }
 0x4eb   : > { %v14660_v42 = vadd.f32 %v4882_v40, %v3985_v32  ;;  %v15746_v40 = vld [vmem:[#allocation66_spill] sm:$0xff] }
 0x4ed   : > { %15743 = vst [vmem:[#allocation57_spill] sm:$0xff] %v14660_v42 }
 0x4ee   : > { %v2854_v57 = vpop.f32.mrf.mxu2 }
 0x4ef   : > { %v2971_v55 = vadd.f32 %v2854_v57, %v1952_v38  ;;  %v3869_v23 = vpop.f32.mrf.mxu3 }
 0x4f0   : > { %v1954_v10 = vpop.f32.mrf.mxu1 }
 0x4f1   : > { %v3986_v35 = vadd.f32 %v3869_v23, %v2971_v55  ;;  %v1955_v24 = vadd.f32 %v1954_v10, %v15746_v40  ;;  %v13155_v10 = vld [vmem:[%s14563_s14 + $0x40] sm:$0xff] }
 0x4f2   : > { %v4887_v1 = vpop.f32.mrf.mxu0 }
 0x4f3   : > { %11649 = vmatmul.msk.bf16.gmra.mxu1 %vm728_vm0, %v12968_v52  ;;  %11966 = vmatmul.msk.bf16.gmra.mxu2 %vm728_vm0, %v13030_v53  ;;  %v14669_v36 = vadd.f32 %v4884_v56, %v3986_v35  ;;  %v15747_v56 = vld [vmem:[#allocation69_spill] sm:$0xff]  ;;  %v12969_v53 = vld [vmem:[%s14547_s26 + $0x40] sm:$0xff] }
 0x4f4   : > { %12283 = vmatmul.msk.bf16.gmra.mxu3 %vm728_vm0, %v13092_v43 }
 0x4f5   : > { %15745 = vst [vmem:[#allocation60_spill] sm:$0xff] %v14669_v36  ;;  %12600 = vmatmul.msk.bf16.gmra.mxu0 %vm728_vm0, %v13154_v14  ;;  %v13031_v14 = vld [vmem:[%s14552_s29 + $0x40] sm:$0xff] }
 0x4f6   : > { %v2857_v58 = vpop.f32.mrf.mxu2  ;;  %v13093_v36 = vld [vmem:[%s14558_s7 + $0x40] sm:$0xff] }
 0x4f7   : > { %v2972_v60 = vadd.f32 %v2857_v58, %v1955_v24  ;;  %v3872_v29 = vpop.f32.mrf.mxu3 }
 0x4f8   : > { %v1956_v32 = vpop.f32.mrf.mxu1 }
 0x4f9   : > { %v3987_v37 = vadd.f32 %v3872_v29, %v2972_v60  ;;  %v1957_v55 = vadd.f32 %v1956_v32, %v15747_v56 }
 0x4fa   : > { %v4889_v38 = vpop.f32.mrf.mxu0 }
 0x4fb   : > { %v14674_v57 = vadd.f32 %v4887_v1, %v3987_v37 }
 0x4fe   : > { %v2859_v23 = vpop.f32.mrf.mxu2 }
 0x4ff   : > { %v2973_v52 = vadd.f32 %v2859_v23, %v1957_v55  ;;  %v3874_v43 = vpop.f32.mrf.mxu3 }
 0x500   : > { %v5627_v35 = vpop.f32.mrf.mxu1 }
 0x501   : > { %v3988_v40 = vadd.f32 %v3874_v43, %v2973_v52  ;;  %v5907_v24 = vadd.f32 %v5627_v35, %v13832_v46  ;;  %v13032_v35 = vld [vmem:[%s14552_s29 + $0x48] sm:$0xff] }
 0x502   : > { %v8672_v42 = vpop.f32.mrf.mxu0 }
 0x503   : > { %11650 = vmatmul.msk.bf16.gmra.mxu1 %vm728_vm0, %v12969_v53  ;;  %11967 = vmatmul.msk.bf16.gmra.mxu2 %vm728_vm0, %v13031_v14  ;;  %v14685_v1 = vadd.f32 %v4889_v38, %v3988_v40  ;;  %v14693_v38 = vld [vmem:[%s15543_s2] ss:$0 sm:$0xff]  ;;  %v12970_v14 = vld [vmem:[%s14547_s26 + $0x48] sm:$0xff] }
 0x504   : > { %12284 = vmatmul.msk.bf16.gmra.mxu3 %vm728_vm0, %v13093_v36  ;;  %v13094_v40 = vld [vmem:[%s14558_s7 + $0x48] sm:$0xff] }
 0x505   : > { %12601 = vmatmul.msk.bf16.gmra.mxu0 %vm728_vm0, %v13155_v10 }
 0x506   : > { %v6642_v58 = vpop.f32.mrf.mxu2 }
 0x507   : > { %v6922_v60 = vadd.f32 %v6642_v58, %v5907_v24  ;;  %v7657_v29 = vpop.f32.mrf.mxu3  ;;  %v13156_v24 = vld [vmem:[%s14563_s14 + $0x48] sm:$0xff] }
 0x508   : > { %v5629_v32 = vpop.f32.mrf.mxu1 }
 0x509   : > { %v7937_v37 = vadd.f32 %v7657_v29, %v6922_v60  ;;  %v5908_v55 = vadd.f32 %v5629_v32, %v13841_v27 }
 0x50a   : > { %v8674_v36 = vpop.f32.mrf.mxu0 }
 0x50b   : > { %v8952_v56 = vadd.f32 %v8672_v42, %v7937_v37 }
 0x50d   : > { %v9068_v46 = vadd.f32 %v14693_v38, %v8952_v56 }
 0x50e   : > { %v6644_v23 = vpop.f32.mrf.mxu2 }
 0x50f   : > { %vm9180_vm1 = vcmp.ge.f32.partialorder %v9068_v46, 0.0  ;;  %v9292_v52 = vmul.f32 0.1, %v9068_v46  ;;  %v6923_v43 = vadd.f32 %v6644_v23, %v5908_v55  ;;  %v7659_v53 = vpop.f32.mrf.mxu3 }
 0x510   : > { %v5632_v10 = vpop.f32.mrf.mxu1 }
 0x511   : > { %v9404_v42 = vsel %vm9180_vm1, %v9068_v46, %v9292_v52  ;;  %v7938_v27 = vadd.f32 %v7659_v53, %v6923_v43  ;;  %v5909_v37 = vadd.f32 %v5632_v10, %v13846_v16 }
 0x512   : > { %v8677_v58 = vpop.f32.mrf.mxu0  ;;  %v9516_v60 = vpack.c.bf16 %v9404_v42, %v9404_v42 }
 0x513   : > { %v8953_v29 = vadd.f32 %v8674_v36, %v7938_v27  ;;  %11651 = vmatmul.msk.bf16.gmra.mxu1 %vm728_vm0, %v12970_v14  ;;  %11968 = vmatmul.msk.bf16.gmra.mxu2 %vm728_vm0, %v13032_v35 }
 0x514   : > { %9629 = vst.msk [vmem:[%s14704_s8] sm:$0xf] %vm9628_vm2, %v9516_v60  ;;  %12285 = vmatmul.msk.bf16.gmra.mxu3 %vm728_vm0, %v13094_v40  ;;  %v12971_v60 = vld [vmem:[%s14547_s26 + $0x50] sm:$0xff] }
 0x515   : > { %12602 = vmatmul.msk.bf16.gmra.mxu0 %vm728_vm0, %v13156_v24  ;;  %v9069_v32 = vadd.f32 %v14693_v38, %v8953_v29  ;;  %v13033_v29 = vld [vmem:[%s14552_s29 + $0x50] sm:$0xff] }
 0x516   : > { %v6647_v56 = vpop.f32.mrf.mxu2 }
 0x517   : > { %vm9181_vm3 = vcmp.ge.f32.partialorder %v9069_v32, 0.0  ;;  %v9293_v46 = vmul.f32 0.1, %v9069_v32  ;;  %v6924_v55 = vadd.f32 %v6647_v56, %v5909_v37  ;;  %v7662_v36 = vpop.f32.mrf.mxu3  ;;  %v13095_v37 = vld [vmem:[%s14558_s7 + $0x50] sm:$0xff] }
 0x518   : > { %v5634_v23 = vpop.f32.mrf.mxu1  ;;  %v13157_v56 = vld [vmem:[%s14563_s14 + $0x50] sm:$0xff] }
 0x519   : > { %v9405_v52 = vsel %vm9181_vm3, %v9069_v32, %v9293_v46  ;;  %v7939_v43 = vadd.f32 %v7662_v36, %v6924_v55  ;;  %v5910_v16 = vadd.f32 %v5634_v23, %v13855_v0 }
 0x51a   : > { %v8679_v53 = vpop.f32.mrf.mxu0  ;;  %v9517_v14 = vpack.c.bf16 %v9405_v52, %v9405_v52 }
 0x51b   : > { %v8954_v35 = vadd.f32 %v8677_v58, %v7939_v43 }
 0x51c   : > { %9630 = vst.msk [vmem:[%s14704_s8 + $0x4] sm:$0xf] %vm9628_vm2, %v9517_v14 }
 0x51d   : > { %v9070_v40 = vadd.f32 %v14693_v38, %v8954_v35 }
 0x51e   : > { %v6649_v10 = vpop.f32.mrf.mxu2 }
 0x51f   : > { %vm9182_vm4 = vcmp.ge.f32.partialorder %v9070_v40, 0.0  ;;  %v9294_v24 = vmul.f32 0.1, %v9070_v40  ;;  %v6925_v42 = vadd.f32 %v6649_v10, %v5910_v16  ;;  %v7664_v27 = vpop.f32.mrf.mxu3 }
 0x520   : > { %v5637_v32 = vpop.f32.mrf.mxu1 }
 0x521   : > { %v9406_v46 = vsel %vm9182_vm4, %v9070_v40, %v9294_v24  ;;  %v7940_v55 = vadd.f32 %v7664_v27, %v6925_v42  ;;  %v5911_v23 = vadd.f32 %v5637_v32, %v13860_v18 }
 0x522   : > { %v8682_v58 = vpop.f32.mrf.mxu0  ;;  %v9518_v36 = vpack.c.bf16 %v9406_v46, %v9406_v46  ;;  %v12972_v46 = vld [vmem:[%s14547_s26 + $0x58] sm:$0xff] }
 0x523   : > { %v8955_v52 = vadd.f32 %v8679_v53, %v7940_v55  ;;  %11652 = vmatmul.msk.bf16.gmra.mxu1 %vm728_vm0, %v12971_v60  ;;  %11969 = vmatmul.msk.bf16.gmra.mxu2 %vm728_vm0, %v13033_v29  ;;  %v13034_v55 = vld [vmem:[%s14552_s29 + $0x58] sm:$0xff] }
 0x524   : > { %9631 = vst.msk [vmem:[%s14704_s8 + $0x8] sm:$0xf] %vm9628_vm2, %v9518_v36  ;;  %12286 = vmatmul.msk.bf16.gmra.mxu3 %vm728_vm0, %v13095_v37 }
 0x525   : > { %12603 = vmatmul.msk.bf16.gmra.mxu0 %vm728_vm0, %v13157_v56  ;;  %v9071_v0 = vadd.f32 %v14693_v38, %v8955_v52  ;;  %v13096_v52 = vld [vmem:[%s14558_s7 + $0x58] sm:$0xff] }
 0x526   : > { %v6652_v43 = vpop.f32.mrf.mxu2 }
 0x527   : > { %vm9183_vm5 = vcmp.ge.f32.partialorder %v9071_v0, 0.0  ;;  %v9295_v14 = vmul.f32 0.1, %v9071_v0  ;;  %v6926_v35 = vadd.f32 %v6652_v43, %v5911_v23  ;;  %v7667_v53 = vpop.f32.mrf.mxu3 }
 0x528   : > { %v5639_v40 = vpop.f32.mrf.mxu1 }
 0x529   : > { %v9407_v16 = vsel %vm9183_vm5, %v9071_v0, %v9295_v14  ;;  %v7941_v10 = vadd.f32 %v7667_v53, %v6926_v35  ;;  %v5912_v18 = vadd.f32 %v5639_v40, %v13869_v11  ;;  %v13158_v0 = vld [vmem:[%s14563_s14 + $0x58] sm:$0xff] }
 0x52a   : > { %v8684_v24 = vpop.f32.mrf.mxu0  ;;  %v9519_v42 = vpack.c.bf16 %v9407_v16, %v9407_v16 }
 0x52b   : > { %v8956_v27 = vadd.f32 %v8682_v58, %v7941_v10 }
 0x52c   : > { %9632 = vst.msk [vmem:[%s14704_s8 + $0xc] sm:$0xf] %vm9628_vm2, %v9519_v42 }
 0x52d   : > { %v9072_v60 = vadd.f32 %v14693_v38, %v8956_v27 }
 0x52e   : > { %v6654_v29 = vpop.f32.mrf.mxu2 }
 0x52f   : > { %vm9184_vm6 = vcmp.ge.f32.partialorder %v9072_v60, 0.0  ;;  %v9296_v32 = vmul.f32 0.1, %v9072_v60  ;;  %v6927_v37 = vadd.f32 %v6654_v29, %v5912_v18  ;;  %v7669_v56 = vpop.f32.mrf.mxu3 }
 0x530   : > { %v5642_v36 = vpop.f32.mrf.mxu1 }
 0x531   : > { %v9408_v23 = vsel %vm9184_vm6, %v9072_v60, %v9296_v32  ;;  %v7942_v43 = vadd.f32 %v7669_v56, %v6927_v37  ;;  %v5913_v53 = vadd.f32 %v5642_v36, %v13874_v33 }
 0x532   : > { %v8687_v58 = vpop.f32.mrf.mxu0  ;;  %v9520_v14 = vpack.c.bf16 %v9408_v23, %v9408_v23 }
 0x533   : > { %v8957_v35 = vadd.f32 %v8684_v24, %v7942_v43  ;;  %11653 = vmatmul.msk.bf16.gmra.mxu1 %vm728_vm0, %v12972_v46  ;;  %11970 = vmatmul.msk.bf16.gmra.mxu2 %vm728_vm0, %v13034_v55  ;;  %v13097_v43 = vld [vmem:[%s14558_s7 + $0x60] sm:$0xff] }
 0x534   : > { %9633 = vst.msk [vmem:[%s14704_s8 + $0x10] sm:$0xf] %vm9628_vm2, %v9520_v14  ;;  %12287 = vmatmul.msk.bf16.gmra.mxu3 %vm728_vm0, %v13096_v52  ;;  %v12973_v52 = vld [vmem:[%s14547_s26 + $0x60] sm:$0xff] }
 0x535   : > { %12604 = vmatmul.msk.bf16.gmra.mxu0 %vm728_vm0, %v13158_v0  ;;  %v9073_v11 = vadd.f32 %v14693_v38, %v8957_v35  ;;  %v13035_v0 = vld [vmem:[%s14552_s29 + $0x60] sm:$0xff] }
 0x536   : > { %v6657_v40 = vpop.f32.mrf.mxu2  ;;  %v13159_v14 = vld [vmem:[%s14563_s14 + $0x60] sm:$0xff] }
 0x537   : > { %vm9185_vm7 = vcmp.ge.f32.partialorder %v9073_v11, 0.0  ;;  %v9297_v16 = vmul.f32 0.1, %v9073_v11  ;;  %v6928_v10 = vadd.f32 %v6657_v40, %v5913_v53  ;;  %v7672_v24 = vpop.f32.mrf.mxu3 }
 0x538   : > { %v5644_v42 = vpop.f32.mrf.mxu1 }
 0x539   : > { %v9409_v27 = vsel %vm9185_vm7, %v9073_v11, %v9297_v16  ;;  %v7943_v60 = vadd.f32 %v7672_v24, %v6928_v10  ;;  %v5914_v33 = vadd.f32 %v5644_v42, %v13883_v25 }
 0x53a   : > { %v8689_v18 = vpop.f32.mrf.mxu0  ;;  %v9521_v29 = vpack.c.bf16 %v9409_v27, %v9409_v27 }
 0x53b   : > { %v8958_v32 = vadd.f32 %v8687_v58, %v7943_v60 }
 0x53c   : > { %9634 = vst.msk [vmem:[%s14704_s8 + $0x14] sm:$0xf] %vm9628_vm2, %v9521_v29 }
 0x53d   : > { %v9074_v37 = vadd.f32 %v14693_v38, %v8958_v32 }
 0x53e   : > { %v6659_v56 = vpop.f32.mrf.mxu2 }
 0x53f   : > { %vm9186_vm8 = vcmp.ge.f32.partialorder %v9074_v37, 0.0  ;;  %v9298_v46 = vmul.f32 0.1, %v9074_v37  ;;  %v6929_v55 = vadd.f32 %v6659_v56, %v5914_v33  ;;  %v7674_v36 = vpop.f32.mrf.mxu3 }
 0x540   : > { %v5647_v23 = vpop.f32.mrf.mxu1 }
 0x541   : > { %v9410_v35 = vsel %vm9186_vm8, %v9074_v37, %v9298_v46  ;;  %v7944_v11 = vadd.f32 %v7674_v36, %v6929_v55  ;;  %v5915_v16 = vadd.f32 %v5647_v23, %v13888_v61  ;;  %v13036_v23 = vld [vmem:[%s14552_s29 + $0x68] sm:$0xff] }
 0x542   : > { %v8692_v58 = vpop.f32.mrf.mxu0  ;;  %v9522_v53 = vpack.c.bf16 %v9410_v35, %v9410_v35  ;;  %v13160_v35 = vld [vmem:[%s14563_s14 + $0x68] sm:$0xff] }
 0x543   : > { %v8959_v40 = vadd.f32 %v8689_v18, %v7944_v11  ;;  %11654 = vmatmul.msk.bf16.gmra.mxu1 %vm728_vm0, %v12973_v52  ;;  %11971 = vmatmul.msk.bf16.gmra.mxu2 %vm728_vm0, %v13035_v0  ;;  %v12974_v0 = vld [vmem:[%s14547_s26 + $0x68] sm:$0xff] }
 0x544   : > { %9635 = vst.msk [vmem:[%s14704_s8 + $0x18] sm:$0xf] %vm9628_vm2, %v9522_v53  ;;  %12288 = vmatmul.msk.bf16.gmra.mxu3 %vm728_vm0, %v13097_v43 }
 0x545   : > { %12605 = vmatmul.msk.bf16.gmra.mxu0 %vm728_vm0, %v13159_v14  ;;  %v9075_v25 = vadd.f32 %v14693_v38, %v8959_v40  ;;  %v13098_v14 = vld [vmem:[%s14558_s7 + $0x68] sm:$0xff] }
 0x546   : > { %v6662_v10 = vpop.f32.mrf.mxu2 }
 0x547   : > { %vm9187_vm9 = vcmp.ge.f32.partialorder %v9075_v25, 0.0  ;;  %v9299_v24 = vmul.f32 0.1, %v9075_v25  ;;  %v6930_v42 = vadd.f32 %v6662_v10, %v5915_v16  ;;  %v7677_v27 = vpop.f32.mrf.mxu3 }
 0x548   : > { %v5649_v60 = vpop.f32.mrf.mxu1 }
 0x549   : > { %v9411_v18 = vsel %vm9187_vm9, %v9075_v25, %v9299_v24  ;;  %v7945_v29 = vadd.f32 %v7677_v27, %v6930_v42  ;;  %v5916_v61 = vadd.f32 %v5649_v60, %v13897_v39 }
 0x54a   : > { %v8694_v32 = vpop.f32.mrf.mxu0  ;;  %v9523_v37 = vpack.c.bf16 %v9411_v18, %v9411_v18 }
 0x54b   : > { %v8960_v33 = vadd.f32 %v8692_v58, %v7945_v29 }
 0x54c   : > { %9636 = vst.msk [vmem:[%s14704_s8 + $0x1c] sm:$0xf] %vm9628_vm2, %v9523_v37 }
 0x54d   : > { %v9076_v56 = vadd.f32 %v14693_v38, %v8960_v33 }
 0x54e   : > { %v6664_v46 = vpop.f32.mrf.mxu2 }
 0x54f   : > { %vm9188_vm10 = vcmp.ge.f32.partialorder %v9076_v56, 0.0  ;;  %v9300_v55 = vmul.f32 0.1, %v9076_v56  ;;  %v6931_v36 = vadd.f32 %v6664_v46, %v5916_v61  ;;  %v7679_v52 = vpop.f32.mrf.mxu3 }
 0x550   : > { %v5652_v43 = vpop.f32.mrf.mxu1 }
 0x551   : > { %v9412_v11 = vsel %vm9188_vm10, %v9076_v56, %v9300_v55  ;;  %v7946_v53 = vadd.f32 %v7679_v52, %v6931_v36  ;;  %v5917_v16 = vadd.f32 %v5652_v43, %v13902_v7  ;;  %v12975_v52 = vld [vmem:[%s14547_s26 + $0x70] sm:$0xff] }
 0x552   : > { %v8697_v58 = vpop.f32.mrf.mxu0  ;;  %v9524_v40 = vpack.c.bf16 %v9412_v11, %v9412_v11  ;;  %v13099_v43 = vld [vmem:[%s14558_s7 + $0x70] sm:$0xff] }
 0x553   : > { %v8961_v25 = vadd.f32 %v8694_v32, %v7946_v53  ;;  %11655 = vmatmul.msk.bf16.gmra.mxu1 %vm728_vm0, %v12974_v0  ;;  %11972 = vmatmul.msk.bf16.gmra.mxu2 %vm728_vm0, %v13036_v23  ;;  %v13037_v0 = vld [vmem:[%s14552_s29 + $0x70] sm:$0xff] }
 0x554   : > { %9637 = vst.msk [vmem:[%s14704_s8 + $0x20] sm:$0xf] %vm9628_vm2, %v9524_v40  ;;  %12289 = vmatmul.msk.bf16.gmra.mxu3 %vm728_vm0, %v13098_v14  ;;  %v13161_v14 = vld [vmem:[%s14563_s14 + $0x70] sm:$0xff] }
 0x555   : > { %12606 = vmatmul.msk.bf16.gmra.mxu0 %vm728_vm0, %v13160_v35  ;;  %v9077_v39 = vadd.f32 %v14693_v38, %v8961_v25 }
 0x556   : > { %v6667_v10 = vpop.f32.mrf.mxu2 }
 0x557   : > { %vm9189_vm11 = vcmp.ge.f32.partialorder %v9077_v39, 0.0  ;;  %v9301_v24 = vmul.f32 0.1, %v9077_v39  ;;  %v6932_v42 = vadd.f32 %v6667_v10, %v5917_v16  ;;  %v7682_v27 = vpop.f32.mrf.mxu3 }
 0x558   : > { %v5654_v60 = vpop.f32.mrf.mxu1 }
 0x559   : > { %v9413_v18 = vsel %vm9189_vm11, %v9077_v39, %v9301_v24  ;;  %v7947_v29 = vadd.f32 %v7682_v27, %v6932_v42  ;;  %v5918_v7 = vadd.f32 %v5654_v60, %v13911_v51 }
 0x55a   : > { %v8699_v32 = vpop.f32.mrf.mxu0  ;;  %v9525_v37 = vpack.c.bf16 %v9413_v18, %v9413_v18 }
 0x55b   : > { %v8962_v33 = vadd.f32 %v8697_v58, %v7947_v29 }
 0x55c   : > { %9638 = vst.msk [vmem:[%s14704_s8 + $0x24] sm:$0xf] %vm9628_vm2, %v9525_v37 }
 0x55d   : > { %v9078_v56 = vadd.f32 %v14693_v38, %v8962_v33 }
 0x55e   : > { %v6669_v61 = vpop.f32.mrf.mxu2 }
 0x55f   : > { %vm9190_vm12 = vcmp.ge.f32.partialorder %v9078_v56, 0.0  ;;  %v9302_v46 = vmul.f32 0.1, %v9078_v56  ;;  %v6933_v55 = vadd.f32 %v6669_v61, %v5918_v7  ;;  %v7684_v36 = vpop.f32.mrf.mxu3 }
 0x560   : > { %v5657_v23 = vpop.f32.mrf.mxu1 }
 0x561   : > { %v9414_v35 = vsel %vm9190_vm12, %v9078_v56, %v9302_v46  ;;  %v7948_v11 = vadd.f32 %v7684_v36, %v6933_v55  ;;  %v5919_v25 = vadd.f32 %v5657_v23, %v13916_v6  ;;  %v12976_v46 = vld [vmem:[%s14547_s26 + $0x78] sm:$0xff] }
 0x562   : > { %v8702_v53 = vpop.f32.mrf.mxu0  ;;  %v9526_v58 = vpack.c.bf16 %v9414_v35, %v9414_v35  ;;  %v13038_v55 = vld [vmem:[%s14552_s29 + $0x78] sm:$0xff] }
 0x563   : > { %v8963_v40 = vadd.f32 %v8699_v32, %v7948_v11  ;;  %11656 = vmatmul.msk.bf16.gmra.mxu1 %vm728_vm0, %v12975_v52  ;;  %11973 = vmatmul.msk.bf16.gmra.mxu2 %vm728_vm0, %v13037_v0  ;;  %v13100_v52 = vld [vmem:[%s14558_s7 + $0x78] sm:$0xff] }
 0x564   : > { %9639 = vst.msk [vmem:[%s14704_s8 + $0x28] sm:$0xf] %vm9628_vm2, %v9526_v58  ;;  %12290 = vmatmul.msk.bf16.gmra.mxu3 %vm728_vm0, %v13099_v43  ;;  %v13162_v0 = vld [vmem:[%s14563_s14 + $0x78] sm:$0xff] }
 0x565   : > { %12607 = vmatmul.msk.bf16.gmra.mxu0 %vm728_vm0, %v13161_v14  ;;  %v9079_v51 = vadd.f32 %v14693_v38, %v8963_v40 }
 0x566   : > { %v6672_v39 = vpop.f32.mrf.mxu2 }
 0x567   : > { %vm9191_vm13 = vcmp.ge.f32.partialorder %v9079_v51, 0.0  ;;  %v9303_v16 = vmul.f32 0.1, %v9079_v51  ;;  %v6934_v10 = vadd.f32 %v6672_v39, %v5919_v25  ;;  %v7687_v24 = vpop.f32.mrf.mxu3 }
 0x568   : > { %v5659_v42 = vpop.f32.mrf.mxu1 }
 0x569   : > { %v9415_v27 = vsel %vm9191_vm13, %v9079_v51, %v9303_v16  ;;  %v7949_v60 = vadd.f32 %v7687_v24, %v6934_v10  ;;  %v5920_v6 = vadd.f32 %v5659_v42, %v13925_v19 }
 0x56a   : > { %v8704_v18 = vpop.f32.mrf.mxu0  ;;  %v9527_v29 = vpack.c.bf16 %v9415_v27, %v9415_v27 }
 0x56b   : > { %v8964_v32 = vadd.f32 %v8702_v53, %v7949_v60 }
 0x56c   : > { %9640 = vst.msk [vmem:[%s14704_s8 + $0x2c] sm:$0xf] %vm9628_vm2, %v9527_v29 }
 0x56d   : > { %v9080_v37 = vadd.f32 %v14693_v38, %v8964_v32 }
 0x56e   : > { %v6674_v33 = vpop.f32.mrf.mxu2 }
 0x56f   : > { %vm9192_vm14 = vcmp.ge.f32.partialorder %v9080_v37, 0.0  ;;  %v9304_v56 = vmul.f32 0.1, %v9080_v37  ;;  %v6935_v7 = vadd.f32 %v6674_v33, %v5920_v6  ;;  %v7689_v61 = vpop.f32.mrf.mxu3  ;;  %v12977_v6 = vld [vmem:[%s14547_s26 + $0x80] sm:$0xff] }
 0x570   : > { %v5662_v36 = vpop.f32.mrf.mxu1  ;;  %v13039_v33 = vld [vmem:[%s14552_s29 + $0x80] sm:$0xff] }
 0x571   : > { %v9416_v23 = vsel %vm9192_vm14, %v9080_v37, %v9304_v56  ;;  %v7950_v43 = vadd.f32 %v7689_v61, %v6935_v7  ;;  %v5921_v53 = vadd.f32 %v5662_v36, %v13930_v54  ;;  %v13101_v7 = vld [vmem:[%s14558_s7 + $0x80] sm:$0xff] }
 0x572   : > { %v8707_v14 = vpop.f32.mrf.mxu0  ;;  %v9528_v35 = vpack.c.bf16 %v9416_v23, %v9416_v23  ;;  %v13163_v61 = vld [vmem:[%s14563_s14 + $0x80] sm:$0xff] }
 0x573   : > { %v8965_v11 = vadd.f32 %v8704_v18, %v7950_v43  ;;  %11657 = vmatmul.msk.bf16.gmra.mxu1 %vm728_vm0, %v12976_v46  ;;  %11974 = vmatmul.msk.bf16.gmra.mxu2 %vm728_vm0, %v13038_v55 }
 0x574   : > { %9641 = vst.msk [vmem:[%s14704_s8 + $0x30] sm:$0xf] %vm9628_vm2, %v9528_v35  ;;  %12291 = vmatmul.msk.bf16.gmra.mxu3 %vm728_vm0, %v13100_v52 }
 0x575   : > { %12608 = vmatmul.msk.bf16.gmra.mxu0 %vm728_vm0, %v13162_v0  ;;  %v9081_v19 = vadd.f32 %v14693_v38, %v8965_v11 }
 0x576   : > { %v6677_v58 = vpop.f32.mrf.mxu2 }
 0x577   : > { %vm9193_vm15 = vcmp.ge.f32.partialorder %v9081_v19, 0.0  ;;  %v9305_v40 = vmul.f32 0.1, %v9081_v19  ;;  %v6936_v51 = vadd.f32 %v6677_v58, %v5921_v53  ;;  %v7692_v25 = vpop.f32.mrf.mxu3 }
 0x578   : > { %v5664_v39 = vpop.f32.mrf.mxu1 }
 0x579   : > { %v9417_v16 = vsel %vm9193_vm15, %v9081_v19, %v9305_v40  ;;  %v7951_v10 = vadd.f32 %v7692_v25, %v6936_v51  ;;  %v5922_v54 = vadd.f32 %v5664_v39, %v13939_v47 }
 0x57a   : > { %v8709_v24 = vpop.f32.mrf.mxu0  ;;  %v9529_v42 = vpack.c.bf16 %v9417_v16, %v9417_v16 }
 0x57b   : > { %v8966_v27 = vadd.f32 %v8707_v14, %v7951_v10 }
 0x57c   : > { %9642 = vst.msk [vmem:[%s14704_s8 + $0x34] sm:$0xf] %vm9628_vm2, %v9529_v42 }
 0x57d   : > { %v9082_v60 = vadd.f32 %v14693_v38, %v8966_v27  ;;  %v12978_v27 = vld [vmem:[%s14547_s26 + $0x88] sm:$0xff] }
 0x57e   : > { %v6679_v18 = vpop.f32.mrf.mxu2 }
 0x57f   : > { %vm9194_vm1 = vcmp.ge.f32.partialorder %v9082_v60, 0.0  ;;  %v9306_v29 = vmul.f32 0.1, %v9082_v60  ;;  %v6937_v32 = vadd.f32 %v6679_v18, %v5922_v54  ;;  %v7694_v37 = vpop.f32.mrf.mxu3  ;;  %v13102_v18 = vld [vmem:[%s14558_s7 + $0x88] sm:$0xff] }
 0x580   : > { %v5667_v56 = vpop.f32.mrf.mxu1 }
 0x581   : > { %v9418_v46 = vsel %vm9194_vm1, %v9082_v60, %v9306_v29  ;;  %v7952_v55 = vadd.f32 %v7694_v37, %v6937_v32  ;;  %v5923_v23 = vadd.f32 %v5667_v56, %v13944_v34  ;;  %v13040_v60 = vld [vmem:[%s14552_s29 + $0x88] sm:$0xff] }
 0x582   : > { %v8712_v36 = vpop.f32.mrf.mxu0  ;;  %v9530_v52 = vpack.c.bf16 %v9418_v46, %v9418_v46  ;;  %v13164_v29 = vld [vmem:[%s14563_s14 + $0x88] sm:$0xff] }
 0x583   : > { %v8967_v0 = vadd.f32 %v8709_v24, %v7952_v55  ;;  %11658 = vmatmul.msk.bf16.gmra.mxu1 %vm728_vm0, %v12977_v6  ;;  %11975 = vmatmul.msk.bf16.gmra.mxu2 %vm728_vm0, %v13039_v33 }
 0x584   : > { %9643 = vst.msk [vmem:[%s14704_s8 + $0x38] sm:$0xf] %vm9628_vm2, %v9530_v52  ;;  %12292 = vmatmul.msk.bf16.gmra.mxu3 %vm728_vm0, %v13101_v7 }
 0x585   : > { %12609 = vmatmul.msk.bf16.gmra.mxu0 %vm728_vm0, %v13163_v61  ;;  %v9083_v47 = vadd.f32 %v14693_v38, %v8967_v0 }
 0x586   : > { %v6682_v43 = vpop.f32.mrf.mxu2 }
 0x587   : > { %vm9195_vm3 = vcmp.ge.f32.partialorder %v9083_v47, 0.0  ;;  %v9307_v14 = vmul.f32 0.1, %v9083_v47  ;;  %v6938_v35 = vadd.f32 %v6682_v43, %v5923_v23  ;;  %v7697_v11 = vpop.f32.mrf.mxu3 }
 0x588   : > { %v5669_v19 = vpop.f32.mrf.mxu1 }
 0x589   : > { %v9419_v53 = vsel %vm9195_vm3, %v9083_v47, %v9307_v14  ;;  %v7953_v58 = vadd.f32 %v7697_v11, %v6938_v35  ;;  %v5924_v34 = vadd.f32 %v5669_v19, %v13962_v50 }
 0x58a   : > { %v8714_v40 = vpop.f32.mrf.mxu0  ;;  %v9531_v51 = vpack.c.bf16 %v9419_v53, %v9419_v53 }
 0x58b   : > { %v8968_v25 = vadd.f32 %v8712_v36, %v7953_v58 }
 0x58c   : > { %9644 = vst.msk [vmem:[%s14704_s8 + $0x3c] sm:$0xf] %vm9628_vm2, %v9531_v51  ;;  %v13041_v51 = vld [vmem:[%s14552_s29 + $0x90] sm:$0xff] }
 0x58d   : > { %v9084_v39 = vadd.f32 %v14693_v38, %v8968_v25 }
 0x58e   : > { %v6684_v16 = vpop.f32.mrf.mxu2 }
 0x58f   : > { %vm9196_vm4 = vcmp.ge.f32.partialorder %v9084_v39, 0.0  ;;  %v9308_v10 = vmul.f32 0.1, %v9084_v39  ;;  %v6939_v24 = vadd.f32 %v6684_v16, %v5924_v34  ;;  %v7699_v42 = vpop.f32.mrf.mxu3  ;;  %v13165_v34 = vld [vmem:[%s14563_s14 + $0x90] sm:$0xff] }
 0x590   : > { %v5672_v54 = vpop.f32.mrf.mxu1 }
 0x591   : > { %v9420_v32 = vsel %vm9196_vm4, %v9084_v39, %v9308_v10  ;;  %v7954_v37 = vadd.f32 %v7699_v42, %v6939_v24  ;;  %v5925_v7 = vadd.f32 %v5672_v54, %v13970_v15  ;;  %v13103_v39 = vld [vmem:[%s14558_s7 + $0x90] sm:$0xff] }
 0x592   : > { %v8717_v6 = vpop.f32.mrf.mxu0  ;;  %v9532_v33 = vpack.c.bf16 %v9420_v32, %v9420_v32 }
 0x593   : > { %v8969_v56 = vadd.f32 %v8714_v40, %v7954_v37  ;;  %11659 = vmatmul.msk.bf16.gmra.mxu1 %vm728_vm0, %v12978_v27  ;;  %11976 = vmatmul.msk.bf16.gmra.mxu2 %vm728_vm0, %v13040_v60  ;;  %v12979_v40 = vld [vmem:[%s14547_s26 + $0x90] sm:$0xff] }
 0x594   : > { %9645 = vst.msk [vmem:[%s14704_s8 + $0x40] sm:$0xf] %vm9628_vm2, %v9532_v33  ;;  %12293 = vmatmul.msk.bf16.gmra.mxu3 %vm728_vm0, %v13102_v18 }
 0x595   : > { %12610 = vmatmul.msk.bf16.gmra.mxu0 %vm728_vm0, %v13164_v29  ;;  %v9085_v50 = vadd.f32 %v14693_v38, %v8969_v56 }
 0x596   : > { %v6687_v61 = vpop.f32.mrf.mxu2 }
 0x597   : > { %vm9197_vm5 = vcmp.ge.f32.partialorder %v9085_v50, 0.0  ;;  %v9309_v46 = vmul.f32 0.1, %v9085_v50  ;;  %v6940_v55 = vadd.f32 %v6687_v61, %v5925_v7  ;;  %v7702_v36 = vpop.f32.mrf.mxu3 }
 0x598   : > { %v5674_v52 = vpop.f32.mrf.mxu1 }
 0x599   : > { %v9421_v0 = vsel %vm9197_vm5, %v9085_v50, %v9309_v46  ;;  %v7955_v47 = vadd.f32 %v7702_v36, %v6940_v55  ;;  %v5926_v15 = vadd.f32 %v5674_v52, %v13979_v30 }
 0x59a   : > { %v8719_v23 = vpop.f32.mrf.mxu0  ;;  %v9533_v43 = vpack.c.bf16 %v9421_v0, %v9421_v0  ;;  %v12980_v0 = vld [vmem:[%s14547_s26 + $0x98] sm:$0xff] }
 0x59b   : > { %v8970_v14 = vadd.f32 %v8717_v6, %v7955_v47  ;;  %v13042_v47 = vld [vmem:[%s14552_s29 + $0x98] sm:$0xff] }
 0x59c   : > { %9646 = vst.msk [vmem:[%s14704_s8 + $0x44] sm:$0xf] %vm9628_vm2, %v9533_v43  ;;  %v13104_v43 = vld [vmem:[%s14558_s7 + $0x98] sm:$0xff] }
 0x59d   : > { %v9086_v35 = vadd.f32 %v14693_v38, %v8970_v14  ;;  %v13166_v14 = vld [vmem:[%s14563_s14 + $0x98] sm:$0xff] }
 0x59e   : > { %v6689_v11 = vpop.f32.mrf.mxu2 }
 0x59f   : > { %vm9198_vm6 = vcmp.ge.f32.partialorder %v9086_v35, 0.0  ;;  %v9310_v19 = vmul.f32 0.1, %v9086_v35  ;;  %v6941_v53 = vadd.f32 %v6689_v11, %v5926_v15  ;;  %v7704_v58 = vpop.f32.mrf.mxu3 }
 0x5a0   : > { %v5677_v25 = vpop.f32.mrf.mxu1 }
 0x5a1   : > { %v9422_v16 = vsel %vm9198_vm6, %v9086_v35, %v9310_v19  ;;  %v7956_v10 = vadd.f32 %v7704_v58, %v6941_v53  ;;  %v5927_v60 = vadd.f32 %v5677_v25, %v13984_v31 }
 0x5a2   : > { %v8722_v24 = vpop.f32.mrf.mxu0  ;;  %v9534_v42 = vpack.c.bf16 %v9422_v16, %v9422_v16 }
 0x5a3   : > { %v8971_v27 = vadd.f32 %v8719_v23, %v7956_v10  ;;  %11660 = vmatmul.msk.bf16.gmra.mxu1 %vm728_vm0, %v12979_v40  ;;  %11977 = vmatmul.msk.bf16.gmra.mxu2 %vm728_vm0, %v13041_v51 }
 0x5a4   : > { %9647 = vst.msk [vmem:[%s14704_s8 + $0x48] sm:$0xf] %vm9628_vm2, %v9534_v42  ;;  %12294 = vmatmul.msk.bf16.gmra.mxu3 %vm728_vm0, %v13103_v39 }
 0x5a5   : > { %12611 = vmatmul.msk.bf16.gmra.mxu0 %vm728_vm0, %v13165_v34  ;;  %v9087_v30 = vadd.f32 %v14693_v38, %v8971_v27 }
 0x5a6   : > { %v6692_v54 = vpop.f32.mrf.mxu2 }
 0x5a7   : > { %vm9199_vm7 = vcmp.ge.f32.partialorder %v9087_v30, 0.0  ;;  %v9311_v18 = vmul.f32 0.1, %v9087_v30  ;;  %v6942_v29 = vadd.f32 %v6692_v54, %v5927_v60  ;;  %v7707_v32 = vpop.f32.mrf.mxu3 }
 0x5a8   : > { %v5679_v37 = vpop.f32.mrf.mxu1 }
 0x5a9   : > { %v9423_v6 = vsel %vm9199_vm7, %v9087_v30, %v9311_v18  ;;  %v7957_v33 = vadd.f32 %v7707_v32, %v6942_v29  ;;  %v5928_v31 = vadd.f32 %v5679_v37, %v13993_v45  ;;  %v12981_v32 = vld [vmem:[%s14547_s26 + $0xa0] sm:$0xff] }
 0x5aa   : > { %v8724_v56 = vpop.f32.mrf.mxu0  ;;  %v9535_v50 = vpack.c.bf16 %v9423_v6, %v9423_v6  ;;  %v13043_v37 = vld [vmem:[%s14552_s29 + $0xa0] sm:$0xff] }
 0x5ab   : > { %v8972_v7 = vadd.f32 %v8722_v24, %v7957_v33  ;;  %v13105_v33 = vld [vmem:[%s14558_s7 + $0xa0] sm:$0xff] }
 0x5ac   : > { %9648 = vst.msk [vmem:[%s14704_s8 + $0x4c] sm:$0xf] %vm9628_vm2, %v9535_v50 }
 0x5ad   : > { %v9088_v61 = vadd.f32 %v14693_v38, %v8972_v7 }
 0x5ae   : > { %v6694_v46 = vpop.f32.mrf.mxu2 }
 0x5af   : > { %vm9200_vm8 = vcmp.ge.f32.partialorder %v9088_v61, 0.0  ;;  %v9312_v55 = vmul.f32 0.1, %v9088_v61  ;;  %v6943_v36 = vadd.f32 %v6694_v46, %v5928_v31  ;;  %v7709_v52 = vpop.f32.mrf.mxu3 }
 0x5b0   : > { %v5682_v23 = vpop.f32.mrf.mxu1 }
 0x5b1   : > { %v9424_v35 = vsel %vm9200_vm8, %v9088_v61, %v9312_v55  ;;  %v7958_v15 = vadd.f32 %v7709_v52, %v6943_v36  ;;  %v5929_v58 = vadd.f32 %v5682_v23, %v13998_v26 }
 0x5b2   : > { %v8727_v11 = vpop.f32.mrf.mxu0  ;;  %v9536_v19 = vpack.c.bf16 %v9424_v35, %v9424_v35 }
 0x5b3   : > { %v8973_v53 = vadd.f32 %v8724_v56, %v7958_v15  ;;  %11661 = vmatmul.msk.bf16.gmra.mxu1 %vm728_vm0, %v12980_v0  ;;  %11978 = vmatmul.msk.bf16.gmra.mxu2 %vm728_vm0, %v13042_v47  ;;  %v13167_v56 = vld [vmem:[%s14563_s14 + $0xa0] sm:$0xff] }
 0x5b4   : > { %9649 = vst.msk [vmem:[%s14704_s8 + $0x50] sm:$0xf] %vm9628_vm2, %v9536_v19  ;;  %12295 = vmatmul.msk.bf16.gmra.mxu3 %vm728_vm0, %v13104_v43 }
 0x5b5   : > { %12612 = vmatmul.msk.bf16.gmra.mxu0 %vm728_vm0, %v13166_v14  ;;  %v9089_v45 = vadd.f32 %v14693_v38, %v8973_v53 }
 0x5b6   : > { %v6697_v40 = vpop.f32.mrf.mxu2 }
 0x5b7   : > { %vm9201_vm9 = vcmp.ge.f32.partialorder %v9089_v45, 0.0  ;;  %v9313_v51 = vmul.f32 0.1, %v9089_v45  ;;  %v6944_v25 = vadd.f32 %v6697_v40, %v5929_v58  ;;  %v7712_v39 = vpop.f32.mrf.mxu3 }
 0x5b8   : > { %v5684_v34 = vpop.f32.mrf.mxu1 }
 0x5b9   : > { %v9425_v16 = vsel %vm9201_vm9, %v9089_v45, %v9313_v51  ;;  %v7959_v10 = vadd.f32 %v7712_v39, %v6944_v25  ;;  %v5930_v26 = vadd.f32 %v5684_v34, %v14007_v28  ;;  %v12982_v51 = vld [vmem:[%s14547_s26 + $0xa8] sm:$0xff] }
 0x5ba   : > { %v8729_v24 = vpop.f32.mrf.mxu0  ;;  %v9537_v42 = vpack.c.bf16 %v9425_v16, %v9425_v16  ;;  %v13044_v25 = vld [vmem:[%s14552_s29 + $0xa8] sm:$0xff] }
 0x5bb   : > { %v8974_v27 = vadd.f32 %v8727_v11, %v7959_v10  ;;  %v13106_v34 = vld [vmem:[%s14558_s7 + $0xa8] sm:$0xff] }
 0x5bc   : > { %9650 = vst.msk [vmem:[%s14704_s8 + $0x54] sm:$0xf] %vm9628_vm2, %v9537_v42  ;;  %v13168_v16 = vld [vmem:[%s14563_s14 + $0xa8] sm:$0xff] }
 0x5bd   : > { %v9090_v30 = vadd.f32 %v14693_v38, %v8974_v27 }
 0x5be   : > { %v6699_v60 = vpop.f32.mrf.mxu2 }
 0x5bf   : > { %vm9202_vm10 = vcmp.ge.f32.partialorder %v9090_v30, 0.0  ;;  %v9314_v54 = vmul.f32 0.1, %v9090_v30  ;;  %v6945_v18 = vadd.f32 %v6699_v60, %v5930_v26  ;;  %v7714_v29 = vpop.f32.mrf.mxu3 }
 0x5c0   : > { %v5687_v6 = vpop.f32.mrf.mxu1 }
 0x5c1   : > { %v9426_v50 = vsel %vm9202_vm10, %v9090_v30, %v9314_v54  ;;  %v7960_v7 = vadd.f32 %v7714_v29, %v6945_v18  ;;  %v5931_v55 = vadd.f32 %v5687_v6, %v14012_v44 }
 0x5c2   : > { %v8732_v61 = vpop.f32.mrf.mxu0  ;;  %v9538_v31 = vpack.c.bf16 %v9426_v50, %v9426_v50 }
 0x5c3   : > { %v8975_v46 = vadd.f32 %v8729_v24, %v7960_v7  ;;  %11662 = vmatmul.msk.bf16.gmra.mxu1 %vm728_vm0, %v12981_v32  ;;  %11979 = vmatmul.msk.bf16.gmra.mxu2 %vm728_vm0, %v13043_v37 }
 0x5c4   : > { %9651 = vst.msk [vmem:[%s14704_s8 + $0x58] sm:$0xf] %vm9628_vm2, %v9538_v31  ;;  %12296 = vmatmul.msk.bf16.gmra.mxu3 %vm728_vm0, %v13105_v33 }
 0x5c5   : > { %12613 = vmatmul.msk.bf16.gmra.mxu0 %vm728_vm0, %v13167_v56  ;;  %v9091_v28 = vadd.f32 %v14693_v38, %v8975_v46 }
 0x5c6   : > { %v6702_v36 = vpop.f32.mrf.mxu2 }
 0x5c7   : > { %vm9203_vm11 = vcmp.ge.f32.partialorder %v9091_v28, 0.0  ;;  %v9315_v52 = vmul.f32 0.1, %v9091_v28  ;;  %v6946_v0 = vadd.f32 %v6702_v36, %v5931_v55  ;;  %v7717_v47 = vpop.f32.mrf.mxu3  ;;  %v12983_v55 = vld [vmem:[%s14547_s26 + $0xb0] sm:$0xff] }
 0x5c8   : > { %v5689_v23 = vpop.f32.mrf.mxu1  ;;  %v13045_v36 = vld [vmem:[%s14552_s29 + $0xb0] sm:$0xff] }
 0x5c9   : > { %v9427_v43 = vsel %vm9203_vm11, %v9091_v28, %v9315_v52  ;;  %v7961_v14 = vadd.f32 %v7717_v47, %v6946_v0  ;;  %v5932_v44 = vadd.f32 %v5689_v23, %v14021_v22  ;;  %v13107_v0 = vld [vmem:[%s14558_s7 + $0xb0] sm:$0xff] }
 0x5ca   : > { %v8734_v35 = vpop.f32.mrf.mxu0  ;;  %v9539_v15 = vpack.c.bf16 %v9427_v43, %v9427_v43  ;;  %v13169_v47 = vld [vmem:[%s14563_s14 + $0xb0] sm:$0xff] }
 0x5cb   : > { %v8976_v11 = vadd.f32 %v8732_v61, %v7961_v14 }
 0x5cc   : > { %9652 = vst.msk [vmem:[%s14704_s8 + $0x5c] sm:$0xf] %vm9628_vm2, %v9539_v15 }
 0x5cd   : > { %v9092_v19 = vadd.f32 %v14693_v38, %v8976_v11 }
 0x5ce   : > { %v6704_v53 = vpop.f32.mrf.mxu2 }
 0x5cf   : > { %vm9204_vm12 = vcmp.ge.f32.partialorder %v9092_v19, 0.0  ;;  %v9316_v45 = vmul.f32 0.1, %v9092_v19  ;;  %v6947_v58 = vadd.f32 %v6704_v53, %v5932_v44  ;;  %v7719_v40 = vpop.f32.mrf.mxu3 }
 0x5d0   : > { %v5692_v39 = vpop.f32.mrf.mxu1 }
 0x5d1   : > { %v9428_v10 = vsel %vm9204_vm12, %v9092_v19, %v9316_v45  ;;  %v7962_v24 = vadd.f32 %v7719_v40, %v6947_v58  ;;  %v5933_v26 = vadd.f32 %v5692_v39, %v14026_v5 }
 0x5d2   : > { %v8737_v42 = vpop.f32.mrf.mxu0  ;;  %v9540_v27 = vpack.c.bf16 %v9428_v10, %v9428_v10 }
 0x5d3   : > { %v8977_v30 = vadd.f32 %v8734_v35, %v7962_v24  ;;  %11663 = vmatmul.msk.bf16.gmra.mxu1 %vm728_vm0, %v12982_v51  ;;  %11980 = vmatmul.msk.bf16.gmra.mxu2 %vm728_vm0, %v13044_v25 }
 0x5d4   : > { %9653 = vst.msk [vmem:[%s14704_s8 + $0x60] sm:$0xf] %vm9628_vm2, %v9540_v27  ;;  %12297 = vmatmul.msk.bf16.gmra.mxu3 %vm728_vm0, %v13106_v34 }
 0x5d5   : > { %12614 = vmatmul.msk.bf16.gmra.mxu0 %vm728_vm0, %v13168_v16  ;;  %v9093_v22 = vadd.f32 %v14693_v38, %v8977_v30  ;;  %v12984_v30 = vld [vmem:[%s14547_s26 + $0xb8] sm:$0xff] }
 0x5d6   : > { %v6707_v60 = vpop.f32.mrf.mxu2 }
 0x5d7   : > { %vm9205_vm13 = vcmp.ge.f32.partialorder %v9093_v22, 0.0  ;;  %v9317_v54 = vmul.f32 0.1, %v9093_v22  ;;  %v6948_v18 = vadd.f32 %v6707_v60, %v5933_v26  ;;  %v7722_v29 = vpop.f32.mrf.mxu3  ;;  %v13108_v60 = vld [vmem:[%s14558_s7 + $0xb8] sm:$0xff] }
 0x5d8   : > { %v5694_v32 = vpop.f32.mrf.mxu1 }
 0x5d9   : > { %v9429_v37 = vsel %vm9205_vm13, %v9093_v22, %v9317_v54  ;;  %v7963_v6 = vadd.f32 %v7722_v29, %v6948_v18  ;;  %v5934_v5 = vadd.f32 %v5694_v32, %v14035_v49  ;;  %v13046_v22 = vld [vmem:[%s14552_s29 + $0xb8] sm:$0xff] }
 0x5da   : > { %v8739_v33 = vpop.f32.mrf.mxu0  ;;  %v9541_v56 = vpack.c.bf16 %v9429_v37, %v9429_v37  ;;  %v13170_v54 = vld [vmem:[%s14563_s14 + $0xb8] sm:$0xff] }
 0x5db   : > { %v8978_v50 = vadd.f32 %v8737_v42, %v7963_v6 }
 0x5dc   : > { %9654 = vst.msk [vmem:[%s14704_s8 + $0x64] sm:$0xf] %vm9628_vm2, %v9541_v56 }
 0x5dd   : > { %v9094_v7 = vadd.f32 %v14693_v38, %v8978_v50 }
 0x5de   : > { %v6709_v61 = vpop.f32.mrf.mxu2 }
 0x5df   : > { %vm9206_vm14 = vcmp.ge.f32.partialorder %v9094_v7, 0.0  ;;  %v9318_v31 = vmul.f32 0.1, %v9094_v7  ;;  %v6949_v46 = vadd.f32 %v6709_v61, %v5934_v5  ;;  %v7724_v28 = vpop.f32.mrf.mxu3 }
 0x5e0   : > { %v5697_v52 = vpop.f32.mrf.mxu1 }
 0x5e1   : > { %v9430_v23 = vsel %vm9206_vm14, %v9094_v7, %v9318_v31  ;;  %v7964_v43 = vadd.f32 %v7724_v28, %v6949_v46  ;;  %v5935_v11 = vadd.f32 %v5697_v52, %v14040_v41 }
 0x5e2   : > { %v8742_v14 = vpop.f32.mrf.mxu0  ;;  %v9542_v35 = vpack.c.bf16 %v9430_v23, %v9430_v23 }
 0x5e3   : > { %v8979_v15 = vadd.f32 %v8739_v33, %v7964_v43  ;;  %11664 = vmatmul.msk.bf16.gmra.mxu1 %vm728_vm0, %v12983_v55  ;;  %11981 = vmatmul.msk.bf16.gmra.mxu2 %vm728_vm0, %v13045_v36 }
 0x5e4   : > { %9655 = vst.msk [vmem:[%s14704_s8 + $0x68] sm:$0xf] %vm9628_vm2, %v9542_v35  ;;  %12298 = vmatmul.msk.bf16.gmra.mxu3 %vm728_vm0, %v13107_v0  ;;  %v13047_v35 = vld [vmem:[%s14552_s29 + $0xc0] sm:$0xff] }
 0x5e5   : > { %12615 = vmatmul.msk.bf16.gmra.mxu0 %vm728_vm0, %v13169_v47  ;;  %v9095_v49 = vadd.f32 %v14693_v38, %v8979_v15 }
 0x5e6   : > { %v6712_v19 = vpop.f32.mrf.mxu2 }
 0x5e7   : > { %vm9207_vm15 = vcmp.ge.f32.partialorder %v9095_v49, 0.0  ;;  %v9319_v44 = vmul.f32 0.1, %v9095_v49  ;;  %v6950_v53 = vadd.f32 %v6712_v19, %v5935_v11  ;;  %v7727_v45 = vpop.f32.mrf.mxu3  ;;  %v13171_v11 = vld [vmem:[%s14563_s14 + $0xc0] sm:$0xff] }
 0x5e8   : > { %v5699_v58 = vpop.f32.mrf.mxu1 }
 0x5e9   : > { %v9431_v40 = vsel %vm9207_vm15, %v9095_v49, %v9319_v44  ;;  %v7965_v51 = vadd.f32 %v7727_v45, %v6950_v53  ;;  %v5936_v41 = vadd.f32 %v5699_v58, %v14049_v4  ;;  %v14939_v4 = vld [vmem:[%s15543_s2] ss:$0 sm:$0xff] }
 0x5ea   : > { %v8744_v25 = vpop.f32.mrf.mxu0  ;;  %v9543_v39 = vpack.c.bf16 %v9431_v40, %v9431_v40  ;;  %v13109_v49 = vld [vmem:[%s14558_s7 + $0xc0] sm:$0xff] }
 0x5eb   : > { %v8980_v34 = vadd.f32 %v8742_v14, %v7965_v51  ;;  %v12985_v14 = vld [vmem:[%s14547_s26 + $0xc0] sm:$0xff] }
 0x5ec   : > { %9656 = vst.msk [vmem:[%s14704_s8 + $0x6c] sm:$0xf] %vm9628_vm2, %v9543_v39 }
 0x5ed   : > { %v9096_v16 = vadd.f32 %v14693_v38, %v8980_v34 }
 0x5ee   : > { %v6714_v10 = vpop.f32.mrf.mxu2 }
 0x5ef   : > { %vm9208_vm1 = vcmp.ge.f32.partialorder %v9096_v16, 0.0  ;;  %v9320_v24 = vmul.f32 0.1, %v9096_v16  ;;  %v6951_v42 = vadd.f32 %v6714_v10, %v5936_v41  ;;  %v7729_v27 = vpop.f32.mrf.mxu3 }
 0x5f0   : > { %v5702_v26 = vpop.f32.mrf.mxu1 }
 0x5f1   : > { %v9432_v18 = vsel %vm9208_vm1, %v9096_v16, %v9320_v24  ;;  %v7966_v29 = vadd.f32 %v7729_v27, %v6951_v42  ;;  %v5937_v33 = vadd.f32 %v5702_v26, %v14054_v62 }
 0x5f2   : > { %v8747_v32 = vpop.f32.mrf.mxu0  ;;  %v9544_v37 = vpack.c.bf16 %v9432_v18, %v9432_v18  ;;  %v12986_v18 = vld [vmem:[%s14547_s26 + $0xc8] sm:$0xff] }
 0x5f3   : > { %v8981_v6 = vadd.f32 %v8744_v25, %v7966_v29  ;;  %11665 = vmatmul.msk.bf16.gmra.mxu1 %vm728_vm0, %v12984_v30  ;;  %11982 = vmatmul.msk.bf16.gmra.mxu2 %vm728_vm0, %v13046_v22  ;;  %v13048_v29 = vld [vmem:[%s14552_s29 + $0xc8] sm:$0xff] }
 0x5f4   : > { %9657 = vst.msk [vmem:[%s14704_s8 + $0x70] sm:$0xf] %vm9628_vm2, %v9544_v37  ;;  %12299 = vmatmul.msk.bf16.gmra.mxu3 %vm728_vm0, %v13108_v60  ;;  %v13110_v37 = vld [vmem:[%s14558_s7 + $0xc8] sm:$0xff] }
 0x5f5   : > { %12616 = vmatmul.msk.bf16.gmra.mxu0 %vm728_vm0, %v13170_v54  ;;  %v9097_v38 = vadd.f32 %v14939_v4, %v8981_v6  ;;  %v13172_v6 = vld [vmem:[%s14563_s14 + $0xc8] sm:$0xff] }
 0x5f6   : > { %v6717_v56 = vpop.f32.mrf.mxu2 }
 0x5f7   : > { %vm9209_vm3 = vcmp.ge.f32.partialorder %v9097_v38, 0.0  ;;  %v9321_v50 = vmul.f32 0.1, %v9097_v38  ;;  %v6952_v7 = vadd.f32 %v6717_v56, %v5937_v33  ;;  %v7732_v5 = vpop.f32.mrf.mxu3 }
 0x5f8   : > { %v5704_v61 = vpop.f32.mrf.mxu1 }
 0x5f9   : > { %v9433_v31 = vsel %vm9209_vm3, %v9097_v38, %v9321_v50  ;;  %v7967_v46 = vadd.f32 %v7732_v5, %v6952_v7  ;;  %v5938_v62 = vadd.f32 %v5704_v61, %v14063_v59 }
 0x5fa   : > { %v8749_v28 = vpop.f32.mrf.mxu0  ;;  %v9545_v55 = vpack.c.bf16 %v9433_v31, %v9433_v31 }
 0x5fb   : > { %v8982_v36 = vadd.f32 %v8747_v32, %v7967_v46 }
 0x5fc   : > { %9658 = vst.msk [vmem:[%s14704_s8 + $0x74] sm:$0xf] %vm9628_vm2, %v9545_v55 }
 0x5fd   : > { %v9098_v52 = vadd.f32 %v14939_v4, %v8982_v36 }
 0x5fe   : > { %v6719_v0 = vpop.f32.mrf.mxu2 }
 0x5ff   : > { %vm9210_vm4 = vcmp.ge.f32.partialorder %v9098_v52, 0.0  ;;  %v9322_v47 = vmul.f32 0.1, %v9098_v52  ;;  %v6953_v23 = vadd.f32 %v6719_v0, %v5938_v62  ;;  %v7734_v43 = vpop.f32.mrf.mxu3 }
 0x600   : > { %v5707_v15 = vpop.f32.mrf.mxu1 }
 0x601   : > { %v9434_v19 = vsel %vm9210_vm4, %v9098_v52, %v9322_v47  ;;  %v7968_v44 = vadd.f32 %v7734_v43, %v6953_v23  ;;  %v5939_v40 = vadd.f32 %v5707_v15, %v14068_v12 }
 0x602   : > { %v8752_v53 = vpop.f32.mrf.mxu0  ;;  %v9546_v45 = vpack.c.bf16 %v9434_v19, %v9434_v19 }
 0x603   : > { %v8983_v58 = vadd.f32 %v8749_v28, %v7968_v44  ;;  %11666 = vmatmul.msk.bf16.gmra.mxu1 %vm728_vm0, %v12985_v14  ;;  %11983 = vmatmul.msk.bf16.gmra.mxu2 %vm728_vm0, %v13047_v35  ;;  %v13111_v44 = vld [vmem:[%s14558_s7 + $0xd0] sm:$0xff] }
 0x604   : > { %9659 = vst.msk [vmem:[%s14704_s8 + $0x78] sm:$0xf] %vm9628_vm2, %v9546_v45  ;;  %12300 = vmatmul.msk.bf16.gmra.mxu3 %vm728_vm0, %v13109_v49  ;;  %v12987_v49 = vld [vmem:[%s14547_s26 + $0xd0] sm:$0xff] }
 0x605   : > { %12617 = vmatmul.msk.bf16.gmra.mxu0 %vm728_vm0, %v13171_v11  ;;  %v9099_v59 = vadd.f32 %v14939_v4, %v8983_v58  ;;  %v13049_v11 = vld [vmem:[%s14552_s29 + $0xd0] sm:$0xff] }
 0x606   : > { %v6722_v51 = vpop.f32.mrf.mxu2 }
 0x607   : > { %vm9211_vm5 = vcmp.ge.f32.partialorder %v9099_v59, 0.0  ;;  %v9323_v25 = vmul.f32 0.1, %v9099_v59  ;;  %v6954_v39 = vadd.f32 %v6722_v51, %v5939_v40  ;;  %v7737_v34 = vpop.f32.mrf.mxu3 }
 0x608   : > { %v5709_v16 = vpop.f32.mrf.mxu1 }
 0x609   : > { %v9435_v41 = vsel %vm9211_vm5, %v9099_v59, %v9323_v25  ;;  %v7969_v10 = vadd.f32 %v7737_v34, %v6954_v39  ;;  %v5940_v12 = vadd.f32 %v5709_v16, %v14077_v8 }
 0x60a   : > { %v8754_v24 = vpop.f32.mrf.mxu0  ;;  %v9547_v42 = vpack.c.bf16 %v9435_v41, %v9435_v41 }
 0x60b   : > { %v8984_v27 = vadd.f32 %v8752_v53, %v7969_v10  ;;  %v13173_v53 = vld [vmem:[%s14563_s14 + $0xd0] sm:$0xff] }
 0x60c   : > { %9660 = vst.msk [vmem:[%s14704_s8 + $0x7c] sm:$0xf] %vm9628_vm2, %v9547_v42 }
 0x60d   : > { %v9100_v30 = vadd.f32 %v14939_v4, %v8984_v27 }
 0x60e   : > { %v6724_v22 = vpop.f32.mrf.mxu2 }
 0x60f   : > { %vm9212_vm6 = vcmp.ge.f32.partialorder %v9100_v30, 0.0  ;;  %v9324_v26 = vmul.f32 0.1, %v9100_v30  ;;  %v6955_v60 = vadd.f32 %v6724_v22, %v5940_v12  ;;  %v7739_v54 = vpop.f32.mrf.mxu3 }
 0x610   : > { %v5712_v32 = vpop.f32.mrf.mxu1 }
 0x611   : > { %v9436_v38 = vsel %vm9212_vm6, %v9100_v30, %v9324_v26  ;;  %v7970_v33 = vadd.f32 %v7739_v54, %v6955_v60  ;;  %v5941_v5 = vadd.f32 %v5712_v32, %v14082_v63  ;;  %v13050_v32 = vld [vmem:[%s14552_s29 + $0xd8] sm:$0xff] }
 0x612   : > { %v8757_v56 = vpop.f32.mrf.mxu0  ;;  %v9548_v50 = vpack.c.bf16 %v9436_v38, %v9436_v38  ;;  %v13174_v38 = vld [vmem:[%s14563_s14 + $0xd8] sm:$0xff] }
 0x613   : > { %v8985_v7 = vadd.f32 %v8754_v24, %v7970_v33  ;;  %11667 = vmatmul.msk.bf16.gmra.mxu1 %vm728_vm0, %v12986_v18  ;;  %11984 = vmatmul.msk.bf16.gmra.mxu2 %vm728_vm0, %v13048_v29  ;;  %v12988_v29 = vld [vmem:[%s14547_s26 + $0xd8] sm:$0xff] }
 0x614   : > { %9661 = vst.msk [vmem:[%s14704_s8 + $0x80] sm:$0xf] %vm9628_vm2, %v9548_v50  ;;  %12301 = vmatmul.msk.bf16.gmra.mxu3 %vm728_vm0, %v13110_v37 }
 0x615   : > { %12618 = vmatmul.msk.bf16.gmra.mxu0 %vm728_vm0, %v13172_v6  ;;  %v9101_v8 = vadd.f32 %v14939_v4, %v8985_v7  ;;  %v13112_v6 = vld [vmem:[%s14558_s7 + $0xd8] sm:$0xff] }
 0x616   : > { %v6727_v61 = vpop.f32.mrf.mxu2 }
 0x617   : > { %vm9213_vm7 = vcmp.ge.f32.partialorder %v9101_v8, 0.0  ;;  %v9325_v31 = vmul.f32 0.1, %v9101_v8  ;;  %v6956_v46 = vadd.f32 %v6727_v61, %v5941_v5  ;;  %v7742_v28 = vpop.f32.mrf.mxu3 }
 0x618   : > { %v5714_v55 = vpop.f32.mrf.mxu1 }
 0x619   : > { %v9437_v36 = vsel %vm9213_vm7, %v9101_v8, %v9325_v31  ;;  %v7971_v52 = vadd.f32 %v7742_v28, %v6956_v46  ;;  %v5942_v63 = vadd.f32 %v5714_v55, %v14091_v21 }
 0x61a   : > { %v8759_v62 = vpop.f32.mrf.mxu0  ;;  %v9549_v0 = vpack.c.bf16 %v9437_v36, %v9437_v36 }
 0x61b   : > { %v8986_v47 = vadd.f32 %v8757_v56, %v7971_v52 }
 0x61c   : > { %9662 = vst.msk [vmem:[%s14704_s8 + $0x84] sm:$0xf] %vm9628_vm2, %v9549_v0 }
 0x61d   : > { %v9102_v23 = vadd.f32 %v14939_v4, %v8986_v47 }
 0x61e   : > { %v6729_v43 = vpop.f32.mrf.mxu2 }
 0x61f   : > { %vm9214_vm8 = vcmp.ge.f32.partialorder %v9102_v23, 0.0  ;;  %v9326_v14 = vmul.f32 0.1, %v9102_v23  ;;  %v6957_v35 = vadd.f32 %v6729_v43, %v5942_v63  ;;  %v7744_v15 = vpop.f32.mrf.mxu3 }
 0x620   : > { %v5717_v19 = vpop.f32.mrf.mxu1 }
 0x621   : > { %v9438_v45 = vsel %vm9214_vm8, %v9102_v23, %v9326_v14  ;;  %v7972_v58 = vadd.f32 %v7744_v15, %v6957_v35  ;;  %v5943_v25 = vadd.f32 %v5717_v19, %v14108_v20  ;;  %v12989_v15 = vld [vmem:[%s14547_s26 + $0xe0] sm:$0xff] }
 0x622   : > { %v8762_v59 = vpop.f32.mrf.mxu0  ;;  %v9550_v40 = vpack.c.bf16 %v9438_v45, %v9438_v45  ;;  %v13113_v19 = vld [vmem:[%s14558_s7 + $0xe0] sm:$0xff] }
 0x623   : > { %v8987_v51 = vadd.f32 %v8759_v62, %v7972_v58  ;;  %11668 = vmatmul.msk.bf16.gmra.mxu1 %vm728_vm0, %v12987_v49  ;;  %11985 = vmatmul.msk.bf16.gmra.mxu2 %vm728_vm0, %v13049_v11  ;;  %v13051_v49 = vld [vmem:[%s14552_s29 + $0xe0] sm:$0xff] }
 0x624   : > { %9663 = vst.msk [vmem:[%s14704_s8 + $0x88] sm:$0xf] %vm9628_vm2, %v9550_v40  ;;  %12302 = vmatmul.msk.bf16.gmra.mxu3 %vm728_vm0, %v13111_v44  ;;  %v13175_v44 = vld [vmem:[%s14563_s14 + $0xe0] sm:$0xff] }
 0x625   : > { %12619 = vmatmul.msk.bf16.gmra.mxu0 %vm728_vm0, %v13173_v53  ;;  %v9103_v21 = vadd.f32 %v14939_v4, %v8987_v51 }
 0x626   : > { %v6732_v39 = vpop.f32.mrf.mxu2 }
 0x627   : > { %vm9215_vm9 = vcmp.ge.f32.partialorder %v9103_v21, 0.0  ;;  %v9327_v34 = vmul.f32 0.1, %v9103_v21  ;;  %v6958_v16 = vadd.f32 %v6732_v39, %v5943_v25  ;;  %v7747_v41 = vpop.f32.mrf.mxu3 }
 0x628   : > { %v5719_v10 = vpop.f32.mrf.mxu1 }
 0x629   : > { %v9439_v24 = vsel %vm9215_vm9, %v9103_v21, %v9327_v34  ;;  %v7973_v42 = vadd.f32 %v7747_v41, %v6958_v16  ;;  %v5944_v20 = vadd.f32 %v5719_v10, %v14117_v3 }
 0x62a   : > { %v8764_v27 = vpop.f32.mrf.mxu0  ;;  %v9551_v30 = vpack.c.bf16 %v9439_v24, %v9439_v24 }
 0x62b   : > { %v8988_v12 = vadd.f32 %v8762_v59, %v7973_v42 }
 0x62c   : > { %9664 = vst.msk [vmem:[%s14704_s8 + $0x8c] sm:$0xf] %vm9628_vm2, %v9551_v30 }
 0x62d   : > { %v9104_v22 = vadd.f32 %v14939_v4, %v8988_v12 }
 0x62e   : > { %v6734_v26 = vpop.f32.mrf.mxu2 }
 0x62f   : > { %vm9216_vm10 = vcmp.ge.f32.partialorder %v9104_v22, 0.0  ;;  %v9328_v60 = vmul.f32 0.1, %v9104_v22  ;;  %v6959_v54 = vadd.f32 %v6734_v26, %v5944_v20  ;;  %v7749_v18 = vpop.f32.mrf.mxu3 }
 0x630   : > { %v5722_v37 = vpop.f32.mrf.mxu1 }
 0x631   : > { %v9440_v33 = vsel %vm9216_vm10, %v9104_v22, %v9328_v60  ;;  %v7974_v56 = vadd.f32 %v7749_v18, %v6959_v54  ;;  %v5945_v5 = vadd.f32 %v5722_v37, %v14122_v48  ;;  %v12990_v60 = vld [vmem:[%s14547_s26 + $0xe8] sm:$0xff] }
 0x632   : > { %v8767_v50 = vpop.f32.mrf.mxu0  ;;  %v9552_v7 = vpack.c.bf16 %v9440_v33, %v9440_v33  ;;  %v13052_v54 = vld [vmem:[%s14552_s29 + $0xe8] sm:$0xff] }
 0x633   : > { %v8989_v8 = vadd.f32 %v8764_v27, %v7974_v56  ;;  %11669 = vmatmul.msk.bf16.gmra.mxu1 %vm728_vm0, %v12988_v29  ;;  %11986 = vmatmul.msk.bf16.gmra.mxu2 %vm728_vm0, %v13050_v32  ;;  %v13114_v29 = vld [vmem:[%s14558_s7 + $0xe8] sm:$0xff] }
 0x634   : > { %9665 = vst.msk [vmem:[%s14704_s8 + $0x90] sm:$0xf] %vm9628_vm2, %v9552_v7  ;;  %12303 = vmatmul.msk.bf16.gmra.mxu3 %vm728_vm0, %v13112_v6  ;;  %v13176_v32 = vld [vmem:[%s14563_s14 + $0xe8] sm:$0xff] }
 0x635   : > { %12620 = vmatmul.msk.bf16.gmra.mxu0 %vm728_vm0, %v13174_v38  ;;  %v9105_v3 = vadd.f32 %v14939_v4, %v8989_v8 }
 0x636   : > { %v6737_v61 = vpop.f32.mrf.mxu2 }
 0x637   : > { %vm9217_vm11 = vcmp.ge.f32.partialorder %v9105_v3, 0.0  ;;  %v9329_v31 = vmul.f32 0.1, %v9105_v3  ;;  %v6960_v46 = vadd.f32 %v6737_v61, %v5945_v5  ;;  %v7752_v28 = vpop.f32.mrf.mxu3 }
 0x638   : > { %v5724_v55 = vpop.f32.mrf.mxu1 }
 0x639   : > { %v9441_v36 = vsel %vm9217_vm11, %v9105_v3, %v9329_v31  ;;  %v7975_v52 = vadd.f32 %v7752_v28, %v6960_v46  ;;  %v5946_v48 = vadd.f32 %v5724_v55, %v14131_v13 }
 0x63a   : > { %v8769_v62 = vpop.f32.mrf.mxu0  ;;  %v9553_v0 = vpack.c.bf16 %v9441_v36, %v9441_v36 }
 0x63b   : > { %v8990_v47 = vadd.f32 %v8767_v50, %v7975_v52  ;;  %v15748_v50 = vld [vmem:[#allocation70_spill] sm:$0xff] }
 0x63c   : > { %9666 = vst.msk [vmem:[%s14704_s8 + $0x94] sm:$0xf] %vm9628_vm2, %v9553_v0  ;;  %v15749_v0 = vld [vmem:[#allocation71_spill] sm:$0xff] }
 0x63d   : > { %v9106_v23 = vadd.f32 %v14939_v4, %v8990_v47 }
 0x63e   : > { %v6739_v63 = vpop.f32.mrf.mxu2 }
 0x63f   : > { %vm9218_vm12 = vcmp.ge.f32.partialorder %v9106_v23, 0.0  ;;  %v9330_v43 = vmul.f32 0.1, %v9106_v23  ;;  %v6961_v14 = vadd.f32 %v6739_v63, %v5946_v48  ;;  %v7754_v35 = vpop.f32.mrf.mxu3 }
 0x640   : > { %v5727_v11 = vpop.f32.mrf.mxu1 }
 0x641   : > { %v9442_v53 = vsel %vm9218_vm12, %v9106_v23, %v9330_v43  ;;  %v7976_v45 = vadd.f32 %v7754_v35, %v6961_v14  ;;  %v5947_v51 = vadd.f32 %v5727_v11, %v14136_v17  ;;  %v12991_v14 = vld [vmem:[%s14547_s26 + $0xf0] sm:$0xff] }
 0x642   : > { %v8772_v58 = vpop.f32.mrf.mxu0  ;;  %v9554_v59 = vpack.c.bf16 %v9442_v53, %v9442_v53  ;;  %v13053_v35 = vld [vmem:[%s14552_s29 + $0xf0] sm:$0xff] }
 0x643   : > { %v8991_v40 = vadd.f32 %v8769_v62, %v7976_v45  ;;  %11670 = vmatmul.msk.bf16.gmra.mxu1 %vm728_vm0, %v12989_v15  ;;  %11987 = vmatmul.msk.bf16.gmra.mxu2 %vm728_vm0, %v13051_v49  ;;  %v13115_v49 = vld [vmem:[%s14558_s7 + $0xf0] sm:$0xff] }
 0x644   : > { %9667 = vst.msk [vmem:[%s14704_s8 + $0x98] sm:$0xf] %vm9628_vm2, %v9554_v59  ;;  %12304 = vmatmul.msk.bf16.gmra.mxu3 %vm728_vm0, %v13113_v19  ;;  %v13177_v11 = vld [vmem:[%s14563_s14 + $0xf0] sm:$0xff] }
 0x645   : > { %12621 = vmatmul.msk.bf16.gmra.mxu0 %vm728_vm0, %v13175_v44  ;;  %v9107_v13 = vadd.f32 %v14939_v4, %v8991_v40  ;;  %v15750_v40 = vld [vmem:[#allocation34_spill] sm:$0xff] }
 0x646   : > { %v6742_v21 = vpop.f32.mrf.mxu2 }
 0x647   : > { %vm9219_vm13 = vcmp.ge.f32.partialorder %v9107_v13, 0.0  ;;  %v9331_v25 = vmul.f32 0.1, %v9107_v13  ;;  %v6962_v39 = vadd.f32 %v6742_v21, %v5947_v51  ;;  %v7757_v34 = vpop.f32.mrf.mxu3 }
 0x648   : > { %v5729_v16 = vpop.f32.mrf.mxu1 }
 0x649   : > { %v9443_v41 = vsel %vm9219_vm13, %v9107_v13, %v9331_v25  ;;  %v7977_v10 = vadd.f32 %v7757_v34, %v6962_v39  ;;  %v5948_v17 = vadd.f32 %v5729_v16, %v14145_v9 }
 0x64a   : > { %v8774_v24 = vpop.f32.mrf.mxu0  ;;  %v9555_v42 = vpack.c.bf16 %v9443_v41, %v9443_v41 }
 0x64b   : > { %v8992_v27 = vadd.f32 %v8772_v58, %v7977_v10 }
 0x64c   : > { %9668 = vst.msk [vmem:[%s14704_s8 + $0x9c] sm:$0xf] %vm9628_vm2, %v9555_v42 }
 0x64d   : > { %v9108_v30 = vadd.f32 %v14939_v4, %v8992_v27 }
 0x64e   : > { %v6744_v12 = vpop.f32.mrf.mxu2 }
 0x64f   : > { %vm9220_vm14 = vcmp.ge.f32.partialorder %v9108_v30, 0.0  ;;  %v9332_v22 = vmul.f32 0.1, %v9108_v30  ;;  %v6963_v20 = vadd.f32 %v6744_v12, %v5948_v17  ;;  %v7759_v26 = vpop.f32.mrf.mxu3 }
 0x650   : > { %v5732_v18 = vpop.f32.mrf.mxu1 }
 0x651   : > { %v9444_v37 = vsel %vm9220_vm14, %v9108_v30, %v9332_v22  ;;  %v7978_v6 = vadd.f32 %v7759_v26, %v6963_v20  ;;  %v5949_v7 = vadd.f32 %v5732_v18, %v15748_v50  ;;  %v15751_v30 = vld [vmem:[#allocation37_spill] sm:$0xff]  ;;  %v15752_v50 = vld [vmem:[#allocation40_spill] sm:$0xff] }
 0x652   : > { %v8777_v38 = vpop.f32.mrf.mxu0  ;;  %v9556_v33 = vpack.c.bf16 %v9444_v37, %v9444_v37 }
 0x653   : > { %v8993_v56 = vadd.f32 %v8774_v24, %v7978_v6  ;;  %11671 = vmatmul.msk.bf16.gmra.mxu1 %vm728_vm0, %v12990_v60  ;;  %11988 = vmatmul.msk.bf16.gmra.mxu2 %vm728_vm0, %v13052_v54  ;;  %v12992_v60 = vld [vmem:[%s14547_s26 + $0xf8] sm:$0xff] }
 0x654   : > { %9669 = vst.msk [vmem:[%s14704_s8 + $0xa0] sm:$0xf] %vm9628_vm2, %v9556_v33  ;;  %12305 = vmatmul.msk.bf16.gmra.mxu3 %vm728_vm0, %v13114_v29  ;;  %v13054_v54 = vld [vmem:[%s14552_s29 + $0xf8] sm:$0xff] }
 0x655   : > { %12622 = vmatmul.msk.bf16.gmra.mxu0 %vm728_vm0, %v13176_v32  ;;  %v9109_v9 = vadd.f32 %v14939_v4, %v8993_v56  ;;  %v13116_v29 = vld [vmem:[%s14558_s7 + $0xf8] sm:$0xff] }
 0x656   : > { %v6747_v8 = vpop.f32.mrf.mxu2  ;;  %v13178_v32 = vld [vmem:[%s14563_s14 + $0xf8] sm:$0xff] }
 0x657   : > { %vm9221_vm15 = vcmp.ge.f32.partialorder %v9109_v9, 0.0  ;;  %v9333_v3 = vmul.f32 0.1, %v9109_v9  ;;  %v6964_v5 = vadd.f32 %v6747_v8, %v5949_v7  ;;  %v7762_v61 = vpop.f32.mrf.mxu3 }
 0x658   : > { %v5734_v31 = vpop.f32.mrf.mxu1 }
 0x659   : > { %v9445_v46 = vsel %vm9221_vm15, %v9109_v9, %v9333_v3  ;;  %v7979_v28 = vadd.f32 %v7762_v61, %v6964_v5  ;;  %v5950_v47 = vadd.f32 %v5734_v31, %v15749_v0  ;;  %v15753_v0 = vld [vmem:[#allocation43_spill] sm:$0xff] }
 0x65a   : > { %v8779_v55 = vpop.f32.mrf.mxu0  ;;  %v9557_v36 = vpack.c.bf16 %v9445_v46, %v9445_v46 }
 0x65b   : > { %v8994_v52 = vadd.f32 %v8777_v38, %v7979_v28 }
 0x65c   : > { %9670 = vst.msk [vmem:[%s14704_s8 + $0xa4] sm:$0xf] %vm9628_vm2, %v9557_v36 }
 0x65d   : > { %v9110_v62 = vadd.f32 %v14939_v4, %v8994_v52 }
 0x65e   : > { %v6749_v23 = vpop.f32.mrf.mxu2 }
 0x65f   : > { %vm9222_vm1 = vcmp.ge.f32.partialorder %v9110_v62, 0.0  ;;  %v9334_v48 = vmul.f32 0.1, %v9110_v62  ;;  %v6965_v63 = vadd.f32 %v6749_v23, %v5950_v47  ;;  %v7764_v43 = vpop.f32.mrf.mxu3 }
 0x660   : > { %v5737_v15 = vpop.f32.mrf.mxu1 }
 0x661   : > { %v9446_v19 = vsel %vm9222_vm1, %v9110_v62, %v9334_v48  ;;  %v7980_v44 = vadd.f32 %v7764_v43, %v6965_v63  ;;  %v5951_v13 = vadd.f32 %v5737_v15, %v15750_v40  ;;  %v15754_v40 = vld [vmem:[#allocation46_spill] sm:$0xff] }
 0x662   : > { %v8782_v53 = vpop.f32.mrf.mxu0  ;;  %v9558_v45 = vpack.c.bf16 %v9446_v19, %v9446_v19 }
 0x663   : > { %v8995_v58 = vadd.f32 %v8779_v55, %v7980_v44  ;;  %11672 = vmatmul.msk.bf16.gmra.mxu1 %vm728_vm0, %v12991_v14  ;;  %11989 = vmatmul.msk.bf16.gmra.mxu2 %vm728_vm0, %v13053_v35  ;;  %v12993_v14 = vld [vmem:[%s14547_s26 + $0x100] sm:$0xff] }
 0x664   : > { %9671 = vst.msk [vmem:[%s14704_s8 + $0xa8] sm:$0xf] %vm9628_vm2, %v9558_v45  ;;  %12306 = vmatmul.msk.bf16.gmra.mxu3 %vm728_vm0, %v13115_v49  ;;  %v13055_v35 = vld [vmem:[%s14552_s29 + $0x100] sm:$0xff] }
 0x665   : > { %12623 = vmatmul.msk.bf16.gmra.mxu0 %vm728_vm0, %v13177_v11  ;;  %v9111_v59 = vadd.f32 %v14939_v4, %v8995_v58  ;;  %v13117_v49 = vld [vmem:[%s14558_s7 + $0x100] sm:$0xff] }
 0x666   : > { %v6752_v51 = vpop.f32.mrf.mxu2  ;;  %v13179_v11 = vld [vmem:[%s14563_s14 + $0x100] sm:$0xff] }
 0x667   : > { %vm9223_vm3 = vcmp.ge.f32.partialorder %v9111_v59, 0.0  ;;  %v9335_v21 = vmul.f32 0.1, %v9111_v59  ;;  %v6966_v25 = vadd.f32 %v6752_v51, %v5951_v13  ;;  %v7767_v39 = vpop.f32.mrf.mxu3 }
 0x668   : > { %v5739_v34 = vpop.f32.mrf.mxu1 }
 0x669   : > { %v9447_v16 = vsel %vm9223_vm3, %v9111_v59, %v9335_v21  ;;  %v7981_v41 = vadd.f32 %v7767_v39, %v6966_v25  ;;  %v5952_v17 = vadd.f32 %v5739_v34, %v15751_v30  ;;  %v15755_v30 = vld [vmem:[#allocation49_spill] sm:$0xff] }
 0x66a   : > { %v8784_v10 = vpop.f32.mrf.mxu0  ;;  %v9559_v24 = vpack.c.bf16 %v9447_v16, %v9447_v16 }
 0x66b   : > { %v8996_v42 = vadd.f32 %v8782_v53, %v7981_v41 }
 0x66c   : > { %9672 = vst.msk [vmem:[%s14704_s8 + $0xac] sm:$0xf] %vm9628_vm2, %v9559_v24 }
 0x66d   : > { %v9112_v27 = vadd.f32 %v14939_v4, %v8996_v42 }
 0x66e   : > { %v6754_v12 = vpop.f32.mrf.mxu2 }
 0x66f   : > { %vm9224_vm4 = vcmp.ge.f32.partialorder %v9112_v27, 0.0  ;;  %v9336_v22 = vmul.f32 0.1, %v9112_v27  ;;  %v6967_v20 = vadd.f32 %v6754_v12, %v5952_v17  ;;  %v7769_v26 = vpop.f32.mrf.mxu3 }
 0x670   : > { %v5742_v18 = vpop.f32.mrf.mxu1 }
 0x671   : > { %v9448_v37 = vsel %vm9224_vm4, %v9112_v27, %v9336_v22  ;;  %v7982_v6 = vadd.f32 %v7769_v26, %v6967_v20  ;;  %v5953_v7 = vadd.f32 %v5742_v18, %v15752_v50  ;;  %v15756_v50 = vld [vmem:[#allocation52_spill] sm:$0xff] }
 0x672   : > { %v8787_v38 = vpop.f32.mrf.mxu0  ;;  %v9560_v33 = vpack.c.bf16 %v9448_v37, %v9448_v37 }
 0x673   : > { %v8997_v56 = vadd.f32 %v8784_v10, %v7982_v6  ;;  %11673 = vmatmul.msk.bf16.gmra.mxu1 %vm728_vm0, %v12992_v60  ;;  %11990 = vmatmul.msk.bf16.gmra.mxu2 %vm728_vm0, %v13054_v54  ;;  %v12994_v60 = vld [vmem:[%s14547_s26 + $0x108] sm:$0xff] }
 0x674   : > { %9673 = vst.msk [vmem:[%s14704_s8 + $0xb0] sm:$0xf] %vm9628_vm2, %v9560_v33  ;;  %12307 = vmatmul.msk.bf16.gmra.mxu3 %vm728_vm0, %v13116_v29  ;;  %v13056_v54 = vld [vmem:[%s14552_s29 + $0x108] sm:$0xff] }
 0x675   : > { %12624 = vmatmul.msk.bf16.gmra.mxu0 %vm728_vm0, %v13178_v32  ;;  %v9113_v9 = vadd.f32 %v14939_v4, %v8997_v56  ;;  %v13118_v29 = vld [vmem:[%s14558_s7 + $0x108] sm:$0xff] }
 0x676   : > { %v6757_v8 = vpop.f32.mrf.mxu2  ;;  %v13180_v32 = vld [vmem:[%s14563_s14 + $0x108] sm:$0xff] }
 0x677   : > { %vm9225_vm5 = vcmp.ge.f32.partialorder %v9113_v9, 0.0  ;;  %v9337_v3 = vmul.f32 0.1, %v9113_v9  ;;  %v6968_v5 = vadd.f32 %v6757_v8, %v5953_v7  ;;  %v7772_v61 = vpop.f32.mrf.mxu3 }
 0x678   : > { %v5744_v31 = vpop.f32.mrf.mxu1 }
 0x679   : > { %v9449_v46 = vsel %vm9225_vm5, %v9113_v9, %v9337_v3  ;;  %v7983_v28 = vadd.f32 %v7772_v61, %v6968_v5  ;;  %v5954_v47 = vadd.f32 %v5744_v31, %v15753_v0  ;;  %v15757_v0 = vld [vmem:[#allocation55_spill] sm:$0xff] }
 0x67a   : > { %v8789_v55 = vpop.f32.mrf.mxu0  ;;  %v9561_v36 = vpack.c.bf16 %v9449_v46, %v9449_v46 }
 0x67b   : > { %v8998_v52 = vadd.f32 %v8787_v38, %v7983_v28 }
 0x67c   : > { %9674 = vst.msk [vmem:[%s14704_s8 + $0xb4] sm:$0xf] %vm9628_vm2, %v9561_v36 }
 0x67d   : > { %v9114_v62 = vadd.f32 %v14939_v4, %v8998_v52 }
 0x67e   : > { %v6759_v23 = vpop.f32.mrf.mxu2 }
 0x67f   : > { %vm9226_vm6 = vcmp.ge.f32.partialorder %v9114_v62, 0.0  ;;  %v9338_v48 = vmul.f32 0.1, %v9114_v62  ;;  %v6969_v63 = vadd.f32 %v6759_v23, %v5954_v47  ;;  %v7774_v43 = vpop.f32.mrf.mxu3 }
 0x680   : > { %v5747_v15 = vpop.f32.mrf.mxu1 }
 0x681   : > { %v9450_v19 = vsel %vm9226_vm6, %v9114_v62, %v9338_v48  ;;  %v7984_v44 = vadd.f32 %v7774_v43, %v6969_v63  ;;  %v5955_v13 = vadd.f32 %v5747_v15, %v15754_v40  ;;  %v15758_v40 = vld [vmem:[#allocation58_spill] sm:$0xff] }
 0x682   : > { %v8792_v53 = vpop.f32.mrf.mxu0  ;;  %v9562_v45 = vpack.c.bf16 %v9450_v19, %v9450_v19 }
 0x683   : > { %v8999_v58 = vadd.f32 %v8789_v55, %v7984_v44  ;;  %11674 = vmatmul.msk.bf16.gmra.mxu1 %vm728_vm0, %v12993_v14  ;;  %11991 = vmatmul.msk.bf16.gmra.mxu2 %vm728_vm0, %v13055_v35  ;;  %v12995_v14 = vld [vmem:[%s14547_s26 + $0x110] sm:$0xff] }
 0x684   : > { %9675 = vst.msk [vmem:[%s14704_s8 + $0xb8] sm:$0xf] %vm9628_vm2, %v9562_v45  ;;  %12308 = vmatmul.msk.bf16.gmra.mxu3 %vm728_vm0, %v13117_v49  ;;  %v13057_v35 = vld [vmem:[%s14552_s29 + $0x110] sm:$0xff] }
 0x685   : > { %12625 = vmatmul.msk.bf16.gmra.mxu0 %vm728_vm0, %v13179_v11  ;;  %v9115_v59 = vadd.f32 %v14939_v4, %v8999_v58  ;;  %v13119_v49 = vld [vmem:[%s14558_s7 + $0x110] sm:$0xff] }
 0x686   : > { %v6762_v51 = vpop.f32.mrf.mxu2  ;;  %v13181_v11 = vld [vmem:[%s14563_s14 + $0x110] sm:$0xff] }
 0x687   : > { %vm9227_vm7 = vcmp.ge.f32.partialorder %v9115_v59, 0.0  ;;  %v9339_v21 = vmul.f32 0.1, %v9115_v59  ;;  %v6970_v25 = vadd.f32 %v6762_v51, %v5955_v13  ;;  %v7777_v39 = vpop.f32.mrf.mxu3 }
 0x688   : > { %v5749_v34 = vpop.f32.mrf.mxu1 }
 0x689   : > { %v9451_v16 = vsel %vm9227_vm7, %v9115_v59, %v9339_v21  ;;  %v7985_v41 = vadd.f32 %v7777_v39, %v6970_v25  ;;  %v5956_v17 = vadd.f32 %v5749_v34, %v15755_v30  ;;  %v15759_v30 = vld [vmem:[#allocation61_spill] sm:$0xff] }
 0x68a   : > { %v8794_v10 = vpop.f32.mrf.mxu0  ;;  %v9563_v24 = vpack.c.bf16 %v9451_v16, %v9451_v16 }
 0x68b   : > { %v9000_v42 = vadd.f32 %v8792_v53, %v7985_v41 }
 0x68c   : > { %9676 = vst.msk [vmem:[%s14704_s8 + $0xbc] sm:$0xf] %vm9628_vm2, %v9563_v24 }
 0x68d   : > { %v9116_v27 = vadd.f32 %v14939_v4, %v9000_v42 }
 0x68e   : > { %v6764_v12 = vpop.f32.mrf.mxu2 }
 0x68f   : > { %vm9228_vm8 = vcmp.ge.f32.partialorder %v9116_v27, 0.0  ;;  %v9340_v22 = vmul.f32 0.1, %v9116_v27  ;;  %v6971_v20 = vadd.f32 %v6764_v12, %v5956_v17  ;;  %v7779_v26 = vpop.f32.mrf.mxu3 }
 0x690   : > { %v5752_v18 = vpop.f32.mrf.mxu1 }
 0x691   : > { %v9452_v37 = vsel %vm9228_vm8, %v9116_v27, %v9340_v22  ;;  %v7986_v6 = vadd.f32 %v7779_v26, %v6971_v20  ;;  %v5957_v7 = vadd.f32 %v5752_v18, %v15756_v50  ;;  %v15760_v50 = vld [vmem:[#allocation64_spill] sm:$0xff] }
 0x692   : > { %v8797_v38 = vpop.f32.mrf.mxu0  ;;  %v9564_v33 = vpack.c.bf16 %v9452_v37, %v9452_v37 }
 0x693   : > { %v9001_v56 = vadd.f32 %v8794_v10, %v7986_v6  ;;  %11675 = vmatmul.msk.bf16.gmra.mxu1 %vm728_vm0, %v12994_v60  ;;  %11992 = vmatmul.msk.bf16.gmra.mxu2 %vm728_vm0, %v13056_v54  ;;  %v12996_v60 = vld [vmem:[%s14547_s26 + $0x118] sm:$0xff] }
 0x694   : > { %9677 = vst.msk [vmem:[%s14704_s8 + $0xc0] sm:$0xf] %vm9628_vm2, %v9564_v33  ;;  %12309 = vmatmul.msk.bf16.gmra.mxu3 %vm728_vm0, %v13118_v29  ;;  %v13058_v54 = vld [vmem:[%s14552_s29 + $0x118] sm:$0xff] }
 0x695   : > { %12626 = vmatmul.msk.bf16.gmra.mxu0 %vm728_vm0, %v13180_v32  ;;  %v9117_v9 = vadd.f32 %v14939_v4, %v9001_v56  ;;  %v13120_v29 = vld [vmem:[%s14558_s7 + $0x118] sm:$0xff] }
 0x696   : > { %v6767_v8 = vpop.f32.mrf.mxu2  ;;  %v13182_v32 = vld [vmem:[%s14563_s14 + $0x118] sm:$0xff] }
 0x697   : > { %vm9229_vm9 = vcmp.ge.f32.partialorder %v9117_v9, 0.0  ;;  %v9341_v3 = vmul.f32 0.1, %v9117_v9  ;;  %v6972_v5 = vadd.f32 %v6767_v8, %v5957_v7  ;;  %v7782_v61 = vpop.f32.mrf.mxu3 }
 0x698   : > { %v5754_v31 = vpop.f32.mrf.mxu1 }
 0x699   : > { %v9453_v46 = vsel %vm9229_vm9, %v9117_v9, %v9341_v3  ;;  %v7987_v28 = vadd.f32 %v7782_v61, %v6972_v5  ;;  %v5958_v47 = vadd.f32 %v5754_v31, %v15757_v0  ;;  %v15761_v0 = vld [vmem:[#allocation67_spill] sm:$0xff] }
 0x69a   : > { %v8799_v55 = vpop.f32.mrf.mxu0  ;;  %v9565_v36 = vpack.c.bf16 %v9453_v46, %v9453_v46 }
 0x69b   : > { %v9002_v52 = vadd.f32 %v8797_v38, %v7987_v28 }
 0x69c   : > { %9678 = vst.msk [vmem:[%s14704_s8 + $0xc4] sm:$0xf] %vm9628_vm2, %v9565_v36 }
 0x69d   : > { %v9118_v62 = vadd.f32 %v14939_v4, %v9002_v52 }
 0x69e   : > { %v6769_v23 = vpop.f32.mrf.mxu2 }
 0x69f   : > { %vm9230_vm10 = vcmp.ge.f32.partialorder %v9118_v62, 0.0  ;;  %v9342_v48 = vmul.f32 0.1, %v9118_v62  ;;  %v6973_v63 = vadd.f32 %v6769_v23, %v5958_v47  ;;  %v7784_v43 = vpop.f32.mrf.mxu3 }
 0x6a0   : > { %v5757_v15 = vpop.f32.mrf.mxu1 }
 0x6a1   : > { %v9454_v19 = vsel %vm9230_vm10, %v9118_v62, %v9342_v48  ;;  %v7988_v44 = vadd.f32 %v7784_v43, %v6973_v63  ;;  %v5959_v13 = vadd.f32 %v5757_v15, %v15758_v40 }
 0x6a2   : > { %v8802_v53 = vpop.f32.mrf.mxu0  ;;  %v9566_v45 = vpack.c.bf16 %v9454_v19, %v9454_v19 }
 0x6a3   : > { %v9003_v58 = vadd.f32 %v8799_v55, %v7988_v44  ;;  %11676 = vmatmul.msk.bf16.gmra.mxu1 %vm728_vm0, %v12995_v14  ;;  %11993 = vmatmul.msk.bf16.gmra.mxu2 %vm728_vm0, %v13057_v35  ;;  %v12997_v14 = vld [vmem:[%s14547_s26 + $0x120] sm:$0xff] }
 0x6a4   : > { %9679 = vst.msk [vmem:[%s14704_s8 + $0xc8] sm:$0xf] %vm9628_vm2, %v9566_v45  ;;  %12310 = vmatmul.msk.bf16.gmra.mxu3 %vm728_vm0, %v13119_v49  ;;  %v13059_v35 = vld [vmem:[%s14552_s29 + $0x120] sm:$0xff] }
 0x6a5   : > { %12627 = vmatmul.msk.bf16.gmra.mxu0 %vm728_vm0, %v13181_v11  ;;  %v9119_v59 = vadd.f32 %v14939_v4, %v9003_v58  ;;  %v13121_v49 = vld [vmem:[%s14558_s7 + $0x120] sm:$0xff] }
 0x6a6   : > { %v6772_v51 = vpop.f32.mrf.mxu2  ;;  %v13183_v11 = vld [vmem:[%s14563_s14 + $0x120] sm:$0xff] }
 0x6a7   : > { %vm9231_vm11 = vcmp.ge.f32.partialorder %v9119_v59, 0.0  ;;  %v9343_v21 = vmul.f32 0.1, %v9119_v59  ;;  %v6974_v25 = vadd.f32 %v6772_v51, %v5959_v13  ;;  %v7787_v39 = vpop.f32.mrf.mxu3 }
 0x6a8   : > { %v5759_v34 = vpop.f32.mrf.mxu1 }
 0x6a9   : > { %v9455_v16 = vsel %vm9231_vm11, %v9119_v59, %v9343_v21  ;;  %v7989_v41 = vadd.f32 %v7787_v39, %v6974_v25  ;;  %v5960_v17 = vadd.f32 %v5759_v34, %v15759_v30 }
 0x6aa   : > { %v8804_v10 = vpop.f32.mrf.mxu0  ;;  %v9567_v24 = vpack.c.bf16 %v9455_v16, %v9455_v16 }
 0x6ab   : > { %v9004_v42 = vadd.f32 %v8802_v53, %v7989_v41 }
 0x6ac   : > { %9680 = vst.msk [vmem:[%s14704_s8 + $0xcc] sm:$0xf] %vm9628_vm2, %v9567_v24 }
 0x6ad   : > { %v9120_v27 = vadd.f32 %v14939_v4, %v9004_v42 }
 0x6ae   : > { %v6774_v12 = vpop.f32.mrf.mxu2 }
 0x6af   : > { %vm9232_vm12 = vcmp.ge.f32.partialorder %v9120_v27, 0.0  ;;  %v9344_v22 = vmul.f32 0.1, %v9120_v27  ;;  %v6975_v20 = vadd.f32 %v6774_v12, %v5960_v17  ;;  %v7789_v26 = vpop.f32.mrf.mxu3 }
 0x6b0   : > { %v5762_v18 = vpop.f32.mrf.mxu1 }
 0x6b1   : > { %v9456_v37 = vsel %vm9232_vm12, %v9120_v27, %v9344_v22  ;;  %v7990_v6 = vadd.f32 %v7789_v26, %v6975_v20  ;;  %v5961_v7 = vadd.f32 %v5762_v18, %v15760_v50  ;;  %v12998_v20 = vld [vmem:[%s14547_s26 + $0x128] sm:$0xff] }
 0x6b2   : > { %v8807_v38 = vpop.f32.mrf.mxu0  ;;  %v9568_v33 = vpack.c.bf16 %v9456_v37, %v9456_v37  ;;  %v13060_v26 = vld [vmem:[%s14552_s29 + $0x128] sm:$0xff] }
 0x6b3   : > { %v9005_v56 = vadd.f32 %v8804_v10, %v7990_v6  ;;  %11677 = vmatmul.msk.bf16.gmra.mxu1 %vm728_vm0, %v12996_v60  ;;  %11994 = vmatmul.msk.bf16.gmra.mxu2 %vm728_vm0, %v13058_v54  ;;  %v13122_v54 = vld [vmem:[%s14558_s7 + $0x128] sm:$0xff] }
 0x6b4   : > { %9681 = vst.msk [vmem:[%s14704_s8 + $0xd0] sm:$0xf] %vm9628_vm2, %v9568_v33  ;;  %12311 = vmatmul.msk.bf16.gmra.mxu3 %vm728_vm0, %v13120_v29  ;;  %v13184_v18 = vld [vmem:[%s14563_s14 + $0x128] sm:$0xff] }
 0x6b5   : > { %12628 = vmatmul.msk.bf16.gmra.mxu0 %vm728_vm0, %v13182_v32  ;;  %v9121_v9 = vadd.f32 %v14939_v4, %v9005_v56  ;;  %v15763_v56 = vld [vmem:[#allocation4_spill] sm:$0xff] }
 0x6b6   : > { %v6777_v8 = vpop.f32.mrf.mxu2 }
 0x6b7   : > { %vm9233_vm13 = vcmp.ge.f32.partialorder %v9121_v9, 0.0  ;;  %v9345_v3 = vmul.f32 0.1, %v9121_v9  ;;  %v6976_v5 = vadd.f32 %v6777_v8, %v5961_v7  ;;  %v7792_v61 = vpop.f32.mrf.mxu3 }
 0x6b8   : > { %v5764_v31 = vpop.f32.mrf.mxu1 }
 0x6b9   : > { %v9457_v46 = vsel %vm9233_vm13, %v9121_v9, %v9345_v3  ;;  %v7991_v28 = vadd.f32 %v7792_v61, %v6976_v5  ;;  %v5962_v47 = vadd.f32 %v5764_v31, %v15761_v0 }
 0x6ba   : > { %v8809_v55 = vpop.f32.mrf.mxu0  ;;  %v9569_v36 = vpack.c.bf16 %v9457_v46, %v9457_v46 }
 0x6bb   : > { %v9006_v52 = vadd.f32 %v8807_v38, %v7991_v28 }
 0x6bc   : > { %9682 = vst.msk [vmem:[%s14704_s8 + $0xd4] sm:$0xf] %vm9628_vm2, %v9569_v36 }
 0x6bd   : > { %v9122_v62 = vadd.f32 %v14939_v4, %v9006_v52  ;;  %v15764_v52 = vld [vmem:[#allocation6_spill] sm:$0xff] }
 0x6be   : > { %v6779_v23 = vpop.f32.mrf.mxu2 }
 0x6bf   : > { %vm9234_vm14 = vcmp.ge.f32.partialorder %v9122_v62, 0.0  ;;  %v9346_v48 = vmul.f32 0.1, %v9122_v62  ;;  %v6977_v63 = vadd.f32 %v6779_v23, %v5962_v47  ;;  %v7794_v43 = vpop.f32.mrf.mxu3 }
 0x6c0   : > { %v5767_v15 = vpop.f32.mrf.mxu1 }
 0x6c1   : > { %v9458_v19 = vsel %vm9234_vm14, %v9122_v62, %v9346_v48  ;;  %v7992_v44 = vadd.f32 %v7794_v43, %v6977_v63  ;;  %v5963_v40 = vadd.f32 %v5767_v15, %v14260_v2  ;;  %v15762_v2 = vld [vmem:[#allocation2_spill] sm:$0xff]  ;;  %v12999_v63 = vld [vmem:[%s14547_s26 + $0x130] sm:$0xff] }
 0x6c2   : > { %v8812_v53 = vpop.f32.mrf.mxu0  ;;  %v9570_v45 = vpack.c.bf16 %v9458_v19, %v9458_v19  ;;  %v13061_v43 = vld [vmem:[%s14552_s29 + $0x130] sm:$0xff] }
 0x6c3   : > { %v9007_v58 = vadd.f32 %v8809_v55, %v7992_v44  ;;  %11678 = vmatmul.msk.bf16.gmra.mxu1 %vm728_vm0, %v12997_v14  ;;  %11995 = vmatmul.msk.bf16.gmra.mxu2 %vm728_vm0, %v13059_v35  ;;  %v13123_v35 = vld [vmem:[%s14558_s7 + $0x130] sm:$0xff] }
 0x6c4   : > { %9683 = vst.msk [vmem:[%s14704_s8 + $0xd8] sm:$0xf] %vm9628_vm2, %v9570_v45  ;;  %12312 = vmatmul.msk.bf16.gmra.mxu3 %vm728_vm0, %v13121_v49  ;;  %v13185_v15 = vld [vmem:[%s14563_s14 + $0x130] sm:$0xff] }
 0x6c5   : > { %12629 = vmatmul.msk.bf16.gmra.mxu0 %vm728_vm0, %v13183_v11  ;;  %v9123_v59 = vadd.f32 %v14939_v4, %v9007_v58  ;;  %v15765_v58 = vld [vmem:[#allocation8_spill] sm:$0xff] }
 0x6c6   : > { %v6782_v13 = vpop.f32.mrf.mxu2 }
 0x6c7   : > { %vm9235_vm15 = vcmp.ge.f32.partialorder %v9123_v59, 0.0  ;;  %v9347_v51 = vmul.f32 0.1, %v9123_v59  ;;  %v6978_v21 = vadd.f32 %v6782_v13, %v5963_v40  ;;  %v7797_v25 = vpop.f32.mrf.mxu3 }
 0x6c8   : > { %v5769_v39 = vpop.f32.mrf.mxu1 }
 0x6c9   : > { %v9459_v34 = vsel %vm9235_vm15, %v9123_v59, %v9347_v51  ;;  %v7993_v16 = vadd.f32 %v7797_v25, %v6978_v21  ;;  %v5964_v27 = vadd.f32 %v5769_v39, %v15762_v2 }
 0x6ca   : > { %v8814_v41 = vpop.f32.mrf.mxu0  ;;  %v9571_v10 = vpack.c.bf16 %v9459_v34, %v9459_v34 }
 0x6cb   : > { %v9008_v24 = vadd.f32 %v8812_v53, %v7993_v16 }
 0x6cc   : > { %9684 = vst.msk [vmem:[%s14704_s8 + $0xdc] sm:$0xf] %vm9628_vm2, %v9571_v10 }
 0x6cd   : > { %v9124_v42 = vadd.f32 %v14939_v4, %v9008_v24 }
 0x6ce   : > { %v6784_v30 = vpop.f32.mrf.mxu2 }
 0x6cf   : > { %vm9236_vm1 = vcmp.ge.f32.partialorder %v9124_v42, 0.0  ;;  %v9348_v17 = vmul.f32 0.1, %v9124_v42  ;;  %v6979_v12 = vadd.f32 %v6784_v30, %v5964_v27  ;;  %v7799_v22 = vpop.f32.mrf.mxu3 }
 0x6d0   : > { %v5772_v60 = vpop.f32.mrf.mxu1 }
 0x6d1   : > { %v9460_v29 = vsel %vm9236_vm1, %v9124_v42, %v9348_v17  ;;  %v7994_v32 = vadd.f32 %v7799_v22, %v6979_v12  ;;  %v5965_v9 = vadd.f32 %v5772_v60, %v15763_v56  ;;  %v15766_v42 = vld [vmem:[#allocation10_spill] sm:$0xff]  ;;  %v13000_v22 = vld [vmem:[%s14547_s26 + $0x138] sm:$0xff] }
 0x6d2   : > { %v8817_v37 = vpop.f32.mrf.mxu0  ;;  %v9572_v6 = vpack.c.bf16 %v9460_v29, %v9460_v29  ;;  %v13124_v60 = vld [vmem:[%s14558_s7 + $0x138] sm:$0xff] }
 0x6d3   : > { %v9009_v38 = vadd.f32 %v8814_v41, %v7994_v32  ;;  %11679 = vmatmul.msk.bf16.gmra.mxu1 %vm728_vm0, %v12998_v20  ;;  %11996 = vmatmul.msk.bf16.gmra.mxu2 %vm728_vm0, %v13060_v26  ;;  %v13062_v20 = vld [vmem:[%s14552_s29 + $0x138] sm:$0xff] }
 0x6d4   : > { %9685 = vst.msk [vmem:[%s14704_s8 + $0xe0] sm:$0xf] %vm9628_vm2, %v9572_v6  ;;  %12313 = vmatmul.msk.bf16.gmra.mxu3 %vm728_vm0, %v13122_v54  ;;  %v13186_v54 = vld [vmem:[%s14563_s14 + $0x138] sm:$0xff] }
 0x6d5   : > { %12630 = vmatmul.msk.bf16.gmra.mxu0 %vm728_vm0, %v13184_v18  ;;  %v9125_v33 = vadd.f32 %v14939_v4, %v9009_v38  ;;  %v15172_v4 = vld [vmem:[%s15543_s2] ss:$0 sm:$0xff] }
 0x6d6   : > { %v6787_v50 = vpop.f32.mrf.mxu2 }
 0x6d7   : > { %vm9237_vm3 = vcmp.ge.f32.partialorder %v9125_v33, 0.0  ;;  %v9349_v7 = vmul.f32 0.1, %v9125_v33  ;;  %v6980_v8 = vadd.f32 %v6787_v50, %v5965_v9  ;;  %v7802_v3 = vpop.f32.mrf.mxu3 }
 0x6d8   : > { %v5774_v5 = vpop.f32.mrf.mxu1 }
 0x6d9   : > { %v9461_v61 = vsel %vm9237_vm3, %v9125_v33, %v9349_v7  ;;  %v7995_v31 = vadd.f32 %v7802_v3, %v6980_v8  ;;  %v5966_v62 = vadd.f32 %v5774_v5, %v15764_v52  ;;  %v15767_v33 = vld [vmem:[#allocation12_spill] sm:$0xff] }
 0x6da   : > { %v8819_v46 = vpop.f32.mrf.mxu0  ;;  %v9573_v28 = vpack.c.bf16 %v9461_v61, %v9461_v61 }
 0x6db   : > { %v9010_v55 = vadd.f32 %v8817_v37, %v7995_v31 }
 0x6dc   : > { %9686 = vst.msk [vmem:[%s14704_s8 + $0xe4] sm:$0xf] %vm9628_vm2, %v9573_v28 }
 0x6dd   : > { %v9126_v36 = vadd.f32 %v15172_v4, %v9010_v55 }
 0x6de   : > { %v6789_v0 = vpop.f32.mrf.mxu2 }
 0x6df   : > { %vm9238_vm4 = vcmp.ge.f32.partialorder %v9126_v36, 0.0  ;;  %v9350_v47 = vmul.f32 0.1, %v9126_v36  ;;  %v6981_v23 = vadd.f32 %v6789_v0, %v5966_v62  ;;  %v7804_v48 = vpop.f32.mrf.mxu3 }
 0x6e0   : > { %v5777_v14 = vpop.f32.mrf.mxu1 }
 0x6e1   : > { %v9462_v49 = vsel %vm9238_vm4, %v9126_v36, %v9350_v47  ;;  %v7996_v11 = vadd.f32 %v7804_v48, %v6981_v23  ;;  %v5967_v59 = vadd.f32 %v5777_v14, %v15765_v58  ;;  %v15768_v36 = vld [vmem:[#allocation14_spill] sm:$0xff] }
 0x6e2   : > { %v8822_v19 = vpop.f32.mrf.mxu0  ;;  %v9574_v44 = vpack.c.bf16 %v9462_v49, %v9462_v49  ;;  %v13001_v48 = vld [vmem:[%s14547_s26 + $0x140] sm:$0xff] }
 0x6e3   : > { %v9011_v53 = vadd.f32 %v8819_v46, %v7996_v11  ;;  %11680 = vmatmul.msk.bf16.gmra.mxu1 %vm728_vm0, %v12999_v63  ;;  %11997 = vmatmul.msk.bf16.gmra.mxu2 %vm728_vm0, %v13061_v43  ;;  %v13063_v63 = vld [vmem:[%s14552_s29 + $0x140] sm:$0xff] }
 0x6e4   : > { %9687 = vst.msk [vmem:[%s14704_s8 + $0xe8] sm:$0xf] %vm9628_vm2, %v9574_v44  ;;  %12314 = vmatmul.msk.bf16.gmra.mxu3 %vm728_vm0, %v13123_v35  ;;  %v13125_v14 = vld [vmem:[%s14558_s7 + $0x140] sm:$0xff] }
 0x6e5   : > { %12631 = vmatmul.msk.bf16.gmra.mxu0 %vm728_vm0, %v13185_v15  ;;  %v9127_v45 = vadd.f32 %v15172_v4, %v9011_v53  ;;  %v13187_v35 = vld [vmem:[%s14563_s14 + $0x140] sm:$0xff] }
 0x6e6   : > { %v6792_v40 = vpop.f32.mrf.mxu2 }
 0x6e7   : > { %vm9239_vm5 = vcmp.ge.f32.partialorder %v9127_v45, 0.0  ;;  %v9351_v13 = vmul.f32 0.1, %v9127_v45  ;;  %v6982_v51 = vadd.f32 %v6792_v40, %v5967_v59  ;;  %v7807_v21 = vpop.f32.mrf.mxu3 }
 0x6e8   : > { %v5779_v25 = vpop.f32.mrf.mxu1 }
 0x6e9   : > { %v9463_v39 = vsel %vm9239_vm5, %v9127_v45, %v9351_v13  ;;  %v7997_v34 = vadd.f32 %v7807_v21, %v6982_v51  ;;  %v5968_v2 = vadd.f32 %v5779_v25, %v15766_v42  ;;  %v15769_v45 = vld [vmem:[#allocation16_spill] sm:$0xff] }
 0x6ea   : > { %v8824_v16 = vpop.f32.mrf.mxu0  ;;  %v9575_v41 = vpack.c.bf16 %v9463_v39, %v9463_v39 }
 0x6eb   : > { %v9012_v10 = vadd.f32 %v8822_v19, %v7997_v34 }
 0x6ec   : > { %9688 = vst.msk [vmem:[%s14704_s8 + $0xec] sm:$0xf] %vm9628_vm2, %v9575_v41 }
 0x6ed   : > { %v9128_v24 = vadd.f32 %v15172_v4, %v9012_v10 }
 0x6ee   : > { %v6794_v27 = vpop.f32.mrf.mxu2 }
 0x6ef   : > { %vm9240_vm6 = vcmp.ge.f32.partialorder %v9128_v24, 0.0  ;;  %v9352_v30 = vmul.f32 0.1, %v9128_v24  ;;  %v6983_v17 = vadd.f32 %v6794_v27, %v5968_v2  ;;  %v7809_v12 = vpop.f32.mrf.mxu3 }
 0x6f0   : > { %v5782_v26 = vpop.f32.mrf.mxu1 }
 0x6f1   : > { %v9464_v18 = vsel %vm9240_vm6, %v9128_v24, %v9352_v30  ;;  %v7998_v29 = vadd.f32 %v7809_v12, %v6983_v17  ;;  %v5969_v56 = vadd.f32 %v5782_v26, %v15767_v33  ;;  %v15770_v24 = vld [vmem:[#allocation18_spill] sm:$0xff]  ;;  %v13002_v12 = vld [vmem:[%s14547_s26 + $0x148] sm:$0xff] }
 0x6f2   : > { %v8827_v32 = vpop.f32.mrf.mxu0  ;;  %v9576_v37 = vpack.c.bf16 %v9464_v18, %v9464_v18  ;;  %v13126_v26 = vld [vmem:[%s14558_s7 + $0x148] sm:$0xff] }
 0x6f3   : > { %v9013_v6 = vadd.f32 %v8824_v16, %v7998_v29  ;;  %11681 = vmatmul.msk.bf16.gmra.mxu1 %vm728_vm0, %v13000_v22  ;;  %11998 = vmatmul.msk.bf16.gmra.mxu2 %vm728_vm0, %v13062_v20  ;;  %v13064_v22 = vld [vmem:[%s14552_s29 + $0x148] sm:$0xff] }
 0x6f4   : > { %9689 = vst.msk [vmem:[%s14704_s8 + $0xf0] sm:$0xf] %vm9628_vm2, %v9576_v37  ;;  %12315 = vmatmul.msk.bf16.gmra.mxu3 %vm728_vm0, %v13124_v60  ;;  %v13188_v60 = vld [vmem:[%s14563_s14 + $0x148] sm:$0xff] }
 0x6f5   : > { %12632 = vmatmul.msk.bf16.gmra.mxu0 %vm728_vm0, %v13186_v54  ;;  %v9129_v38 = vadd.f32 %v15172_v4, %v9013_v6 }
 0x6f6   : > { %v6797_v9 = vpop.f32.mrf.mxu2 }
 0x6f7   : > { %vm9241_vm7 = vcmp.ge.f32.partialorder %v9129_v38, 0.0  ;;  %v9353_v50 = vmul.f32 0.1, %v9129_v38  ;;  %v6984_v7 = vadd.f32 %v6797_v9, %v5969_v56  ;;  %v7812_v8 = vpop.f32.mrf.mxu3 }
 0x6f8   : > { %v5784_v3 = vpop.f32.mrf.mxu1 }
 0x6f9   : > { %v9465_v5 = vsel %vm9241_vm7, %v9129_v38, %v9353_v50  ;;  %v7999_v61 = vadd.f32 %v7812_v8, %v6984_v7  ;;  %v5970_v52 = vadd.f32 %v5784_v3, %v15768_v36  ;;  %v15771_v38 = vld [vmem:[#allocation20_spill] sm:$0xff] }
 0x6fa   : > { %v8829_v31 = vpop.f32.mrf.mxu0  ;;  %v9577_v46 = vpack.c.bf16 %v9465_v5, %v9465_v5 }
 0x6fb   : > { %v9014_v28 = vadd.f32 %v8827_v32, %v7999_v61 }
 0x6fc   : > { %9690 = vst.msk [vmem:[%s14704_s8 + $0xf4] sm:$0xf] %vm9628_vm2, %v9577_v46 }
 0x6fd   : > { %v9130_v55 = vadd.f32 %v15172_v4, %v9014_v28 }
 0x6fe   : > { %v6799_v62 = vpop.f32.mrf.mxu2 }
 0x6ff   : > { %vm9242_vm8 = vcmp.ge.f32.partialorder %v9130_v55, 0.0  ;;  %v9354_v0 = vmul.f32 0.1, %v9130_v55  ;;  %v6985_v47 = vadd.f32 %v6799_v62, %v5970_v52  ;;  %v7814_v23 = vpop.f32.mrf.mxu3 }
 0x700   : > { %v5787_v43 = vpop.f32.mrf.mxu1 }
 0x701   : > { %v9466_v15 = vsel %vm9242_vm8, %v9130_v55, %v9354_v0  ;;  %v8000_v49 = vadd.f32 %v7814_v23, %v6985_v47  ;;  %v5971_v58 = vadd.f32 %v5787_v43, %v15769_v45  ;;  %v15772_v55 = vld [vmem:[#allocation22_spill] sm:$0xff]  ;;  %v13003_v23 = vld [vmem:[%s14547_s26 + $0x150] sm:$0xff] }
 0x702   : > { %v8832_v11 = vpop.f32.mrf.mxu0  ;;  %v9578_v19 = vpack.c.bf16 %v9466_v15, %v9466_v15  ;;  %v13127_v43 = vld [vmem:[%s14558_s7 + $0x150] sm:$0xff] }
 0x703   : > { %v9015_v44 = vadd.f32 %v8829_v31, %v8000_v49  ;;  %11682 = vmatmul.msk.bf16.gmra.mxu1 %vm728_vm0, %v13001_v48  ;;  %11999 = vmatmul.msk.bf16.gmra.mxu2 %vm728_vm0, %v13063_v63  ;;  %v13065_v48 = vld [vmem:[%s14552_s29 + $0x150] sm:$0xff] }
 0x704   : > { %9691 = vst.msk [vmem:[%s14704_s8 + $0xf8] sm:$0xf] %vm9628_vm2, %v9578_v19  ;;  %12316 = vmatmul.msk.bf16.gmra.mxu3 %vm728_vm0, %v13125_v14  ;;  %v13189_v14 = vld [vmem:[%s14563_s14 + $0x150] sm:$0xff] }
 0x705   : > { %12633 = vmatmul.msk.bf16.gmra.mxu0 %vm728_vm0, %v13187_v35  ;;  %v9131_v53 = vadd.f32 %v15172_v4, %v9015_v44 }
 0x706   : > { %v6802_v59 = vpop.f32.mrf.mxu2 }
 0x707   : > { %vm9243_vm9 = vcmp.ge.f32.partialorder %v9131_v53, 0.0  ;;  %v9355_v40 = vmul.f32 0.1, %v9131_v53  ;;  %v6986_v13 = vadd.f32 %v6802_v59, %v5971_v58  ;;  %v7817_v51 = vpop.f32.mrf.mxu3 }
 0x708   : > { %v5789_v21 = vpop.f32.mrf.mxu1 }
 0x709   : > { %v9467_v25 = vsel %vm9243_vm9, %v9131_v53, %v9355_v40  ;;  %v8001_v39 = vadd.f32 %v7817_v51, %v6986_v13  ;;  %v5972_v42 = vadd.f32 %v5789_v21, %v15770_v24  ;;  %v15773_v53 = vld [vmem:[#allocation24_spill] sm:$0xff] }
 0x70a   : > { %v8834_v34 = vpop.f32.mrf.mxu0  ;;  %v9579_v16 = vpack.c.bf16 %v9467_v25, %v9467_v25 }
 0x70b   : > { %v9016_v41 = vadd.f32 %v8832_v11, %v8001_v39 }
 0x70c   : > { %9692 = vst.msk [vmem:[%s14704_s8 + $0xfc] sm:$0xf] %vm9628_vm2, %v9579_v16 }
 0x70d   : > { %v9132_v10 = vadd.f32 %v15172_v4, %v9016_v41 }
 0x70e   : > { %v6804_v2 = vpop.f32.mrf.mxu2 }
 0x70f   : > { %vm9244_vm10 = vcmp.ge.f32.partialorder %v9132_v10, 0.0  ;;  %v9356_v27 = vmul.f32 0.1, %v9132_v10  ;;  %v6987_v30 = vadd.f32 %v6804_v2, %v5972_v42  ;;  %v7819_v17 = vpop.f32.mrf.mxu3 }
 0x710   : > { %v5792_v20 = vpop.f32.mrf.mxu1 }
 0x711   : > { %v9468_v54 = vsel %vm9244_vm10, %v9132_v10, %v9356_v27  ;;  %v8002_v18 = vadd.f32 %v7819_v17, %v6987_v30  ;;  %v5973_v33 = vadd.f32 %v5792_v20, %v15771_v38  ;;  %v15774_v10 = vld [vmem:[#allocation26_spill] sm:$0xff]  ;;  %v13004_v17 = vld [vmem:[%s14547_s26 + $0x158] sm:$0xff] }
 0x712   : > { %v8837_v29 = vpop.f32.mrf.mxu0  ;;  %v9580_v32 = vpack.c.bf16 %v9468_v54, %v9468_v54  ;;  %v13128_v20 = vld [vmem:[%s14558_s7 + $0x158] sm:$0xff] }
 0x713   : > { %v9017_v37 = vadd.f32 %v8834_v34, %v8002_v18  ;;  %11683 = vmatmul.msk.bf16.gmra.mxu1 %vm728_vm0, %v13002_v12  ;;  %12000 = vmatmul.msk.bf16.gmra.mxu2 %vm728_vm0, %v13064_v22  ;;  %v13066_v12 = vld [vmem:[%s14552_s29 + $0x158] sm:$0xff] }
 0x714   : > { %9693 = vst.msk [vmem:[%s14704_s8 + $0x100] sm:$0xf] %vm9628_vm2, %v9580_v32  ;;  %12317 = vmatmul.msk.bf16.gmra.mxu3 %vm728_vm0, %v13126_v26  ;;  %v13190_v26 = vld [vmem:[%s14563_s14 + $0x158] sm:$0xff] }
 0x715   : > { %12634 = vmatmul.msk.bf16.gmra.mxu0 %vm728_vm0, %v13188_v60  ;;  %v9133_v6 = vadd.f32 %v15172_v4, %v9017_v37 }
 0x716   : > { %v6807_v56 = vpop.f32.mrf.mxu2 }
 0x717   : > { %vm9245_vm11 = vcmp.ge.f32.partialorder %v9133_v6, 0.0  ;;  %v9357_v9 = vmul.f32 0.1, %v9133_v6  ;;  %v6988_v50 = vadd.f32 %v6807_v56, %v5973_v33  ;;  %v7822_v7 = vpop.f32.mrf.mxu3 }
 0x718   : > { %v5794_v8 = vpop.f32.mrf.mxu1 }
 0x719   : > { %v9469_v3 = vsel %vm9245_vm11, %v9133_v6, %v9357_v9  ;;  %v8003_v5 = vadd.f32 %v7822_v7, %v6988_v50  ;;  %v5974_v36 = vadd.f32 %v5794_v8, %v15772_v55  ;;  %v15775_v6 = vld [vmem:[#allocation28_spill] sm:$0xff] }
 0x71a   : > { %v8839_v61 = vpop.f32.mrf.mxu0  ;;  %v9581_v31 = vpack.c.bf16 %v9469_v3, %v9469_v3 }
 0x71b   : > { %v9018_v46 = vadd.f32 %v8837_v29, %v8003_v5 }
 0x71c   : > { %9694 = vst.msk [vmem:[%s14704_s8 + $0x104] sm:$0xf] %vm9628_vm2, %v9581_v31 }
 0x71d   : > { %v9134_v28 = vadd.f32 %v15172_v4, %v9018_v46 }
 0x71e   : > { %v6809_v52 = vpop.f32.mrf.mxu2 }
 0x71f   : > { %vm9246_vm12 = vcmp.ge.f32.partialorder %v9134_v28, 0.0  ;;  %v9358_v62 = vmul.f32 0.1, %v9134_v28  ;;  %v6989_v0 = vadd.f32 %v6809_v52, %v5974_v36  ;;  %v7824_v47 = vpop.f32.mrf.mxu3 }
 0x720   : > { %v5797_v63 = vpop.f32.mrf.mxu1 }
 0x721   : > { %v9470_v35 = vsel %vm9246_vm12, %v9134_v28, %v9358_v62  ;;  %v8004_v15 = vadd.f32 %v7824_v47, %v6989_v0  ;;  %v5975_v45 = vadd.f32 %v5797_v63, %v15773_v53  ;;  %v15776_v28 = vld [vmem:[#allocation30_spill] sm:$0xff] }
 0x722   : > { %v8842_v49 = vpop.f32.mrf.mxu0  ;;  %v9582_v11 = vpack.c.bf16 %v9470_v35, %v9470_v35  ;;  %v13005_v47 = vld [vmem:[%s14547_s26 + $0x160] sm:$0xff] }
 0x723   : > { %v9019_v19 = vadd.f32 %v8839_v61, %v8004_v15  ;;  %11684 = vmatmul.msk.bf16.gmra.mxu1 %vm728_vm0, %v13003_v23  ;;  %12001 = vmatmul.msk.bf16.gmra.mxu2 %vm728_vm0, %v13065_v48  ;;  %v13067_v23 = vld [vmem:[%s14552_s29 + $0x160] sm:$0xff] }
 0x724   : > { %9695 = vst.msk [vmem:[%s14704_s8 + $0x108] sm:$0xf] %vm9628_vm2, %v9582_v11  ;;  %12318 = vmatmul.msk.bf16.gmra.mxu3 %vm728_vm0, %v13127_v43  ;;  %v13129_v63 = vld [vmem:[%s14558_s7 + $0x160] sm:$0xff] }
 0x725   : > { %12635 = vmatmul.msk.bf16.gmra.mxu0 %vm728_vm0, %v13189_v14  ;;  %v9135_v44 = vadd.f32 %v15172_v4, %v9019_v19  ;;  %v13191_v43 = vld [vmem:[%s14563_s14 + $0x160] sm:$0xff] }
 0x726   : > { %v6812_v58 = vpop.f32.mrf.mxu2 }
 0x727   : > { %vm9247_vm13 = vcmp.ge.f32.partialorder %v9135_v44, 0.0  ;;  %v9359_v59 = vmul.f32 0.1, %v9135_v44  ;;  %v6990_v40 = vadd.f32 %v6812_v58, %v5975_v45  ;;  %v7827_v13 = vpop.f32.mrf.mxu3 }
 0x728   : > { %v5799_v51 = vpop.f32.mrf.mxu1 }
 0x729   : > { %v9471_v21 = vsel %vm9247_vm13, %v9135_v44, %v9359_v59  ;;  %v8005_v25 = vadd.f32 %v7827_v13, %v6990_v40  ;;  %v5976_v24 = vadd.f32 %v5799_v51, %v15774_v10  ;;  %v15777_v44 = vld [vmem:[#allocation32_spill] sm:$0xff] }
 0x72a   : > { %v8844_v39 = vpop.f32.mrf.mxu0  ;;  %v9583_v34 = vpack.c.bf16 %v9471_v21, %v9471_v21 }
 0x72b   : > { %v9020_v16 = vadd.f32 %v8842_v49, %v8005_v25 }
 0x72c   : > { %9696 = vst.msk [vmem:[%s14704_s8 + $0x10c] sm:$0xf] %vm9628_vm2, %v9583_v34 }
 0x72d   : > { %v9136_v41 = vadd.f32 %v15172_v4, %v9020_v16 }
 0x72e   : > { %v6814_v42 = vpop.f32.mrf.mxu2 }
 0x72f   : > { %vm9248_vm14 = vcmp.ge.f32.partialorder %v9136_v41, 0.0  ;;  %v9360_v2 = vmul.f32 0.1, %v9136_v41  ;;  %v6991_v27 = vadd.f32 %v6814_v42, %v5976_v24  ;;  %v7829_v30 = vpop.f32.mrf.mxu3 }
 0x730   : > { %v5802_v22 = vpop.f32.mrf.mxu1 }
 0x731   : > { %v9472_v60 = vsel %vm9248_vm14, %v9136_v41, %v9360_v2  ;;  %v8006_v54 = vadd.f32 %v7829_v30, %v6991_v27  ;;  %v5977_v38 = vadd.f32 %v5802_v22, %v15775_v6  ;;  %v15778_v41 = vld [vmem:[#allocation35_spill] sm:$0xff] }
 0x732   : > { %v8847_v18 = vpop.f32.mrf.mxu0  ;;  %v9584_v29 = vpack.c.bf16 %v9472_v60, %v9472_v60  ;;  %v13006_v30 = vld [vmem:[%s14547_s26 + $0x168] sm:$0xff] }
 0x733   : > { %v9021_v32 = vadd.f32 %v8844_v39, %v8006_v54  ;;  %11685 = vmatmul.msk.bf16.gmra.mxu1 %vm728_vm0, %v13004_v17  ;;  %12002 = vmatmul.msk.bf16.gmra.mxu2 %vm728_vm0, %v13066_v12  ;;  %v13068_v17 = vld [vmem:[%s14552_s29 + $0x168] sm:$0xff] }
 0x734   : > { %9697 = vst.msk [vmem:[%s14704_s8 + $0x110] sm:$0xf] %vm9628_vm2, %v9584_v29  ;;  %12319 = vmatmul.msk.bf16.gmra.mxu3 %vm728_vm0, %v13128_v20  ;;  %v13130_v22 = vld [vmem:[%s14558_s7 + $0x168] sm:$0xff] }
 0x735   : > { %12636 = vmatmul.msk.bf16.gmra.mxu0 %vm728_vm0, %v13190_v26  ;;  %v9137_v37 = vadd.f32 %v15172_v4, %v9021_v32  ;;  %v13192_v20 = vld [vmem:[%s14563_s14 + $0x168] sm:$0xff] }
 0x736   : > { %v6817_v33 = vpop.f32.mrf.mxu2 }
 0x737   : > { %vm9249_vm15 = vcmp.ge.f32.partialorder %v9137_v37, 0.0  ;;  %v9361_v56 = vmul.f32 0.1, %v9137_v37  ;;  %v6992_v9 = vadd.f32 %v6817_v33, %v5977_v38  ;;  %v7832_v50 = vpop.f32.mrf.mxu3 }
 0x738   : > { %v5804_v7 = vpop.f32.mrf.mxu1 }
 0x739   : > { %v9473_v8 = vsel %vm9249_vm15, %v9137_v37, %v9361_v56  ;;  %v8007_v3 = vadd.f32 %v7832_v50, %v6992_v9  ;;  %v5978_v55 = vadd.f32 %v5804_v7, %v15776_v28  ;;  %v15779_v37 = vld [vmem:[#allocation38_spill] sm:$0xff] }
 0x73a   : > { %v8849_v5 = vpop.f32.mrf.mxu0  ;;  %v9585_v61 = vpack.c.bf16 %v9473_v8, %v9473_v8 }
 0x73b   : > { %v9022_v31 = vadd.f32 %v8847_v18, %v8007_v3 }
 0x73c   : > { %9698 = vst.msk [vmem:[%s14704_s8 + $0x114] sm:$0xf] %vm9628_vm2, %v9585_v61 }
 0x73d   : > { %v9138_v46 = vadd.f32 %v15172_v4, %v9022_v31 }
 0x73e   : > { %v6819_v36 = vpop.f32.mrf.mxu2 }
 0x73f   : > { %vm9250_vm1 = vcmp.ge.f32.partialorder %v9138_v46, 0.0  ;;  %v9362_v52 = vmul.f32 0.1, %v9138_v46  ;;  %v6993_v62 = vadd.f32 %v6819_v36, %v5978_v55  ;;  %v7834_v0 = vpop.f32.mrf.mxu3 }
 0x740   : > { %v5807_v48 = vpop.f32.mrf.mxu1 }
 0x741   : > { %v9474_v14 = vsel %vm9250_vm1, %v9138_v46, %v9362_v52  ;;  %v8008_v35 = vadd.f32 %v7834_v0, %v6993_v62  ;;  %v5979_v53 = vadd.f32 %v5807_v48, %v15777_v44  ;;  %v15780_v46 = vld [vmem:[#allocation41_spill] sm:$0xff]  ;;  %v13007_v0 = vld [vmem:[%s14547_s26 + $0x170] sm:$0xff] }
 0x742   : > { %v8852_v15 = vpop.f32.mrf.mxu0  ;;  %v9586_v49 = vpack.c.bf16 %v9474_v14, %v9474_v14  ;;  %v13131_v48 = vld [vmem:[%s14558_s7 + $0x170] sm:$0xff] }
 0x743   : > { %v9023_v11 = vadd.f32 %v8849_v5, %v8008_v35  ;;  %11686 = vmatmul.msk.bf16.gmra.mxu1 %vm728_vm0, %v13005_v47  ;;  %12003 = vmatmul.msk.bf16.gmra.mxu2 %vm728_vm0, %v13067_v23  ;;  %v13069_v47 = vld [vmem:[%s14552_s29 + $0x170] sm:$0xff] }
 0x744   : > { %9699 = vst.msk [vmem:[%s14704_s8 + $0x118] sm:$0xf] %vm9628_vm2, %v9586_v49  ;;  %12320 = vmatmul.msk.bf16.gmra.mxu3 %vm728_vm0, %v13129_v63  ;;  %v13193_v63 = vld [vmem:[%s14563_s14 + $0x170] sm:$0xff] }
 0x745   : > { %12637 = vmatmul.msk.bf16.gmra.mxu0 %vm728_vm0, %v13191_v43  ;;  %v9139_v19 = vadd.f32 %v15172_v4, %v9023_v11 }
 0x746   : > { %v6822_v45 = vpop.f32.mrf.mxu2 }
 0x747   : > { %vm9251_vm3 = vcmp.ge.f32.partialorder %v9139_v19, 0.0  ;;  %v9363_v58 = vmul.f32 0.1, %v9139_v19  ;;  %v6994_v59 = vadd.f32 %v6822_v45, %v5979_v53  ;;  %v7837_v40 = vpop.f32.mrf.mxu3 }
 0x748   : > { %v5809_v13 = vpop.f32.mrf.mxu1 }
 0x749   : > { %v9475_v51 = vsel %vm9251_vm3, %v9139_v19, %v9363_v58  ;;  %v8009_v21 = vadd.f32 %v7837_v40, %v6994_v59  ;;  %v5980_v10 = vadd.f32 %v5809_v13, %v15778_v41  ;;  %v15781_v19 = vld [vmem:[#allocation44_spill] sm:$0xff] }
 0x74a   : > { %v8854_v25 = vpop.f32.mrf.mxu0  ;;  %v9587_v39 = vpack.c.bf16 %v9475_v51, %v9475_v51 }
 0x74b   : > { %v9024_v34 = vadd.f32 %v8852_v15, %v8009_v21 }
 0x74c   : > { %9700 = vst.msk [vmem:[%s14704_s8 + $0x11c] sm:$0xf] %vm9628_vm2, %v9587_v39 }
 0x74d   : > { %v9140_v16 = vadd.f32 %v15172_v4, %v9024_v34 }
 0x74e   : > { %v6824_v24 = vpop.f32.mrf.mxu2 }
 0x74f   : > { %vm9252_vm4 = vcmp.ge.f32.partialorder %v9140_v16, 0.0  ;;  %v9364_v42 = vmul.f32 0.1, %v9140_v16  ;;  %v6995_v2 = vadd.f32 %v6824_v24, %v5980_v10  ;;  %v7839_v27 = vpop.f32.mrf.mxu3 }
 0x750   : > { %v5812_v12 = vpop.f32.mrf.mxu1 }
 0x751   : > { %v9476_v26 = vsel %vm9252_vm4, %v9140_v16, %v9364_v42  ;;  %v8010_v60 = vadd.f32 %v7839_v27, %v6995_v2  ;;  %v5981_v6 = vadd.f32 %v5812_v12, %v15779_v37  ;;  %v15782_v16 = vld [vmem:[#allocation47_spill] sm:$0xff]  ;;  %v13008_v27 = vld [vmem:[%s14547_s26 + $0x178] sm:$0xff] }
 0x752   : > { %v8857_v54 = vpop.f32.mrf.mxu0  ;;  %v9588_v18 = vpack.c.bf16 %v9476_v26, %v9476_v26  ;;  %v13132_v12 = vld [vmem:[%s14558_s7 + $0x178] sm:$0xff] }
 0x753   : > { %v9025_v29 = vadd.f32 %v8854_v25, %v8010_v60  ;;  %11687 = vmatmul.msk.bf16.gmra.mxu1 %vm728_vm0, %v13006_v30  ;;  %12004 = vmatmul.msk.bf16.gmra.mxu2 %vm728_vm0, %v13068_v17  ;;  %v13070_v30 = vld [vmem:[%s14552_s29 + $0x178] sm:$0xff] }
 0x754   : > { %9701 = vst.msk [vmem:[%s14704_s8 + $0x120] sm:$0xf] %vm9628_vm2, %v9588_v18  ;;  %12321 = vmatmul.msk.bf16.gmra.mxu3 %vm728_vm0, %v13130_v22  ;;  %v13194_v22 = vld [vmem:[%s14563_s14 + $0x178] sm:$0xff] }
 0x755   : > { %12638 = vmatmul.msk.bf16.gmra.mxu0 %vm728_vm0, %v13192_v20  ;;  %v9141_v32 = vadd.f32 %v15172_v4, %v9025_v29 }
 0x756   : > { %v6827_v38 = vpop.f32.mrf.mxu2 }
 0x757   : > { %vm9253_vm5 = vcmp.ge.f32.partialorder %v9141_v32, 0.0  ;;  %v9365_v33 = vmul.f32 0.1, %v9141_v32  ;;  %v6996_v56 = vadd.f32 %v6827_v38, %v5981_v6  ;;  %v7842_v9 = vpop.f32.mrf.mxu3 }
 0x758   : > { %v5814_v50 = vpop.f32.mrf.mxu1 }
 0x759   : > { %v9477_v7 = vsel %vm9253_vm5, %v9141_v32, %v9365_v33  ;;  %v8011_v8 = vadd.f32 %v7842_v9, %v6996_v56  ;;  %v5982_v28 = vadd.f32 %v5814_v50, %v15780_v46  ;;  %v15783_v32 = vld [vmem:[#allocation50_spill] sm:$0xff] }
 0x75a   : > { %v8859_v3 = vpop.f32.mrf.mxu0  ;;  %v9589_v5 = vpack.c.bf16 %v9477_v7, %v9477_v7 }
 0x75b   : > { %v9026_v61 = vadd.f32 %v8857_v54, %v8011_v8 }
 0x75c   : > { %9702 = vst.msk [vmem:[%s14704_s8 + $0x124] sm:$0xf] %vm9628_vm2, %v9589_v5 }
 0x75d   : > { %v9142_v31 = vadd.f32 %v15172_v4, %v9026_v61 }
 0x75e   : > { %v6829_v55 = vpop.f32.mrf.mxu2 }
 0x75f   : > { %vm9254_vm6 = vcmp.ge.f32.partialorder %v9142_v31, 0.0  ;;  %v9366_v36 = vmul.f32 0.1, %v9142_v31  ;;  %v6997_v52 = vadd.f32 %v6829_v55, %v5982_v28  ;;  %v7844_v62 = vpop.f32.mrf.mxu3 }
 0x760   : > { %v5817_v23 = vpop.f32.mrf.mxu1 }
 0x761   : > { %v9478_v43 = vsel %vm9254_vm6, %v9142_v31, %v9366_v36  ;;  %v8012_v14 = vadd.f32 %v7844_v62, %v6997_v52  ;;  %v5983_v44 = vadd.f32 %v5817_v23, %v15781_v19  ;;  %v15784_v31 = vld [vmem:[#allocation53_spill] sm:$0xff]  ;;  %v13009_v62 = vld [vmem:[%s14547_s26 + $0x180] sm:$0xff] }
 0x762   : > { %v8862_v35 = vpop.f32.mrf.mxu0  ;;  %v9590_v15 = vpack.c.bf16 %v9478_v43, %v9478_v43  ;;  %v13133_v23 = vld [vmem:[%s14558_s7 + $0x180] sm:$0xff] }
 0x763   : > { %v9027_v49 = vadd.f32 %v8859_v3, %v8012_v14  ;;  %11688 = vmatmul.msk.bf16.gmra.mxu1 %vm728_vm0, %v13007_v0  ;;  %12005 = vmatmul.msk.bf16.gmra.mxu2 %vm728_vm0, %v13069_v47  ;;  %v13071_v0 = vld [vmem:[%s14552_s29 + $0x180] sm:$0xff] }
 0x764   : > { %9703 = vst.msk [vmem:[%s14704_s8 + $0x128] sm:$0xf] %vm9628_vm2, %v9590_v15  ;;  %12322 = vmatmul.msk.bf16.gmra.mxu3 %vm728_vm0, %v13131_v48  ;;  %v13195_v48 = vld [vmem:[%s14563_s14 + $0x180] sm:$0xff] }
 0x765   : > { %12639 = vmatmul.msk.bf16.gmra.mxu0 %vm728_vm0, %v13193_v63  ;;  %v9143_v11 = vadd.f32 %v15172_v4, %v9027_v49 }
 0x766   : > { %v6832_v53 = vpop.f32.mrf.mxu2 }
 0x767   : > { %vm9255_vm7 = vcmp.ge.f32.partialorder %v9143_v11, 0.0  ;;  %v9367_v45 = vmul.f32 0.1, %v9143_v11  ;;  %v6998_v58 = vadd.f32 %v6832_v53, %v5983_v44  ;;  %v7847_v59 = vpop.f32.mrf.mxu3 }
 0x768   : > { %v5819_v40 = vpop.f32.mrf.mxu1 }
 0x769   : > { %v9479_v13 = vsel %vm9255_vm7, %v9143_v11, %v9367_v45  ;;  %v8013_v51 = vadd.f32 %v7847_v59, %v6998_v58  ;;  %v5984_v41 = vadd.f32 %v5819_v40, %v15782_v16  ;;  %v15785_v11 = vld [vmem:[#allocation56_spill] sm:$0xff] }
 0x76a   : > { %v8864_v21 = vpop.f32.mrf.mxu0  ;;  %v9591_v25 = vpack.c.bf16 %v9479_v13, %v9479_v13 }
 0x76b   : > { %v9028_v39 = vadd.f32 %v8862_v35, %v8013_v51 }
 0x76c   : > { %9704 = vst.msk [vmem:[%s14704_s8 + $0x12c] sm:$0xf] %vm9628_vm2, %v9591_v25 }
 0x76d   : > { %v9144_v34 = vadd.f32 %v15172_v4, %v9028_v39 }
 0x76e   : > { %v6834_v10 = vpop.f32.mrf.mxu2 }
 0x76f   : > { %vm9256_vm8 = vcmp.ge.f32.partialorder %v9144_v34, 0.0  ;;  %v9368_v24 = vmul.f32 0.1, %v9144_v34  ;;  %v6999_v42 = vadd.f32 %v6834_v10, %v5984_v41  ;;  %v7849_v2 = vpop.f32.mrf.mxu3 }
 0x770   : > { %v5822_v17 = vpop.f32.mrf.mxu1 }
 0x771   : > { %v9480_v20 = vsel %vm9256_vm8, %v9144_v34, %v9368_v24  ;;  %v8014_v26 = vadd.f32 %v7849_v2, %v6999_v42  ;;  %v5985_v37 = vadd.f32 %v5822_v17, %v15783_v32  ;;  %v15786_v34 = vld [vmem:[#allocation59_spill] sm:$0xff] }
 0x772   : > { %v8867_v60 = vpop.f32.mrf.mxu0  ;;  %v9592_v54 = vpack.c.bf16 %v9480_v20, %v9480_v20  ;;  %v13010_v2 = vld [vmem:[%s14547_s26 + $0x188] sm:$0xff] }
 0x773   : > { %v9029_v18 = vadd.f32 %v8864_v21, %v8014_v26  ;;  %11689 = vmatmul.msk.bf16.gmra.mxu1 %vm728_vm0, %v13008_v27  ;;  %12006 = vmatmul.msk.bf16.gmra.mxu2 %vm728_vm0, %v13070_v30  ;;  %v13072_v27 = vld [vmem:[%s14552_s29 + $0x188] sm:$0xff] }
 0x774   : > { %9705 = vst.msk [vmem:[%s14704_s8 + $0x130] sm:$0xf] %vm9628_vm2, %v9592_v54  ;;  %12323 = vmatmul.msk.bf16.gmra.mxu3 %vm728_vm0, %v13132_v12  ;;  %v13134_v17 = vld [vmem:[%s14558_s7 + $0x188] sm:$0xff] }
 0x775   : > { %12640 = vmatmul.msk.bf16.gmra.mxu0 %vm728_vm0, %v13194_v22  ;;  %v9145_v29 = vadd.f32 %v15172_v4, %v9029_v18  ;;  %v13196_v12 = vld [vmem:[%s14563_s14 + $0x188] sm:$0xff] }
 0x776   : > { %v6837_v6 = vpop.f32.mrf.mxu2 }
 0x777   : > { %vm9257_vm9 = vcmp.ge.f32.partialorder %v9145_v29, 0.0  ;;  %v9369_v38 = vmul.f32 0.1, %v9145_v29  ;;  %v7000_v33 = vadd.f32 %v6837_v6, %v5985_v37  ;;  %v7852_v56 = vpop.f32.mrf.mxu3 }
 0x778   : > { %v5824_v9 = vpop.f32.mrf.mxu1 }
 0x779   : > { %v9481_v50 = vsel %vm9257_vm9, %v9145_v29, %v9369_v38  ;;  %v8015_v7 = vadd.f32 %v7852_v56, %v7000_v33  ;;  %v5986_v46 = vadd.f32 %v5824_v9, %v15784_v31  ;;  %v15787_v29 = vld [vmem:[#allocation62_spill] sm:$0xff] }
 0x77a   : > { %v8869_v8 = vpop.f32.mrf.mxu0  ;;  %v9593_v3 = vpack.c.bf16 %v9481_v50, %v9481_v50 }
 0x77b   : > { %v9030_v5 = vadd.f32 %v8867_v60, %v8015_v7 }
 0x77c   : > { %9706 = vst.msk [vmem:[%s14704_s8 + $0x134] sm:$0xf] %vm9628_vm2, %v9593_v3 }
 0x77d   : > { %v9146_v61 = vadd.f32 %v15172_v4, %v9030_v5 }
 0x77e   : > { %v6839_v28 = vpop.f32.mrf.mxu2 }
 0x77f   : > { %vm9258_vm10 = vcmp.ge.f32.partialorder %v9146_v61, 0.0  ;;  %v9370_v55 = vmul.f32 0.1, %v9146_v61  ;;  %v7001_v36 = vadd.f32 %v6839_v28, %v5986_v46  ;;  %v7854_v52 = vpop.f32.mrf.mxu3 }
 0x780   : > { %v5827_v47 = vpop.f32.mrf.mxu1 }
 0x781   : > { %v9482_v63 = vsel %vm9258_vm10, %v9146_v61, %v9370_v55  ;;  %v8016_v43 = vadd.f32 %v7854_v52, %v7001_v36  ;;  %v5987_v19 = vadd.f32 %v5827_v47, %v15785_v11  ;;  %v15788_v61 = vld [vmem:[#allocation65_spill] sm:$0xff]  ;;  %v13011_v52 = vld [vmem:[%s14547_s26 + $0x190] sm:$0xff] }
 0x782   : > { %v8872_v14 = vpop.f32.mrf.mxu0  ;;  %v9594_v35 = vpack.c.bf16 %v9482_v63, %v9482_v63  ;;  %v13135_v47 = vld [vmem:[%s14558_s7 + $0x190] sm:$0xff] }
 0x783   : > { %v9031_v15 = vadd.f32 %v8869_v8, %v8016_v43  ;;  %11690 = vmatmul.msk.bf16.gmra.mxu1 %vm728_vm0, %v13009_v62  ;;  %12007 = vmatmul.msk.bf16.gmra.mxu2 %vm728_vm0, %v13071_v0  ;;  %v13073_v62 = vld [vmem:[%s14552_s29 + $0x190] sm:$0xff] }
 0x784   : > { %9707 = vst.msk [vmem:[%s14704_s8 + $0x138] sm:$0xf] %vm9628_vm2, %v9594_v35  ;;  %12324 = vmatmul.msk.bf16.gmra.mxu3 %vm728_vm0, %v13133_v23  ;;  %v13197_v23 = vld [vmem:[%s14563_s14 + $0x190] sm:$0xff] }
 0x785   : > { %12641 = vmatmul.msk.bf16.gmra.mxu0 %vm728_vm0, %v13195_v48  ;;  %v9147_v49 = vadd.f32 %v15172_v4, %v9031_v15 }
 0x786   : > { %v6842_v44 = vpop.f32.mrf.mxu2 }
 0x787   : > { %vm9259_vm11 = vcmp.ge.f32.partialorder %v9147_v49, 0.0  ;;  %v9371_v53 = vmul.f32 0.1, %v9147_v49  ;;  %v7002_v45 = vadd.f32 %v6842_v44, %v5987_v19  ;;  %v7857_v58 = vpop.f32.mrf.mxu3 }
 0x788   : > { %v5829_v59 = vpop.f32.mrf.mxu1 }
 0x789   : > { %v9483_v40 = vsel %vm9259_vm11, %v9147_v49, %v9371_v53  ;;  %v8017_v13 = vadd.f32 %v7857_v58, %v7002_v45  ;;  %v5988_v16 = vadd.f32 %v5829_v59, %v15786_v34  ;;  %v15789_v49 = vld [vmem:[#allocation68_spill] sm:$0xff] }
 0x78a   : > { %v8874_v51 = vpop.f32.mrf.mxu0  ;;  %v9595_v21 = vpack.c.bf16 %v9483_v40, %v9483_v40 }
 0x78b   : > { %v9032_v25 = vadd.f32 %v8872_v14, %v8017_v13 }
 0x78c   : > { %9708 = vst.msk [vmem:[%s14704_s8 + $0x13c] sm:$0xf] %vm9628_vm2, %v9595_v21 }
 0x78d   : > { %v9148_v39 = vadd.f32 %v15172_v4, %v9032_v25 }
 0x78e   : > { %v6844_v41 = vpop.f32.mrf.mxu2 }
 0x78f   : > { %vm9260_vm12 = vcmp.ge.f32.partialorder %v9148_v39, 0.0  ;;  %v9372_v10 = vmul.f32 0.1, %v9148_v39  ;;  %v7003_v24 = vadd.f32 %v6844_v41, %v5988_v16  ;;  %v7859_v42 = vpop.f32.mrf.mxu3 }
 0x790   : > { %v5832_v30 = vpop.f32.mrf.mxu1 }
 0x791   : > { %v9484_v22 = vsel %vm9260_vm12, %v9148_v39, %v9372_v10  ;;  %v8018_v20 = vadd.f32 %v7859_v42, %v7003_v24  ;;  %v5989_v32 = vadd.f32 %v5832_v30, %v15787_v29  ;;  %v15790_v39 = vld [vmem:[#allocation3_spill] sm:$0xff]  ;;  %v13012_v42 = vld [vmem:[%s14547_s26 + $0x198] sm:$0xff] }
 0x792   : > { %v8877_v26 = vpop.f32.mrf.mxu0  ;;  %v9596_v60 = vpack.c.bf16 %v9484_v22, %v9484_v22  ;;  %v13136_v30 = vld [vmem:[%s14558_s7 + $0x198] sm:$0xff] }
 0x793   : > { %v9033_v54 = vadd.f32 %v8874_v51, %v8018_v20  ;;  %11691 = vmatmul.msk.bf16.gmra.mxu1 %vm728_vm0, %v13010_v2  ;;  %12008 = vmatmul.msk.bf16.gmra.mxu2 %vm728_vm0, %v13072_v27  ;;  %v13074_v2 = vld [vmem:[%s14552_s29 + $0x198] sm:$0xff] }
 0x794   : > { %9709 = vst.msk [vmem:[%s14704_s8 + $0x140] sm:$0xf] %vm9628_vm2, %v9596_v60  ;;  %12325 = vmatmul.msk.bf16.gmra.mxu3 %vm728_vm0, %v13134_v17  ;;  %v13198_v17 = vld [vmem:[%s14563_s14 + $0x198] sm:$0xff] }
 0x795   : > { %12642 = vmatmul.msk.bf16.gmra.mxu0 %vm728_vm0, %v13196_v12  ;;  %v9149_v18 = vadd.f32 %v15172_v4, %v9033_v54 }
 0x796   : > { %v6847_v37 = vpop.f32.mrf.mxu2 }
 0x797   : > { %vm9261_vm13 = vcmp.ge.f32.partialorder %v9149_v18, 0.0  ;;  %v9373_v6 = vmul.f32 0.1, %v9149_v18  ;;  %v7004_v38 = vadd.f32 %v6847_v37, %v5989_v32  ;;  %v7862_v33 = vpop.f32.mrf.mxu3 }
 0x798   : > { %v5834_v56 = vpop.f32.mrf.mxu1 }
 0x799   : > { %v9485_v9 = vsel %vm9261_vm13, %v9149_v18, %v9373_v6  ;;  %v8019_v50 = vadd.f32 %v7862_v33, %v7004_v38  ;;  %v5990_v31 = vadd.f32 %v5834_v56, %v15788_v61  ;;  %v15791_v18 = vld [vmem:[#allocation5_spill] sm:$0xff] }
 0x79a   : > { %v8879_v7 = vpop.f32.mrf.mxu0  ;;  %v9597_v8 = vpack.c.bf16 %v9485_v9, %v9485_v9 }
 0x79b   : > { %v9034_v3 = vadd.f32 %v8877_v26, %v8019_v50 }
 0x79c   : > { %9710 = vst.msk [vmem:[%s14704_s8 + $0x144] sm:$0xf] %vm9628_vm2, %v9597_v8 }
 0x79d   : > { %v9150_v5 = vadd.f32 %v15172_v4, %v9034_v3 }
 0x79e   : > { %v6849_v46 = vpop.f32.mrf.mxu2 }
 0x79f   : > { %vm9262_vm14 = vcmp.ge.f32.partialorder %v9150_v5, 0.0  ;;  %v9374_v28 = vmul.f32 0.1, %v9150_v5  ;;  %v7005_v55 = vadd.f32 %v6849_v46, %v5990_v31  ;;  %v7864_v36 = vpop.f32.mrf.mxu3 }
 0x7a0   : > { %v5837_v0 = vpop.f32.mrf.mxu1 }
 0x7a1   : > { %v9486_v48 = vsel %vm9262_vm14, %v9150_v5, %v9374_v28  ;;  %v8020_v63 = vadd.f32 %v7864_v36, %v7005_v55  ;;  %v5991_v11 = vadd.f32 %v5837_v0, %v15789_v49  ;;  %v15792_v5 = vld [vmem:[#allocation7_spill] sm:$0xff]  ;;  %v13013_v36 = vld [vmem:[%s14547_s26 + $0x1a0] sm:$0xff] }
 0x7a2   : > { %v8882_v43 = vpop.f32.mrf.mxu0  ;;  %v9598_v14 = vpack.c.bf16 %v9486_v48, %v9486_v48  ;;  %v13137_v0 = vld [vmem:[%s14558_s7 + $0x1a0] sm:$0xff] }
 0x7a3   : > { %v9035_v35 = vadd.f32 %v8879_v7, %v8020_v63  ;;  %11692 = vmatmul.msk.bf16.gmra.mxu1 %vm728_vm0, %v13011_v52  ;;  %12009 = vmatmul.msk.bf16.gmra.mxu2 %vm728_vm0, %v13073_v62  ;;  %v13075_v52 = vld [vmem:[%s14552_s29 + $0x1a0] sm:$0xff] }
 0x7a4   : > { %9711 = vst.msk [vmem:[%s14704_s8 + $0x148] sm:$0xf] %vm9628_vm2, %v9598_v14  ;;  %12326 = vmatmul.msk.bf16.gmra.mxu3 %vm728_vm0, %v13135_v47  ;;  %v13199_v47 = vld [vmem:[%s14563_s14 + $0x1a0] sm:$0xff] }
 0x7a5   : > { %12643 = vmatmul.msk.bf16.gmra.mxu0 %vm728_vm0, %v13197_v23  ;;  %v9151_v15 = vadd.f32 %v15172_v4, %v9035_v35 }
 0x7a6   : > { %v6852_v19 = vpop.f32.mrf.mxu2 }
 0x7a7   : > { %vm9263_vm15 = vcmp.ge.f32.partialorder %v9151_v15, 0.0  ;;  %v9375_v44 = vmul.f32 0.1, %v9151_v15  ;;  %v7006_v53 = vadd.f32 %v6852_v19, %v5991_v11  ;;  %v7867_v45 = vpop.f32.mrf.mxu3 }
 0x7a8   : > { %v5839_v58 = vpop.f32.mrf.mxu1 }
 0x7a9   : > { %v9487_v59 = vsel %vm9263_vm15, %v9151_v15, %v9375_v44  ;;  %v8021_v40 = vadd.f32 %v7867_v45, %v7006_v53  ;;  %v5992_v34 = vadd.f32 %v5839_v58, %v15790_v39  ;;  %v15793_v15 = vld [vmem:[#allocation9_spill] sm:$0xff] }
 0x7aa   : > { %v8884_v13 = vpop.f32.mrf.mxu0  ;;  %v9599_v51 = vpack.c.bf16 %v9487_v59, %v9487_v59 }
 0x7ab   : > { %v9036_v21 = vadd.f32 %v8882_v43, %v8021_v40 }
 0x7ac   : > { %9712 = vst.msk [vmem:[%s14704_s8 + $0x14c] sm:$0xf] %vm9628_vm2, %v9599_v51 }
 0x7ad   : > { %v9152_v25 = vadd.f32 %v15172_v4, %v9036_v21 }
 0x7ae   : > { %v6854_v16 = vpop.f32.mrf.mxu2 }
 0x7af   : > { %vm9264_vm1 = vcmp.ge.f32.partialorder %v9152_v25, 0.0  ;;  %v9376_v41 = vmul.f32 0.1, %v9152_v25  ;;  %v7007_v10 = vadd.f32 %v6854_v16, %v5992_v34  ;;  %v7869_v24 = vpop.f32.mrf.mxu3 }
 0x7b0   : > { %v5842_v27 = vpop.f32.mrf.mxu1 }
 0x7b1   : > { %v9488_v12 = vsel %vm9264_vm1, %v9152_v25, %v9376_v41  ;;  %v8022_v22 = vadd.f32 %v7869_v24, %v7007_v10  ;;  %v5993_v29 = vadd.f32 %v5842_v27, %v15791_v18  ;;  %v15794_v25 = vld [vmem:[#allocation11_spill] sm:$0xff] }
 0x7b2   : > { %v8887_v20 = vpop.f32.mrf.mxu0  ;;  %v9600_v26 = vpack.c.bf16 %v9488_v12, %v9488_v12  ;;  %v13014_v24 = vld [vmem:[%s14547_s26 + $0x1a8] sm:$0xff] }
 0x7b3   : > { %v9037_v60 = vadd.f32 %v8884_v13, %v8022_v22  ;;  %11693 = vmatmul.msk.bf16.gmra.mxu1 %vm728_vm0, %v13012_v42  ;;  %12010 = vmatmul.msk.bf16.gmra.mxu2 %vm728_vm0, %v13074_v2  ;;  %v13076_v42 = vld [vmem:[%s14552_s29 + $0x1a8] sm:$0xff] }
 0x7b4   : > { %9713 = vst.msk [vmem:[%s14704_s8 + $0x150] sm:$0xf] %vm9628_vm2, %v9600_v26  ;;  %12327 = vmatmul.msk.bf16.gmra.mxu3 %vm728_vm0, %v13136_v30  ;;  %v13138_v27 = vld [vmem:[%s14558_s7 + $0x1a8] sm:$0xff] }
 0x7b5   : > { %12644 = vmatmul.msk.bf16.gmra.mxu0 %vm728_vm0, %v13198_v17  ;;  %v9153_v54 = vadd.f32 %v15172_v4, %v9037_v60  ;;  %v13200_v30 = vld [vmem:[%s14563_s14 + $0x1a8] sm:$0xff] }
 0x7b6   : > { %v6857_v32 = vpop.f32.mrf.mxu2 }
 0x7b7   : > { %vm9265_vm3 = vcmp.ge.f32.partialorder %v9153_v54, 0.0  ;;  %v9377_v37 = vmul.f32 0.1, %v9153_v54  ;;  %v7008_v6 = vadd.f32 %v6857_v32, %v5993_v29  ;;  %v7872_v38 = vpop.f32.mrf.mxu3 }
 0x7b8   : > { %v5844_v33 = vpop.f32.mrf.mxu1 }
 0x7b9   : > { %v9489_v56 = vsel %vm9265_vm3, %v9153_v54, %v9377_v37  ;;  %v8023_v9 = vadd.f32 %v7872_v38, %v7008_v6  ;;  %v5994_v61 = vadd.f32 %v5844_v33, %v15792_v5  ;;  %v15795_v54 = vld [vmem:[#allocation13_spill] sm:$0xff] }
 0x7ba   : > { %v8889_v50 = vpop.f32.mrf.mxu0  ;;  %v9601_v7 = vpack.c.bf16 %v9489_v56, %v9489_v56 }
 0x7bb   : > { %v9038_v8 = vadd.f32 %v8887_v20, %v8023_v9 }
 0x7bc   : > { %9714 = vst.msk [vmem:[%s14704_s8 + $0x154] sm:$0xf] %vm9628_vm2, %v9601_v7 }
 0x7bd   : > { %v9154_v3 = vadd.f32 %v15172_v4, %v9038_v8  ;;  %v15413_v4 = vld [vmem:[%s15543_s2] ss:$0 sm:$0xff] }
 0x7be   : > { %v6859_v31 = vpop.f32.mrf.mxu2 }
 0x7bf   : > { %vm9266_vm4 = vcmp.ge.f32.partialorder %v9154_v3, 0.0  ;;  %v9378_v46 = vmul.f32 0.1, %v9154_v3  ;;  %v7009_v28 = vadd.f32 %v6859_v31, %v5994_v61  ;;  %v7874_v55 = vpop.f32.mrf.mxu3 }
 0x7c0   : > { %v5847_v62 = vpop.f32.mrf.mxu1 }
 0x7c1   : > { %v9490_v23 = vsel %vm9266_vm4, %v9154_v3, %v9378_v46  ;;  %v8024_v48 = vadd.f32 %v7874_v55, %v7009_v28  ;;  %v5995_v49 = vadd.f32 %v5847_v62, %v15793_v15  ;;  %v15796_v3 = vld [vmem:[#allocation15_spill] sm:$0xff]  ;;  %v13015_v55 = vld [vmem:[%s14547_s26 + $0x1b0] sm:$0xff] }
 0x7c2   : > { %v8892_v63 = vpop.f32.mrf.mxu0  ;;  %v9602_v43 = vpack.c.bf16 %v9490_v23, %v9490_v23  ;;  %v13139_v62 = vld [vmem:[%s14558_s7 + $0x1b0] sm:$0xff] }
 0x7c3   : > { %v9039_v14 = vadd.f32 %v8889_v50, %v8024_v48  ;;  %11694 = vmatmul.msk.bf16.gmra.mxu1 %vm728_vm0, %v13013_v36  ;;  %12011 = vmatmul.msk.bf16.gmra.mxu2 %vm728_vm0, %v13075_v52  ;;  %v13077_v36 = vld [vmem:[%s14552_s29 + $0x1b0] sm:$0xff] }
 0x7c4   : > { %9715 = vst.msk [vmem:[%s14704_s8 + $0x158] sm:$0xf] %vm9628_vm2, %v9602_v43  ;;  %12328 = vmatmul.msk.bf16.gmra.mxu3 %vm728_vm0, %v13137_v0  ;;  %v13201_v0 = vld [vmem:[%s14563_s14 + $0x1b0] sm:$0xff] }
 0x7c5   : > { %12645 = vmatmul.msk.bf16.gmra.mxu0 %vm728_vm0, %v13199_v47  ;;  %v9155_v35 = vadd.f32 %v15413_v4, %v9039_v14 }
 0x7c6   : > { %v6862_v11 = vpop.f32.mrf.mxu2 }
 0x7c7   : > { %vm9267_vm5 = vcmp.ge.f32.partialorder %v9155_v35, 0.0  ;;  %v9379_v19 = vmul.f32 0.1, %v9155_v35  ;;  %v7010_v44 = vadd.f32 %v6862_v11, %v5995_v49  ;;  %v7877_v53 = vpop.f32.mrf.mxu3 }
 0x7c8   : > { %v5849_v45 = vpop.f32.mrf.mxu1 }
 0x7c9   : > { %v9491_v58 = vsel %vm9267_vm5, %v9155_v35, %v9379_v19  ;;  %v8025_v59 = vadd.f32 %v7877_v53, %v7010_v44  ;;  %v5996_v39 = vadd.f32 %v5849_v45, %v15794_v25  ;;  %v15797_v35 = vld [vmem:[#allocation17_spill] sm:$0xff] }
 0x7ca   : > { %v8894_v40 = vpop.f32.mrf.mxu0  ;;  %v9603_v13 = vpack.c.bf16 %v9491_v58, %v9491_v58 }
 0x7cb   : > { %v9040_v51 = vadd.f32 %v8892_v63, %v8025_v59 }
 0x7cc   : > { %9716 = vst.msk [vmem:[%s14704_s8 + $0x15c] sm:$0xf] %vm9628_vm2, %v9603_v13 }
 0x7cd   : > { %v9156_v21 = vadd.f32 %v15413_v4, %v9040_v51 }
 0x7ce   : > { %v6864_v34 = vpop.f32.mrf.mxu2 }
 0x7cf   : > { %vm9268_vm6 = vcmp.ge.f32.partialorder %v9156_v21, 0.0  ;;  %v9380_v16 = vmul.f32 0.1, %v9156_v21  ;;  %v7011_v41 = vadd.f32 %v6864_v34, %v5996_v39  ;;  %v7879_v10 = vpop.f32.mrf.mxu3 }
 0x7d0   : > { %v5852_v2 = vpop.f32.mrf.mxu1 }
 0x7d1   : > { %v9492_v17 = vsel %vm9268_vm6, %v9156_v21, %v9380_v16  ;;  %v8026_v12 = vadd.f32 %v7879_v10, %v7011_v41  ;;  %v5997_v18 = vadd.f32 %v5852_v2, %v15795_v54  ;;  %v15798_v21 = vld [vmem:[#allocation19_spill] sm:$0xff]  ;;  %v13016_v10 = vld [vmem:[%s14547_s26 + $0x1b8] sm:$0xff] }
 0x7d2   : > { %v8897_v22 = vpop.f32.mrf.mxu0  ;;  %v9604_v20 = vpack.c.bf16 %v9492_v17, %v9492_v17  ;;  %v13140_v2 = vld [vmem:[%s14558_s7 + $0x1b8] sm:$0xff] }
 0x7d3   : > { %v9041_v26 = vadd.f32 %v8894_v40, %v8026_v12  ;;  %11695 = vmatmul.msk.bf16.gmra.mxu1 %vm728_vm0, %v13014_v24  ;;  %12012 = vmatmul.msk.bf16.gmra.mxu2 %vm728_vm0, %v13076_v42  ;;  %v13078_v24 = vld [vmem:[%s14552_s29 + $0x1b8] sm:$0xff] }
 0x7d4   : > { %9717 = vst.msk [vmem:[%s14704_s8 + $0x160] sm:$0xf] %vm9628_vm2, %v9604_v20  ;;  %12329 = vmatmul.msk.bf16.gmra.mxu3 %vm728_vm0, %v13138_v27  ;;  %v13202_v27 = vld [vmem:[%s14563_s14 + $0x1b8] sm:$0xff] }
 0x7d5   : > { %12646 = vmatmul.msk.bf16.gmra.mxu0 %vm728_vm0, %v13200_v30  ;;  %v9157_v60 = vadd.f32 %v15413_v4, %v9041_v26 }
 0x7d6   : > { %v6867_v29 = vpop.f32.mrf.mxu2 }
 0x7d7   : > { %vm9269_vm7 = vcmp.ge.f32.partialorder %v9157_v60, 0.0  ;;  %v9381_v32 = vmul.f32 0.1, %v9157_v60  ;;  %v7012_v37 = vadd.f32 %v6867_v29, %v5997_v18  ;;  %v7882_v6 = vpop.f32.mrf.mxu3 }
 0x7d8   : > { %v5854_v38 = vpop.f32.mrf.mxu1 }
 0x7d9   : > { %v9493_v33 = vsel %vm9269_vm7, %v9157_v60, %v9381_v32  ;;  %v8027_v56 = vadd.f32 %v7882_v6, %v7012_v37  ;;  %v5998_v5 = vadd.f32 %v5854_v38, %v15796_v3  ;;  %v15799_v60 = vld [vmem:[#allocation21_spill] sm:$0xff] }
 0x7da   : > { %v8899_v9 = vpop.f32.mrf.mxu0  ;;  %v9605_v50 = vpack.c.bf16 %v9493_v33, %v9493_v33 }
 0x7db   : > { %v9042_v7 = vadd.f32 %v8897_v22, %v8027_v56 }
 0x7dc   : > { %9718 = vst.msk [vmem:[%s14704_s8 + $0x164] sm:$0xf] %vm9628_vm2, %v9605_v50 }
 0x7dd   : > { %v9158_v8 = vadd.f32 %v15413_v4, %v9042_v7 }
 0x7de   : > { %v6869_v61 = vpop.f32.mrf.mxu2 }
 0x7df   : > { %vm9270_vm8 = vcmp.ge.f32.partialorder %v9158_v8, 0.0  ;;  %v9382_v31 = vmul.f32 0.1, %v9158_v8  ;;  %v7013_v46 = vadd.f32 %v6869_v61, %v5998_v5  ;;  %v7884_v28 = vpop.f32.mrf.mxu3 }
 0x7e0   : > { %v5857_v52 = vpop.f32.mrf.mxu1 }
 0x7e1   : > { %v9494_v47 = vsel %vm9270_vm8, %v9158_v8, %v9382_v31  ;;  %v8028_v23 = vadd.f32 %v7884_v28, %v7013_v46  ;;  %v5999_v15 = vadd.f32 %v5857_v52, %v15797_v35  ;;  %v15800_v8 = vld [vmem:[#allocation23_spill] sm:$0xff] }
 0x7e2   : > { %v8902_v48 = vpop.f32.mrf.mxu0  ;;  %v9606_v63 = vpack.c.bf16 %v9494_v47, %v9494_v47 }
 0x7e3   : > { %v9043_v43 = vadd.f32 %v8899_v9, %v8028_v23  ;;  %11696 = vmatmul.msk.bf16.gmra.mxu1 %vm728_vm0, %v13015_v55  ;;  %12013 = vmatmul.msk.bf16.gmra.mxu2 %vm728_vm0, %v13077_v36  ;;  %v15801_v23 = vld [vmem:[#allocation25_spill] sm:$0xff] }
 0x7e4   : > { %9719 = vst.msk [vmem:[%s14704_s8 + $0x168] sm:$0xf] %vm9628_vm2, %v9606_v63  ;;  %12330 = vmatmul.msk.bf16.gmra.mxu3 %vm728_vm0, %v13139_v62 }
 0x7e5   : > { %12647 = vmatmul.msk.bf16.gmra.mxu0 %vm728_vm0, %v13201_v0  ;;  %v9159_v14 = vadd.f32 %v15413_v4, %v9043_v43 }
 0x7e6   : > { %v6872_v49 = vpop.f32.mrf.mxu2 }
 0x7e7   : > { %vm9271_vm9 = vcmp.ge.f32.partialorder %v9159_v14, 0.0  ;;  %v9383_v11 = vmul.f32 0.1, %v9159_v14  ;;  %v7014_v19 = vadd.f32 %v6872_v49, %v5999_v15  ;;  %v7887_v44 = vpop.f32.mrf.mxu3 }
 0x7e8   : > { %v5859_v53 = vpop.f32.mrf.mxu1 }
 0x7e9   : > { %v9495_v45 = vsel %vm9271_vm9, %v9159_v14, %v9383_v11  ;;  %v8029_v58 = vadd.f32 %v7887_v44, %v7014_v19  ;;  %v6000_v25 = vadd.f32 %v5859_v53, %v15798_v21 }
 0x7ea   : > { %v8904_v59 = vpop.f32.mrf.mxu0  ;;  %v9607_v40 = vpack.c.bf16 %v9495_v45, %v9495_v45 }
 0x7eb   : > { %v9044_v13 = vadd.f32 %v8902_v48, %v8029_v58  ;;  %v15802_v58 = vld [vmem:[#allocation27_spill] sm:$0xff] }
 0x7ec   : > { %9720 = vst.msk [vmem:[%s14704_s8 + $0x16c] sm:$0xf] %vm9628_vm2, %v9607_v40 }
 0x7ed   : > { %v9160_v51 = vadd.f32 %v15413_v4, %v9044_v13 }
 0x7ee   : > { %v6874_v39 = vpop.f32.mrf.mxu2 }
 0x7ef   : > { %vm9272_vm10 = vcmp.ge.f32.partialorder %v9160_v51, 0.0  ;;  %v9384_v34 = vmul.f32 0.1, %v9160_v51  ;;  %v7015_v16 = vadd.f32 %v6874_v39, %v6000_v25  ;;  %v7889_v41 = vpop.f32.mrf.mxu3 }
 0x7f0   : > { %v5862_v42 = vpop.f32.mrf.mxu1 }
 0x7f1   : > { %v9496_v30 = vsel %vm9272_vm10, %v9160_v51, %v9384_v34  ;;  %v8030_v17 = vadd.f32 %v7889_v41, %v7015_v16  ;;  %v6001_v54 = vadd.f32 %v5862_v42, %v15799_v60  ;;  %v15803_v42 = vld [vmem:[#allocation29_spill] sm:$0xff] }
 0x7f2   : > { %v8907_v12 = vpop.f32.mrf.mxu0  ;;  %v9608_v22 = vpack.c.bf16 %v9496_v30, %v9496_v30 }
 0x7f3   : > { %v9045_v20 = vadd.f32 %v8904_v59, %v8030_v17  ;;  %11697 = vmatmul.msk.bf16.gmra.mxu1 %vm728_vm0, %v13016_v10  ;;  %12014 = vmatmul.msk.bf16.gmra.mxu2 %vm728_vm0, %v13078_v24 }
 0x7f4   : > { %9721 = vst.msk [vmem:[%s14704_s8 + $0x170] sm:$0xf] %vm9628_vm2, %v9608_v22  ;;  %12331 = vmatmul.msk.bf16.gmra.mxu3 %vm728_vm0, %v13140_v2 }
 0x7f5   : > { %12648 = vmatmul.msk.bf16.gmra.mxu0 %vm728_vm0, %v13202_v27  ;;  %v9161_v26 = vadd.f32 %v15413_v4, %v9045_v20 }
 0x7f6   : > { %v6877_v18 = vpop.f32.mrf.mxu2 }
 0x7f7   : > { %vm9273_vm11 = vcmp.ge.f32.partialorder %v9161_v26, 0.0  ;;  %v9385_v29 = vmul.f32 0.1, %v9161_v26  ;;  %v7016_v32 = vadd.f32 %v6877_v18, %v6001_v54  ;;  %v7892_v37 = vpop.f32.mrf.mxu3 }
 0x7f8   : > { %v5864_v6 = vpop.f32.mrf.mxu1 }
 0x7f9   : > { %v9497_v38 = vsel %vm9273_vm11, %v9161_v26, %v9385_v29  ;;  %v8031_v33 = vadd.f32 %v7892_v37, %v7016_v32  ;;  %v6002_v3 = vadd.f32 %v5864_v6, %v15800_v8  ;;  %v15804_v32 = vld [vmem:[#allocation31_spill] sm:$0xff] }
 0x7fa   : > { %v8909_v56 = vpop.f32.mrf.mxu0  ;;  %v9609_v9 = vpack.c.bf16 %v9497_v38, %v9497_v38 }
 0x7fb   : > { %v9046_v50 = vadd.f32 %v8907_v12, %v8031_v33 }
 0x7fc   : > { %9722 = vst.msk [vmem:[%s14704_s8 + $0x174] sm:$0xf] %vm9628_vm2, %v9609_v9 }
 0x7fd   : > { %v9162_v7 = vadd.f32 %v15413_v4, %v9046_v50 }
 0x7fe   : > { %v6879_v5 = vpop.f32.mrf.mxu2 }
 0x7ff   : > { %vm9274_vm0 = vcmp.ge.f32.partialorder %v9162_v7, 0.0  ;;  %v9386_v61 = vmul.f32 0.1, %v9162_v7  ;;  %v7017_v31 = vadd.f32 %v6879_v5, %v6002_v3  ;;  %v7894_v46 = vpop.f32.mrf.mxu3 }
 0x800   : > { %v5867_v28 = vpop.f32.mrf.mxu1 }
 0x801   : > { %v9498_v55 = vsel %vm9274_vm0, %v9162_v7, %v9386_v61  ;;  %v8032_v36 = vadd.f32 %v7894_v46, %v7017_v31  ;;  %v6003_v48 = vadd.f32 %v5867_v28, %v15801_v23  ;;  %v15805_v31 = vld [vmem:[#allocation33_spill] sm:$0xff] }
 0x802   : > { %v8912_v52 = vpop.f32.mrf.mxu0  ;;  %v9610_v62 = vpack.c.bf16 %v9498_v55, %v9498_v55 }
 0x803   : > { %v9047_v0 = vadd.f32 %v8909_v56, %v8032_v36 }
 0x804   : > { %9723 = vst.msk [vmem:[%s14704_s8 + $0x178] sm:$0xf] %vm9628_vm2, %v9610_v62 }
 0x805   : > { %v9163_v47 = vadd.f32 %v15413_v4, %v9047_v0 }
 0x806   : > { %v6882_v63 = vpop.f32.mrf.mxu2 }
 0x807   : > { %vm9275_vm12 = vcmp.ge.f32.partialorder %v9163_v47, 0.0  ;;  %v9387_v43 = vmul.f32 0.1, %v9163_v47  ;;  %v7018_v14 = vadd.f32 %v6882_v63, %v6003_v48  ;;  %v7897_v35 = vpop.f32.mrf.mxu3 }
 0x808   : > { %v5869_v15 = vpop.f32.mrf.mxu1 }
 0x809   : > { %v9499_v49 = vsel %vm9275_vm12, %v9163_v47, %v9387_v43  ;;  %v8033_v11 = vadd.f32 %v7897_v35, %v7018_v14  ;;  %v6004_v59 = vadd.f32 %v5869_v15, %v15802_v58  ;;  %v15806_v14 = vld [vmem:[#allocation36_spill] sm:$0xff] }
 0x80a   : > { %v8914_v19 = vpop.f32.mrf.mxu0  ;;  %v9611_v44 = vpack.c.bf16 %v9499_v49, %v9499_v49 }
 0x80b   : > { %v9048_v53 = vadd.f32 %v8912_v52, %v8033_v11 }
 0x80c   : > { %9724 = vst.msk [vmem:[%s14704_s8 + $0x17c] sm:$0xf] %vm9628_vm2, %v9611_v44 }
 0x80d   : > { %v9164_v45 = vadd.f32 %v15413_v4, %v9048_v53 }
 0x80e   : > { %v6884_v40 = vpop.f32.mrf.mxu2 }
 0x80f   : > { %vm9276_vm13 = vcmp.ge.f32.partialorder %v9164_v45, 0.0  ;;  %v9388_v13 = vmul.f32 0.1, %v9164_v45  ;;  %v7019_v51 = vadd.f32 %v6884_v40, %v6004_v59  ;;  %v7899_v21 = vpop.f32.mrf.mxu3 }
 0x810   : > { %v5872_v25 = vpop.f32.mrf.mxu1 }
 0x811   : > { %v9500_v39 = vsel %vm9276_vm13, %v9164_v45, %v9388_v13  ;;  %v8034_v34 = vadd.f32 %v7899_v21, %v7019_v51  ;;  %v6005_v2 = vadd.f32 %v5872_v25, %v15803_v42  ;;  %v15807_v51 = vld [vmem:[#allocation39_spill] sm:$0xff] }
 0x812   : > { %v8917_v16 = vpop.f32.mrf.mxu0  ;;  %v9612_v41 = vpack.c.bf16 %v9500_v39, %v9500_v39 }
 0x813   : > { %v9049_v10 = vadd.f32 %v8914_v19, %v8034_v34 }
 0x814   : > { %9725 = vst.msk [vmem:[%s14704_s8 + $0x180] sm:$0xf] %vm9628_vm2, %v9612_v41 }
 0x815   : > { %v9165_v24 = vadd.f32 %v15413_v4, %v9049_v10 }
 0x816   : > { %v6887_v27 = vpop.f32.mrf.mxu2 }
 0x817   : > { %vm9277_vm14 = vcmp.ge.f32.partialorder %v9165_v24, 0.0  ;;  %v9389_v30 = vmul.f32 0.1, %v9165_v24  ;;  %v7020_v17 = vadd.f32 %v6887_v27, %v6005_v2  ;;  %v7902_v12 = vpop.f32.mrf.mxu3 }
 0x818   : > { %v5874_v22 = vpop.f32.mrf.mxu1 }
 0x819   : > { %v9501_v20 = vsel %vm9277_vm14, %v9165_v24, %v9389_v30  ;;  %v8035_v26 = vadd.f32 %v7902_v12, %v7020_v17  ;;  %v6006_v37 = vadd.f32 %v5874_v22, %v15804_v32  ;;  %v15808_v17 = vld [vmem:[#allocation42_spill] sm:$0xff] }
 0x81a   : > { %v8919_v60 = vpop.f32.mrf.mxu0  ;;  %v9613_v54 = vpack.c.bf16 %v9501_v20, %v9501_v20 }
 0x81b   : > { %v9050_v18 = vadd.f32 %v8917_v16, %v8035_v26 }
 0x81c   : > { %9726 = vst.msk [vmem:[%s14704_s8 + $0x184] sm:$0xf] %vm9628_vm2, %v9613_v54 }
 0x81d   : > { %v9166_v29 = vadd.f32 %v15413_v4, %v9050_v18 }
 0x81e   : > { %v6889_v6 = vpop.f32.mrf.mxu2 }
 0x81f   : > { %vm9278_vm15 = vcmp.ge.f32.partialorder %v9166_v29, 0.0  ;;  %v9390_v38 = vmul.f32 0.1, %v9166_v29  ;;  %v7021_v33 = vadd.f32 %v6889_v6, %v6006_v37  ;;  %v7904_v56 = vpop.f32.mrf.mxu3 }
 0x820   : > { %v5877_v9 = vpop.f32.mrf.mxu1 }
 0x821   : > { %v9502_v50 = vsel %vm9278_vm15, %v9166_v29, %v9390_v38  ;;  %v8036_v7 = vadd.f32 %v7904_v56, %v7021_v33  ;;  %v6007_v46 = vadd.f32 %v5877_v9, %v15805_v31  ;;  %v15809_v33 = vld [vmem:[#allocation45_spill] sm:$0xff] }
 0x822   : > { %v8922_v8 = vpop.f32.mrf.mxu0  ;;  %v9614_v3 = vpack.c.bf16 %v9502_v50, %v9502_v50 }
 0x823   : > { %v9051_v5 = vadd.f32 %v8919_v60, %v8036_v7 }
 0x824   : > { %9727 = vst.msk [vmem:[%s14704_s8 + $0x188] sm:$0xf] %vm9628_vm2, %v9614_v3 }
 0x825   : > { %v9167_v61 = vadd.f32 %v15413_v4, %v9051_v5 }
 0x826   : > { %v6892_v28 = vpop.f32.mrf.mxu2 }
 0x827   : > { %vm9279_vm1 = vcmp.ge.f32.partialorder %v9167_v61, 0.0  ;;  %v9391_v55 = vmul.f32 0.1, %v9167_v61  ;;  %v7022_v36 = vadd.f32 %v6892_v28, %v6007_v46  ;;  %v7907_v52 = vpop.f32.mrf.mxu3 }
 0x828   : > { %v5879_v62 = vpop.f32.mrf.mxu1 }
 0x829   : > { %v9503_v0 = vsel %vm9279_vm1, %v9167_v61, %v9391_v55  ;;  %v8037_v47 = vadd.f32 %v7907_v52, %v7022_v36  ;;  %v6008_v35 = vadd.f32 %v5879_v62, %v15806_v14  ;;  %v15810_v36 = vld [vmem:[#allocation48_spill] sm:$0xff] }
 0x82a   : > { %v8924_v23 = vpop.f32.mrf.mxu0  ;;  %v9615_v48 = vpack.c.bf16 %v9503_v0, %v9503_v0 }
 0x82b   : > { %v9052_v63 = vadd.f32 %v8922_v8, %v8037_v47 }
 0x82c   : > { %9728 = vst.msk [vmem:[%s14704_s8 + $0x18c] sm:$0xf] %vm9628_vm2, %v9615_v48 }
 0x82d   : > { %v9168_v43 = vadd.f32 %v15413_v4, %v9052_v63 }
 0x82e   : > { %v6894_v15 = vpop.f32.mrf.mxu2 }
 0x82f   : > { %vm9280_vm3 = vcmp.ge.f32.partialorder %v9168_v43, 0.0  ;;  %v9392_v49 = vmul.f32 0.1, %v9168_v43  ;;  %v7023_v11 = vadd.f32 %v6894_v15, %v6008_v35  ;;  %v7909_v19 = vpop.f32.mrf.mxu3 }
 0x830   : > { %v5882_v44 = vpop.f32.mrf.mxu1 }
 0x831   : > { %v9504_v53 = vsel %vm9280_vm3, %v9168_v43, %v9392_v49  ;;  %v8038_v45 = vadd.f32 %v7909_v19, %v7023_v11  ;;  %v6009_v21 = vadd.f32 %v5882_v44, %v15807_v51  ;;  %v15811_v11 = vld [vmem:[#allocation51_spill] sm:$0xff] }
 0x832   : > { %v8927_v58 = vpop.f32.mrf.mxu0  ;;  %v9616_v59 = vpack.c.bf16 %v9504_v53, %v9504_v53 }
 0x833   : > { %v9053_v40 = vadd.f32 %v8924_v23, %v8038_v45 }
 0x834   : > { %9729 = vst.msk [vmem:[%s14704_s8 + $0x190] sm:$0xf] %vm9628_vm2, %v9616_v59 }
 0x835   : > { %v9169_v13 = vadd.f32 %v15413_v4, %v9053_v40 }
 0x836   : > { %v6897_v25 = vpop.f32.mrf.mxu2 }
 0x837   : > { %vm9281_vm4 = vcmp.ge.f32.partialorder %v9169_v13, 0.0  ;;  %v9393_v39 = vmul.f32 0.1, %v9169_v13  ;;  %v7024_v34 = vadd.f32 %v6897_v25, %v6009_v21  ;;  %v7912_v16 = vpop.f32.mrf.mxu3 }
 0x838   : > { %v5884_v41 = vpop.f32.mrf.mxu1 }
 0x839   : > { %v9505_v10 = vsel %vm9281_vm4, %v9169_v13, %v9393_v39  ;;  %v8039_v24 = vadd.f32 %v7912_v16, %v7024_v34  ;;  %v6010_v12 = vadd.f32 %v5884_v41, %v15808_v17  ;;  %v15812_v34 = vld [vmem:[#allocation54_spill] sm:$0xff] }
 0x83a   : > { %v8929_v42 = vpop.f32.mrf.mxu0  ;;  %v9617_v2 = vpack.c.bf16 %v9505_v10, %v9505_v10 }
 0x83b   : > { %v9054_v27 = vadd.f32 %v8927_v58, %v8039_v24 }
 0x83c   : > { %9730 = vst.msk [vmem:[%s14704_s8 + $0x194] sm:$0xf] %vm9628_vm2, %v9617_v2 }
 0x83d   : > { %v9170_v30 = vadd.f32 %v15413_v4, %v9054_v27 }
 0x83e   : > { %v6899_v22 = vpop.f32.mrf.mxu2 }
 0x83f   : > { %vm9282_vm5 = vcmp.ge.f32.partialorder %v9170_v30, 0.0  ;;  %v9394_v20 = vmul.f32 0.1, %v9170_v30  ;;  %v7025_v26 = vadd.f32 %v6899_v22, %v6010_v12  ;;  %v7914_v60 = vpop.f32.mrf.mxu3 }
 0x840   : > { %v5887_v54 = vpop.f32.mrf.mxu1 }
 0x841   : > { %v9506_v18 = vsel %vm9282_vm5, %v9170_v30, %v9394_v20  ;;  %v8040_v29 = vadd.f32 %v7914_v60, %v7025_v26  ;;  %v6011_v56 = vadd.f32 %v5887_v54, %v15809_v33  ;;  %v15813_v26 = vld [vmem:[#allocation57_spill] sm:$0xff] }
 0x842   : > { %v8932_v32 = vpop.f32.mrf.mxu0  ;;  %v9618_v37 = vpack.c.bf16 %v9506_v18, %v9506_v18 }
 0x843   : > { %v9055_v6 = vadd.f32 %v8929_v42, %v8040_v29 }
 0x844   : > { %9731 = vst.msk [vmem:[%s14704_s8 + $0x198] sm:$0xf] %vm9628_vm2, %v9618_v37 }
 0x845   : > { %v9171_v38 = vadd.f32 %v15413_v4, %v9055_v6 }
 0x846   : > { %v6902_v9 = vpop.f32.mrf.mxu2 }
 0x847   : > { %vm9283_vm6 = vcmp.ge.f32.partialorder %v9171_v38, 0.0  ;;  %v9395_v50 = vmul.f32 0.1, %v9171_v38  ;;  %v7026_v7 = vadd.f32 %v6902_v9, %v6011_v56  ;;  %v7917_v8 = vpop.f32.mrf.mxu3 }
 0x848   : > { %v5889_v3 = vpop.f32.mrf.mxu1 }
 0x849   : > { %v9507_v5 = vsel %vm9283_vm6, %v9171_v38, %v9395_v50  ;;  %v8041_v61 = vadd.f32 %v7917_v8, %v7026_v7  ;;  %v6012_v52 = vadd.f32 %v5889_v3, %v15810_v36  ;;  %v15814_v50 = vld [vmem:[#allocation60_spill] sm:$0xff] }
 0x84a   : > { %v8934_v31 = vpop.f32.mrf.mxu0  ;;  %v9619_v46 = vpack.c.bf16 %v9507_v5, %v9507_v5 }
 0x84b   : > { %v9056_v28 = vadd.f32 %v8932_v32, %v8041_v61 }
 0x84c   : > { %9732 = vst.msk [vmem:[%s14704_s8 + $0x19c] sm:$0xf] %vm9628_vm2, %v9619_v46 }
 0x84d   : > { %v9172_v55 = vadd.f32 %v15413_v4, %v9056_v28 }
 0x84e   : > { %v6904_v62 = vpop.f32.mrf.mxu2 }
 0x84f   : > { %vm9284_vm7 = vcmp.ge.f32.partialorder %v9172_v55, 0.0  ;;  %v9396_v0 = vmul.f32 0.1, %v9172_v55  ;;  %v7027_v47 = vadd.f32 %v6904_v62, %v6012_v52  ;;  %v7919_v23 = vpop.f32.mrf.mxu3 }
 0x850   : > { %v5892_v48 = vpop.f32.mrf.mxu1 }
 0x851   : > { %v9508_v63 = vsel %vm9284_vm7, %v9172_v55, %v9396_v0  ;;  %v8042_v43 = vadd.f32 %v7919_v23, %v7027_v47  ;;  %v6013_v19 = vadd.f32 %v5892_v48, %v15811_v11 }
 0x852   : > { %v8937_v14 = vpop.f32.mrf.mxu0  ;;  %v9620_v35 = vpack.c.bf16 %v9508_v63, %v9508_v63 }
 0x853   : > { %v9057_v15 = vadd.f32 %v8934_v31, %v8042_v43 }
 0x854   : > { %9733 = vst.msk [vmem:[%s14704_s8 + $0x1a0] sm:$0xf] %vm9628_vm2, %v9620_v35 }
 0x855   : > { %v9173_v49 = vadd.f32 %v15413_v4, %v9057_v15 }
 0x856   : > { %v6907_v44 = vpop.f32.mrf.mxu2 }
 0x857   : > { %vm9285_vm8 = vcmp.ge.f32.partialorder %v9173_v49, 0.0  ;;  %v9397_v53 = vmul.f32 0.1, %v9173_v49  ;;  %v7028_v45 = vadd.f32 %v6907_v44, %v6013_v19  ;;  %v7922_v58 = vpop.f32.mrf.mxu3 }
 0x858   : > { %v5894_v59 = vpop.f32.mrf.mxu1 }
 0x859   : > { %v9509_v40 = vsel %vm9285_vm8, %v9173_v49, %v9397_v53  ;;  %v8043_v13 = vadd.f32 %v7922_v58, %v7028_v45  ;;  %v6014_v16 = vadd.f32 %v5894_v59, %v15812_v34 }
 0x85a   : > { %v9621_v51 = vpack.c.bf16 %v9509_v40, %v9509_v40  ;;  %v8939_v21 = vpop.f32.mrf.mxu0 }
 0x85b   : > { %v9058_v25 = vadd.f32 %v8937_v14, %v8043_v13 }
 0x85c   : > { %9734 = vst.msk [vmem:[%s14704_s8 + $0x1a4] sm:$0xf] %vm9628_vm2, %v9621_v51 }
 0x85d   : > { %v9174_v39 = vadd.f32 %v15413_v4, %v9058_v25 }
 0x85e   : > { %v6909_v41 = vpop.f32.mrf.mxu2 }
 0x85f   : > { %vm9286_vm9 = vcmp.ge.f32.partialorder %v9174_v39, 0.0  ;;  %v9398_v10 = vmul.f32 0.1, %v9174_v39  ;;  %v7029_v24 = vadd.f32 %v6909_v41, %v6014_v16  ;;  %v7924_v42 = vpop.f32.mrf.mxu3 }
 0x860   : > { %v5897_v2 = vpop.f32.mrf.mxu1 }
 0x861   : > { %v9510_v27 = vsel %vm9286_vm9, %v9174_v39, %v9398_v10  ;;  %v8044_v30 = vadd.f32 %v7924_v42, %v7029_v24  ;;  %v6015_v60 = vadd.f32 %v5897_v2, %v15813_v26 }
 0x862   : > { %v9622_v17 = vpack.c.bf16 %v9510_v27, %v9510_v27  ;;  %v8942_v22 = vpop.f32.mrf.mxu0 }
 0x863   : > { %v9059_v12 = vadd.f32 %v8939_v21, %v8044_v30 }
 0x864   : > { %9735 = vst.msk [vmem:[%s14704_s8 + $0x1a8] sm:$0xf] %vm9628_vm2, %v9622_v17 }
 0x865   : > { %v9175_v20 = vadd.f32 %v15413_v4, %v9059_v12 }
 0x866   : > { %v6912_v54 = vpop.f32.mrf.mxu2 }
 0x867   : > { %vm9287_vm10 = vcmp.ge.f32.partialorder %v9175_v20, 0.0  ;;  %v9399_v18 = vmul.f32 0.1, %v9175_v20  ;;  %v7030_v29 = vadd.f32 %v6912_v54, %v6015_v60  ;;  %v7927_v32 = vpop.f32.mrf.mxu3 }
 0x868   : > { %v5899_v37 = vpop.f32.mrf.mxu1 }
 0x869   : > { %v9511_v6 = vsel %vm9287_vm10, %v9175_v20, %v9399_v18  ;;  %v8045_v38 = vadd.f32 %v7927_v32, %v7030_v29  ;;  %v6016_v7 = vadd.f32 %v5899_v37, %v15814_v50 }
 0x86a   : > { %v9623_v33 = vpack.c.bf16 %v9511_v6, %v9511_v6  ;;  %v8944_v8 = vpop.f32.mrf.mxu0 }
 0x86b   : > { %v9060_v56 = vadd.f32 %v8942_v22, %v8045_v38 }
 0x86c   : > { %9736 = vst.msk [vmem:[%s14704_s8 + $0x1ac] sm:$0xf] %vm9628_vm2, %v9623_v33 }
 0x86d   : > { %v9176_v9 = vadd.f32 %v15413_v4, %v9060_v56 }
 0x86e   : > { %v6914_v3 = vpop.f32.mrf.mxu2 }
 0x86f   : > { %vm9288_vm11 = vcmp.ge.f32.partialorder %v9176_v9, 0.0  ;;  %v9400_v5 = vmul.f32 0.1, %v9176_v9  ;;  %v7031_v61 = vadd.f32 %v6914_v3, %v6016_v7  ;;  %v7929_v31 = vpop.f32.mrf.mxu3 }
 0x870   : > { %v5902_v46 = vpop.f32.mrf.mxu1 }
 0x871   : > { %v9512_v28 = vsel %vm9288_vm11, %v9176_v9, %v9400_v5  ;;  %v8046_v55 = vadd.f32 %v7929_v31, %v7031_v61  ;;  %v6017_v0 = vadd.f32 %v5902_v46, %v14674_v57 }
 0x872   : > { %v9624_v36 = vpack.c.bf16 %v9512_v28, %v9512_v28  ;;  %v8947_v43 = vpop.f32.mrf.mxu0 }
 0x873   : > { %v9061_v52 = vadd.f32 %v8944_v8, %v8046_v55 }
 0x874   : > { %9737 = vst.msk [vmem:[%s14704_s8 + $0x1b0] sm:$0xf] %vm9628_vm2, %v9624_v36 }
 0x875   : > { %v9177_v62 = vadd.f32 %v15413_v4, %v9061_v52 }
 0x876   : > { %v6917_v47 = vpop.f32.mrf.mxu2 }
 0x877   : > { %vm9289_vm0 = vcmp.ge.f32.partialorder %v9177_v62, 0.0  ;;  %v9401_v23 = vmul.f32 0.1, %v9177_v62  ;;  %v7032_v48 = vadd.f32 %v6917_v47, %v6017_v0  ;;  %v7932_v63 = vpop.f32.mrf.mxu3 }
 0x878   : > { %v5904_v49 = vpop.f32.mrf.mxu1 }
 0x879   : > { %v9513_v14 = vsel %vm9289_vm0, %v9177_v62, %v9401_v23  ;;  %v8047_v35 = vadd.f32 %v7932_v63, %v7032_v48  ;;  %v6018_v44 = vadd.f32 %v5904_v49, %v14685_v1 }
 0x87a   : > { %v9625_v15 = vpack.c.bf16 %v9513_v14, %v9513_v14  ;;  %v8949_v51 = vpop.f32.mrf.mxu0 }
 0x87b   : > { %v9062_v11 = vadd.f32 %v8947_v43, %v8047_v35 }
 0x87c   : > { %9738 = vst.msk [vmem:[%s14704_s8 + $0x1b4] sm:$0xf] %vm9628_vm2, %v9625_v15 }
 0x87d   : > { %v9178_v19 = vadd.f32 %v15413_v4, %v9062_v11 }
 0x87e   : > { %v6919_v53 = vpop.f32.mrf.mxu2 }
 0x87f   : > { %vm9290_vm12 = vcmp.ge.f32.partialorder %v9178_v19, 0.0  ;;  %v9402_v57 = vmul.f32 0.1, %v9178_v19  ;;  %v7033_v45 = vadd.f32 %v6919_v53, %v6018_v44  ;;  %v7934_v58 = vpop.f32.mrf.mxu3 }
 0x881   : > { %v9514_v59 = vsel %vm9290_vm12, %v9178_v19, %v9402_v57  ;;  %v8048_v40 = vadd.f32 %v7934_v58, %v7033_v45 }
 0x882   : > { %v9626_v13 = vpack.c.bf16 %v9514_v59, %v9514_v59 }
 0x883   : > { %v9063_v21 = vadd.f32 %v8949_v51, %v8048_v40 }
 0x884   : > { %9739 = vst.msk [vmem:[%s14704_s8 + $0x1b8] sm:$0xf] %vm9628_vm2, %v9626_v13 }
 0x885   : > { %v9179_v25 = vadd.f32 %v15413_v4, %v9063_v21 }
 0x887   : > { %vm9291_vm13 = vcmp.ge.f32.partialorder %v9179_v25, 0.0  ;;  %v9403_v39 = vmul.f32 0.1, %v9179_v25 }
 0x889   : > { %v9515_v34 = vsel %vm9291_vm13, %v9179_v25, %v9403_v39 }
 0x88a   : > { %v9627_v16 = vpack.c.bf16 %v9515_v34, %v9515_v34 }
 0x88c   : > { %9740 = vst.msk [vmem:[%s14704_s8 + $0x1bc] sm:$0xf] %vm9628_vm2, %v9627_v16 }
 0x88d PF: > { %s13_s12 = sadd.s32 1, %s13245_s12  }
 0x88e   : > { %p10_p4 = scmp.ge.s32.totalorder %s13_s12, 9  }
 0x890   :  { %12 = sbr.rel (!%p10_p4) target bundleno = 1 (0x1), region = 76 }

// kernel: voxnet_forward.5
= control target key start
LH: loop header
LB: loop body
LE: loop exit
PB: predicated region body
PF: predicated region fallthrough
CT: control target
= control target key end

     0   :  { %s8146_s1 = inlined_call_operand.vmem [shape: bf16[6912,128], index: 1, kind: input, shape index: {}]   ;;  %s8147_s0 = inlined_call_operand.vmem [shape: bf16[8,6912], index: 0, kind: input, shape index: {}]   ;;  %s8148_s2 = inlined_call_operand.vmem [shape: f32[1,128], index: 2, kind: input, shape index: {}]   ;;  %s8149_s4 = inlined_call_operand.vmem [shape: f32[1,128], index: 4, kind: input, shape index: {}]   ;;  %s8150_s3 = inlined_call_operand.vmem [shape: bf16[128,128], index: 3, kind: input, shape index: {}]   ;;  %s8151_s5 = inlined_call_operand.vmem [shape: f32[8,128], index: 5, kind: output, shape index: {}]  }
   0x1   :  { %v6253_v0 = vld [vmem:[%s8146_s1 + $0x38] sm:$0xff]  ;;  %v6252_v4 = vld [vmem:[%s8146_s1 + $0x30] sm:$0xff]  ;;  %v6251_v8 = vld [vmem:[%s8146_s1 + $0x28] sm:$0xff] }
   0x2   :  { %v6261_v1 = vld [vmem:[%s8146_s1 + $0x78] sm:$0xff]  ;;  %3696 = vmatpush.bf16.msra.mxu0 %v6253_v0  ;;  %v6260_v5 = vld [vmem:[%s8146_s1 + $0x70] sm:$0xff]  ;;  %v6259_v9 = vld [vmem:[%s8146_s1 + $0x68] sm:$0xff] }
   0x3   :  { %v6269_v2 = vld [vmem:[%s8146_s1 + $0xb8] sm:$0xff]  ;;  %3709 = vmatpush.bf16.msra.mxu1 %v6261_v1  ;;  %v6268_v6 = vld [vmem:[%s8146_s1 + $0xb0] sm:$0xff]  ;;  %v6267_v10 = vld [vmem:[%s8146_s1 + $0xa8] sm:$0xff] }
   0x4   :  { %v6277_v3 = vld [vmem:[%s8146_s1 + $0xf8] sm:$0xff]  ;;  %3722 = vmatpush.bf16.msra.mxu2 %v6269_v2  ;;  %v6276_v7 = vld [vmem:[%s8146_s1 + $0xf0] sm:$0xff]  ;;  %v6275_v11 = vld [vmem:[%s8146_s1 + $0xe8] sm:$0xff] }
   0x5   :  { %3735 = vmatpush.bf16.msra.mxu3 %v6277_v3  ;;  %v6250_v12 = vld [vmem:[%s8146_s1 + $0x20] sm:$0xff]  ;;  %v6249_v16 = vld [vmem:[%s8146_s1 + $0x18] sm:$0xff]  ;;  %v6248_v20 = vld [vmem:[%s8146_s1 + $0x10] sm:$0xff] }
   0x6   :  { %3697 = vmatpush.bf16.msra.mxu0 %v6252_v4  ;;  %v6258_v13 = vld [vmem:[%s8146_s1 + $0x60] sm:$0xff]  ;;  %v6257_v17 = vld [vmem:[%s8146_s1 + $0x58] sm:$0xff]  ;;  %v6256_v21 = vld [vmem:[%s8146_s1 + $0x50] sm:$0xff] }
   0x7   :  { %3710 = vmatpush.bf16.msra.mxu1 %v6260_v5  ;;  %v6266_v14 = vld [vmem:[%s8146_s1 + $0xa0] sm:$0xff]  ;;  %v6265_v18 = vld [vmem:[%s8146_s1 + $0x98] sm:$0xff]  ;;  %v6264_v22 = vld [vmem:[%s8146_s1 + $0x90] sm:$0xff] }
   0x8   :  { %3723 = vmatpush.bf16.msra.mxu2 %v6268_v6  ;;  %v6274_v15 = vld [vmem:[%s8146_s1 + $0xe0] sm:$0xff]  ;;  %v6273_v19 = vld [vmem:[%s8146_s1 + $0xd8] sm:$0xff]  ;;  %v6272_v23 = vld [vmem:[%s8146_s1 + $0xd0] sm:$0xff] }
   0x9   :  { %3736 = vmatpush.bf16.msra.mxu3 %v6276_v7  ;;  %v6247_v24 = vld [vmem:[%s8146_s1 + $0x8] sm:$0xff]  ;;  %v20_v26 = vld [vmem:[%s8147_s0] sm:$0xff]  ;;  %v6285_v35 = vld [vmem:[%s8146_s1 + $0x138] sm:$0xff] }
   0xa   :  { %3698 = vmatpush.bf16.msra.mxu0 %v6251_v8  ;;  %v6255_v25 = vld [vmem:[%s8146_s1 + $0x48] sm:$0xff]  ;;  %v942_v30 = vunpack.c.l.b16 %v20_v26  ;;  %v6246_v31 = vld [vmem:[%s8146_s1] sm:$0xff]  ;;  %v943_v36 = vunpack.c.h.b16 %v20_v26  ;;  %v6293_v37 = vld [vmem:[%s8146_s1 + $0x178] sm:$0xff] }
   0xb   :  { %3711 = vmatpush.bf16.msra.mxu1 %v6259_v9  ;;  %v6263_v27 = vld [vmem:[%s8146_s1 + $0x88] sm:$0xff]  ;;  %v6254_v32 = vld [vmem:[%s8146_s1 + $0x40] sm:$0xff]  ;;  %v6301_v38 = vld [vmem:[%s8146_s1 + $0x1b8] sm:$0xff] }
   0xc   :  { %3724 = vmatpush.bf16.msra.mxu2 %v6267_v10  ;;  %v6271_v28 = vld [vmem:[%s8146_s1 + $0xc8] sm:$0xff]  ;;  %v6262_v34 = vld [vmem:[%s8146_s1 + $0x80] sm:$0xff]  ;;  %v996_v40 = vpack.c.b16 %v942_v30, %v942_v30  ;;  %v6309_v42 = vld [vmem:[%s8146_s1 + $0x1f8] sm:$0xff]  ;;  %v997_v45 = vpack.c.b16 %v943_v36, %v943_v36 }
   0xd   :  { %3737 = vmatpush.bf16.msra.mxu3 %v6275_v11  ;;  %v21_v29 = vld [vmem:[%s8147_s0 + $0x8] sm:$0xff]  ;;  %v6270_v39 = vld [vmem:[%s8146_s1 + $0xc0] sm:$0xff]  ;;  %v6284_v44 = vld [vmem:[%s8146_s1 + $0x130] sm:$0xff] }
   0xe   :  { %3699 = vmatpush.bf16.msra.mxu0 %v6250_v12  ;;  %v944_v33 = vunpack.c.l.b16 %v21_v29  ;;  %v945_v41 = vunpack.c.h.b16 %v21_v29  ;;  %v6292_v46 = vld [vmem:[%s8146_s1 + $0x170] sm:$0xff]  ;;  %v6283_v50 = vld [vmem:[%s8146_s1 + $0x128] sm:$0xff]  ;;  %v6282_v54 = vld [vmem:[%s8146_s1 + $0x120] sm:$0xff] }
   0xf   :  { %3712 = vmatpush.bf16.msra.mxu1 %v6258_v13  ;;  %v6300_v47 = vld [vmem:[%s8146_s1 + $0x1b0] sm:$0xff]  ;;  %v6291_v51 = vld [vmem:[%s8146_s1 + $0x168] sm:$0xff]  ;;  %v6290_v55 = vld [vmem:[%s8146_s1 + $0x160] sm:$0xff] }
  0x10   :  { %3725 = vmatpush.bf16.msra.mxu2 %v6266_v14  ;;  %v998_v43 = vpack.c.b16 %v944_v33, %v944_v33  ;;  %v999_v48 = vpack.c.b16 %v945_v41, %v945_v41  ;;  %v6308_v49 = vld [vmem:[%s8146_s1 + $0x1f0] sm:$0xff]  ;;  %v6299_v52 = vld [vmem:[%s8146_s1 + $0x1a8] sm:$0xff]  ;;  %v6298_v56 = vld [vmem:[%s8146_s1 + $0x1a0] sm:$0xff] }
  0x11   :  { %3738 = vmatpush.bf16.msra.mxu3 %v6274_v15  ;;  %v6307_v53 = vld [vmem:[%s8146_s1 + $0x1e8] sm:$0xff]  ;;  %v6306_v57 = vld [vmem:[%s8146_s1 + $0x1e0] sm:$0xff]  ;;  %v6281_v58 = vld [vmem:[%s8146_s1 + $0x118] sm:$0xff] }
  0x12   :  { %3700 = vmatpush.bf16.msra.mxu0 %v6249_v16  ;;  %v6289_v59 = vld [vmem:[%s8146_s1 + $0x158] sm:$0xff]  ;;  %v6280_v62 = vld [vmem:[%s8146_s1 + $0x110] sm:$0xff]  ;;  %v6279_v2 = vld [vmem:[%s8146_s1 + $0x108] sm:$0xff] }
  0x13   :  { %3713 = vmatpush.bf16.msra.mxu1 %v6257_v17  ;;  %v6297_v60 = vld [vmem:[%s8146_s1 + $0x198] sm:$0xff]  ;;  %v6288_v63 = vld [vmem:[%s8146_s1 + $0x150] sm:$0xff]  ;;  %v6287_v3 = vld [vmem:[%s8146_s1 + $0x148] sm:$0xff] }
  0x14   :  { %3726 = vmatpush.bf16.msra.mxu2 %v6265_v18  ;;  %v6305_v61 = vld [vmem:[%s8146_s1 + $0x1d8] sm:$0xff]  ;;  %v6296_v0 = vld [vmem:[%s8146_s1 + $0x190] sm:$0xff]  ;;  %v6295_v4 = vld [vmem:[%s8146_s1 + $0x188] sm:$0xff] }
  0x15   :  { %3739 = vmatpush.bf16.msra.mxu3 %v6273_v19  ;;  %v6304_v1 = vld [vmem:[%s8146_s1 + $0x1d0] sm:$0xff]  ;;  %v23_v5 = vld [vmem:[%s8147_s0 + $0x18] sm:$0xff]  ;;  %v6303_v7 = vld [vmem:[%s8146_s1 + $0x1c8] sm:$0xff] }
  0x16   :  { %3701 = vmatpush.bf16.msra.mxu0 %v6248_v20  ;;  %v22_v6 = vld [vmem:[%s8147_s0 + $0x10] sm:$0xff]  ;;  %v6278_v8 = vld [vmem:[%s8146_s1 + $0x100] sm:$0xff]  ;;  %v948_v9 = vunpack.c.l.b16 %v23_v5  ;;  %v6317_v14 = vld [vmem:[%s8146_s1 + $0x238] sm:$0xff]  ;;  %v949_v18 = vunpack.c.h.b16 %v23_v5 }
  0x17   :  { %3714 = vmatpush.bf16.msra.mxu1 %v6256_v21  ;;  %v6286_v10 = vld [vmem:[%s8146_s1 + $0x140] sm:$0xff]  ;;  %v946_v12 = vunpack.c.l.b16 %v22_v6  ;;  %v947_v13 = vunpack.c.h.b16 %v22_v6  ;;  %v6325_v15 = vld [vmem:[%s8146_s1 + $0x278] sm:$0xff]  ;;  %v6323_v29 = vld [vmem:[%s8146_s1 + $0x268] sm:$0xff] }
  0x18   :  { %3727 = vmatpush.bf16.msra.mxu2 %v6264_v22  ;;  %v6294_v11 = vld [vmem:[%s8146_s1 + $0x180] sm:$0xff]  ;;  %v6333_v16 = vld [vmem:[%s8146_s1 + $0x2b8] sm:$0xff]  ;;  %v1002_v20 = vpack.c.b16 %v948_v9, %v948_v9  ;;  %v1003_v26 = vpack.c.b16 %v949_v18, %v949_v18  ;;  %v6331_v30 = vld [vmem:[%s8146_s1 + $0x2a8] sm:$0xff] }
  0x19   :  { %3740 = vmatpush.bf16.msra.mxu3 %v6272_v23  ;;  %v6302_v17 = vld [vmem:[%s8146_s1 + $0x1c0] sm:$0xff]  ;;  %v6341_v19 = vld [vmem:[%s8146_s1 + $0x2f8] sm:$0xff]  ;;  %v1000_v21 = vpack.c.b16 %v946_v12, %v946_v12  ;;  %v1001_v22 = vpack.c.b16 %v947_v13, %v947_v13  ;;  %v6316_v23 = vld [vmem:[%s8146_s1 + $0x230] sm:$0xff] }
  0x1a   :  { %3702 = vmatpush.bf16.msra.mxu0 %v6247_v24  ;;  %v6324_v24 = vld [vmem:[%s8146_s1 + $0x270] sm:$0xff]  ;;  %v6322_v33 = vld [vmem:[%s8146_s1 + $0x260] sm:$0xff]  ;;  %v6313_v36 = vld [vmem:[%s8146_s1 + $0x218] sm:$0xff] }
  0x1b   :  { %3715 = vmatpush.bf16.msra.mxu1 %v6255_v25  ;;  %v6332_v25 = vld [vmem:[%s8146_s1 + $0x2b0] sm:$0xff]  ;;  %v6347_v6 = vld [vmem:[%s8146_s1 + $0x328] sm:$0xff]  ;;  %v6362_v12 = vld [vmem:[%s8146_s1 + $0x3a0] sm:$0xff] }
  0x1c   :  { %3728 = vmatpush.bf16.msra.mxu2 %v6263_v27  ;;  %v6340_v27 = vld [vmem:[%s8146_s1 + $0x2f0] sm:$0xff]  ;;  %v6371_v9 = vld [vmem:[%s8146_s1 + $0x3e8] sm:$0xff]  ;;  %v6370_v13 = vld [vmem:[%s8146_s1 + $0x3e0] sm:$0xff] }
  0x1d   :  { %3741 = vmatpush.bf16.msra.mxu3 %v6271_v28  ;;  %v6315_v28 = vld [vmem:[%s8146_s1 + $0x228] sm:$0xff]  ;;  %v6320_v41 = vld [vmem:[%s8146_s1 + $0x250] sm:$0xff] }
  0x1e   :  { %3703 = vmatpush.bf16.msra.mxu0 %v6246_v31  ;;  %v6339_v31 = vld [vmem:[%s8146_s1 + $0x2e8] sm:$0xff]  ;;  %v6372_v5 = vld [vmem:[%s8146_s1 + $0x3f0] sm:$0xff] }
  0x1f   :  { %3716 = vmatpush.bf16.msra.mxu1 %v6254_v32  ;;  %v6314_v32 = vld [vmem:[%s8146_s1 + $0x220] sm:$0xff]  ;;  %v6344_v18 = vld [vmem:[%s8146_s1 + $0x310] sm:$0xff] }
  0x20   :  { %3729 = vmatpush.bf16.msra.mxu2 %v6262_v34  ;;  %v6330_v34 = vld [vmem:[%s8146_s1 + $0x2a0] sm:$0xff] }
  0x21   :  { %3742 = vmatpush.bf16.msra.mxu3 %v6270_v39  ;;  %3704 = vmatmul.bf16.vlgmr.msra.gmra.mxu0 %v996_v40  ;;  %v6337_v39 = vld [vmem:[%s8146_s1 + $0x2d8] sm:$0xff]  ;;  %v6312_v40 = vld [vmem:[%s8146_s1 + $0x210] sm:$0xff] }
  0x22   :  { %3748 = vmatpush.bf16.msrb.mxu0 %v6285_v35  ;;  %3717 = vmatmul.bf16.vlgmr.msra.gmra.mxu1 %v997_v45  ;;  %v6338_v35 = vld [vmem:[%s8146_s1 + $0x2e0] sm:$0xff]  ;;  %v6319_v45 = vld [vmem:[%s8146_s1 + $0x248] sm:$0xff] }
  0x23   :  { %3761 = vmatpush.bf16.msrb.mxu1 %v6293_v37  ;;  %3730 = vmatmul.bf16.vlgmr.msra.gmra.mxu2 %v998_v43  ;;  %v6321_v37 = vld [vmem:[%s8146_s1 + $0x258] sm:$0xff]  ;;  %v6336_v43 = vld [vmem:[%s8146_s1 + $0x2d0] sm:$0xff] }
  0x24   :  { %3774 = vmatpush.bf16.msrb.mxu2 %v6301_v38  ;;  %3743 = vmatmul.bf16.vlgmr.msra.gmra.mxu3 %v999_v48  ;;  %v6329_v38 = vld [vmem:[%s8146_s1 + $0x298] sm:$0xff]  ;;  %v25_v48 = vld [vmem:[%s8147_s0 + $0x28] sm:$0xff] }
  0x25   :  { %3787 = vmatpush.bf16.msrb.mxu3 %v6309_v42  ;;  %v6328_v42 = vld [vmem:[%s8146_s1 + $0x290] sm:$0xff] }
  0x26   :  { %3749 = vmatpush.bf16.msrb.mxu0 %v6284_v44  ;;  %v6311_v44 = vld [vmem:[%s8146_s1 + $0x208] sm:$0xff] }
  0x27   :  { %3762 = vmatpush.bf16.msrb.mxu1 %v6292_v46  ;;  %v24_v46 = vld [vmem:[%s8147_s0 + $0x20] sm:$0xff] }
  0x28   :  { %3775 = vmatpush.bf16.msrb.mxu2 %v6300_v47  ;;  %v6327_v47 = vld [vmem:[%s8146_s1 + $0x288] sm:$0xff] }
  0x29   :  { %3788 = vmatpush.bf16.msrb.mxu3 %v6308_v49  ;;  %v6335_v49 = vld [vmem:[%s8146_s1 + $0x2c8] sm:$0xff] }
  0x2a   :  { %3750 = vmatpush.bf16.msrb.mxu0 %v6283_v50  ;;  %v950_v50 = vunpack.c.l.b16 %v24_v46 }
  0x2b   :  { %3763 = vmatpush.bf16.msrb.mxu1 %v6291_v51  ;;  %v6310_v51 = vld [vmem:[%s8146_s1 + $0x200] sm:$0xff] }
  0x2c   :  { %3776 = vmatpush.bf16.msrb.mxu2 %v6299_v52  ;;  %v6318_v52 = vld [vmem:[%s8146_s1 + $0x240] sm:$0xff] }
  0x2d   :  { %3789 = vmatpush.bf16.msrb.mxu3 %v6307_v53  ;;  %v952_v53 = vunpack.c.l.b16 %v25_v48 }
  0x2e   :  { %3751 = vmatpush.bf16.msrb.mxu0 %v6282_v54  ;;  %v6326_v54 = vld [vmem:[%s8146_s1 + $0x280] sm:$0xff] }
  0x2f   :  { %3764 = vmatpush.bf16.msrb.mxu1 %v6290_v55  ;;  %v6349_v55 = vld [vmem:[%s8146_s1 + $0x338] sm:$0xff] }
  0x30   :  { %3777 = vmatpush.bf16.msrb.mxu2 %v6298_v56  ;;  %v951_v56 = vunpack.c.h.b16 %v24_v46  ;;  %v6396_v46 = vld [vmem:[%s8146_s1 + $0x4b0] sm:$0xff] }
  0x31   :  { %3790 = vmatpush.bf16.msrb.mxu3 %v6306_v57  ;;  %v6357_v57 = vld [vmem:[%s8146_s1 + $0x378] sm:$0xff] }
  0x32   :  { %3752 = vmatpush.bf16.msrb.mxu0 %v6281_v58  ;;  %v6365_v58 = vld [vmem:[%s8146_s1 + $0x3b8] sm:$0xff] }
  0x33   :  { %3765 = vmatpush.bf16.msrb.mxu1 %v6289_v59  ;;  %v953_v59 = vunpack.c.h.b16 %v25_v48  ;;  %v6379_v48 = vld [vmem:[%s8146_s1 + $0x428] sm:$0xff] }
  0x34   :  { %3778 = vmatpush.bf16.msrb.mxu2 %v6297_v60  ;;  %v6334_v60 = vld [vmem:[%s8146_s1 + $0x2c0] sm:$0xff] }
  0x35   :  { %3791 = vmatpush.bf16.msrb.mxu3 %v6305_v61  ;;  %v1004_v61 = vpack.c.b16 %v950_v50, %v950_v50  ;;  %v6395_v50 = vld [vmem:[%s8146_s1 + $0x4a8] sm:$0xff] }
  0x36   :  { %3753 = vmatpush.bf16.msrb.mxu0 %v6280_v62  ;;  %v1006_v62 = vpack.c.b16 %v952_v53, %v952_v53  ;;  %v6386_v53 = vld [vmem:[%s8146_s1 + $0x460] sm:$0xff] }
  0x37   :  { %3766 = vmatpush.bf16.msrb.mxu1 %v6288_v63  ;;  %v6373_v63 = vld [vmem:[%s8146_s1 + $0x3f8] sm:$0xff] }
  0x38   :  { %3779 = vmatpush.bf16.msrb.mxu2 %v6296_v0  ;;  %v1005_v0 = vpack.c.b16 %v951_v56, %v951_v56  ;;  %v6377_v56 = vld [vmem:[%s8146_s1 + $0x418] sm:$0xff] }
  0x39   :  { %3792 = vmatpush.bf16.msrb.mxu3 %v6304_v1  ;;  %v6348_v1 = vld [vmem:[%s8146_s1 + $0x330] sm:$0xff] }
  0x3a   :  { %3754 = vmatpush.bf16.msrb.mxu0 %v6279_v2  ;;  %v1007_v2 = vpack.c.b16 %v953_v59, %v953_v59  ;;  %v6401_v59 = vld [vmem:[%s8146_s1 + $0x4d8] sm:$0xff] }
  0x3b   :  { %3767 = vmatpush.bf16.msrb.mxu1 %v6287_v3  ;;  %v6356_v3 = vld [vmem:[%s8146_s1 + $0x370] sm:$0xff] }
  0x3c   :  { %3780 = vmatpush.bf16.msrb.mxu2 %v6295_v4  ;;  %v6364_v4 = vld [vmem:[%s8146_s1 + $0x3b0] sm:$0xff] }
  0x3d   :  { %3793 = vmatpush.bf16.msrb.mxu3 %v6303_v7  ;;  %v6355_v7 = vld [vmem:[%s8146_s1 + $0x368] sm:$0xff] }
  0x3e   :  { %3755 = vmatpush.bf16.msrb.mxu0 %v6278_v8  ;;  %v6363_v8 = vld [vmem:[%s8146_s1 + $0x3a8] sm:$0xff] }
  0x3f   :  { %3768 = vmatpush.bf16.msrb.mxu1 %v6286_v10  ;;  %v6346_v10 = vld [vmem:[%s8146_s1 + $0x320] sm:$0xff] }
  0x40   :  { %3781 = vmatpush.bf16.msrb.mxu2 %v6294_v11  ;;  %v6354_v11 = vld [vmem:[%s8146_s1 + $0x360] sm:$0xff] }
  0x41   :  { %3794 = vmatpush.bf16.msrb.mxu3 %v6302_v17  ;;  %3756 = vmatmul.bf16.vlgmr.msrb.gmra.mxu0 %v1000_v21  ;;  %v6369_v17 = vld [vmem:[%s8146_s1 + $0x3d8] sm:$0xff]  ;;  %v6368_v21 = vld [vmem:[%s8146_s1 + $0x3d0] sm:$0xff] }
  0x42   :  { %3800 = vmatpush.bf16.msra.mxu0 %v6317_v14  ;;  %3769 = vmatmul.bf16.vlgmr.msrb.gmra.mxu1 %v1001_v22  ;;  %v6345_v14 = vld [vmem:[%s8146_s1 + $0x318] sm:$0xff]  ;;  %v6343_v22 = vld [vmem:[%s8146_s1 + $0x308] sm:$0xff] }
  0x43   :  { %3813 = vmatpush.bf16.msra.mxu1 %v6325_v15  ;;  %3782 = vmatmul.bf16.vlgmr.msrb.gmra.mxu2 %v1002_v20  ;;  %v6353_v15 = vld [vmem:[%s8146_s1 + $0x358] sm:$0xff]  ;;  %v6360_v20 = vld [vmem:[%s8146_s1 + $0x390] sm:$0xff] }
  0x44   :  { %3826 = vmatpush.bf16.msra.mxu2 %v6333_v16  ;;  %3795 = vmatmul.bf16.vlgmr.msrb.gmra.mxu3 %v1003_v26  ;;  %v6361_v16 = vld [vmem:[%s8146_s1 + $0x398] sm:$0xff] }
  0x45   :  { %3839 = vmatpush.bf16.msra.mxu3 %v6341_v19  ;;  %v6352_v19 = vld [vmem:[%s8146_s1 + $0x350] sm:$0xff]  ;;  %v27_v26 = vld [vmem:[%s8147_s0 + $0x38] sm:$0xff] }
  0x46   :  { %3801 = vmatpush.bf16.msra.mxu0 %v6316_v23  ;;  %v6351_v23 = vld [vmem:[%s8146_s1 + $0x348] sm:$0xff] }
  0x47   :  { %3814 = vmatpush.bf16.msra.mxu1 %v6324_v24  ;;  %v26_v24 = vld [vmem:[%s8147_s0 + $0x30] sm:$0xff] }
  0x48   :  { %3827 = vmatpush.bf16.msra.mxu2 %v6332_v25  ;;  %v6359_v25 = vld [vmem:[%s8146_s1 + $0x388] sm:$0xff] }
  0x49   :  { %3840 = vmatpush.bf16.msra.mxu3 %v6340_v27  ;;  %v6367_v27 = vld [vmem:[%s8146_s1 + $0x3c8] sm:$0xff] }
  0x4a   :  { %3802 = vmatpush.bf16.msra.mxu0 %v6315_v28  ;;  %v6342_v28 = vld [vmem:[%s8146_s1 + $0x300] sm:$0xff] }
  0x4b   :  { %3815 = vmatpush.bf16.msra.mxu1 %v6323_v29  ;;  %v954_v29 = vunpack.c.l.b16 %v26_v24 }
  0x4c   :  { %3828 = vmatpush.bf16.msra.mxu2 %v6331_v30  ;;  %v6350_v30 = vld [vmem:[%s8146_s1 + $0x340] sm:$0xff] }
  0x4d   :  { %3841 = vmatpush.bf16.msra.mxu3 %v6339_v31  ;;  %v6381_v31 = vld [vmem:[%s8146_s1 + $0x438] sm:$0xff] }
  0x4e   :  { %3803 = vmatpush.bf16.msra.mxu0 %v6314_v32  ;;  %v956_v32 = vunpack.c.l.b16 %v27_v26 }
  0x4f   :  { %3816 = vmatpush.bf16.msra.mxu1 %v6322_v33  ;;  %v955_v33 = vunpack.c.h.b16 %v26_v24  ;;  %v6428_v24 = vld [vmem:[%s8146_s1 + $0x5b0] sm:$0xff] }
  0x50   :  { %3829 = vmatpush.bf16.msra.mxu2 %v6330_v34  ;;  %v6358_v34 = vld [vmem:[%s8146_s1 + $0x380] sm:$0xff] }
  0x51   :  { %3842 = vmatpush.bf16.msra.mxu3 %v6338_v35  ;;  %v6389_v35 = vld [vmem:[%s8146_s1 + $0x478] sm:$0xff] }
  0x52   :  { %3804 = vmatpush.bf16.msra.mxu0 %v6313_v36  ;;  %v957_v36 = vunpack.c.h.b16 %v27_v26  ;;  %v6411_v26 = vld [vmem:[%s8146_s1 + $0x528] sm:$0xff] }
  0x53   :  { %3817 = vmatpush.bf16.msra.mxu1 %v6321_v37  ;;  %v6397_v37 = vld [vmem:[%s8146_s1 + $0x4b8] sm:$0xff] }
  0x54   :  { %3830 = vmatpush.bf16.msra.mxu2 %v6329_v38  ;;  %v6366_v38 = vld [vmem:[%s8146_s1 + $0x3c0] sm:$0xff] }
  0x55   :  { %3843 = vmatpush.bf16.msra.mxu3 %v6337_v39  ;;  %v1008_v39 = vpack.c.b16 %v954_v29, %v954_v29  ;;  %v6686_v29 = vld [vmem:[%s8148_s2] ss:$0 sm:$0xff] }
  0x56   :  { %3805 = vmatpush.bf16.msra.mxu0 %v6312_v40  ;;  %v6405_v40 = vld [vmem:[%s8146_s1 + $0x4f8] sm:$0xff] }
  0x57   :  { %3818 = vmatpush.bf16.msra.mxu1 %v6320_v41  ;;  %v1010_v41 = vpack.c.b16 %v956_v32, %v956_v32 }
  0x58   :  { %3831 = vmatpush.bf16.msra.mxu2 %v6328_v42  ;;  %v1009_v42 = vpack.c.b16 %v955_v33, %v955_v33  ;;  %v6418_v33 = vld [vmem:[%s8146_s1 + $0x560] sm:$0xff] }
  0x59   :  { %3844 = vmatpush.bf16.msra.mxu3 %v6336_v43  ;;  %v1011_v43 = vpack.c.b16 %v957_v36, %v957_v36 }
  0x5a   :  { %3806 = vmatpush.bf16.msra.mxu0 %v6311_v44  ;;  %v6380_v44 = vld [vmem:[%s8146_s1 + $0x430] sm:$0xff] }
  0x5b   :  { %3819 = vmatpush.bf16.msra.mxu1 %v6319_v45  ;;  %v6388_v45 = vld [vmem:[%s8146_s1 + $0x470] sm:$0xff] }
  0x5c   :  { %3832 = vmatpush.bf16.msra.mxu2 %v6327_v47  ;;  %v6404_v47 = vld [vmem:[%s8146_s1 + $0x4f0] sm:$0xff] }
  0x5d   :  { %3845 = vmatpush.bf16.msra.mxu3 %v6335_v49  ;;  %v6387_v49 = vld [vmem:[%s8146_s1 + $0x468] sm:$0xff] }
  0x5e   :  { %3807 = vmatpush.bf16.msra.mxu0 %v6310_v51  ;;  %v6403_v51 = vld [vmem:[%s8146_s1 + $0x4e8] sm:$0xff] }
  0x5f   :  { %3820 = vmatpush.bf16.msra.mxu1 %v6318_v52  ;;  %v6378_v52 = vld [vmem:[%s8146_s1 + $0x420] sm:$0xff] }
  0x60   :  { %3833 = vmatpush.bf16.msra.mxu2 %v6326_v54  ;;  %v6394_v54 = vld [vmem:[%s8146_s1 + $0x4a0] sm:$0xff] }
  0x61   :  { %3846 = vmatpush.bf16.msra.mxu3 %v6334_v60  ;;  %3808 = vmatmul.bf16.vlgmr.msra.gmra.mxu0 %v1004_v61  ;;  %v6376_v60 = vld [vmem:[%s8146_s1 + $0x410] sm:$0xff] }
  0x62   :  { %3852 = vmatpush.bf16.msrb.mxu0 %v6349_v55  ;;  %3821 = vmatmul.bf16.vlgmr.msra.gmra.mxu1 %v1005_v0  ;;  %v6402_v55 = vld [vmem:[%s8146_s1 + $0x4e0] sm:$0xff]  ;;  %v6384_v61 = vld [vmem:[%s8146_s1 + $0x450] sm:$0xff]  ;;  %v6375_v0 = vld [vmem:[%s8146_s1 + $0x408] sm:$0xff] }
  0x63   :  { %3865 = vmatpush.bf16.msrb.mxu1 %v6357_v57  ;;  %3834 = vmatmul.bf16.vlgmr.msra.gmra.mxu2 %v1006_v62  ;;  %v6385_v57 = vld [vmem:[%s8146_s1 + $0x458] sm:$0xff]  ;;  %v6392_v62 = vld [vmem:[%s8146_s1 + $0x490] sm:$0xff] }
  0x64   :  { %3878 = vmatpush.bf16.msrb.mxu2 %v6365_v58  ;;  %3847 = vmatmul.bf16.vlgmr.msra.gmra.mxu3 %v1007_v2  ;;  %v6393_v58 = vld [vmem:[%s8146_s1 + $0x498] sm:$0xff]  ;;  %v6391_v2 = vld [vmem:[%s8146_s1 + $0x488] sm:$0xff] }
  0x65   :  { %3891 = vmatpush.bf16.msrb.mxu3 %v6373_v63  ;;  %v6400_v63 = vld [vmem:[%s8146_s1 + $0x4d0] sm:$0xff] }
  0x66   :  { %3853 = vmatpush.bf16.msrb.mxu0 %v6348_v1  ;;  %v6383_v1 = vld [vmem:[%s8146_s1 + $0x448] sm:$0xff] }
  0x67   :  { %3866 = vmatpush.bf16.msrb.mxu1 %v6356_v3  ;;  %v28_v3 = vld [vmem:[%s8147_s0 + $0x40] sm:$0xff] }
  0x68   :  { %3879 = vmatpush.bf16.msrb.mxu2 %v6364_v4  ;;  %v29_v4 = vld [vmem:[%s8147_s0 + $0x48] sm:$0xff] }
  0x69   :  { %3892 = vmatpush.bf16.msrb.mxu3 %v6372_v5  ;;  %v6399_v5 = vld [vmem:[%s8146_s1 + $0x4c8] sm:$0xff] }
  0x6a   :  { %3854 = vmatpush.bf16.msrb.mxu0 %v6347_v6  ;;  %v6374_v6 = vld [vmem:[%s8146_s1 + $0x400] sm:$0xff] }
  0x6b   :  { %3867 = vmatpush.bf16.msrb.mxu1 %v6355_v7  ;;  %v958_v7 = vunpack.c.l.b16 %v28_v3 }
  0x6c   :  { %3880 = vmatpush.bf16.msrb.mxu2 %v6363_v8  ;;  %v960_v8 = vunpack.c.l.b16 %v29_v4 }
  0x6d   :  { %3893 = vmatpush.bf16.msrb.mxu3 %v6371_v9  ;;  %v6382_v9 = vld [vmem:[%s8146_s1 + $0x440] sm:$0xff] }
  0x6e   :  { %3855 = vmatpush.bf16.msrb.mxu0 %v6346_v10  ;;  %v6390_v10 = vld [vmem:[%s8146_s1 + $0x480] sm:$0xff] }
  0x6f   :  { %3868 = vmatpush.bf16.msrb.mxu1 %v6354_v11  ;;  %v959_v11 = vunpack.c.h.b16 %v28_v3  ;;  %v6453_v3 = vld [vmem:[%s8146_s1 + $0x678] sm:$0xff] }
  0x70   :  { %3881 = vmatpush.bf16.msrb.mxu2 %v6362_v12  ;;  %v6413_v12 = vld [vmem:[%s8146_s1 + $0x538] sm:$0xff] }
  0x71   :  { %3894 = vmatpush.bf16.msrb.mxu3 %v6370_v13  ;;  %v6421_v13 = vld [vmem:[%s8146_s1 + $0x578] sm:$0xff] }
  0x72   :  { %3856 = vmatpush.bf16.msrb.mxu0 %v6345_v14  ;;  %v961_v14 = vunpack.c.h.b16 %v29_v4 }
  0x73   :  { %3869 = vmatpush.bf16.msrb.mxu1 %v6353_v15  ;;  %v6429_v15 = vld [vmem:[%s8146_s1 + $0x5b8] sm:$0xff] }
  0x74   :  { %3882 = vmatpush.bf16.msrb.mxu2 %v6361_v16  ;;  %v6398_v16 = vld [vmem:[%s8146_s1 + $0x4c0] sm:$0xff] }
  0x75   :  { %3895 = vmatpush.bf16.msrb.mxu3 %v6369_v17  ;;  %v1012_v17 = vpack.c.b16 %v958_v7, %v958_v7  ;;  %v6430_v7 = vld [vmem:[%s8146_s1 + $0x5c0] sm:$0xff] }
  0x76   :  { %3857 = vmatpush.bf16.msrb.mxu0 %v6344_v18  ;;  %v1014_v18 = vpack.c.b16 %v960_v8, %v960_v8 }
  0x77   :  { %3870 = vmatpush.bf16.msrb.mxu1 %v6352_v19  ;;  %v6437_v19 = vld [vmem:[%s8146_s1 + $0x5f8] sm:$0xff] }
  0x78   :  { %3883 = vmatpush.bf16.msrb.mxu2 %v6360_v20  ;;  %v1013_v20 = vpack.c.b16 %v959_v11, %v959_v11 }
  0x79   :  { %3896 = vmatpush.bf16.msrb.mxu3 %v6368_v21  ;;  %v1015_v21 = vpack.c.b16 %v961_v14, %v961_v14  ;;  %v6452_v14 = vld [vmem:[%s8146_s1 + $0x670] sm:$0xff] }
  0x7a   :  { %3858 = vmatpush.bf16.msrb.mxu0 %v6343_v22  ;;  %v6412_v22 = vld [vmem:[%s8146_s1 + $0x530] sm:$0xff] }
  0x7b   :  { %3871 = vmatpush.bf16.msrb.mxu1 %v6351_v23  ;;  %v6420_v23 = vld [vmem:[%s8146_s1 + $0x570] sm:$0xff] }
  0x7c   :  { %3884 = vmatpush.bf16.msrb.mxu2 %v6359_v25  ;;  %v6436_v25 = vld [vmem:[%s8146_s1 + $0x5f0] sm:$0xff] }
  0x7d   :  { %3897 = vmatpush.bf16.msrb.mxu3 %v6367_v27  ;;  %v6419_v27 = vld [vmem:[%s8146_s1 + $0x568] sm:$0xff] }
  0x7e   :  { %3859 = vmatpush.bf16.msrb.mxu0 %v6342_v28  ;;  %v6427_v28 = vld [vmem:[%s8146_s1 + $0x5a8] sm:$0xff] }
  0x7f   :  { %3872 = vmatpush.bf16.msrb.mxu1 %v6350_v30  ;;  %v6435_v30 = vld [vmem:[%s8146_s1 + $0x5e8] sm:$0xff] }
  0x80   :  { %3885 = vmatpush.bf16.msrb.mxu2 %v6358_v34  ;;  %v6426_v34 = vld [vmem:[%s8146_s1 + $0x5a0] sm:$0xff] }
  0x81   :  { %3898 = vmatpush.bf16.msrb.mxu3 %v6366_v38  ;;  %3860 = vmatmul.bf16.vlgmr.msrb.gmra.mxu0 %v1008_v39  ;;  %v6409_v39 = vld [vmem:[%s8146_s1 + $0x518] sm:$0xff] }
  0x82   :  { %3904 = vmatpush.bf16.msra.mxu0 %v6381_v31  ;;  %3873 = vmatmul.bf16.vlgmr.msrb.gmra.mxu1 %v1009_v42  ;;  %v6410_v31 = vld [vmem:[%s8146_s1 + $0x520] sm:$0xff]  ;;  %v6433_v42 = vld [vmem:[%s8146_s1 + $0x5d8] sm:$0xff] }
  0x83   :  { %3917 = vmatpush.bf16.msra.mxu1 %v6389_v35  ;;  %3886 = vmatmul.bf16.vlgmr.msrb.gmra.mxu2 %v1010_v41  ;;  %v6425_v41 = vld [vmem:[%s8146_s1 + $0x598] sm:$0xff] }
  0x84   :  { %3930 = vmatpush.bf16.msra.mxu2 %v6397_v37  ;;  %3899 = vmatmul.bf16.vlgmr.msrb.gmra.mxu3 %v1011_v43  ;;  %v6434_v37 = vld [vmem:[%s8146_s1 + $0x5e0] sm:$0xff] }
  0x85   :  { %3943 = vmatpush.bf16.msra.mxu3 %v6405_v40  ;;  %v6417_v40 = vld [vmem:[%s8146_s1 + $0x558] sm:$0xff] }
  0x86   :  { %3905 = vmatpush.bf16.msra.mxu0 %v6380_v44  ;;  %v6408_v44 = vld [vmem:[%s8146_s1 + $0x510] sm:$0xff] }
  0x87   :  { %3918 = vmatpush.bf16.msra.mxu1 %v6388_v45 }
  0x88   :  { %3931 = vmatpush.bf16.msra.mxu2 %v6396_v46 }
  0x89   :  { %3944 = vmatpush.bf16.msra.mxu3 %v6404_v47  ;;  %v6416_v47 = vld [vmem:[%s8146_s1 + $0x550] sm:$0xff] }
  0x8a   :  { %3906 = vmatpush.bf16.msra.mxu0 %v6379_v48  ;;  %v6424_v48 = vld [vmem:[%s8146_s1 + $0x590] sm:$0xff] }
  0x8b   :  { %3919 = vmatpush.bf16.msra.mxu1 %v6387_v49 }
  0x8c   :  { %3932 = vmatpush.bf16.msra.mxu2 %v6395_v50 }
  0x8d   :  { %3945 = vmatpush.bf16.msra.mxu3 %v6403_v51  ;;  %v6432_v51 = vld [vmem:[%s8146_s1 + $0x5d0] sm:$0xff] }
  0x8e   :  { %3907 = vmatpush.bf16.msra.mxu0 %v6378_v52 }
  0x8f   :  { %3920 = vmatpush.bf16.msra.mxu1 %v6386_v53  ;;  %v6407_v53 = vld [vmem:[%s8146_s1 + $0x508] sm:$0xff] }
  0x90   :  { %3933 = vmatpush.bf16.msra.mxu2 %v6394_v54  ;;  %v6415_v54 = vld [vmem:[%s8146_s1 + $0x548] sm:$0xff] }
  0x91   :  { %3946 = vmatpush.bf16.msra.mxu3 %v6402_v55  ;;  %v6423_v55 = vld [vmem:[%s8146_s1 + $0x588] sm:$0xff] }
  0x92   :  { %3908 = vmatpush.bf16.msra.mxu0 %v6377_v56  ;;  %v30_v56 = vld [vmem:[%s8147_s0 + $0x50] sm:$0xff] }
  0x93   :  { %3921 = vmatpush.bf16.msra.mxu1 %v6385_v57  ;;  %v31_v57 = vld [vmem:[%s8147_s0 + $0x58] sm:$0xff] }
  0x94   :  { %3934 = vmatpush.bf16.msra.mxu2 %v6393_v58  ;;  %v6431_v58 = vld [vmem:[%s8146_s1 + $0x5c8] sm:$0xff]  ;;  %v965_v4 = vunpack.c.h.b16 %v31_v57 }
  0x95   :  { %3947 = vmatpush.bf16.msra.mxu3 %v6401_v59 }
  0x96   :  { %3909 = vmatpush.bf16.msra.mxu0 %v6376_v60  ;;  %v6406_v60 = vld [vmem:[%s8146_s1 + $0x500] sm:$0xff] }
  0x97   :  { %3922 = vmatpush.bf16.msra.mxu1 %v6384_v61  ;;  %v962_v61 = vunpack.c.l.b16 %v30_v56 }
  0x98   :  { %3935 = vmatpush.bf16.msra.mxu2 %v6392_v62  ;;  %v964_v62 = vunpack.c.l.b16 %v31_v57  ;;  %v6477_v57 = vld [vmem:[%s8146_s1 + $0x738] sm:$0xff] }
  0x99   :  { %3948 = vmatpush.bf16.msra.mxu3 %v6400_v63  ;;  %v6414_v63 = vld [vmem:[%s8146_s1 + $0x540] sm:$0xff]  ;;  %v1016_v8 = vpack.c.b16 %v962_v61, %v962_v61 }
  0x9a   :  { %3910 = vmatpush.bf16.msra.mxu0 %v6375_v0  ;;  %v6422_v0 = vld [vmem:[%s8146_s1 + $0x580] sm:$0xff] }
  0x9b   :  { %3923 = vmatpush.bf16.msra.mxu1 %v6383_v1  ;;  %v963_v1 = vunpack.c.h.b16 %v30_v56  ;;  %v6462_v61 = vld [vmem:[%s8146_s1 + $0x6c0] sm:$0xff] }
  0x9c   :  { %3936 = vmatpush.bf16.msra.mxu2 %v6391_v2  ;;  %v6445_v2 = vld [vmem:[%s8146_s1 + $0x638] sm:$0xff] }
  0x9d   :  { %3949 = vmatpush.bf16.msra.mxu3 %v6399_v5  ;;  %v1017_v11 = vpack.c.b16 %v963_v1, %v963_v1 }
  0x9e   :  { %3911 = vmatpush.bf16.msra.mxu0 %v6374_v6  ;;  %v3705_v32 = vpop.f32.mrf.mxu0  ;;  %v6461_v6 = vld [vmem:[%s8146_s1 + $0x6b8] sm:$0xff] }
  0x9f   :  { %3924 = vmatpush.bf16.msra.mxu1 %v6382_v9  ;;  %v3706_v35 = vadd.f32 %v6686_v29, %v3705_v32  ;;  %v3718_v36 = vpop.f32.mrf.mxu1  ;;  %v1018_v9 = vpack.c.b16 %v964_v62, %v964_v62 }
  0xa0   :  { %3937 = vmatpush.bf16.msra.mxu2 %v6390_v10  ;;  %v6469_v10 = vld [vmem:[%s8146_s1 + $0x6f8] sm:$0xff] }
  0xa1   :  { %3950 = vmatpush.bf16.msra.mxu3 %v6398_v16  ;;  %3912 = vmatmul.bf16.vlgmr.msra.gmra.mxu0 %v1012_v17  ;;  %v3719_v38 = vadd.f32 %v3718_v36, %v3706_v35  ;;  %v6468_v16 = vld [vmem:[%s8146_s1 + $0x6f0] sm:$0xff]  ;;  %v6443_v17 = vld [vmem:[%s8146_s1 + $0x628] sm:$0xff] }
  0xa2   :  { %3956 = vmatpush.bf16.msrb.mxu0 %v6413_v12  ;;  %3925 = vmatmul.bf16.vlgmr.msra.gmra.mxu1 %v1013_v20  ;;  %v1019_v12 = vpack.c.b16 %v965_v4, %v965_v4  ;;  %v6467_v20 = vld [vmem:[%s8146_s1 + $0x6e8] sm:$0xff]  ;;  %v6440_v35 = vld [vmem:[%s8146_s1 + $0x610] sm:$0xff] }
  0xa3   :  { %3969 = vmatpush.bf16.msrb.mxu1 %v6421_v13  ;;  %3938 = vmatmul.bf16.vlgmr.msra.gmra.mxu2 %v1014_v18  ;;  %v6444_v13 = vld [vmem:[%s8146_s1 + $0x630] sm:$0xff]  ;;  %v6451_v18 = vld [vmem:[%s8146_s1 + $0x668] sm:$0xff] }
  0xa4   :  { %3982 = vmatpush.bf16.msrb.mxu2 %v6429_v15  ;;  %3951 = vmatmul.bf16.vlgmr.msra.gmra.mxu3 %v1015_v21  ;;  %v6460_v15 = vld [vmem:[%s8146_s1 + $0x6b0] sm:$0xff]  ;;  %v6442_v21 = vld [vmem:[%s8146_s1 + $0x620] sm:$0xff] }
  0xa5   :  { %3995 = vmatpush.bf16.msrb.mxu3 %v6437_v19  ;;  %v6459_v19 = vld [vmem:[%s8146_s1 + $0x6a8] sm:$0xff]  ;;  %v6448_v36 = vld [vmem:[%s8146_s1 + $0x650] sm:$0xff] }
  0xa6   :  { %3957 = vmatpush.bf16.msrb.mxu0 %v6412_v22  ;;  %v3731_v43 = vpop.f32.mrf.mxu2  ;;  %v3707_v46 = vpop.f32.mrf.mxu0  ;;  %v6450_v22 = vld [vmem:[%s8146_s1 + $0x660] sm:$0xff]  ;;  %v6484_v4 = vld [vmem:[%s8146_s1 + $0x770] sm:$0xff] }
  0xa7   :  { %3970 = vmatpush.bf16.msrb.mxu1 %v6420_v23  ;;  %v3732_v45 = vadd.f32 %v3731_v43, %v3719_v38  ;;  %v3744_v49 = vpop.f32.mrf.mxu3  ;;  %v3720_v50 = vpop.f32.mrf.mxu1  ;;  %v6458_v23 = vld [vmem:[%s8146_s1 + $0x6a0] sm:$0xff]  ;;  %v6439_v43 = vld [vmem:[%s8146_s1 + $0x608] sm:$0xff] }
  0xa8   :  { %3983 = vmatpush.bf16.msrb.mxu2 %v6428_v24  ;;  %v32_v46 = vld [vmem:[%s8147_s0 + $0x60] sm:$0xff] }
  0xa9   :  { %3996 = vmatpush.bf16.msrb.mxu3 %v6436_v25  ;;  %v7303_v52 = vadd.f32 %v3744_v49, %v3732_v45  ;;  %v6455_v45 = vld [vmem:[%s8146_s1 + $0x688] sm:$0xff]  ;;  %v6438_v50 = vld [vmem:[%s8146_s1 + $0x600] sm:$0xff] }
  0xaa   :  { %3958 = vmatpush.bf16.msrb.mxu0 %v6411_v26  ;;  %v6463_v49 = vld [vmem:[%s8146_s1 + $0x6c8] sm:$0xff] }
  0xab   :  { %3971 = vmatpush.bf16.msrb.mxu1 %v6419_v27  ;;  %v6466_v27 = vld [vmem:[%s8146_s1 + $0x6e0] sm:$0xff] }
  0xac   :  { %3984 = vmatpush.bf16.msrb.mxu2 %v6427_v28  ;;  %v6441_v28 = vld [vmem:[%s8146_s1 + $0x618] sm:$0xff] }
  0xad   :  { %3997 = vmatpush.bf16.msrb.mxu3 %v6435_v30  ;;  %v6449_v30 = vld [vmem:[%s8146_s1 + $0x658] sm:$0xff] }
  0xae   :  { %3959 = vmatpush.bf16.msrb.mxu0 %v6410_v31  ;;  %v3733_v59 = vpop.f32.mrf.mxu2  ;;  %v6457_v31 = vld [vmem:[%s8146_s1 + $0x698] sm:$0xff] }
  0xaf   :  { %3972 = vmatpush.bf16.msrb.mxu1 %v6418_v33  ;;  %v3746_v5 = vpop.f32.mrf.mxu3  ;;  %v6465_v33 = vld [vmem:[%s8146_s1 + $0x6d8] sm:$0xff] }
  0xb0   :  { %3985 = vmatpush.bf16.msrb.mxu2 %v6426_v34  ;;  %v6492_v5 = vld [vmem:[%s8146_s1 + $0x7b0] sm:$0xff] }
  0xb1   :  { %3998 = vmatpush.bf16.msrb.mxu3 %v6434_v37  ;;  %v6456_v37 = vld [vmem:[%s8146_s1 + $0x690] sm:$0xff] }
  0xb2   :  { %3960 = vmatpush.bf16.msrb.mxu0 %v6409_v39 }
  0xb3   :  { %3973 = vmatpush.bf16.msrb.mxu1 %v6417_v40 }
  0xb4   :  { %3986 = vmatpush.bf16.msrb.mxu2 %v6425_v41 }
  0xb5   :  { %3999 = vmatpush.bf16.msrb.mxu3 %v6433_v42  ;;  %v6464_v42 = vld [vmem:[%s8146_s1 + $0x6d0] sm:$0xff] }
  0xb6   :  { %3961 = vmatpush.bf16.msrb.mxu0 %v6408_v44  ;;  %v6447_v44 = vld [vmem:[%s8146_s1 + $0x648] sm:$0xff] }
  0xb7   :  { %3974 = vmatpush.bf16.msrb.mxu1 %v6416_v47  ;;  %v33_v47 = vld [vmem:[%s8147_s0 + $0x68] sm:$0xff] }
  0xb8   :  { %3987 = vmatpush.bf16.msrb.mxu2 %v6424_v48  ;;  %v969_v59 = vunpack.c.h.b16 %v33_v47 }
  0xb9   :  { %4000 = vmatpush.bf16.msrb.mxu3 %v6432_v51  ;;  %v966_v51 = vunpack.c.l.b16 %v32_v46 }
  0xba   :  { %3962 = vmatpush.bf16.msrb.mxu0 %v6407_v53  ;;  %v6446_v53 = vld [vmem:[%s8146_s1 + $0x640] sm:$0xff] }
  0xbb   :  { %3975 = vmatpush.bf16.msrb.mxu1 %v6415_v54  ;;  %v6454_v54 = vld [vmem:[%s8146_s1 + $0x680] sm:$0xff]  ;;  %v1020_v62 = vpack.c.b16 %v966_v51, %v966_v51 }
  0xbc   :  { %3988 = vmatpush.bf16.msrb.mxu2 %v6423_v55  ;;  %v967_v55 = vunpack.c.h.b16 %v32_v46  ;;  %v6494_v51 = vld [vmem:[%s8146_s1 + $0x7c0] sm:$0xff] }
  0xbd   :  { %4001 = vmatpush.bf16.msrb.mxu3 %v6431_v58  ;;  %v6485_v58 = vld [vmem:[%s8146_s1 + $0x778] sm:$0xff] }
  0xbe   :  { %3963 = vmatpush.bf16.msrb.mxu0 %v6406_v60  ;;  %v3757_v24 = vpop.f32.mrf.mxu0  ;;  %v6493_v60 = vld [vmem:[%s8146_s1 + $0x7b8] sm:$0xff]  ;;  %v1021_v1 = vpack.c.b16 %v967_v55, %v967_v55 }
  0xbf   :  { %3976 = vmatpush.bf16.msrb.mxu1 %v6414_v63  ;;  %v3770_v25 = vpop.f32.mrf.mxu1  ;;  %v3758_v26 = vadd.f32 %v3757_v24, %v7303_v52  ;;  %v968_v52 = vunpack.c.l.b16 %v33_v47  ;;  %v6497_v24 = vld [vmem:[%s8146_s1 + $0x7d8] sm:$0xff] }
  0xc0   :  { %3989 = vmatpush.bf16.msrb.mxu2 %v6422_v0  ;;  %v6501_v0 = vld [vmem:[%s8146_s1 + $0x7f8] sm:$0xff] }
  0xc1   :  { %4002 = vmatpush.bf16.msrb.mxu3 %v6430_v7  ;;  %3964 = vmatmul.bf16.vlgmr.msrb.gmra.mxu0 %v1016_v8  ;;  %v3771_v29 = vadd.f32 %v3770_v25, %v3758_v26  ;;  %v1022_v63 = vpack.c.b16 %v968_v52, %v968_v52  ;;  %v6475_v7 = vld [vmem:[%s8146_s1 + $0x728] sm:$0xff]  ;;  %v6509_v47 = vld [vmem:[%s8146_s1 + $0x838] sm:$0xff] }
  0xc2   :  { %4008 = vmatpush.bf16.msra.mxu0 %v6445_v2  ;;  %3977 = vmatmul.bf16.vlgmr.msrb.gmra.mxu1 %v1017_v11  ;;  %v1023_v2 = vpack.c.b16 %v969_v59, %v969_v59  ;;  %v6483_v8 = vld [vmem:[%s8146_s1 + $0x768] sm:$0xff]  ;;  %v6524_v59 = vld [vmem:[%s8146_s1 + $0x8b0] sm:$0xff] }
  0xc3   :  { %4021 = vmatpush.bf16.msra.mxu1 %v6453_v3  ;;  %3990 = vmatmul.bf16.vlgmr.msrb.gmra.mxu2 %v1018_v9  ;;  %v6476_v3 = vld [vmem:[%s8146_s1 + $0x730] sm:$0xff]  ;;  %v6491_v9 = vld [vmem:[%s8146_s1 + $0x7a8] sm:$0xff] }
  0xc4   :  { %4034 = vmatpush.bf16.msra.mxu2 %v6461_v6  ;;  %4003 = vmatmul.bf16.vlgmr.msrb.gmra.mxu3 %v1019_v12  ;;  %v6500_v6 = vld [vmem:[%s8146_s1 + $0x7f0] sm:$0xff] }
  0xc5   :  { %4047 = vmatpush.bf16.msra.mxu3 %v6469_v10  ;;  %v6499_v10 = vld [vmem:[%s8146_s1 + $0x7e8] sm:$0xff] }
  0xc6   :  { %4009 = vmatpush.bf16.msra.mxu0 %v6444_v13  ;;  %v3783_v32 = vpop.f32.mrf.mxu2  ;;  %v3759_v39 = vpop.f32.mrf.mxu0  ;;  %v6474_v13 = vld [vmem:[%s8146_s1 + $0x720] sm:$0xff] }
  0xc7   :  { %4022 = vmatpush.bf16.msra.mxu1 %v6452_v14  ;;  %v3784_v34 = vadd.f32 %v3783_v32, %v3771_v29  ;;  %v3796_v38 = vpop.f32.mrf.mxu3  ;;  %v3772_v41 = vpop.f32.mrf.mxu1  ;;  %v6482_v14 = vld [vmem:[%s8146_s1 + $0x760] sm:$0xff]  ;;  %v6480_v29 = vld [vmem:[%s8146_s1 + $0x750] sm:$0xff]  ;;  %v6495_v39 = vld [vmem:[%s8146_s1 + $0x7c8] sm:$0xff] }
  0xc8   :  { %4035 = vmatpush.bf16.msra.mxu2 %v6460_v15  ;;  %v6490_v15 = vld [vmem:[%s8146_s1 + $0x7a0] sm:$0xff]  ;;  %v6496_v32 = vld [vmem:[%s8146_s1 + $0x7d0] sm:$0xff] }
  0xc9   :  { %4048 = vmatpush.bf16.msra.mxu3 %v6468_v16  ;;  %v3797_v40 = vadd.f32 %v3796_v38, %v3784_v34  ;;  %v6479_v34 = vld [vmem:[%s8146_s1 + $0x748] sm:$0xff] }
  0xca   :  { %4010 = vmatpush.bf16.msra.mxu0 %v6443_v17 }
  0xcb   :  { %4023 = vmatpush.bf16.msra.mxu1 %v6451_v18  ;;  %v6498_v18 = vld [vmem:[%s8146_s1 + $0x7e0] sm:$0xff] }
  0xcc   :  { %4036 = vmatpush.bf16.msra.mxu2 %v6459_v19  ;;  %v6473_v19 = vld [vmem:[%s8146_s1 + $0x718] sm:$0xff] }
  0xcd   :  { %4049 = vmatpush.bf16.msra.mxu3 %v6467_v20  ;;  %v6481_v20 = vld [vmem:[%s8146_s1 + $0x758] sm:$0xff] }
  0xce   :  { %4011 = vmatpush.bf16.msra.mxu0 %v6442_v21  ;;  %v3785_v48 = vpop.f32.mrf.mxu2  ;;  %v6489_v21 = vld [vmem:[%s8146_s1 + $0x798] sm:$0xff] }
  0xcf   :  { %4024 = vmatpush.bf16.msra.mxu1 %v6450_v22  ;;  %v3798_v56 = vpop.f32.mrf.mxu3  ;;  %v6517_v48 = vld [vmem:[%s8146_s1 + $0x878] sm:$0xff] }
  0xd0   :  { %4037 = vmatpush.bf16.msra.mxu2 %v6458_v23 }
  0xd1   :  { %4050 = vmatpush.bf16.msra.mxu3 %v6466_v27  ;;  %v6472_v27 = vld [vmem:[%s8146_s1 + $0x710] sm:$0xff] }
  0xd2   :  { %4012 = vmatpush.bf16.msra.mxu0 %v6441_v28 }
  0xd3   :  { %4025 = vmatpush.bf16.msra.mxu1 %v6449_v30  ;;  %v6488_v30 = vld [vmem:[%s8146_s1 + $0x790] sm:$0xff] }
  0xd4   :  { %4038 = vmatpush.bf16.msra.mxu2 %v6457_v31 }
  0xd5   :  { %4051 = vmatpush.bf16.msra.mxu3 %v6465_v33  ;;  %v6471_v33 = vld [vmem:[%s8146_s1 + $0x708] sm:$0xff] }
  0xd6   :  { %4013 = vmatpush.bf16.msra.mxu0 %v6440_v35  ;;  %v6487_v35 = vld [vmem:[%s8146_s1 + $0x788] sm:$0xff] }
  0xd7   :  { %4026 = vmatpush.bf16.msra.mxu1 %v6448_v36  ;;  %v34_v36 = vld [vmem:[%s8147_s0 + $0x70] sm:$0xff] }
  0xd8   :  { %4039 = vmatpush.bf16.msra.mxu2 %v6456_v37  ;;  %v35_v37 = vld [vmem:[%s8147_s0 + $0x78] sm:$0xff]  ;;  %v970_v41 = vunpack.c.l.b16 %v34_v36  ;;  %v971_v46 = vunpack.c.h.b16 %v34_v36 }
  0xd9   :  { %4052 = vmatpush.bf16.msra.mxu3 %v6464_v42  ;;  %v972_v42 = vunpack.c.l.b16 %v35_v37 }
  0xda   :  { %4014 = vmatpush.bf16.msra.mxu0 %v6439_v43  ;;  %v1024_v52 = vpack.c.b16 %v970_v41, %v970_v41  ;;  %v1025_v55 = vpack.c.b16 %v971_v46, %v971_v46  ;;  %v6526_v41 = vld [vmem:[%s8146_s1 + $0x8c0] sm:$0xff] }
  0xdb   :  { %4027 = vmatpush.bf16.msra.mxu1 %v6447_v44  ;;  %v6478_v44 = vld [vmem:[%s8146_s1 + $0x740] sm:$0xff] }
  0xdc   :  { %4040 = vmatpush.bf16.msra.mxu2 %v6455_v45  ;;  %v6486_v45 = vld [vmem:[%s8146_s1 + $0x780] sm:$0xff] }
  0xdd   :  { %4053 = vmatpush.bf16.msra.mxu3 %v6463_v49  ;;  %v973_v49 = vunpack.c.h.b16 %v35_v37  ;;  %v6541_v37 = vld [vmem:[%s8146_s1 + $0x938] sm:$0xff] }
  0xde   :  { %4015 = vmatpush.bf16.msra.mxu0 %v6438_v50  ;;  %v3809_v11 = vpop.f32.mrf.mxu0  ;;  %v6525_v50 = vld [vmem:[%s8146_s1 + $0x8b8] sm:$0xff] }
  0xdf   :  { %4028 = vmatpush.bf16.msra.mxu1 %v6446_v53  ;;  %v3810_v12 = vadd.f32 %v3809_v11, %v3797_v40  ;;  %v3822_v16 = vpop.f32.mrf.mxu1  ;;  %v6470_v40 = vld [vmem:[%s8146_s1 + $0x700] sm:$0xff]  ;;  %v1026_v53 = vpack.c.b16 %v972_v42, %v972_v42  ;;  %v1027_v56 = vpack.c.b16 %v973_v49, %v973_v49  ;;  %v6521_v11 = vld [vmem:[%s8146_s1 + $0x898] sm:$0xff]  ;;  %v6556_v49 = vld [vmem:[%s8146_s1 + $0x9b0] sm:$0xff] }
  0xe0   :  { %4041 = vmatpush.bf16.msra.mxu2 %v6454_v54  ;;  %v6533_v54 = vld [vmem:[%s8146_s1 + $0x8f8] sm:$0xff] }
  0xe1   :  { %4054 = vmatpush.bf16.msra.mxu3 %v6462_v61  ;;  %4016 = vmatmul.bf16.vlgmr.msra.gmra.mxu0 %v1020_v62  ;;  %v3823_v17 = vadd.f32 %v3822_v16, %v3810_v12  ;;  %v6507_v61 = vld [vmem:[%s8146_s1 + $0x828] sm:$0xff] }
  0xe2   :  { %4060 = vmatpush.bf16.msrb.mxu0 %v6477_v57  ;;  %4029 = vmatmul.bf16.vlgmr.msra.gmra.mxu1 %v1021_v1  ;;  %v6508_v57 = vld [vmem:[%s8146_s1 + $0x830] sm:$0xff]  ;;  %v6515_v62 = vld [vmem:[%s8146_s1 + $0x868] sm:$0xff] }
  0xe3   :  { %4073 = vmatpush.bf16.msrb.mxu1 %v6485_v58  ;;  %4042 = vmatmul.bf16.vlgmr.msra.gmra.mxu2 %v1022_v63  ;;  %v6516_v58 = vld [vmem:[%s8146_s1 + $0x870] sm:$0xff]  ;;  %v6523_v63 = vld [vmem:[%s8146_s1 + $0x8a8] sm:$0xff] }
  0xe4   :  { %4086 = vmatpush.bf16.msrb.mxu2 %v6493_v60  ;;  %4055 = vmatmul.bf16.vlgmr.msra.gmra.mxu3 %v1023_v2  ;;  %v6532_v60 = vld [vmem:[%s8146_s1 + $0x8f0] sm:$0xff] }
  0xe5   :  { %4099 = vmatpush.bf16.msrb.mxu3 %v6501_v0  ;;  %v6531_v0 = vld [vmem:[%s8146_s1 + $0x8e8] sm:$0xff] }
  0xe6   :  { %4061 = vmatpush.bf16.msrb.mxu0 %v6476_v3  ;;  %v3835_v22 = vpop.f32.mrf.mxu2  ;;  %v3811_v25 = vpop.f32.mrf.mxu0  ;;  %v6506_v3 = vld [vmem:[%s8146_s1 + $0x820] sm:$0xff] }
  0xe7   :  { %4074 = vmatpush.bf16.msrb.mxu1 %v6484_v4  ;;  %v3836_v23 = vadd.f32 %v3835_v22, %v3823_v17  ;;  %v3848_v26 = vpop.f32.mrf.mxu3  ;;  %v3824_v31 = vpop.f32.mrf.mxu1  ;;  %v6504_v17 = vld [vmem:[%s8146_s1 + $0x810] sm:$0xff]  ;;  %v6519_v25 = vld [vmem:[%s8146_s1 + $0x888] sm:$0xff] }
  0xe8   :  { %4087 = vmatpush.bf16.msrb.mxu2 %v6492_v5  ;;  %v6514_v5 = vld [vmem:[%s8146_s1 + $0x860] sm:$0xff]  ;;  %v6528_v22 = vld [vmem:[%s8146_s1 + $0x8d0] sm:$0xff] }
  0xe9   :  { %4100 = vmatpush.bf16.msrb.mxu3 %v6500_v6  ;;  %v7501_v28 = vadd.f32 %v3848_v26, %v3836_v23  ;;  %v6522_v6 = vld [vmem:[%s8146_s1 + $0x8a0] sm:$0xff]  ;;  %v6503_v23 = vld [vmem:[%s8146_s1 + $0x808] sm:$0xff] }
  0xea   :  { %4062 = vmatpush.bf16.msrb.mxu0 %v6475_v7  ;;  %v36_v26 = vld [vmem:[%s8147_s0 + $0x80] sm:$0xff] }
  0xeb   :  { %4075 = vmatpush.bf16.msrb.mxu1 %v6483_v8  ;;  %v6530_v8 = vld [vmem:[%s8146_s1 + $0x8e0] sm:$0xff]  ;;  %v975_v36 = vunpack.c.h.b16 %v36_v26 }
  0xec   :  { %4088 = vmatpush.bf16.msrb.mxu2 %v6491_v9  ;;  %v6505_v9 = vld [vmem:[%s8146_s1 + $0x818] sm:$0xff]  ;;  %v6502_v31 = vld [vmem:[%s8146_s1 + $0x800] sm:$0xff] }
  0xed   :  { %4101 = vmatpush.bf16.msrb.mxu3 %v6499_v10  ;;  %v6513_v10 = vld [vmem:[%s8146_s1 + $0x858] sm:$0xff] }
  0xee   :  { %4063 = vmatpush.bf16.msrb.mxu0 %v6474_v13  ;;  %v3837_v38 = vpop.f32.mrf.mxu2 }
  0xef   :  { %4076 = vmatpush.bf16.msrb.mxu1 %v6482_v14  ;;  %v3850_v43 = vpop.f32.mrf.mxu3  ;;  %v6529_v14 = vld [vmem:[%s8146_s1 + $0x8d8] sm:$0xff] }
  0xf0   :  { %4089 = vmatpush.bf16.msrb.mxu2 %v6490_v15  ;;  %v6549_v38 = vld [vmem:[%s8146_s1 + $0x978] sm:$0xff] }
  0xf1   :  { %4102 = vmatpush.bf16.msrb.mxu3 %v6498_v18 }
  0xf2   :  { %4064 = vmatpush.bf16.msrb.mxu0 %v6473_v19 }
  0xf3   :  { %4077 = vmatpush.bf16.msrb.mxu1 %v6481_v20  ;;  %v6512_v20 = vld [vmem:[%s8146_s1 + $0x850] sm:$0xff] }
  0xf4   :  { %4090 = vmatpush.bf16.msrb.mxu2 %v6489_v21  ;;  %v6520_v21 = vld [vmem:[%s8146_s1 + $0x890] sm:$0xff] }
  0xf5   :  { %4103 = vmatpush.bf16.msrb.mxu3 %v6497_v24  ;;  %v6511_v24 = vld [vmem:[%s8146_s1 + $0x848] sm:$0xff] }
  0xf6   :  { %4065 = vmatpush.bf16.msrb.mxu0 %v6472_v27  ;;  %v37_v27 = vld [vmem:[%s8147_s0 + $0x88] sm:$0xff] }
  0xf7   :  { %4078 = vmatpush.bf16.msrb.mxu1 %v6480_v29  ;;  %v6527_v29 = vld [vmem:[%s8146_s1 + $0x8c8] sm:$0xff] }
  0xf8   :  { %4091 = vmatpush.bf16.msrb.mxu2 %v6488_v30 }
  0xf9   :  { %4104 = vmatpush.bf16.msrb.mxu3 %v6496_v32  ;;  %v974_v32 = vunpack.c.l.b16 %v36_v26 }
  0xfa   :  { %4066 = vmatpush.bf16.msrb.mxu0 %v6471_v33  ;;  %v976_v33 = vunpack.c.l.b16 %v37_v27 }
  0xfb   :  { %4079 = vmatpush.bf16.msrb.mxu1 %v6479_v34  ;;  %v6510_v34 = vld [vmem:[%s8146_s1 + $0x840] sm:$0xff]  ;;  %v1028_v42 = vpack.c.b16 %v974_v32, %v974_v32 }
  0xfc   :  { %4092 = vmatpush.bf16.msrb.mxu2 %v6487_v35  ;;  %v6518_v35 = vld [vmem:[%s8146_s1 + $0x880] sm:$0xff]  ;;  %v1030_v43 = vpack.c.b16 %v976_v33, %v976_v33 }
  0xfd   :  { %4105 = vmatpush.bf16.msrb.mxu3 %v6495_v39  ;;  %v977_v39 = vunpack.c.h.b16 %v37_v27  ;;  %v6573_v27 = vld [vmem:[%s8146_s1 + $0xa38] sm:$0xff] }
  0xfe   :  { %4067 = vmatpush.bf16.msrb.mxu0 %v6470_v40  ;;  %v3861_v1 = vpop.f32.mrf.mxu0  ;;  %v6557_v40 = vld [vmem:[%s8146_s1 + $0x9b8] sm:$0xff] }
  0xff   :  { %4080 = vmatpush.bf16.msrb.mxu1 %v6478_v44  ;;  %v3862_v2 = vadd.f32 %v3861_v1, %v7501_v28  ;;  %v3874_v4 = vpop.f32.mrf.mxu1  ;;  %v6565_v44 = vld [vmem:[%s8146_s1 + $0x9f8] sm:$0xff]  ;;  %v1031_v46 = vpack.c.b16 %v977_v39, %v977_v39  ;;  %v6588_v39 = vld [vmem:[%s8146_s1 + $0xab0] sm:$0xff] }
 0x100   :  { %4093 = vmatpush.bf16.msrb.mxu2 %v6486_v45  ;;  %v1029_v45 = vpack.c.b16 %v975_v36, %v975_v36  ;;  %v6553_v1 = vld [vmem:[%s8146_s1 + $0x998] sm:$0xff] }
 0x101   :  { %4106 = vmatpush.bf16.msrb.mxu3 %v6494_v51  ;;  %4068 = vmatmul.bf16.vlgmr.msrb.gmra.mxu0 %v1024_v52  ;;  %v3875_v7 = vadd.f32 %v3874_v4, %v3862_v2  ;;  %v6539_v51 = vld [vmem:[%s8146_s1 + $0x928] sm:$0xff]  ;;  %v6561_v4 = vld [vmem:[%s8146_s1 + $0x9d8] sm:$0xff] }
 0x102   :  { %4112 = vmatpush.bf16.msra.mxu0 %v6509_v47  ;;  %4081 = vmatmul.bf16.vlgmr.msrb.gmra.mxu1 %v1025_v55  ;;  %v6540_v47 = vld [vmem:[%s8146_s1 + $0x930] sm:$0xff]  ;;  %v6547_v52 = vld [vmem:[%s8146_s1 + $0x968] sm:$0xff] }
 0x103   :  { %4125 = vmatpush.bf16.msra.mxu1 %v6517_v48  ;;  %4094 = vmatmul.bf16.vlgmr.msrb.gmra.mxu2 %v1026_v53  ;;  %v6548_v48 = vld [vmem:[%s8146_s1 + $0x970] sm:$0xff]  ;;  %v6555_v53 = vld [vmem:[%s8146_s1 + $0x9a8] sm:$0xff] }
 0x104   :  { %4138 = vmatpush.bf16.msra.mxu2 %v6525_v50  ;;  %4107 = vmatmul.bf16.vlgmr.msrb.gmra.mxu3 %v1027_v56  ;;  %v6564_v50 = vld [vmem:[%s8146_s1 + $0x9f0] sm:$0xff] }
 0x105   :  { %4151 = vmatpush.bf16.msra.mxu3 %v6533_v54  ;;  %v6563_v54 = vld [vmem:[%s8146_s1 + $0x9e8] sm:$0xff] }
 0x106   :  { %4113 = vmatpush.bf16.msra.mxu0 %v6508_v57  ;;  %v3887_v12 = vpop.f32.mrf.mxu2  ;;  %v3863_v16 = vpop.f32.mrf.mxu0  ;;  %v6538_v57 = vld [vmem:[%s8146_s1 + $0x920] sm:$0xff] }
 0x107   :  { %4126 = vmatpush.bf16.msra.mxu1 %v6516_v58  ;;  %v3888_v13 = vadd.f32 %v3887_v12, %v3875_v7  ;;  %v3900_v15 = vpop.f32.mrf.mxu3  ;;  %v3876_v18 = vpop.f32.mrf.mxu1  ;;  %v6560_v12 = vld [vmem:[%s8146_s1 + $0x9d0] sm:$0xff] }
 0x108   :  { %4139 = vmatpush.bf16.msra.mxu2 %v6524_v59  ;;  %v6546_v59 = vld [vmem:[%s8146_s1 + $0x960] sm:$0xff]  ;;  %v38_v16 = vld [vmem:[%s8147_s0 + $0x90] sm:$0xff] }
 0x109   :  { %4152 = vmatpush.bf16.msra.mxu3 %v6532_v60  ;;  %v7606_v19 = vadd.f32 %v3900_v15, %v3888_v13  ;;  %v6554_v60 = vld [vmem:[%s8146_s1 + $0x9a0] sm:$0xff]  ;;  %v6535_v13 = vld [vmem:[%s8146_s1 + $0x908] sm:$0xff]  ;;  %v979_v26 = vunpack.c.h.b16 %v38_v16 }
 0x10a   :  { %4114 = vmatpush.bf16.msra.mxu0 %v6507_v61  ;;  %v6551_v15 = vld [vmem:[%s8146_s1 + $0x988] sm:$0xff] }
 0x10b   :  { %4127 = vmatpush.bf16.msra.mxu1 %v6515_v62  ;;  %v6562_v62 = vld [vmem:[%s8146_s1 + $0x9e0] sm:$0xff] }
 0x10c   :  { %4140 = vmatpush.bf16.msra.mxu2 %v6523_v63  ;;  %v6537_v63 = vld [vmem:[%s8146_s1 + $0x918] sm:$0xff] }
 0x10d   :  { %4153 = vmatpush.bf16.msra.mxu3 %v6531_v0  ;;  %v6545_v0 = vld [vmem:[%s8146_s1 + $0x958] sm:$0xff] }
 0x10e   :  { %4115 = vmatpush.bf16.msra.mxu0 %v6506_v3  ;;  %v3889_v28 = vpop.f32.mrf.mxu2 }
 0x10f   :  { %4128 = vmatpush.bf16.msra.mxu1 %v6514_v5  ;;  %v3902_v30 = vpop.f32.mrf.mxu3  ;;  %v6581_v28 = vld [vmem:[%s8146_s1 + $0xa78] sm:$0xff] }
 0x110   :  { %4141 = vmatpush.bf16.msra.mxu2 %v6522_v6  ;;  %v6589_v30 = vld [vmem:[%s8146_s1 + $0xab8] sm:$0xff] }
 0x111   :  { %4154 = vmatpush.bf16.msra.mxu3 %v6530_v8  ;;  %v6536_v8 = vld [vmem:[%s8146_s1 + $0x910] sm:$0xff] }
 0x112   :  { %4116 = vmatpush.bf16.msra.mxu0 %v6505_v9 }
 0x113   :  { %4129 = vmatpush.bf16.msra.mxu1 %v6513_v10  ;;  %v6544_v10 = vld [vmem:[%s8146_s1 + $0x950] sm:$0xff] }
 0x114   :  { %4142 = vmatpush.bf16.msra.mxu2 %v6521_v11  ;;  %v6552_v11 = vld [vmem:[%s8146_s1 + $0x990] sm:$0xff] }
 0x115   :  { %4155 = vmatpush.bf16.msra.mxu3 %v6529_v14  ;;  %v6543_v14 = vld [vmem:[%s8146_s1 + $0x948] sm:$0xff] }
 0x116   :  { %4117 = vmatpush.bf16.msra.mxu0 %v6504_v17  ;;  %v39_v17 = vld [vmem:[%s8147_s0 + $0x98] sm:$0xff] }
 0x117   :  { %4130 = vmatpush.bf16.msra.mxu1 %v6512_v20 }
 0x118   :  { %4143 = vmatpush.bf16.msra.mxu2 %v6520_v21  ;;  %v6534_v21 = vld [vmem:[%s8146_s1 + $0x900] sm:$0xff] }
 0x119   :  { %4156 = vmatpush.bf16.msra.mxu3 %v6528_v22  ;;  %v978_v22 = vunpack.c.l.b16 %v38_v16 }
 0x11a   :  { %4118 = vmatpush.bf16.msra.mxu0 %v6503_v23  ;;  %v980_v23 = vunpack.c.l.b16 %v39_v17 }
 0x11b   :  { %4131 = vmatpush.bf16.msra.mxu1 %v6511_v24  ;;  %v6542_v24 = vld [vmem:[%s8146_s1 + $0x940] sm:$0xff]  ;;  %v1032_v32 = vpack.c.b16 %v978_v22, %v978_v22 }
 0x11c   :  { %4144 = vmatpush.bf16.msra.mxu2 %v6519_v25  ;;  %v6550_v25 = vld [vmem:[%s8146_s1 + $0x980] sm:$0xff]  ;;  %v1034_v33 = vpack.c.b16 %v980_v23, %v980_v23 }
 0x11d   :  { %4157 = vmatpush.bf16.msra.mxu3 %v6527_v29  ;;  %v981_v29 = vunpack.c.h.b16 %v39_v17  ;;  %v6605_v17 = vld [vmem:[%s8146_s1 + $0xb38] sm:$0xff] }
 0x11e   :  { %4119 = vmatpush.bf16.msra.mxu0 %v6502_v31  ;;  %v3913_v55 = vpop.f32.mrf.mxu0  ;;  %v6558_v31 = vld [vmem:[%s8146_s1 + $0x9c0] sm:$0xff] }
 0x11f   :  { %4132 = vmatpush.bf16.msra.mxu1 %v6510_v34  ;;  %v3914_v56 = vadd.f32 %v3913_v55, %v7606_v19  ;;  %v3926_v58 = vpop.f32.mrf.mxu1  ;;  %v6559_v19 = vld [vmem:[%s8146_s1 + $0x9c8] sm:$0xff]  ;;  %v6597_v34 = vld [vmem:[%s8146_s1 + $0xaf8] sm:$0xff]  ;;  %v1035_v36 = vpack.c.b16 %v981_v29, %v981_v29  ;;  %v6620_v29 = vld [vmem:[%s8146_s1 + $0xbb0] sm:$0xff] }
 0x120   :  { %4145 = vmatpush.bf16.msra.mxu2 %v6518_v35  ;;  %v1033_v35 = vpack.c.b16 %v979_v26, %v979_v26  ;;  %v6585_v55 = vld [vmem:[%s8146_s1 + $0xa98] sm:$0xff] }
 0x121   :  { %4158 = vmatpush.bf16.msra.mxu3 %v6526_v41  ;;  %4120 = vmatmul.bf16.vlgmr.msra.gmra.mxu0 %v1028_v42  ;;  %v3927_v61 = vadd.f32 %v3926_v58, %v3914_v56  ;;  %v6571_v41 = vld [vmem:[%s8146_s1 + $0xa28] sm:$0xff]  ;;  %v6593_v58 = vld [vmem:[%s8146_s1 + $0xad8] sm:$0xff] }
 0x122   :  { %4164 = vmatpush.bf16.msrb.mxu0 %v6541_v37  ;;  %4133 = vmatmul.bf16.vlgmr.msra.gmra.mxu1 %v1029_v45  ;;  %v6572_v37 = vld [vmem:[%s8146_s1 + $0xa30] sm:$0xff]  ;;  %v6579_v42 = vld [vmem:[%s8146_s1 + $0xa68] sm:$0xff] }
 0x123   :  { %4177 = vmatpush.bf16.msrb.mxu1 %v6549_v38  ;;  %4146 = vmatmul.bf16.vlgmr.msra.gmra.mxu2 %v1030_v43  ;;  %v6580_v38 = vld [vmem:[%s8146_s1 + $0xa70] sm:$0xff]  ;;  %v6587_v43 = vld [vmem:[%s8146_s1 + $0xaa8] sm:$0xff] }
 0x124   :  { %4190 = vmatpush.bf16.msrb.mxu2 %v6557_v40  ;;  %4159 = vmatmul.bf16.vlgmr.msra.gmra.mxu3 %v1031_v46  ;;  %v6596_v40 = vld [vmem:[%s8146_s1 + $0xaf0] sm:$0xff] }
 0x125   :  { %4203 = vmatpush.bf16.msrb.mxu3 %v6565_v44  ;;  %v6595_v44 = vld [vmem:[%s8146_s1 + $0xae8] sm:$0xff] }
 0x126   :  { %4165 = vmatpush.bf16.msrb.mxu0 %v6540_v47  ;;  %v3939_v2 = vpop.f32.mrf.mxu2  ;;  %v3915_v6 = vpop.f32.mrf.mxu0  ;;  %v6570_v47 = vld [vmem:[%s8146_s1 + $0xa20] sm:$0xff] }
 0x127   :  { %4178 = vmatpush.bf16.msrb.mxu1 %v6548_v48  ;;  %v3940_v3 = vadd.f32 %v3939_v2, %v3927_v61  ;;  %v3952_v5 = vpop.f32.mrf.mxu3  ;;  %v3928_v9 = vpop.f32.mrf.mxu1  ;;  %v6592_v2 = vld [vmem:[%s8146_s1 + $0xad0] sm:$0xff]  ;;  %v40_v6 = vld [vmem:[%s8147_s0 + $0xa0] sm:$0xff] }
 0x128   :  { %4191 = vmatpush.bf16.msrb.mxu2 %v6556_v49  ;;  %v6578_v49 = vld [vmem:[%s8146_s1 + $0xa60] sm:$0xff]  ;;  %v6591_v9 = vld [vmem:[%s8146_s1 + $0xac8] sm:$0xff]  ;;  %v983_v16 = vunpack.c.h.b16 %v40_v6 }
 0x129   :  { %4204 = vmatpush.bf16.msrb.mxu3 %v6564_v50  ;;  %v7708_v7 = vadd.f32 %v3952_v5, %v3940_v3  ;;  %v6586_v50 = vld [vmem:[%s8146_s1 + $0xaa0] sm:$0xff]  ;;  %v6567_v3 = vld [vmem:[%s8146_s1 + $0xa08] sm:$0xff] }
 0x12a   :  { %4166 = vmatpush.bf16.msrb.mxu0 %v6539_v51  ;;  %v6583_v5 = vld [vmem:[%s8146_s1 + $0xa88] sm:$0xff] }
 0x12b   :  { %4179 = vmatpush.bf16.msrb.mxu1 %v6547_v52  ;;  %v6594_v52 = vld [vmem:[%s8146_s1 + $0xae0] sm:$0xff] }
 0x12c   :  { %4192 = vmatpush.bf16.msrb.mxu2 %v6555_v53  ;;  %v6569_v53 = vld [vmem:[%s8146_s1 + $0xa18] sm:$0xff] }
 0x12d   :  { %4205 = vmatpush.bf16.msrb.mxu3 %v6563_v54  ;;  %v6577_v54 = vld [vmem:[%s8146_s1 + $0xa58] sm:$0xff] }
 0x12e   :  { %4167 = vmatpush.bf16.msrb.mxu0 %v6538_v57  ;;  %v3941_v18 = vpop.f32.mrf.mxu2 }
 0x12f   :  { %4180 = vmatpush.bf16.msrb.mxu1 %v6546_v59  ;;  %v3954_v20 = vpop.f32.mrf.mxu3  ;;  %v6613_v18 = vld [vmem:[%s8146_s1 + $0xb78] sm:$0xff] }
 0x130   :  { %4193 = vmatpush.bf16.msrb.mxu2 %v6554_v60  ;;  %v6621_v20 = vld [vmem:[%s8146_s1 + $0xbb8] sm:$0xff] }
 0x131   :  { %4206 = vmatpush.bf16.msrb.mxu3 %v6562_v62  ;;  %v6568_v62 = vld [vmem:[%s8146_s1 + $0xa10] sm:$0xff] }
 0x132   :  { %4168 = vmatpush.bf16.msrb.mxu0 %v6537_v63 }
 0x133   :  { %4181 = vmatpush.bf16.msrb.mxu1 %v6545_v0  ;;  %v6576_v0 = vld [vmem:[%s8146_s1 + $0xa50] sm:$0xff] }
 0x134   :  { %4194 = vmatpush.bf16.msrb.mxu2 %v6553_v1  ;;  %v6584_v1 = vld [vmem:[%s8146_s1 + $0xa90] sm:$0xff] }
 0x135   :  { %4207 = vmatpush.bf16.msrb.mxu3 %v6561_v4  ;;  %v6575_v4 = vld [vmem:[%s8146_s1 + $0xa48] sm:$0xff] }
 0x136   :  { %4169 = vmatpush.bf16.msrb.mxu0 %v6536_v8 }
 0x137   :  { %4182 = vmatpush.bf16.msrb.mxu1 %v6544_v10 }
 0x138   :  { %4195 = vmatpush.bf16.msrb.mxu2 %v6552_v11  ;;  %v6566_v11 = vld [vmem:[%s8146_s1 + $0xa00] sm:$0xff] }
 0x139   :  { %4208 = vmatpush.bf16.msrb.mxu3 %v6560_v12  ;;  %v982_v12 = vunpack.c.l.b16 %v40_v6 }
 0x13a   :  { %4170 = vmatpush.bf16.msrb.mxu0 %v6535_v13 }
 0x13b   :  { %4183 = vmatpush.bf16.msrb.mxu1 %v6543_v14  ;;  %v6574_v14 = vld [vmem:[%s8146_s1 + $0xa40] sm:$0xff]  ;;  %v1036_v22 = vpack.c.b16 %v982_v12, %v982_v12 }
 0x13c   :  { %4196 = vmatpush.bf16.msrb.mxu2 %v6551_v15  ;;  %v6582_v15 = vld [vmem:[%s8146_s1 + $0xa80] sm:$0xff] }
 0x13d   :  { %4209 = vmatpush.bf16.msrb.mxu3 %v6559_v19 }
 0x13e   :  { %4171 = vmatpush.bf16.msrb.mxu0 %v6534_v21  ;;  %v3965_v45 = vpop.f32.mrf.mxu0  ;;  %v6590_v21 = vld [vmem:[%s8146_s1 + $0xac0] sm:$0xff] }
 0x13f   :  { %4184 = vmatpush.bf16.msrb.mxu1 %v6542_v24  ;;  %v3966_v46 = vadd.f32 %v3965_v45, %v7708_v7  ;;  %v3978_v48 = vpop.f32.mrf.mxu1  ;;  %v41_v7 = vld [vmem:[%s8147_s0 + $0xa8] sm:$0xff]  ;;  %v6629_v24 = vld [vmem:[%s8146_s1 + $0xbf8] sm:$0xff] }
 0x140   :  { %4197 = vmatpush.bf16.msrb.mxu2 %v6550_v25  ;;  %v984_v13 = vunpack.c.l.b16 %v41_v7  ;;  %v985_v19 = vunpack.c.h.b16 %v41_v7  ;;  %v1037_v25 = vpack.c.b16 %v983_v16, %v983_v16  ;;  %v6617_v45 = vld [vmem:[%s8146_s1 + $0xb98] sm:$0xff] }
 0x141   :  { %4210 = vmatpush.bf16.msrb.mxu3 %v6558_v31  ;;  %4172 = vmatmul.bf16.vlgmr.msrb.gmra.mxu0 %v1032_v32  ;;  %v3979_v51 = vadd.f32 %v3978_v48, %v3966_v46  ;;  %v6603_v31 = vld [vmem:[%s8146_s1 + $0xb28] sm:$0xff]  ;;  %v6625_v48 = vld [vmem:[%s8146_s1 + $0xbd8] sm:$0xff] }
 0x142   :  { %4216 = vmatpush.bf16.msra.mxu0 %v6573_v27  ;;  %4185 = vmatmul.bf16.vlgmr.msrb.gmra.mxu1 %v1033_v35  ;;  %v1038_v23 = vpack.c.b16 %v984_v13, %v984_v13  ;;  %v1039_v26 = vpack.c.b16 %v985_v19, %v985_v19  ;;  %v6604_v27 = vld [vmem:[%s8146_s1 + $0xb30] sm:$0xff]  ;;  %v6611_v32 = vld [vmem:[%s8146_s1 + $0xb68] sm:$0xff]  ;;  %v6637_v7 = vld [vmem:[%s8146_s1 + $0xc38] sm:$0xff] }
 0x143   :  { %4229 = vmatpush.bf16.msra.mxu1 %v6581_v28  ;;  %4198 = vmatmul.bf16.vlgmr.msrb.gmra.mxu2 %v1034_v33  ;;  %v6612_v28 = vld [vmem:[%s8146_s1 + $0xb70] sm:$0xff]  ;;  %v6619_v33 = vld [vmem:[%s8146_s1 + $0xba8] sm:$0xff] }
 0x144   :  { %4242 = vmatpush.bf16.msra.mxu2 %v6589_v30  ;;  %4211 = vmatmul.bf16.vlgmr.msrb.gmra.mxu3 %v1035_v36  ;;  %v6628_v30 = vld [vmem:[%s8146_s1 + $0xbf0] sm:$0xff] }
 0x145   :  { %4255 = vmatpush.bf16.msra.mxu3 %v6597_v34  ;;  %v6627_v34 = vld [vmem:[%s8146_s1 + $0xbe8] sm:$0xff]  ;;  %v6652_v19 = vld [vmem:[%s8146_s1 + $0xcb0] sm:$0xff] }
 0x146   :  { %4217 = vmatpush.bf16.msra.mxu0 %v6572_v37  ;;  %v3991_v56 = vpop.f32.mrf.mxu2  ;;  %v3967_v60 = vpop.f32.mrf.mxu0  ;;  %v6602_v37 = vld [vmem:[%s8146_s1 + $0xb20] sm:$0xff] }
 0x147   :  { %4230 = vmatpush.bf16.msra.mxu1 %v6580_v38  ;;  %v3992_v57 = vadd.f32 %v3991_v56, %v3979_v51  ;;  %v4004_v59 = vpop.f32.mrf.mxu3  ;;  %v3980_v63 = vpop.f32.mrf.mxu1  ;;  %v6624_v56 = vld [vmem:[%s8146_s1 + $0xbd0] sm:$0xff] }
 0x148   :  { %4243 = vmatpush.bf16.msra.mxu2 %v6588_v39  ;;  %v6610_v39 = vld [vmem:[%s8146_s1 + $0xb60] sm:$0xff]  ;;  %v42_v60 = vld [vmem:[%s8147_s0 + $0xb0] sm:$0xff]  ;;  %v6623_v63 = vld [vmem:[%s8146_s1 + $0xbc8] sm:$0xff] }
 0x149   :  { %4256 = vmatpush.bf16.msra.mxu3 %v6596_v40  ;;  %v7813_v61 = vadd.f32 %v4004_v59, %v3992_v57  ;;  %v6618_v40 = vld [vmem:[%s8146_s1 + $0xba0] sm:$0xff]  ;;  %v6599_v57 = vld [vmem:[%s8146_s1 + $0xb08] sm:$0xff]  ;;  %v987_v6 = vunpack.c.h.b16 %v42_v60 }
 0x14a   :  { %4218 = vmatpush.bf16.msra.mxu0 %v6571_v41  ;;  %v6615_v59 = vld [vmem:[%s8146_s1 + $0xb88] sm:$0xff] }
 0x14b   :  { %4231 = vmatpush.bf16.msra.mxu1 %v6579_v42  ;;  %v6626_v42 = vld [vmem:[%s8146_s1 + $0xbe0] sm:$0xff] }
 0x14c   :  { %4244 = vmatpush.bf16.msra.mxu2 %v6587_v43  ;;  %v6601_v43 = vld [vmem:[%s8146_s1 + $0xb18] sm:$0xff] }
 0x14d   :  { %4257 = vmatpush.bf16.msra.mxu3 %v6595_v44  ;;  %v6609_v44 = vld [vmem:[%s8146_s1 + $0xb58] sm:$0xff] }
 0x14e   :  { %4219 = vmatpush.bf16.msra.mxu0 %v6570_v47  ;;  %v3993_v8 = vpop.f32.mrf.mxu2 }
 0x14f   :  { %4232 = vmatpush.bf16.msra.mxu1 %v6578_v49  ;;  %v4006_v10 = vpop.f32.mrf.mxu3  ;;  %v6645_v8 = vld [vmem:[%s8146_s1 + $0xc78] sm:$0xff] }
 0x150   :  { %4245 = vmatpush.bf16.msra.mxu2 %v6586_v50  ;;  %v6653_v10 = vld [vmem:[%s8146_s1 + $0xcb8] sm:$0xff] }
 0x151   :  { %4258 = vmatpush.bf16.msra.mxu3 %v6594_v52  ;;  %v6600_v52 = vld [vmem:[%s8146_s1 + $0xb10] sm:$0xff] }
 0x152   :  { %4220 = vmatpush.bf16.msra.mxu0 %v6569_v53 }
 0x153   :  { %4233 = vmatpush.bf16.msra.mxu1 %v6577_v54  ;;  %v6608_v54 = vld [vmem:[%s8146_s1 + $0xb50] sm:$0xff] }
 0x154   :  { %4246 = vmatpush.bf16.msra.mxu2 %v6585_v55  ;;  %v6616_v55 = vld [vmem:[%s8146_s1 + $0xb90] sm:$0xff] }
 0x155   :  { %4259 = vmatpush.bf16.msra.mxu3 %v6593_v58  ;;  %v6607_v58 = vld [vmem:[%s8146_s1 + $0xb48] sm:$0xff] }
 0x156   :  { %4221 = vmatpush.bf16.msra.mxu0 %v6568_v62 }
 0x157   :  { %4234 = vmatpush.bf16.msra.mxu1 %v6576_v0 }
 0x158   :  { %4247 = vmatpush.bf16.msra.mxu2 %v6584_v1  ;;  %v6598_v1 = vld [vmem:[%s8146_s1 + $0xb00] sm:$0xff] }
 0x159   :  { %4260 = vmatpush.bf16.msra.mxu3 %v6592_v2  ;;  %v986_v2 = vunpack.c.l.b16 %v42_v60  ;;  %v6646_v60 = vld [vmem:[%s8146_s1 + $0xc80] sm:$0xff] }
 0x15a   :  { %4222 = vmatpush.bf16.msra.mxu0 %v6567_v3 }
 0x15b   :  { %4235 = vmatpush.bf16.msra.mxu1 %v6575_v4  ;;  %v6606_v4 = vld [vmem:[%s8146_s1 + $0xb40] sm:$0xff]  ;;  %v1040_v12 = vpack.c.b16 %v986_v2, %v986_v2 }
 0x15c   :  { %4248 = vmatpush.bf16.msra.mxu2 %v6583_v5  ;;  %v6614_v5 = vld [vmem:[%s8146_s1 + $0xb80] sm:$0xff] }
 0x15d   :  { %4261 = vmatpush.bf16.msra.mxu3 %v6591_v9 }
 0x15e   :  { %4223 = vmatpush.bf16.msra.mxu0 %v6566_v11  ;;  %v4017_v35 = vpop.f32.mrf.mxu0  ;;  %v6622_v11 = vld [vmem:[%s8146_s1 + $0xbc0] sm:$0xff] }
 0x15f   :  { %4236 = vmatpush.bf16.msra.mxu1 %v6574_v14  ;;  %v4018_v36 = vadd.f32 %v4017_v35, %v7813_v61  ;;  %v4030_v38 = vpop.f32.mrf.mxu1  ;;  %v43_v61 = vld [vmem:[%s8147_s0 + $0xb8] sm:$0xff] }
 0x160   :  { %4249 = vmatpush.bf16.msra.mxu2 %v6582_v15  ;;  %v988_v3 = vunpack.c.l.b16 %v43_v61  ;;  %v989_v9 = vunpack.c.h.b16 %v43_v61  ;;  %v6661_v14 = vld [vmem:[%s8146_s1 + $0xcf8] sm:$0xff]  ;;  %v1041_v15 = vpack.c.b16 %v987_v6, %v987_v6  ;;  %v6676_v6 = vld [vmem:[%s8146_s1 + $0xd70] sm:$0xff] }
 0x161   :  { %4262 = vmatpush.bf16.msra.mxu3 %v6590_v21  ;;  %4224 = vmatmul.bf16.vlgmr.msra.gmra.mxu0 %v1036_v22  ;;  %v4031_v41 = vadd.f32 %v4030_v38, %v4018_v36  ;;  %v6635_v21 = vld [vmem:[%s8146_s1 + $0xc28] sm:$0xff]  ;;  %v6649_v35 = vld [vmem:[%s8146_s1 + $0xc98] sm:$0xff] }
 0x162   :  { %4268 = vmatpush.bf16.msrb.mxu0 %v6605_v17  ;;  %4237 = vmatmul.bf16.vlgmr.msra.gmra.mxu1 %v1037_v25  ;;  %v1042_v13 = vpack.c.b16 %v988_v3, %v988_v3  ;;  %v1043_v16 = vpack.c.b16 %v989_v9, %v989_v9  ;;  %v6636_v17 = vld [vmem:[%s8146_s1 + $0xc30] sm:$0xff]  ;;  %v6643_v22 = vld [vmem:[%s8146_s1 + $0xc68] sm:$0xff]  ;;  %v6657_v38 = vld [vmem:[%s8146_s1 + $0xcd8] sm:$0xff] }
 0x163   :  { %4281 = vmatpush.bf16.msrb.mxu1 %v6613_v18  ;;  %4250 = vmatmul.bf16.vlgmr.msra.gmra.mxu2 %v1038_v23  ;;  %v6644_v18 = vld [vmem:[%s8146_s1 + $0xc70] sm:$0xff]  ;;  %v6651_v23 = vld [vmem:[%s8146_s1 + $0xca8] sm:$0xff]  ;;  %v6669_v61 = vld [vmem:[%s8146_s1 + $0xd38] sm:$0xff] }
 0x164   :  { %4294 = vmatpush.bf16.msrb.mxu2 %v6621_v20  ;;  %4263 = vmatmul.bf16.vlgmr.msra.gmra.mxu3 %v1039_v26  ;;  %v6660_v20 = vld [vmem:[%s8146_s1 + $0xcf0] sm:$0xff] }
 0x165   :  { %4307 = vmatpush.bf16.msrb.mxu3 %v6629_v24  ;;  %v6659_v24 = vld [vmem:[%s8146_s1 + $0xce8] sm:$0xff] }
 0x166   :  { %4269 = vmatpush.bf16.msrb.mxu0 %v6604_v27  ;;  %v4043_v46 = vpop.f32.mrf.mxu2  ;;  %v4019_v50 = vpop.f32.mrf.mxu0  ;;  %v6634_v27 = vld [vmem:[%s8146_s1 + $0xc20] sm:$0xff] }
 0x167   :  { %4282 = vmatpush.bf16.msrb.mxu1 %v6612_v28  ;;  %v4044_v47 = vadd.f32 %v4043_v46, %v4031_v41  ;;  %v4056_v49 = vpop.f32.mrf.mxu3  ;;  %v4032_v53 = vpop.f32.mrf.mxu1  ;;  %v6656_v46 = vld [vmem:[%s8146_s1 + $0xcd0] sm:$0xff]  ;;  %v6647_v50 = vld [vmem:[%s8146_s1 + $0xc88] sm:$0xff] }
 0x168   :  { %4295 = vmatpush.bf16.msrb.mxu2 %v6620_v29  ;;  %v6642_v29 = vld [vmem:[%s8146_s1 + $0xc60] sm:$0xff]  ;;  %v6655_v53 = vld [vmem:[%s8146_s1 + $0xcc8] sm:$0xff] }
 0x169   :  { %4308 = vmatpush.bf16.msrb.mxu3 %v6628_v30  ;;  %v7918_v51 = vadd.f32 %v4056_v49, %v4044_v47  ;;  %v6650_v30 = vld [vmem:[%s8146_s1 + $0xca0] sm:$0xff]  ;;  %v6631_v47 = vld [vmem:[%s8146_s1 + $0xc08] sm:$0xff] }
 0x16a   :  { %4270 = vmatpush.bf16.msrb.mxu0 %v6603_v31  ;;  %v6639_v49 = vld [vmem:[%s8146_s1 + $0xc48] sm:$0xff] }
 0x16b   :  { %4283 = vmatpush.bf16.msrb.mxu1 %v6611_v32  ;;  %v6658_v32 = vld [vmem:[%s8146_s1 + $0xce0] sm:$0xff] }
 0x16c   :  { %4296 = vmatpush.bf16.msrb.mxu2 %v6619_v33  ;;  %v6633_v33 = vld [vmem:[%s8146_s1 + $0xc18] sm:$0xff] }
 0x16d   :  { %4309 = vmatpush.bf16.msrb.mxu3 %v6627_v34  ;;  %v6641_v34 = vld [vmem:[%s8146_s1 + $0xc58] sm:$0xff] }
 0x16e   :  { %4271 = vmatpush.bf16.msrb.mxu0 %v6602_v37  ;;  %v4045_v62 = vpop.f32.mrf.mxu2 }
 0x16f   :  { %4284 = vmatpush.bf16.msrb.mxu1 %v6610_v39  ;;  %v4058_v0 = vpop.f32.mrf.mxu3  ;;  %v6677_v62 = vld [vmem:[%s8146_s1 + $0xd78] sm:$0xff] }
 0x170   :  { %4297 = vmatpush.bf16.msrb.mxu2 %v6618_v40  ;;  %v6654_v0 = vld [vmem:[%s8146_s1 + $0xcc0] sm:$0xff] }
 0x171   :  { %4310 = vmatpush.bf16.msrb.mxu3 %v6626_v42  ;;  %v6632_v42 = vld [vmem:[%s8146_s1 + $0xc10] sm:$0xff] }
 0x172   :  { %4272 = vmatpush.bf16.msrb.mxu0 %v6601_v43 }
 0x173   :  { %4285 = vmatpush.bf16.msrb.mxu1 %v6609_v44  ;;  %v6640_v44 = vld [vmem:[%s8146_s1 + $0xc50] sm:$0xff] }
 0x174   :  { %4298 = vmatpush.bf16.msrb.mxu2 %v6617_v45  ;;  %v6648_v45 = vld [vmem:[%s8146_s1 + $0xc90] sm:$0xff] }
 0x175   :  { %4311 = vmatpush.bf16.msrb.mxu3 %v6625_v48  ;;  %v44_v48 = vld [vmem:[%s8147_s0 + $0xc0] sm:$0xff] }
 0x176   :  { %4273 = vmatpush.bf16.msrb.mxu0 %v6600_v52 }
 0x177   :  { %4286 = vmatpush.bf16.msrb.mxu1 %v6608_v54  ;;  %v990_v54 = vunpack.c.l.b16 %v44_v48 }
 0x178   :  { %4299 = vmatpush.bf16.msrb.mxu2 %v6616_v55 }
 0x179   :  { %4312 = vmatpush.bf16.msrb.mxu3 %v6624_v56  ;;  %v6630_v56 = vld [vmem:[%s8146_s1 + $0xc00] sm:$0xff] }
 0x17a   :  { %4274 = vmatpush.bf16.msrb.mxu0 %v6599_v57 }
 0x17b   :  { %4287 = vmatpush.bf16.msrb.mxu1 %v6607_v58  ;;  %v991_v58 = vunpack.c.h.b16 %v44_v48 }
 0x17c   :  { %4300 = vmatpush.bf16.msrb.mxu2 %v6615_v59  ;;  %v6638_v59 = vld [vmem:[%s8146_s1 + $0xc40] sm:$0xff] }
 0x17d   :  { %4313 = vmatpush.bf16.msrb.mxu3 %v6623_v63  ;;  %v1045_v3 = vpack.c.b16 %v991_v58, %v991_v58 }
 0x17e   :  { %4275 = vmatpush.bf16.msrb.mxu0 %v6598_v1  ;;  %v4069_v25 = vpop.f32.mrf.mxu0  ;;  %v1044_v1 = vpack.c.b16 %v990_v54, %v990_v54 }
 0x17f   :  { %4288 = vmatpush.bf16.msrb.mxu1 %v6606_v4  ;;  %v4070_v26 = vadd.f32 %v4069_v25, %v7918_v51  ;;  %v4082_v28 = vpop.f32.mrf.mxu1  ;;  %v45_v51 = vld [vmem:[%s8147_s0 + $0xc8] sm:$0xff] }
 0x180   :  { %4301 = vmatpush.bf16.msrb.mxu2 %v6614_v5  ;;  %v992_v57 = vunpack.c.l.b16 %v45_v51  ;;  %v993_v63 = vunpack.c.h.b16 %v45_v51  ;;  %v6668_v5 = vld [vmem:[%s8146_s1 + $0xd30] sm:$0xff]  ;;  %v6663_v25 = vld [vmem:[%s8146_s1 + $0xd08] sm:$0xff] }
 0x181   :  { %4314 = vmatpush.bf16.msrb.mxu3 %v6622_v11  ;;  %4276 = vmatmul.bf16.vlgmr.msrb.gmra.mxu0 %v1040_v12  ;;  %v4083_v31 = vadd.f32 %v4082_v28, %v4070_v26  ;;  %v6666_v11 = vld [vmem:[%s8146_s1 + $0xd20] sm:$0xff]  ;;  %v46_v26 = vld [vmem:[%s8147_s0 + $0xd0] sm:$0xff] }
 0x182   :  { %4320 = vmatpush.bf16.msra.mxu0 %v6637_v7  ;;  %4289 = vmatmul.bf16.vlgmr.msrb.gmra.mxu1 %v1041_v15  ;;  %v1046_v2 = vpack.c.b16 %v992_v57, %v992_v57  ;;  %v1047_v4 = vpack.c.b16 %v993_v63, %v993_v63  ;;  %v6667_v7 = vld [vmem:[%s8146_s1 + $0xd28] sm:$0xff]  ;;  %v6665_v15 = vld [vmem:[%s8146_s1 + $0xd18] sm:$0xff] }
 0x183   :  { %4333 = vmatpush.bf16.msra.mxu1 %v6645_v8  ;;  %4302 = vmatmul.bf16.vlgmr.msrb.gmra.mxu2 %v1042_v13  ;;  %v6675_v8 = vld [vmem:[%s8146_s1 + $0xd68] sm:$0xff]  ;;  %v6674_v13 = vld [vmem:[%s8146_s1 + $0xd60] sm:$0xff] }
 0x184   :  { %4346 = vmatpush.bf16.msra.mxu2 %v6653_v10  ;;  %4315 = vmatmul.bf16.vlgmr.msrb.gmra.mxu3 %v1043_v16  ;;  %v6673_v16 = vld [vmem:[%s8146_s1 + $0xd58] sm:$0xff] }
 0x185   :  { %4359 = vmatpush.bf16.msra.mxu3 %v6661_v14 }
 0x186   :  { %4321 = vmatpush.bf16.msra.mxu0 %v6636_v17  ;;  %v4095_v36 = vpop.f32.mrf.mxu2  ;;  %v4071_v40 = vpop.f32.mrf.mxu0 }
 0x187   :  { %4334 = vmatpush.bf16.msra.mxu1 %v6644_v18  ;;  %v4096_v37 = vadd.f32 %v4095_v36, %v4083_v31  ;;  %v4108_v39 = vpop.f32.mrf.mxu3  ;;  %v4084_v43 = vpop.f32.mrf.mxu1  ;;  %v6662_v31 = vld [vmem:[%s8146_s1 + $0xd00] sm:$0xff] }
 0x188   :  { %4347 = vmatpush.bf16.msra.mxu2 %v6652_v19 }
 0x189   :  { %4360 = vmatpush.bf16.msra.mxu3 %v6660_v20  ;;  %v4109_v41 = vadd.f32 %v4108_v39, %v4096_v37 }
 0x18a   :  { %4322 = vmatpush.bf16.msra.mxu0 %v6635_v21 }
 0x18b   :  { %4335 = vmatpush.bf16.msra.mxu1 %v6643_v22  ;;  %v6664_v22 = vld [vmem:[%s8146_s1 + $0xd10] sm:$0xff] }
 0x18c   :  { %4348 = vmatpush.bf16.msra.mxu2 %v6651_v23 }
 0x18d   :  { %4361 = vmatpush.bf16.msra.mxu3 %v6659_v24  ;;  %v6672_v24 = vld [vmem:[%s8146_s1 + $0xd50] sm:$0xff] }
 0x18e   :  { %4323 = vmatpush.bf16.msra.mxu0 %v6634_v27  ;;  %v4097_v52 = vpop.f32.mrf.mxu2  ;;  %v6671_v27 = vld [vmem:[%s8146_s1 + $0xd48] sm:$0xff] }
 0x18f   :  { %4336 = vmatpush.bf16.msra.mxu1 %v6642_v29  ;;  %v4110_v55 = vpop.f32.mrf.mxu3  ;;  %v994_v29 = vunpack.c.l.b16 %v46_v26 }
 0x190   :  { %4349 = vmatpush.bf16.msra.mxu2 %v6650_v30 }
 0x191   :  { %4362 = vmatpush.bf16.msra.mxu3 %v6658_v32  ;;  %v995_v32 = vunpack.c.h.b16 %v46_v26 }
 0x192   :  { %4324 = vmatpush.bf16.msra.mxu0 %v6633_v33  ;;  %v6670_v33 = vld [vmem:[%s8146_s1 + $0xd40] sm:$0xff] }
 0x193   :  { %4337 = vmatpush.bf16.msra.mxu1 %v6641_v34  ;;  %v1048_v34 = vpack.c.b16 %v994_v29, %v994_v29 }
 0x194   :  { %4350 = vmatpush.bf16.msra.mxu2 %v6649_v35  ;;  %v1049_v35 = vpack.c.b16 %v995_v32, %v995_v32 }
 0x195   :  { %4363 = vmatpush.bf16.msra.mxu3 %v6657_v38 }
 0x196   :  { %4325 = vmatpush.bf16.msra.mxu0 %v6632_v42 }
 0x197   :  { %4338 = vmatpush.bf16.msra.mxu1 %v6640_v44 }
 0x198   :  { %4351 = vmatpush.bf16.msra.mxu2 %v6648_v45 }
 0x199   :  { %4364 = vmatpush.bf16.msra.mxu3 %v6656_v46 }
 0x19a   :  { %4326 = vmatpush.bf16.msra.mxu0 %v6631_v47 }
 0x19b   :  { %4339 = vmatpush.bf16.msra.mxu1 %v6639_v49 }
 0x19c   :  { %4352 = vmatpush.bf16.msra.mxu2 %v6647_v50 }
 0x19d   :  { %4365 = vmatpush.bf16.msra.mxu3 %v6655_v53 }
 0x19e   :  { %4327 = vmatpush.bf16.msra.mxu0 %v6630_v56  ;;  %v4121_v9 = vpop.f32.mrf.mxu0 }
 0x19f   :  { %4340 = vmatpush.bf16.msra.mxu1 %v6638_v59  ;;  %v4122_v10 = vadd.f32 %v4121_v9, %v4109_v41  ;;  %v4134_v12 = vpop.f32.mrf.mxu1 }
 0x1a0   :  { %4353 = vmatpush.bf16.msra.mxu2 %v6646_v60  ;;  %v6685_v60 = vld [vmem:[%s8150_s3 + $0x38] sm:$0xff] }
 0x1a1   :  { %4366 = vmatpush.bf16.msra.mxu3 %v6654_v0  ;;  %4328 = vmatmul.bf16.vlgmr.msra.gmra.mxu0 %v1044_v1  ;;  %v4135_v14 = vadd.f32 %v4134_v12, %v4122_v10  ;;  %v6678_v12 = vld [vmem:[%s8150_s3] sm:$0xff] }
 0x1a2   :  { %4372 = vmatpush.bf16.msrb.mxu0 %v6669_v61  ;;  %4341 = vmatmul.bf16.vlgmr.msra.gmra.mxu1 %v1045_v3 }
 0x1a3   :  { %4385 = vmatpush.bf16.msrb.mxu1 %v6677_v62  ;;  %4354 = vmatmul.bf16.vlgmr.msra.gmra.mxu2 %v1046_v2  ;;  %v6684_v62 = vld [vmem:[%s8150_s3 + $0x30] sm:$0xff]  ;;  %v6683_v2 = vld [vmem:[%s8150_s3 + $0x28] sm:$0xff] }
 0x1a4   :  { %4367 = vmatmul.bf16.vlgmr.msra.gmra.mxu3 %v1047_v4  ;;  %4468 = vmatpush.bf16.msrb.mxu2 %v6685_v60  ;;  %v6682_v4 = vld [vmem:[%s8150_s3 + $0x20] sm:$0xff] }
 0x1a6   :  { %4373 = vmatpush.bf16.msrb.mxu0 %v6668_v5  ;;  %v4147_v17 = vpop.f32.mrf.mxu2  ;;  %v4123_v20 = vpop.f32.mrf.mxu0 }
 0x1a7   :  { %4386 = vmatpush.bf16.msrb.mxu1 %v6676_v6  ;;  %v4148_v18 = vadd.f32 %v4147_v17, %v4135_v14  ;;  %v4160_v19 = vpop.f32.mrf.mxu3  ;;  %v4136_v23 = vpop.f32.mrf.mxu1  ;;  %v6681_v6 = vld [vmem:[%s8150_s3 + $0x18] sm:$0xff] }
 0x1a8   :  { %4469 = vmatpush.bf16.msrb.mxu2 %v6684_v62 }
 0x1a9   :  { %v4161_v21 = vadd.f32 %v4160_v19, %v4148_v18 }
 0x1aa   :  { %4374 = vmatpush.bf16.msrb.mxu0 %v6667_v7  ;;  %v6680_v7 = vld [vmem:[%s8150_s3 + $0x10] sm:$0xff] }
 0x1ab   :  { %4387 = vmatpush.bf16.msrb.mxu1 %v6675_v8  ;;  %v6679_v8 = vld [vmem:[%s8150_s3 + $0x8] sm:$0xff] }
 0x1ac   :  { %4470 = vmatpush.bf16.msrb.mxu2 %v6683_v2 }
 0x1ae   :  { %4375 = vmatpush.bf16.msrb.mxu0 %v6666_v11  ;;  %v4149_v28 = vpop.f32.mrf.mxu2 }
 0x1af   :  { %4388 = vmatpush.bf16.msrb.mxu1 %v6674_v13  ;;  %v4162_v30 = vpop.f32.mrf.mxu3 }
 0x1b0   :  { %4471 = vmatpush.bf16.msrb.mxu2 %v6682_v4 }
 0x1b2   :  { %4376 = vmatpush.bf16.msrb.mxu0 %v6665_v15 }
 0x1b3   :  { %4389 = vmatpush.bf16.msrb.mxu1 %v6673_v16 }
 0x1b4   :  { %4472 = vmatpush.bf16.msrb.mxu2 %v6681_v6 }
 0x1b6   :  { %4377 = vmatpush.bf16.msrb.mxu0 %v6664_v22 }
 0x1b7   :  { %4390 = vmatpush.bf16.msrb.mxu1 %v6672_v24 }
 0x1b8   :  { %4473 = vmatpush.bf16.msrb.mxu2 %v6680_v7 }
 0x1ba   :  { %4378 = vmatpush.bf16.msrb.mxu0 %v6663_v25 }
 0x1bb   :  { %4391 = vmatpush.bf16.msrb.mxu1 %v6671_v27 }
 0x1bc   :  { %4474 = vmatpush.bf16.msrb.mxu2 %v6679_v8 }
 0x1be   :  { %4379 = vmatpush.bf16.msrb.mxu0 %v6662_v31  ;;  %v4173_v36 = vpop.f32.mrf.mxu0 }
 0x1bf   :  { %4392 = vmatpush.bf16.msrb.mxu1 %v6670_v33  ;;  %v4174_v37 = vadd.f32 %v4173_v36, %v4161_v21  ;;  %v4186_v38 = vpop.f32.mrf.mxu1  ;;  %v6687_v36 = vld [vmem:[%s8149_s4] ss:$0 sm:$0xff] }
 0x1c0   :  { %4475 = vmatpush.bf16.msrb.mxu2 %v6678_v12 }
 0x1c1   :  { %4380 = vmatmul.bf16.vlgmr.msrb.gmra.mxu0 %v1048_v34  ;;  %v4187_v39 = vadd.f32 %v4186_v38, %v4174_v37 }
 0x1c2   :  { %4393 = vmatmul.bf16.vlgmr.msrb.gmra.mxu1 %v1049_v35 }
 0x1c6   :  { %v4199_v40 = vpop.f32.mrf.mxu2  ;;  %v4175_v43 = vpop.f32.mrf.mxu0 }
 0x1c7   :  { %v4200_v41 = vadd.f32 %v4199_v40, %v4187_v39  ;;  %v4212_v42 = vpop.f32.mrf.mxu3  ;;  %v4188_v45 = vpop.f32.mrf.mxu1 }
 0x1c9   :  { %v4213_v44 = vadd.f32 %v4212_v42, %v4200_v41 }
 0x1ce   :  { %v4201_v46 = vpop.f32.mrf.mxu2 }
 0x1cf   :  { %v4214_v47 = vpop.f32.mrf.mxu3 }
 0x1de   :  { %v4225_v48 = vpop.f32.mrf.mxu0 }
 0x1df   :  { %v4226_v49 = vadd.f32 %v4225_v48, %v4213_v44  ;;  %v4238_v50 = vpop.f32.mrf.mxu1 }
 0x1e1   :  { %v4239_v51 = vadd.f32 %v4238_v50, %v4226_v49 }
 0x1e6   :  { %v4251_v52 = vpop.f32.mrf.mxu2  ;;  %v4227_v54 = vpop.f32.mrf.mxu0 }
 0x1e7   :  { %v4264_v53 = vpop.f32.mrf.mxu3  ;;  %v4240_v55 = vpop.f32.mrf.mxu1  ;;  %v4252_v10 = vadd.f32 %v4251_v52, %v4239_v51 }
 0x1e9   :  { %v4265_v13 = vadd.f32 %v4264_v53, %v4252_v10 }
 0x1ee   :  { %v4253_v56 = vpop.f32.mrf.mxu2 }
 0x1ef   :  { %v4266_v57 = vpop.f32.mrf.mxu3 }
 0x1fe   :  { %v4277_v58 = vpop.f32.mrf.mxu0 }
 0x1ff   :  { %v4290_v59 = vpop.f32.mrf.mxu1  ;;  %v4278_v14 = vadd.f32 %v4277_v58, %v4265_v13 }
 0x201   :  { %v4291_v19 = vadd.f32 %v4290_v59, %v4278_v14 }
 0x206   :  { %v4303_v61 = vpop.f32.mrf.mxu2  ;;  %v4279_v0 = vpop.f32.mrf.mxu0 }
 0x207   :  { %v4316_v63 = vpop.f32.mrf.mxu3  ;;  %v4292_v1 = vpop.f32.mrf.mxu1  ;;  %v4304_v20 = vadd.f32 %v4303_v61, %v4291_v19 }
 0x209   :  { %v4317_v22 = vadd.f32 %v4316_v63, %v4304_v20 }
 0x20e   :  { %v4305_v3 = vpop.f32.mrf.mxu2 }
 0x20f   :  { %v4318_v5 = vpop.f32.mrf.mxu3 }
 0x21e   :  { %v4329_v9 = vpop.f32.mrf.mxu0 }
 0x21f   :  { %v4342_v11 = vpop.f32.mrf.mxu1  ;;  %v4330_v24 = vadd.f32 %v4329_v9, %v4317_v22 }
 0x221   :  { %v4343_v25 = vadd.f32 %v4342_v11, %v4330_v24 }
 0x226   :  { %v4355_v15 = vpop.f32.mrf.mxu2  ;;  %v4331_v16 = vpop.f32.mrf.mxu0 }
 0x227   :  { %v4368_v17 = vpop.f32.mrf.mxu3  ;;  %v4344_v18 = vpop.f32.mrf.mxu1  ;;  %v4356_v26 = vadd.f32 %v4355_v15, %v4343_v25 }
 0x229   :  { %v4369_v27 = vadd.f32 %v4368_v17, %v4356_v26 }
 0x22e   :  { %v4357_v21 = vpop.f32.mrf.mxu2 }
 0x22f   :  { %v4370_v23 = vpop.f32.mrf.mxu3 }
 0x23e   :  { %v4381_v28 = vpop.f32.mrf.mxu0 }
 0x23f   :  { %v4382_v29 = vadd.f32 %v4381_v28, %v4369_v27  ;;  %v4394_v30 = vpop.f32.mrf.mxu1 }
 0x241   :  { %v4395_v31 = vadd.f32 %v4394_v30, %v4382_v29 }
 0x243   :  { %v4398_v32 = vmax.f32 %v4395_v31, 0.0 }
 0x245   :  { %v4399_v33 = vpack.c.bf16 %v4398_v32, %v4398_v32 }
 0x246   :  { %v4383_v34 = vpop.f32.mrf.mxu0 }
 0x247   :  { %v4396_v35 = vpop.f32.mrf.mxu1  ;;  %4476 = vmatmul.bf16.vlgmr.msrb.gmra.mxu2 %v4399_v33 }
 0x2ca   :  { %v4477_v37 = vpop.f32.mrf.mxu2 }
 0x2cb   :  { %v4478_v38 = vadd.f32 %v6687_v36, %v4477_v37 }
 0x2cd   :  { %4481 = vst [vmem:[%s8151_s5] sm:$0xff] %v4478_v38 }
 0x2d2   :  { %v4479_v39 = vpop.f32.mrf.mxu2 }

</bundles_post_ra>
